<compile_context>
chip_gen: v7x
topology: tpu7x:2x2x1
jax: 0.10.0
libtpu: 0.0.40
codegen_flags: <defaults>
</compile_context>

<pallas_src>
import functools

import numpy as np
import jax
import jax.numpy as jnp
from jax import lax
from jax.experimental import pallas as pl
from jax.experimental.pallas import tpu as pltpu

MFCC_N_MELS = 32

_TM_TARGET = 1024              # rows per matmul tile (v5e/v6e sweet spot, safe on v7x)
_VMEM_CAP = 40 * 1024 * 1024   # <= 40 MiB: headroom under v7x's 64 MiB / TensorCore


def _pad128(c):
    return ((c + 127) // 128) * 128


def _pick_tm(M, target=_TM_TARGET):
    """Largest tm <= target that divides M, is a multiple of 16 (bf16 sublane
    packing) and -- when M allows it -- yields >= 2 grid steps (v7x: 2 TCs)."""
    if M <= 32 or M % 16 != 0:
        return M
    cap = min(target, M // 2)
    cap -= cap % 16
    for tm in range(cap, 15, -16):
        if M % tm == 0:
            return tm
    return M


def _pick_frames(BT):
    """Frames per last_conv_pool step: multiple of 8 (sublane-dense output
    stores) with >= 2 grid steps when possible; else all frames in one step."""
    for f in (16, 8):
        if BT % f == 0 and BT // f >= 2:
            return f
    return BT


def _vmem_limit(per_step_bytes, resident_bytes):
    # double-buffered tiled blocks + grid-invariant residents + scratch headroom
    need = 2 * per_step_bytes + resident_bytes + (4 << 20)
    return int(min(max(need, 16 << 20), _VMEM_CAP))


# ----------------------------- Pallas kernels -------------------------------

def _apply_act(y, act):
    if act == "relu":
        return jnp.maximum(y, 0.0)
    if act == "relu6":
        return jnp.clip(y, 0.0, 6.0)
    return y


def _pointwise_kernel(*refs, act, has_prologue, has_residual):
    """[optional bias+ReLU6 prologue] -> bf16 matmul -> bias -> act -> [+res]."""
    idx = 0
    x_ref = refs[idx]; idx += 1
    if has_prologue:
        pb_ref = refs[idx]; idx += 1
    if has_residual:
        r_ref = refs[idx]; idx += 1
    w_ref = refs[idx]; idx += 1
    b_ref = refs[idx]; idx += 1
    o_ref = refs[idx]

    x = x_ref[...]
    if has_prologue:
        # deferred depthwise-BN bias + ReLU6 (f32: v5e VPU has no bf16 ALU)
        x = jnp.clip(x.astype(jnp.float32) + pb_ref[...], 0.0, 6.0)
    y = jnp.dot(x.astype(jnp.bfloat16), w_ref[...],
                preferred_element_type=jnp.float32)
    y = y + b_ref[...]
    y = _apply_act(y, act)
    if has_residual:
        y = y + r_ref[...].astype(jnp.float32)
    o_ref[...] = y.astype(o_ref.dtype)


def pointwise_matmul(x, w, b, *, act="none", prologue_bias=None, residual=None,
                     out_dtype=jnp.bfloat16, tm_target=_TM_TARGET):
    """(M,K) @ (K,N) with BN folded into w/b; M-tiled, pipelined, lane-dense."""
    M, K = x.shape
    N = w.shape[1]
    tm = _pick_tm(M, tm_target)
    has_prologue = prologue_bias is not None
    has_residual = residual is not None
    out_bytes = np.dtype(out_dtype).itemsize

    args = [x]
    in_specs = [pl.BlockSpec((tm, K), lambda i: (i, 0))]
    per_step = tm * K * np.dtype(x.dtype).itemsize + tm * N * out_bytes
    if has_prologue:
        args.append(prologue_bias.reshape(1, K).astype(jnp.float32))
        in_specs.append(pl.BlockSpec((1, K), lambda i: (0, 0)))
    if has_residual:
        args.append(residual)
        in_specs.append(pl.BlockSpec((tm, N), lambda i: (i, 0)))
        per_step += tm * N * np.dtype(residual.dtype).itemsize
    args += [w, b.reshape(1, N).astype(jnp.float32)]
    in_specs += [pl.BlockSpec((K, N), lambda i: (0, 0)),
                 pl.BlockSpec((1, N), lambda i: (0, 0))]
    resident = K * N * np.dtype(w.dtype).itemsize + (K + N) * 4 + tm * N * 4

    return pl.pallas_call(
        functools.partial(_pointwise_kernel, act=act,
                          has_prologue=has_prologue, has_residual=has_residual),
        out_shape=jax.ShapeDtypeStruct((M, N), out_dtype),
        grid=(M // tm,),
        in_specs=in_specs,
        out_specs=pl.BlockSpec((tm, N), lambda i: (i, 0)),
        compiler_params=pltpu.CompilerParams(
            dimension_semantics=("parallel",),
            vmem_limit_bytes=_vmem_limit(per_step, resident)),
    )(*args)


def _last_conv_pool_kernel(x_ref, w_ref, b_ref, o_ref, *, inv_hw):
    # F frames per grid step: (F*HW, Cin) @ (Cin, Cout) -> ReLU6 -> per-frame mean
    f, hw, cin = x_ref.shape
    x = x_ref[...].reshape(f * hw, cin)
    y = jnp.dot(x, w_ref[...], preferred_element_type=jnp.float32)
    y = jnp.clip(y + b_ref[...], 0.0, 6.0)
    o_ref[...] = jnp.sum(y.reshape(f, hw, -1), axis=1) * inv_hw


def last_conv_pool(x3, w, b):
    """Fused 1x1 conv (320pad->1280) + ReLU6 + AdaptiveAvgPool2d((1,1)).

    x3: (B*T, H*W, Cin_pad) bf16 -> (B*T, 1280) f32, never materializing the
    (B*T, H*W, 1280) feature map in HBM.
    """
    BT, HW, Cin = x3.shape
    Cout = w.shape[1]
    F = _pick_frames(BT)
    per_step = F * HW * Cin * np.dtype(x3.dtype).itemsize + F * Cout * 4
    resident = Cin * Cout * np.dtype(w.dtype).itemsize + Cout * 4 + F * HW * Cout * 4
    return pl.pallas_call(
        functools.partial(_last_conv_pool_kernel, inv_hw=1.0 / HW),
        out_shape=jax.ShapeDtypeStruct((BT, Cout), jnp.float32),
        grid=(BT // F,),
        in_specs=[pl.BlockSpec((F, HW, Cin), lambda i: (i, 0, 0)),
                  pl.BlockSpec((Cin, Cout), lambda i: (0, 0)),
                  pl.BlockSpec((1, Cout), lambda i: (0, 0))],
        out_specs=pl.BlockSpec((F, Cout), lambda i: (i, 0)),
        compiler_params=pltpu.CompilerParams(
            dimension_semantics=("parallel",),
            vmem_limit_bytes=_vmem_limit(per_step, resident)),
    )(x3, w, b.reshape(1, Cout))


def _head_kernel(v_ref, a_ref, wv_ref, bv_ref, wa1_ref, ba1_ref, wa2_ref,
                 ba2_ref, wc1v_ref, wc1a_ref, bc1_ref, wc2_ref, bc2_ref, o_ref):
    # video_fc on the time-averaged pooled features
    v = jnp.dot(v_ref[...], wv_ref[...], preferred_element_type=jnp.float32) + bv_ref[...]
    # audio_fc: Linear -> ReLU -> Linear
    a = jnp.dot(a_ref[...], wa1_ref[...], preferred_element_type=jnp.float32) + ba1_ref[...]
    a = jnp.maximum(a, 0.0)
    a = jnp.dot(a, wa2_ref[...], preferred_element_type=jnp.float32) + ba2_ref[...]
    # classifier on concat([v, a]) -- concat realised as split-weight matmuls
    h = (jnp.dot(v, wc1v_ref[...], preferred_element_type=jnp.float32)
         + jnp.dot(a, wc1a_ref[...], preferred_element_type=jnp.float32)
         + bc1_ref[...])
    h = jnp.maximum(h, 0.0)
    # final (64 -> 1) as a VPU multiply-reduce instead of a 1-lane MXU matmul
    o_ref[...] = jnp.sum(h * wc2_ref[...], axis=-1, keepdims=True) + bc2_ref[...]


def fused_head(v_feat, audio, hp):
    """v_feat: (B, 1280) f32, audio: (B, 32) f32 -> (B, 1) f32. Latency-bound;
    single un-gridded pallas_call, whole (tiny) operands resident in VMEM."""
    B = v_feat.shape[0]
    args = [
        v_feat, audio,
        hp["wv"], hp["bv"].reshape(1, -1),
        hp["wa1"], hp["ba1"].reshape(1, -1),
        hp["wa2"], hp["ba2"].reshape(1, -1),
        hp["wc1v"], hp["wc1a"], hp["bc1"].reshape(1, -1),
        hp["wc2"].reshape(1, -1), hp["bc2"].reshape(1, -1),
    ]
    return pl.pallas_call(
        _head_kernel,
        out_shape=jax.ShapeDtypeStruct((B, 1), jnp.float32),
    )(*args)


# --------------------------- MobileNetV2 backbone ---------------------------

def conv2d_nhwc(x, w, stride, groups=1):
    # PyTorch Conv2d(k=3, padding=1) equivalent; f32 accumulation/output.
    return lax.conv_general_dilated(
        x, w, (stride, stride), [(1, 1), (1, 1)],
        dimension_numbers=("NHWC", "HWIO", "NHWC"),
        feature_group_count=groups,
        preferred_element_type=jnp.float32)


def mobilenet_features_pooled(x, mp):
    """x: (B*T, H, W, 3) bf16 -> pooled (B*T, 1280) f32."""
    # stem: 3x3 s2 conv (XLA) + folded-BN affine + ReLU6 + lane pad to 128.
    # The affine/ReLU6/pad are plain jnp so XLA fuses them into the conv
    # epilogue (no standalone Pallas kernel, no extra HBM round trip).
    x = conv2d_nhwc(x, mp["stem_w"], 2)
    x = jnp.clip(x * mp["stem_scale"] + mp["stem_bias"], 0.0, 6.0)
    x = jnp.pad(x, ((0, 0),) * 3 + ((0, mp["stem_pad"]),)).astype(jnp.bfloat16)

    for blk in mp["blocks"]:
        inp = x
        h = x
        if blk["expand_w"] is not None:
            N, H, W, C = h.shape
            h = pointwise_matmul(h.reshape(N * H * W, C), blk["expand_w"],
                                 blk["expand_b"], act="relu6").reshape(N, H, W, -1)
        # depthwise 3x3 (BN scale folded into dw_w); BN bias + ReLU6 deferred
        # into the projection kernel prologue.
        # TODO(synk): fuse this depthwise conv into the projection kernel
        # (halo load + 9 shifted VPU taps) to cut two HBM passes of (M, hidden).
        h = conv2d_nhwc(h, blk["dw_w"], blk["stride"],
                        groups=h.shape[-1]).astype(jnp.bfloat16)
        N, H, W, C = h.shape
        res = inp.reshape(N * H * W, inp.shape[-1]) if blk["use_res"] else None
        h = pointwise_matmul(h.reshape(N * H * W, C), blk["proj_w"],
                             blk["proj_b"], act="none",
                             prologue_bias=blk["dw_bias"], residual=res)
        x = h.reshape(N, H, W, -1)

    # fused last ConvBNReLU6 (320pad -> 1280) + spatial mean pooling
    N, H, W, C = x.shape
    return last_conv_pool(x.reshape(N, H * W, C), mp["last_w"], mp["last_b"])


# ------------------------------- parameters ---------------------------------

def init_params(key):
    keys = iter(jax.random.split(key, 1024))

    def nrm(shape, fan_in):
        std = (2.0 / fan_in) ** 0.5
        return std * jax.random.normal(next(keys), shape, jnp.float32)

    def bn_fold(c):
        gamma = 1.0 + 0.1 * jax.random.normal(next(keys), (c,), jnp.float32)
        beta = 0.1 * jax.random.normal(next(keys), (c,), jnp.float32)
        mean = 0.1 * jax.random.normal(next(keys), (c,), jnp.float32)
        var = jnp.abs(1.0 + 0.1 * jax.random.normal(next(keys), (c,), jnp.float32))
        scale = gamma / jnp.sqrt(var + 1e-5)
        bias = beta - mean * scale
        return scale, bias

    def pad_mat(w, K, N):
        # zero-pad (k, n) -> (K, N); padded rows/cols keep padded lanes at 0.
        return jnp.zeros((K, N), w.dtype).at[:w.shape[0], :w.shape[1]].set(w)

    def pad_vec(v, N):
        return jnp.zeros((N,), v.dtype).at[:v.shape[0]].set(v)

    mp = {}
    mp["stem_w"] = nrm((3, 3, 3, 32), 3 * 3 * 3).astype(jnp.bfloat16)
    mp["stem_scale"], mp["stem_bias"] = bn_fold(32)
    mp["stem_pad"] = _pad128(32) - 32

    cfg = [(1, 16, 1, 1), (6, 24, 2, 2), (6, 32, 3, 2), (6, 64, 4, 2),
           (6, 96, 3, 1), (6, 160, 3, 2), (6, 320, 1, 1)]
    blocks = []
    in_c = 32
    for t, c, n, s in cfg:
        for i in range(n):
            stride = s if i == 0 else 1
            hidden = in_c * t
            in_p, hid_p, out_p = _pad128(in_c), _pad128(hidden), _pad128(c)
            blk = {"stride": stride, "use_res": (stride == 1 and in_c == c)}
            if t != 1:
                w = nrm((in_c, hidden), in_c)          # 1x1 conv as (Cin, Cout)
                sc, bi = bn_fold(hidden)
                blk["expand_w"] = pad_mat((w * sc[None, :]).astype(jnp.bfloat16),
                                          in_p, hid_p)   # fold BN, lane-pad
                blk["expand_b"] = pad_vec(bi, hid_p)
            else:
                blk["expand_w"] = None
                blk["expand_b"] = None
            dw = nrm((3, 3, 1, hidden), 3 * 3)
            dw_sc, dw_bi = bn_fold(hidden)
            dw_w = (dw * dw_sc[None, None, None, :]).astype(jnp.bfloat16)
            blk["dw_w"] = jnp.zeros((3, 3, 1, hid_p),
                                    jnp.bfloat16).at[..., :hidden].set(dw_w)
            blk["dw_bias"] = pad_vec(dw_bi, hid_p)
            w = nrm((hidden, c), hidden)
            sc, bi = bn_fold(c)
            blk["proj_w"] = pad_mat((w * sc[None, :]).astype(jnp.bfloat16),
                                    hid_p, out_p)
            blk["proj_b"] = pad_vec(bi, out_p)
            blocks.append(blk)
            in_c = c
    mp["blocks"] = blocks

    w = nrm((320, 1280), 320)
    sc, bi = bn_fold(1280)
    mp["last_w"] = pad_mat((w * sc[None, :]).astype(jnp.bfloat16),
                           _pad128(320), 1280)
    mp["last_b"] = bi

    hp = {}

    def lin(fan_in, fan_out):
        w = nrm((fan_in, fan_out), fan_in)
        b = 0.01 * jax.random.normal(next(keys), (fan_out,), jnp.float32)
        return w, b

    hp["wv"], hp["bv"] = lin(1280, 128)              # video_fc
    hp["wa1"], hp["ba1"] = lin(MFCC_N_MELS, 64)      # audio_fc[0]
    hp["wa2"], hp["ba2"] = lin(64, 32)               # audio_fc[2]
    wc1, hp["bc1"] = lin(128 + 32, 64)               # classifier[0]
    hp["wc1v"], hp["wc1a"] = wc1[:128], wc1[128:]    # split for concat-free fusion
    hp["wc2"], hp["bc2"] = lin(64, 1)                # classifier[2]
    return {"mobilenet": mp, "head": hp}


# --------------------------------- forward ----------------------------------

def forward(params, video, audio):
    # video: (B, T, C, H, W) (PyTorch NCHW per frame), audio: (B, MFCC_N_MELS)
    B, T, C, H, W = video.shape
    x = video.reshape(B * T, C, H, W).transpose(0, 2, 3, 1).astype(jnp.bfloat16)
    pooled = mobilenet_features_pooled(x, params["mobilenet"])  # (B*T, 1280) f32
    v_feat = pooled.reshape(B, T, 1280).mean(axis=1)            # over-T mean (XLA)
    out = fused_head(v_feat, audio, params["head"])             # (B, 1)
    # NOTE: like torch .squeeze(), this also drops the batch dim when B == 1.
    return jnp.squeeze(out)


if __name__ == "__main__":
    key = jax.random.PRNGKey(0)
    pk, vk, ak = jax.random.split(key, 3)
    params = init_params(pk)

    B, T, C, H, W = 2, 3, 3, 16, 16
    video = jax.random.normal(vk, (B, T, C, H, W), jnp.float32)
    audio = jax.random.normal(ak, (B, MFCC_N_MELS), jnp.float32)

    fwd = jax.jit(functools.partial(forward, params))
    out = fwd(video, audio)
    jax.block_until_ready(out)
    assert out.shape == (B,) and out.dtype == jnp.float32
    print("KERNEL_OK")
</pallas_src>

<mosaic_0001>
module attributes {stable_mosaic.version = 11 : i64} {
  func.func @_pointwise_kernel(%arg0: i32, %arg1: memref<192x128xbf16, #tpu.memory_space<vmem>>, %arg2: memref<128x128xbf16, #tpu.memory_space<vmem>>, %arg3: memref<1x128xf32, #tpu.memory_space<vmem>>, %arg4: memref<192x128xbf16, #tpu.memory_space<vmem>>) attributes {dimension_semantics = [#tpu.dimension_semantics<parallel>], iteration_bounds = array<i64: 2>, scalar_prefetch = 0 : i64, scratch_operands = 0 : i64, tpu.core_type = #tpu.core_type<tc>, window_params = [{transform_indices = @transform_0, window_bounds = array<i64: 192, 128>}, {pipeline_mode = #tpu.pipeline_mode<synchronous>, transform_indices = @transform_1, window_bounds = array<i64: 128, 128>}, {pipeline_mode = #tpu.pipeline_mode<synchronous>, transform_indices = @transform_2, window_bounds = array<i64: 1, 128>}, {transform_indices = @transform_3, window_bounds = array<i64: 192, 128>}]} {
    %c0 = arith.constant 0 : index
    %c0_0 = arith.constant 0 : index
    %0 = vector.load %arg1[%c0, %c0_0] : memref<192x128xbf16, #tpu.memory_space<vmem>>, vector<192x128xbf16>
    %c0_1 = arith.constant 0 : index
    %c0_2 = arith.constant 0 : index
    %1 = vector.load %arg2[%c0_1, %c0_2] : memref<128x128xbf16, #tpu.memory_space<vmem>>, vector<128x128xbf16>
    %cst = arith.constant dense<0.000000e+00> : vector<192x128xf32>
    %2 = tpu.matmul %0, %1, %cst {dimension_numbers = #tpu.dot_dimension_numbers<[1], [0], [0], [1], [0, 0, 1, 1], [], []>} : vector<192x128xbf16>, vector<128x128xbf16>, vector<192x128xf32> -> vector<192x128xf32>
    %c0_3 = arith.constant 0 : index
    %c0_4 = arith.constant 0 : index
    %3 = vector.load %arg3[%c0_3, %c0_4] : memref<1x128xf32, #tpu.memory_space<vmem>>, vector<1x128xf32>
    %4 = vector.broadcast %3 : vector<1x128xf32> to vector<192x128xf32>
    %5 = arith.addf %2, %4 : vector<192x128xf32>
    %cst_5 = arith.constant 0.000000e+00 : f32
    %cst_6 = arith.constant 6.000000e+00 : f32
    %6 = vector.broadcast %cst_5 : f32 to vector<192x128xf32>
    %7 = arith.maximumf %6, %5 : vector<192x128xf32>
    %8 = vector.broadcast %cst_6 : f32 to vector<192x128xf32>
    %9 = arith.minimumf %8, %7 : vector<192x128xf32>
    %10 = arith.truncf %9 : vector<192x128xf32> to vector<192x128xbf16>
    %c0_7 = arith.constant 0 : index
    %c0_8 = arith.constant 0 : index
    %11 = vector.load %arg4[%c0_7, %c0_8] : memref<192x128xbf16, #tpu.memory_space<vmem>>, vector<192x128xbf16>
    tpu.vector_store %arg4[%c0_7, %c0_8], %10 {strides = array<i32>} : memref<192x128xbf16, #tpu.memory_space<vmem>>, vector<192x128xbf16>,
    return
  }
  func.func @transform_0(%arg0: i32) -> (i32, i32) {
    %c0_i32 = arith.constant 0 : i32
    %c0_i32_0 = arith.constant 0 : i32
    return %arg0, %c0_i32 : i32, i32
  }
  func.func @transform_1(%arg0: i32) -> (i32, i32) {
    %c0_i32 = arith.constant 0 : i32
    %c0_i32_0 = arith.constant 0 : i32
    %c0_i32_1 = arith.constant 0 : i32
    return %c0_i32, %c0_i32_0 : i32, i32
  }
  func.func @transform_2(%arg0: i32) -> (i32, i32) {
    %c0_i32 = arith.constant 0 : i32
    %c0_i32_0 = arith.constant 0 : i32
    %c0_i32_1 = arith.constant 0 : i32
    return %c0_i32, %c0_i32_0 : i32, i32
  }
  func.func @transform_3(%arg0: i32) -> (i32, i32) {
    %c0_i32 = arith.constant 0 : i32
    %c0_i32_0 = arith.constant 0 : i32
    return %arg0, %c0_i32 : i32, i32
  }
}

module attributes {stable_mosaic.version = 11 : i64} {
  func.func @_pointwise_kernel(%arg0: i32, %arg1: memref<192x128xbf16, #tpu.memory_space<vmem>>, %arg2: memref<1x128xf32, #tpu.memory_space<vmem>>, %arg3: memref<128x128xbf16, #tpu.memory_space<vmem>>, %arg4: memref<1x128xf32, #tpu.memory_space<vmem>>, %arg5: memref<192x128xbf16, #tpu.memory_space<vmem>>) attributes {dimension_semantics = [#tpu.dimension_semantics<parallel>], iteration_bounds = array<i64: 2>, scalar_prefetch = 0 : i64, scratch_operands = 0 : i64, tpu.core_type = #tpu.core_type<tc>, window_params = [{transform_indices = @transform_0, window_bounds = array<i64: 192, 128>}, {pipeline_mode = #tpu.pipeline_mode<synchronous>, transform_indices = @transform_1, window_bounds = array<i64: 1, 128>}, {pipeline_mode = #tpu.pipeline_mode<synchronous>, transform_indices = @transform_2, window_bounds = array<i64: 128, 128>}, {pipeline_mode = #tpu.pipeline_mode<synchronous>, transform_indices = @transform_3, window_bounds = array<i64: 1, 128>}, {transform_indices = @transform_4, window_bounds = array<i64: 192, 128>}]} {
    %c0 = arith.constant 0 : index
    %c0_0 = arith.constant 0 : index
    %0 = vector.load %arg1[%c0, %c0_0] : memref<192x128xbf16, #tpu.memory_space<vmem>>, vector<192x128xbf16>
    %1 = arith.extf %0 : vector<192x128xbf16> to vector<192x128xf32>
    %c0_1 = arith.constant 0 : index
    %c0_2 = arith.constant 0 : index
    %2 = vector.load %arg2[%c0_1, %c0_2] : memref<1x128xf32, #tpu.memory_space<vmem>>, vector<1x128xf32>
    %3 = vector.broadcast %2 : vector<1x128xf32> to vector<192x128xf32>
    %4 = arith.addf %1, %3 : vector<192x128xf32>
    %cst = arith.constant 0.000000e+00 : f32
    %cst_3 = arith.constant 6.000000e+00 : f32
    %5 = vector.broadcast %cst : f32 to vector<192x128xf32>
    %6 = arith.maximumf %5, %4 : vector<192x128xf32>
    %7 = vector.broadcast %cst_3 : f32 to vector<192x128xf32>
    %8 = arith.minimumf %7, %6 : vector<192x128xf32>
    %9 = arith.truncf %8 : vector<192x128xf32> to vector<192x128xbf16>
    %c0_4 = arith.constant 0 : index
    %c0_5 = arith.constant 0 : index
    %10 = vector.load %arg3[%c0_4, %c0_5] : memref<128x128xbf16, #tpu.memory_space<vmem>>, vector<128x128xbf16>
    %cst_6 = arith.constant dense<0.000000e+00> : vector<192x128xf32>
    %11 = tpu.matmul %9, %10, %cst_6 {dimension_numbers = #tpu.dot_dimension_numbers<[1], [0], [0], [1], [0, 0, 1, 1], [], []>} : vector<192x128xbf16>, vector<128x128xbf16>, vector<192x128xf32> -> vector<192x128xf32>
    %c0_7 = arith.constant 0 : index
    %c0_8 = arith.constant 0 : index
    %12 = vector.load %arg4[%c0_7, %c0_8] : memref<1x128xf32, #tpu.memory_space<vmem>>, vector<1x128xf32>
    %13 = vector.broadcast %12 : vector<1x128xf32> to vector<192x128xf32>
    %14 = arith.addf %11, %13 : vector<192x128xf32>
    %15 = arith.truncf %14 : vector<192x128xf32> to vector<192x128xbf16>
    %c0_9 = arith.constant 0 : index
    %c0_10 = arith.constant 0 : index
    %16 = vector.load %arg5[%c0_9, %c0_10] : memref<192x128xbf16, #tpu.memory_space<vmem>>, vector<192x128xbf16>
    tpu.vector_store %arg5[%c0_9, %c0_10], %15 {strides = array<i32>} : memref<192x128xbf16, #tpu.memory_space<vmem>>, vector<192x128xbf16>,
    return
  }
  func.func @transform_0(%arg0: i32) -> (i32, i32) {
    %c0_i32 = arith.constant 0 : i32
    %c0_i32_0 = arith.constant 0 : i32
    return %arg0, %c0_i32 : i32, i32
  }
  func.func @transform_1(%arg0: i32) -> (i32, i32) {
    %c0_i32 = arith.constant 0 : i32
    %c0_i32_0 = arith.constant 0 : i32
    %c0_i32_1 = arith.constant 0 : i32
    return %c0_i32, %c0_i32_0 : i32, i32
  }
  func.func @transform_2(%arg0: i32) -> (i32, i32) {
    %c0_i32 = arith.constant 0 : i32
    %c0_i32_0 = arith.constant 0 : i32
    %c0_i32_1 = arith.constant 0 : i32
    return %c0_i32, %c0_i32_0 : i32, i32
  }
  func.func @transform_3(%arg0: i32) -> (i32, i32) {
    %c0_i32 = arith.constant 0 : i32
    %c0_i32_0 = arith.constant 0 : i32
    %c0_i32_1 = arith.constant 0 : i32
    return %c0_i32, %c0_i32_0 : i32, i32
  }
  func.func @transform_4(%arg0: i32) -> (i32, i32) {
    %c0_i32 = arith.constant 0 : i32
    %c0_i32_0 = arith.constant 0 : i32
    return %arg0, %c0_i32 : i32, i32
  }
}

module attributes {stable_mosaic.version = 11 : i64} {
  func.func @_pointwise_kernel(%arg0: i32, %arg1: memref<48x128xbf16, #tpu.memory_space<vmem>>, %arg2: memref<1x128xf32, #tpu.memory_space<vmem>>, %arg3: memref<128x128xbf16, #tpu.memory_space<vmem>>, %arg4: memref<1x128xf32, #tpu.memory_space<vmem>>, %arg5: memref<48x128xbf16, #tpu.memory_space<vmem>>) attributes {dimension_semantics = [#tpu.dimension_semantics<parallel>], iteration_bounds = array<i64: 2>, scalar_prefetch = 0 : i64, scratch_operands = 0 : i64, tpu.core_type = #tpu.core_type<tc>, window_params = [{transform_indices = @transform_0, window_bounds = array<i64: 48, 128>}, {pipeline_mode = #tpu.pipeline_mode<synchronous>, transform_indices = @transform_1, window_bounds = array<i64: 1, 128>}, {pipeline_mode = #tpu.pipeline_mode<synchronous>, transform_indices = @transform_2, window_bounds = array<i64: 128, 128>}, {pipeline_mode = #tpu.pipeline_mode<synchronous>, transform_indices = @transform_3, window_bounds = array<i64: 1, 128>}, {transform_indices = @transform_4, window_bounds = array<i64: 48, 128>}]} {
    %c0 = arith.constant 0 : index
    %c0_0 = arith.constant 0 : index
    %0 = vector.load %arg1[%c0, %c0_0] : memref<48x128xbf16, #tpu.memory_space<vmem>>, vector<48x128xbf16>
    %1 = arith.extf %0 : vector<48x128xbf16> to vector<48x128xf32>
    %c0_1 = arith.constant 0 : index
    %c0_2 = arith.constant 0 : index
    %2 = vector.load %arg2[%c0_1, %c0_2] : memref<1x128xf32, #tpu.memory_space<vmem>>, vector<1x128xf32>
    %3 = vector.broadcast %2 : vector<1x128xf32> to vector<48x128xf32>
    %4 = arith.addf %1, %3 : vector<48x128xf32>
    %cst = arith.constant 0.000000e+00 : f32
    %cst_3 = arith.constant 6.000000e+00 : f32
    %5 = vector.broadcast %cst : f32 to vector<48x128xf32>
    %6 = arith.maximumf %5, %4 : vector<48x128xf32>
    %7 = vector.broadcast %cst_3 : f32 to vector<48x128xf32>
    %8 = arith.minimumf %7, %6 : vector<48x128xf32>
    %9 = arith.truncf %8 : vector<48x128xf32> to vector<48x128xbf16>
    %c0_4 = arith.constant 0 : index
    %c0_5 = arith.constant 0 : index
    %10 = vector.load %arg3[%c0_4, %c0_5] : memref<128x128xbf16, #tpu.memory_space<vmem>>, vector<128x128xbf16>
    %cst_6 = arith.constant dense<0.000000e+00> : vector<48x128xf32>
    %11 = tpu.matmul %9, %10, %cst_6 {dimension_numbers = #tpu.dot_dimension_numbers<[1], [0], [0], [1], [0, 0, 1, 1], [], []>} : vector<48x128xbf16>, vector<128x128xbf16>, vector<48x128xf32> -> vector<48x128xf32>
    %c0_7 = arith.constant 0 : index
    %c0_8 = arith.constant 0 : index
    %12 = vector.load %arg4[%c0_7, %c0_8] : memref<1x128xf32, #tpu.memory_space<vmem>>, vector<1x128xf32>
    %13 = vector.broadcast %12 : vector<1x128xf32> to vector<48x128xf32>
    %14 = arith.addf %11, %13 : vector<48x128xf32>
    %15 = arith.truncf %14 : vector<48x128xf32> to vector<48x128xbf16>
    %c0_9 = arith.constant 0 : index
    %c0_10 = arith.constant 0 : index
    %16 = vector.load %arg5[%c0_9, %c0_10] : memref<48x128xbf16, #tpu.memory_space<vmem>>, vector<48x128xbf16>
    tpu.vector_store %arg5[%c0_9, %c0_10], %15 {strides = array<i32>} : memref<48x128xbf16, #tpu.memory_space<vmem>>, vector<48x128xbf16>,
    return
  }
  func.func @transform_0(%arg0: i32) -> (i32, i32) {
    %c0_i32 = arith.constant 0 : i32
    %c0_i32_0 = arith.constant 0 : i32
    return %arg0, %c0_i32 : i32, i32
  }
  func.func @transform_1(%arg0: i32) -> (i32, i32) {
    %c0_i32 = arith.constant 0 : i32
    %c0_i32_0 = arith.constant 0 : i32
    %c0_i32_1 = arith.constant 0 : i32
    return %c0_i32, %c0_i32_0 : i32, i32
  }
  func.func @transform_2(%arg0: i32) -> (i32, i32) {
    %c0_i32 = arith.constant 0 : i32
    %c0_i32_0 = arith.constant 0 : i32
    %c0_i32_1 = arith.constant 0 : i32
    return %c0_i32, %c0_i32_0 : i32, i32
  }
  func.func @transform_3(%arg0: i32) -> (i32, i32) {
    %c0_i32 = arith.constant 0 : i32
    %c0_i32_0 = arith.constant 0 : i32
    %c0_i32_1 = arith.constant 0 : i32
    return %c0_i32, %c0_i32_0 : i32, i32
  }
  func.func @transform_4(%arg0: i32) -> (i32, i32) {
    %c0_i32 = arith.constant 0 : i32
    %c0_i32_0 = arith.constant 0 : i32
    return %arg0, %c0_i32 : i32, i32
  }
}

module attributes {stable_mosaic.version = 11 : i64} {
  func.func @_pointwise_kernel(%arg0: i32, %arg1: memref<48x128xbf16, #tpu.memory_space<vmem>>, %arg2: memref<128x256xbf16, #tpu.memory_space<vmem>>, %arg3: memref<1x256xf32, #tpu.memory_space<vmem>>, %arg4: memref<48x256xbf16, #tpu.memory_space<vmem>>) attributes {dimension_semantics = [#tpu.dimension_semantics<parallel>], iteration_bounds = array<i64: 2>, scalar_prefetch = 0 : i64, scratch_operands = 0 : i64, tpu.core_type = #tpu.core_type<tc>, window_params = [{transform_indices = @transform_0, window_bounds = array<i64: 48, 128>}, {pipeline_mode = #tpu.pipeline_mode<synchronous>, transform_indices = @transform_1, window_bounds = array<i64: 128, 256>}, {pipeline_mode = #tpu.pipeline_mode<synchronous>, transform_indices = @transform_2, window_bounds = array<i64: 1, 256>}, {transform_indices = @transform_3, window_bounds = array<i64: 48, 256>}]} {
    %c0 = arith.constant 0 : index
    %c0_0 = arith.constant 0 : index
    %0 = vector.load %arg1[%c0, %c0_0] : memref<48x128xbf16, #tpu.memory_space<vmem>>, vector<48x128xbf16>
    %c0_1 = arith.constant 0 : index
    %c0_2 = arith.constant 0 : index
    %1 = vector.load %arg2[%c0_1, %c0_2] : memref<128x256xbf16, #tpu.memory_space<vmem>>, vector<128x256xbf16>
    %cst = arith.constant dense<0.000000e+00> : vector<48x256xf32>
    %2 = tpu.matmul %0, %1, %cst {dimension_numbers = #tpu.dot_dimension_numbers<[1], [0], [0], [1], [0, 0, 1, 1], [], []>} : vector<48x128xbf16>, vector<128x256xbf16>, vector<48x256xf32> -> vector<48x256xf32>
    %c0_3 = arith.constant 0 : index
    %c0_4 = arith.constant 0 : index
    %3 = vector.load %arg3[%c0_3, %c0_4] : memref<1x256xf32, #tpu.memory_space<vmem>>, vector<1x256xf32>
    %4 = vector.broadcast %3 : vector<1x256xf32> to vector<48x256xf32>
    %5 = arith.addf %2, %4 : vector<48x256xf32>
    %cst_5 = arith.constant 0.000000e+00 : f32
    %cst_6 = arith.constant 6.000000e+00 : f32
    %6 = vector.broadcast %cst_5 : f32 to vector<48x256xf32>
    %7 = arith.maximumf %6, %5 : vector<48x256xf32>
    %8 = vector.broadcast %cst_6 : f32 to vector<48x256xf32>
    %9 = arith.minimumf %8, %7 : vector<48x256xf32>
    %10 = arith.truncf %9 : vector<48x256xf32> to vector<48x256xbf16>
    %c0_7 = arith.constant 0 : index
    %c0_8 = arith.constant 0 : index
    %11 = vector.load %arg4[%c0_7, %c0_8] : memref<48x256xbf16, #tpu.memory_space<vmem>>, vector<48x256xbf16>
    tpu.vector_store %arg4[%c0_7, %c0_8], %10 {strides = array<i32>} : memref<48x256xbf16, #tpu.memory_space<vmem>>, vector<48x256xbf16>,
    return
  }
  func.func @transform_0(%arg0: i32) -> (i32, i32) {
    %c0_i32 = arith.constant 0 : i32
    %c0_i32_0 = arith.constant 0 : i32
    return %arg0, %c0_i32 : i32, i32
  }
  func.func @transform_1(%arg0: i32) -> (i32, i32) {
    %c0_i32 = arith.constant 0 : i32
    %c0_i32_0 = arith.constant 0 : i32
    %c0_i32_1 = arith.constant 0 : i32
    return %c0_i32, %c0_i32_0 : i32, i32
  }
  func.func @transform_2(%arg0: i32) -> (i32, i32) {
    %c0_i32 = arith.constant 0 : i32
    %c0_i32_0 = arith.constant 0 : i32
    %c0_i32_1 = arith.constant 0 : i32
    return %c0_i32, %c0_i32_0 : i32, i32
  }
  func.func @transform_3(%arg0: i32) -> (i32, i32) {
    %c0_i32 = arith.constant 0 : i32
    %c0_i32_0 = arith.constant 0 : i32
    return %arg0, %c0_i32 : i32, i32
  }
}

module attributes {stable_mosaic.version = 11 : i64} {
  func.func @_pointwise_kernel(%arg0: i32, %arg1: memref<48x256xbf16, #tpu.memory_space<vmem>>, %arg2: memref<1x256xf32, #tpu.memory_space<vmem>>, %arg3: memref<48x128xbf16, #tpu.memory_space<vmem>>, %arg4: memref<256x128xbf16, #tpu.memory_space<vmem>>, %arg5: memref<1x128xf32, #tpu.memory_space<vmem>>, %arg6: memref<48x128xbf16, #tpu.memory_space<vmem>>) attributes {dimension_semantics = [#tpu.dimension_semantics<parallel>], iteration_bounds = array<i64: 2>, scalar_prefetch = 0 : i64, scratch_operands = 0 : i64, tpu.core_type = #tpu.core_type<tc>, window_params = [{transform_indices = @transform_0, window_bounds = array<i64: 48, 256>}, {pipeline_mode = #tpu.pipeline_mode<synchronous>, transform_indices = @transform_1, window_bounds = array<i64: 1, 256>}, {transform_indices = @transform_2, window_bounds = array<i64: 48, 128>}, {pipeline_mode = #tpu.pipeline_mode<synchronous>, transform_indices = @transform_3, window_bounds = array<i64: 256, 128>}, {pipeline_mode = #tpu.pipeline_mode<synchronous>, transform_indices = @transform_4, window_bounds = array<i64: 1, 128>}, {transform_indices = @transform_5, window_bounds = array<i64: 48, 128>}]} {
    %c0 = arith.constant 0 : index
    %c0_0 = arith.constant 0 : index
    %0 = vector.load %arg1[%c0, %c0_0] : memref<48x256xbf16, #tpu.memory_space<vmem>>, vector<48x256xbf16>
    %1 = arith.extf %0 : vector<48x256xbf16> to vector<48x256xf32>
    %c0_1 = arith.constant 0 : index
    %c0_2 = arith.constant 0 : index
    %2 = vector.load %arg2[%c0_1, %c0_2] : memref<1x256xf32, #tpu.memory_space<vmem>>, vector<1x256xf32>
    %3 = vector.broadcast %2 : vector<1x256xf32> to vector<48x256xf32>
    %4 = arith.addf %1, %3 : vector<48x256xf32>
    %cst = arith.constant 0.000000e+00 : f32
    %cst_3 = arith.constant 6.000000e+00 : f32
    %5 = vector.broadcast %cst : f32 to vector<48x256xf32>
    %6 = arith.maximumf %5, %4 : vector<48x256xf32>
    %7 = vector.broadcast %cst_3 : f32 to vector<48x256xf32>
    %8 = arith.minimumf %7, %6 : vector<48x256xf32>
    %9 = arith.truncf %8 : vector<48x256xf32> to vector<48x256xbf16>
    %c0_4 = arith.constant 0 : index
    %c0_5 = arith.constant 0 : index
    %10 = vector.load %arg4[%c0_4, %c0_5] : memref<256x128xbf16, #tpu.memory_space<vmem>>, vector<256x128xbf16>
    %cst_6 = arith.constant dense<0.000000e+00> : vector<48x128xf32>
    %11 = tpu.matmul %9, %10, %cst_6 {dimension_numbers = #tpu.dot_dimension_numbers<[1], [0], [0], [1], [0, 0, 1, 1], [], []>} : vector<48x256xbf16>, vector<256x128xbf16>, vector<48x128xf32> -> vector<48x128xf32>
    %c0_7 = arith.constant 0 : index
    %c0_8 = arith.constant 0 : index
    %12 = vector.load %arg5[%c0_7, %c0_8] : memref<1x128xf32, #tpu.memory_space<vmem>>, vector<1x128xf32>
    %13 = vector.broadcast %12 : vector<1x128xf32> to vector<48x128xf32>
    %14 = arith.addf %11, %13 : vector<48x128xf32>
    %c0_9 = arith.constant 0 : index
    %c0_10 = arith.constant 0 : index
    %15 = vector.load %arg3[%c0_9, %c0_10] : memref<48x128xbf16, #tpu.memory_space<vmem>>, vector<48x128xbf16>
    %16 = arith.extf %15 : vector<48x128xbf16> to vector<48x128xf32>
    %17 = arith.addf %14, %16 : vector<48x128xf32>
    %18 = arith.truncf %17 : vector<48x128xf32> to vector<48x128xbf16>
    %c0_11 = arith.constant 0 : index
    %c0_12 = arith.constant 0 : index
    %19 = vector.load %arg6[%c0_11, %c0_12] : memref<48x128xbf16, #tpu.memory_space<vmem>>, vector<48x128xbf16>
    tpu.vector_store %arg6[%c0_11, %c0_12], %18 {strides = array<i32>} : memref<48x128xbf16, #tpu.memory_space<vmem>>, vector<48x128xbf16>,
    return
  }
  func.func @transform_0(%arg0: i32) -> (i32, i32) {
    %c0_i32 = arith.constant 0 : i32
    %c0_i32_0 = arith.constant 0 : i32
    return %arg0, %c0_i32 : i32, i32
  }
  func.func @transform_1(%arg0: i32) -> (i32, i32) {
    %c0_i32 = arith.constant 0 : i32
    %c0_i32_0 = arith.constant 0 : i32
    %c0_i32_1 = arith.constant 0 : i32
    return %c0_i32, %c0_i32_0 : i32, i32
  }
  func.func @transform_2(%arg0: i32) -> (i32, i32) {
    %c0_i32 = arith.constant 0 : i32
    %c0_i32_0 = arith.constant 0 : i32
    return %arg0, %c0_i32 : i32, i32
  }
  func.func @transform_3(%arg0: i32) -> (i32, i32) {
    %c0_i32 = arith.constant 0 : i32
    %c0_i32_0 = arith.constant 0 : i32
    %c0_i32_1 = arith.constant 0 : i32
    return %c0_i32, %c0_i32_0 : i32, i32
  }
  func.func @transform_4(%arg0: i32) -> (i32, i32) {
    %c0_i32 = arith.constant 0 : i32
    %c0_i32_0 = arith.constant 0 : i32
    %c0_i32_1 = arith.constant 0 : i32
    return %c0_i32, %c0_i32_0 : i32, i32
  }
  func.func @transform_5(%arg0: i32) -> (i32, i32) {
    %c0_i32 = arith.constant 0 : i32
    %c0_i32_0 = arith.constant 0 : i32
    return %arg0, %c0_i32 : i32, i32
  }
}

module attributes {stable_mosaic.version = 11 : i64} {
  func.func @_pointwise_kernel(%arg0: i32, %arg1: memref<24x256xbf16, #tpu.memory_space<vmem>>, %arg2: memref<1x256xf32, #tpu.memory_space<vmem>>, %arg3: memref<256x128xbf16, #tpu.memory_space<vmem>>, %arg4: memref<1x128xf32, #tpu.memory_space<vmem>>, %arg5: memref<24x128xbf16, #tpu.memory_space<vmem>>) attributes {dimension_semantics = [#tpu.dimension_semantics<parallel>], iteration_bounds = array<i64: 1>, scalar_prefetch = 0 : i64, scratch_operands = 0 : i64, tpu.core_type = #tpu.core_type<tc>, window_params = [{transform_indices = @transform_0, window_bounds = array<i64: 24, 256>}, {pipeline_mode = #tpu.pipeline_mode<synchronous>, transform_indices = @transform_1, window_bounds = array<i64: 1, 256>}, {pipeline_mode = #tpu.pipeline_mode<synchronous>, transform_indices = @transform_2, window_bounds = array<i64: 256, 128>}, {pipeline_mode = #tpu.pipeline_mode<synchronous>, transform_indices = @transform_3, window_bounds = array<i64: 1, 128>}, {transform_indices = @transform_4, window_bounds = array<i64: 24, 128>}]} {
    %c0 = arith.constant 0 : index
    %c0_0 = arith.constant 0 : index
    %0 = vector.load %arg1[%c0, %c0_0] : memref<24x256xbf16, #tpu.memory_space<vmem>>, vector<24x256xbf16>
    %1 = arith.extf %0 : vector<24x256xbf16> to vector<24x256xf32>
    %c0_1 = arith.constant 0 : index
    %c0_2 = arith.constant 0 : index
    %2 = vector.load %arg2[%c0_1, %c0_2] : memref<1x256xf32, #tpu.memory_space<vmem>>, vector<1x256xf32>
    %3 = vector.broadcast %2 : vector<1x256xf32> to vector<24x256xf32>
    %4 = arith.addf %1, %3 : vector<24x256xf32>
    %cst = arith.constant 0.000000e+00 : f32
    %cst_3 = arith.constant 6.000000e+00 : f32
    %5 = vector.broadcast %cst : f32 to vector<24x256xf32>
    %6 = arith.maximumf %5, %4 : vector<24x256xf32>
    %7 = vector.broadcast %cst_3 : f32 to vector<24x256xf32>
    %8 = arith.minimumf %7, %6 : vector<24x256xf32>
    %9 = arith.truncf %8 : vector<24x256xf32> to vector<24x256xbf16>
    %c0_4 = arith.constant 0 : index
    %c0_5 = arith.constant 0 : index
    %10 = vector.load %arg3[%c0_4, %c0_5] : memref<256x128xbf16, #tpu.memory_space<vmem>>, vector<256x128xbf16>
    %cst_6 = arith.constant dense<0.000000e+00> : vector<24x128xf32>
    %11 = tpu.matmul %9, %10, %cst_6 {dimension_numbers = #tpu.dot_dimension_numbers<[1], [0], [0], [1], [0, 0, 1, 1], [], []>} : vector<24x256xbf16>, vector<256x128xbf16>, vector<24x128xf32> -> vector<24x128xf32>
    %c0_7 = arith.constant 0 : index
    %c0_8 = arith.constant 0 : index
    %12 = vector.load %arg4[%c0_7, %c0_8] : memref<1x128xf32, #tpu.memory_space<vmem>>, vector<1x128xf32>
    %13 = vector.broadcast %12 : vector<1x128xf32> to vector<24x128xf32>
    %14 = arith.addf %11, %13 : vector<24x128xf32>
    %15 = arith.truncf %14 : vector<24x128xf32> to vector<24x128xbf16>
    %c0_9 = arith.constant 0 : index
    %c0_10 = arith.constant 0 : index
    %16 = vector.load %arg5[%c0_9, %c0_10] : memref<24x128xbf16, #tpu.memory_space<vmem>>, vector<24x128xbf16>
    tpu.vector_store %arg5[%c0_9, %c0_10], %15 {strides = array<i32>} : memref<24x128xbf16, #tpu.memory_space<vmem>>, vector<24x128xbf16>,
    return
  }
  func.func @transform_0(%arg0: i32) -> (i32, i32) {
    %c0_i32 = arith.constant 0 : i32
    %c0_i32_0 = arith.constant 0 : i32
    return %arg0, %c0_i32 : i32, i32
  }
  func.func @transform_1(%arg0: i32) -> (i32, i32) {
    %c0_i32 = arith.constant 0 : i32
    %c0_i32_0 = arith.constant 0 : i32
    %c0_i32_1 = arith.constant 0 : i32
    return %c0_i32, %c0_i32_0 : i32, i32
  }
  func.func @transform_2(%arg0: i32) -> (i32, i32) {
    %c0_i32 = arith.constant 0 : i32
    %c0_i32_0 = arith.constant 0 : i32
    %c0_i32_1 = arith.constant 0 : i32
    return %c0_i32, %c0_i32_0 : i32, i32
  }
  func.func @transform_3(%arg0: i32) -> (i32, i32) {
    %c0_i32 = arith.constant 0 : i32
    %c0_i32_0 = arith.constant 0 : i32
    %c0_i32_1 = arith.constant 0 : i32
    return %c0_i32, %c0_i32_0 : i32, i32
  }
  func.func @transform_4(%arg0: i32) -> (i32, i32) {
    %c0_i32 = arith.constant 0 : i32
    %c0_i32_0 = arith.constant 0 : i32
    return %arg0, %c0_i32 : i32, i32
  }
}

module attributes {stable_mosaic.version = 11 : i64} {
  func.func @_pointwise_kernel(%arg0: i32, %arg1: memref<24x128xbf16, #tpu.memory_space<vmem>>, %arg2: memref<128x256xbf16, #tpu.memory_space<vmem>>, %arg3: memref<1x256xf32, #tpu.memory_space<vmem>>, %arg4: memref<24x256xbf16, #tpu.memory_space<vmem>>) attributes {dimension_semantics = [#tpu.dimension_semantics<parallel>], iteration_bounds = array<i64: 1>, scalar_prefetch = 0 : i64, scratch_operands = 0 : i64, tpu.core_type = #tpu.core_type<tc>, window_params = [{transform_indices = @transform_0, window_bounds = array<i64: 24, 128>}, {pipeline_mode = #tpu.pipeline_mode<synchronous>, transform_indices = @transform_1, window_bounds = array<i64: 128, 256>}, {pipeline_mode = #tpu.pipeline_mode<synchronous>, transform_indices = @transform_2, window_bounds = array<i64: 1, 256>}, {transform_indices = @transform_3, window_bounds = array<i64: 24, 256>}]} {
    %c0 = arith.constant 0 : index
    %c0_0 = arith.constant 0 : index
    %0 = vector.load %arg1[%c0, %c0_0] : memref<24x128xbf16, #tpu.memory_space<vmem>>, vector<24x128xbf16>
    %c0_1 = arith.constant 0 : index
    %c0_2 = arith.constant 0 : index
    %1 = vector.load %arg2[%c0_1, %c0_2] : memref<128x256xbf16, #tpu.memory_space<vmem>>, vector<128x256xbf16>
    %cst = arith.constant dense<0.000000e+00> : vector<24x256xf32>
    %2 = tpu.matmul %0, %1, %cst {dimension_numbers = #tpu.dot_dimension_numbers<[1], [0], [0], [1], [0, 0, 1, 1], [], []>} : vector<24x128xbf16>, vector<128x256xbf16>, vector<24x256xf32> -> vector<24x256xf32>
    %c0_3 = arith.constant 0 : index
    %c0_4 = arith.constant 0 : index
    %3 = vector.load %arg3[%c0_3, %c0_4] : memref<1x256xf32, #tpu.memory_space<vmem>>, vector<1x256xf32>
    %4 = vector.broadcast %3 : vector<1x256xf32> to vector<24x256xf32>
    %5 = arith.addf %2, %4 : vector<24x256xf32>
    %cst_5 = arith.constant 0.000000e+00 : f32
    %cst_6 = arith.constant 6.000000e+00 : f32
    %6 = vector.broadcast %cst_5 : f32 to vector<24x256xf32>
    %7 = arith.maximumf %6, %5 : vector<24x256xf32>
    %8 = vector.broadcast %cst_6 : f32 to vector<24x256xf32>
    %9 = arith.minimumf %8, %7 : vector<24x256xf32>
    %10 = arith.truncf %9 : vector<24x256xf32> to vector<24x256xbf16>
    %c0_7 = arith.constant 0 : index
    %c0_8 = arith.constant 0 : index
    %11 = vector.load %arg4[%c0_7, %c0_8] : memref<24x256xbf16, #tpu.memory_space<vmem>>, vector<24x256xbf16>
    tpu.vector_store %arg4[%c0_7, %c0_8], %10 {strides = array<i32>} : memref<24x256xbf16, #tpu.memory_space<vmem>>, vector<24x256xbf16>,
    return
  }
  func.func @transform_0(%arg0: i32) -> (i32, i32) {
    %c0_i32 = arith.constant 0 : i32
    %c0_i32_0 = arith.constant 0 : i32
    return %arg0, %c0_i32 : i32, i32
  }
  func.func @transform_1(%arg0: i32) -> (i32, i32) {
    %c0_i32 = arith.constant 0 : i32
    %c0_i32_0 = arith.constant 0 : i32
    %c0_i32_1 = arith.constant 0 : i32
    return %c0_i32, %c0_i32_0 : i32, i32
  }
  func.func @transform_2(%arg0: i32) -> (i32, i32) {
    %c0_i32 = arith.constant 0 : i32
    %c0_i32_0 = arith.constant 0 : i32
    %c0_i32_1 = arith.constant 0 : i32
    return %c0_i32, %c0_i32_0 : i32, i32
  }
  func.func @transform_3(%arg0: i32) -> (i32, i32) {
    %c0_i32 = arith.constant 0 : i32
    %c0_i32_0 = arith.constant 0 : i32
    return %arg0, %c0_i32 : i32, i32
  }
}

module attributes {stable_mosaic.version = 11 : i64} {
  func.func @_pointwise_kernel(%arg0: i32, %arg1: memref<6x256xbf16, #tpu.memory_space<vmem>>, %arg2: memref<1x256xf32, #tpu.memory_space<vmem>>, %arg3: memref<256x128xbf16, #tpu.memory_space<vmem>>, %arg4: memref<1x128xf32, #tpu.memory_space<vmem>>, %arg5: memref<6x128xbf16, #tpu.memory_space<vmem>>) attributes {dimension_semantics = [#tpu.dimension_semantics<parallel>], iteration_bounds = array<i64: 1>, scalar_prefetch = 0 : i64, scratch_operands = 0 : i64, tpu.core_type = #tpu.core_type<tc>, window_params = [{transform_indices = @transform_0, window_bounds = array<i64: 6, 256>}, {pipeline_mode = #tpu.pipeline_mode<synchronous>, transform_indices = @transform_1, window_bounds = array<i64: 1, 256>}, {pipeline_mode = #tpu.pipeline_mode<synchronous>, transform_indices = @transform_2, window_bounds = array<i64: 256, 128>}, {pipeline_mode = #tpu.pipeline_mode<synchronous>, transform_indices = @transform_3, window_bounds = array<i64: 1, 128>}, {transform_indices = @transform_4, window_bounds = array<i64: 6, 128>}]} {
    %c0 = arith.constant 0 : index
    %c0_0 = arith.constant 0 : index
    %0 = vector.load %arg1[%c0, %c0_0] : memref<6x256xbf16, #tpu.memory_space<vmem>>, vector<6x256xbf16>
    %1 = arith.extf %0 : vector<6x256xbf16> to vector<6x256xf32>
    %c0_1 = arith.constant 0 : index
    %c0_2 = arith.constant 0 : index
    %2 = vector.load %arg2[%c0_1, %c0_2] : memref<1x256xf32, #tpu.memory_space<vmem>>, vector<1x256xf32>
    %3 = vector.broadcast %2 : vector<1x256xf32> to vector<6x256xf32>
    %4 = arith.addf %1, %3 : vector<6x256xf32>
    %cst = arith.constant 0.000000e+00 : f32
    %cst_3 = arith.constant 6.000000e+00 : f32
    %5 = vector.broadcast %cst : f32 to vector<6x256xf32>
    %6 = arith.maximumf %5, %4 : vector<6x256xf32>
    %7 = vector.broadcast %cst_3 : f32 to vector<6x256xf32>
    %8 = arith.minimumf %7, %6 : vector<6x256xf32>
    %9 = arith.truncf %8 : vector<6x256xf32> to vector<6x256xbf16>
    %c0_4 = arith.constant 0 : index
    %c0_5 = arith.constant 0 : index
    %10 = vector.load %arg3[%c0_4, %c0_5] : memref<256x128xbf16, #tpu.memory_space<vmem>>, vector<256x128xbf16>
    %cst_6 = arith.constant dense<0.000000e+00> : vector<6x128xf32>
    %11 = tpu.matmul %9, %10, %cst_6 {dimension_numbers = #tpu.dot_dimension_numbers<[1], [0], [0], [1], [0, 0, 1, 1], [], []>} : vector<6x256xbf16>, vector<256x128xbf16>, vector<6x128xf32> -> vector<6x128xf32>
    %c0_7 = arith.constant 0 : index
    %c0_8 = arith.constant 0 : index
    %12 = vector.load %arg4[%c0_7, %c0_8] : memref<1x128xf32, #tpu.memory_space<vmem>>, vector<1x128xf32>
    %13 = vector.broadcast %12 : vector<1x128xf32> to vector<6x128xf32>
    %14 = arith.addf %11, %13 : vector<6x128xf32>
    %15 = arith.truncf %14 : vector<6x128xf32> to vector<6x128xbf16>
    %c0_9 = arith.constant 0 : index
    %c0_10 = arith.constant 0 : index
    %16 = vector.load %arg5[%c0_9, %c0_10] : memref<6x128xbf16, #tpu.memory_space<vmem>>, vector<6x128xbf16>
    tpu.vector_store %arg5[%c0_9, %c0_10], %15 {strides = array<i32>} : memref<6x128xbf16, #tpu.memory_space<vmem>>, vector<6x128xbf16>,
    return
  }
  func.func @transform_0(%arg0: i32) -> (i32, i32) {
    %c0_i32 = arith.constant 0 : i32
    %c0_i32_0 = arith.constant 0 : i32
    return %arg0, %c0_i32 : i32, i32
  }
  func.func @transform_1(%arg0: i32) -> (i32, i32) {
    %c0_i32 = arith.constant 0 : i32
    %c0_i32_0 = arith.constant 0 : i32
    %c0_i32_1 = arith.constant 0 : i32
    return %c0_i32, %c0_i32_0 : i32, i32
  }
  func.func @transform_2(%arg0: i32) -> (i32, i32) {
    %c0_i32 = arith.constant 0 : i32
    %c0_i32_0 = arith.constant 0 : i32
    %c0_i32_1 = arith.constant 0 : i32
    return %c0_i32, %c0_i32_0 : i32, i32
  }
  func.func @transform_3(%arg0: i32) -> (i32, i32) {
    %c0_i32 = arith.constant 0 : i32
    %c0_i32_0 = arith.constant 0 : i32
    %c0_i32_1 = arith.constant 0 : i32
    return %c0_i32, %c0_i32_0 : i32, i32
  }
  func.func @transform_4(%arg0: i32) -> (i32, i32) {
    %c0_i32 = arith.constant 0 : i32
    %c0_i32_0 = arith.constant 0 : i32
    return %arg0, %c0_i32 : i32, i32
  }
}

module attributes {stable_mosaic.version = 11 : i64} {
  func.func @_pointwise_kernel(%arg0: i32, %arg1: memref<24x256xbf16, #tpu.memory_space<vmem>>, %arg2: memref<1x256xf32, #tpu.memory_space<vmem>>, %arg3: memref<24x128xbf16, #tpu.memory_space<vmem>>, %arg4: memref<256x128xbf16, #tpu.memory_space<vmem>>, %arg5: memref<1x128xf32, #tpu.memory_space<vmem>>, %arg6: memref<24x128xbf16, #tpu.memory_space<vmem>>) attributes {dimension_semantics = [#tpu.dimension_semantics<parallel>], iteration_bounds = array<i64: 1>, scalar_prefetch = 0 : i64, scratch_operands = 0 : i64, tpu.core_type = #tpu.core_type<tc>, window_params = [{transform_indices = @transform_0, window_bounds = array<i64: 24, 256>}, {pipeline_mode = #tpu.pipeline_mode<synchronous>, transform_indices = @transform_1, window_bounds = array<i64: 1, 256>}, {transform_indices = @transform_2, window_bounds = array<i64: 24, 128>}, {pipeline_mode = #tpu.pipeline_mode<synchronous>, transform_indices = @transform_3, window_bounds = array<i64: 256, 128>}, {pipeline_mode = #tpu.pipeline_mode<synchronous>, transform_indices = @transform_4, window_bounds = array<i64: 1, 128>}, {transform_indices = @transform_5, window_bounds = array<i64: 24, 128>}]} {
    %c0 = arith.constant 0 : index
    %c0_0 = arith.constant 0 : index
    %0 = vector.load %arg1[%c0, %c0_0] : memref<24x256xbf16, #tpu.memory_space<vmem>>, vector<24x256xbf16>
    %1 = arith.extf %0 : vector<24x256xbf16> to vector<24x256xf32>
    %c0_1 = arith.constant 0 : index
    %c0_2 = arith.constant 0 : index
    %2 = vector.load %arg2[%c0_1, %c0_2] : memref<1x256xf32, #tpu.memory_space<vmem>>, vector<1x256xf32>
    %3 = vector.broadcast %2 : vector<1x256xf32> to vector<24x256xf32>
    %4 = arith.addf %1, %3 : vector<24x256xf32>
    %cst = arith.constant 0.000000e+00 : f32
    %cst_3 = arith.constant 6.000000e+00 : f32
    %5 = vector.broadcast %cst : f32 to vector<24x256xf32>
    %6 = arith.maximumf %5, %4 : vector<24x256xf32>
    %7 = vector.broadcast %cst_3 : f32 to vector<24x256xf32>
    %8 = arith.minimumf %7, %6 : vector<24x256xf32>
    %9 = arith.truncf %8 : vector<24x256xf32> to vector<24x256xbf16>
    %c0_4 = arith.constant 0 : index
    %c0_5 = arith.constant 0 : index
    %10 = vector.load %arg4[%c0_4, %c0_5] : memref<256x128xbf16, #tpu.memory_space<vmem>>, vector<256x128xbf16>
    %cst_6 = arith.constant dense<0.000000e+00> : vector<24x128xf32>
    %11 = tpu.matmul %9, %10, %cst_6 {dimension_numbers = #tpu.dot_dimension_numbers<[1], [0], [0], [1], [0, 0, 1, 1], [], []>} : vector<24x256xbf16>, vector<256x128xbf16>, vector<24x128xf32> -> vector<24x128xf32>
    %c0_7 = arith.constant 0 : index
    %c0_8 = arith.constant 0 : index
    %12 = vector.load %arg5[%c0_7, %c0_8] : memref<1x128xf32, #tpu.memory_space<vmem>>, vector<1x128xf32>
    %13 = vector.broadcast %12 : vector<1x128xf32> to vector<24x128xf32>
    %14 = arith.addf %11, %13 : vector<24x128xf32>
    %c0_9 = arith.constant 0 : index
    %c0_10 = arith.constant 0 : index
    %15 = vector.load %arg3[%c0_9, %c0_10] : memref<24x128xbf16, #tpu.memory_space<vmem>>, vector<24x128xbf16>
    %16 = arith.extf %15 : vector<24x128xbf16> to vector<24x128xf32>
    %17 = arith.addf %14, %16 : vector<24x128xf32>
    %18 = arith.truncf %17 : vector<24x128xf32> to vector<24x128xbf16>
    %c0_11 = arith.constant 0 : index
    %c0_12 = arith.constant 0 : index
    %19 = vector.load %arg6[%c0_11, %c0_12] : memref<24x128xbf16, #tpu.memory_space<vmem>>, vector<24x128xbf16>
    tpu.vector_store %arg6[%c0_11, %c0_12], %18 {strides = array<i32>} : memref<24x128xbf16, #tpu.memory_space<vmem>>, vector<24x128xbf16>,
    return
  }
  func.func @transform_0(%arg0: i32) -> (i32, i32) {
    %c0_i32 = arith.constant 0 : i32
    %c0_i32_0 = arith.constant 0 : i32
    return %arg0, %c0_i32 : i32, i32
  }
  func.func @transform_1(%arg0: i32) -> (i32, i32) {
    %c0_i32 = arith.constant 0 : i32
    %c0_i32_0 = arith.constant 0 : i32
    %c0_i32_1 = arith.constant 0 : i32
    return %c0_i32, %c0_i32_0 : i32, i32
  }
  func.func @transform_2(%arg0: i32) -> (i32, i32) {
    %c0_i32 = arith.constant 0 : i32
    %c0_i32_0 = arith.constant 0 : i32
    return %arg0, %c0_i32 : i32, i32
  }
  func.func @transform_3(%arg0: i32) -> (i32, i32) {
    %c0_i32 = arith.constant 0 : i32
    %c0_i32_0 = arith.constant 0 : i32
    %c0_i32_1 = arith.constant 0 : i32
    return %c0_i32, %c0_i32_0 : i32, i32
  }
  func.func @transform_4(%arg0: i32) -> (i32, i32) {
    %c0_i32 = arith.constant 0 : i32
    %c0_i32_0 = arith.constant 0 : i32
    %c0_i32_1 = arith.constant 0 : i32
    return %c0_i32, %c0_i32_0 : i32, i32
  }
  func.func @transform_5(%arg0: i32) -> (i32, i32) {
    %c0_i32 = arith.constant 0 : i32
    %c0_i32_0 = arith.constant 0 : i32
    return %arg0, %c0_i32 : i32, i32
  }
}

module attributes {stable_mosaic.version = 11 : i64} {
  func.func @_pointwise_kernel(%arg0: i32, %arg1: memref<6x128xbf16, #tpu.memory_space<vmem>>, %arg2: memref<128x384xbf16, #tpu.memory_space<vmem>>, %arg3: memref<1x384xf32, #tpu.memory_space<vmem>>, %arg4: memref<6x384xbf16, #tpu.memory_space<vmem>>) attributes {dimension_semantics = [#tpu.dimension_semantics<parallel>], iteration_bounds = array<i64: 1>, scalar_prefetch = 0 : i64, scratch_operands = 0 : i64, tpu.core_type = #tpu.core_type<tc>, window_params = [{transform_indices = @transform_0, window_bounds = array<i64: 6, 128>}, {pipeline_mode = #tpu.pipeline_mode<synchronous>, transform_indices = @transform_1, window_bounds = array<i64: 128, 384>}, {pipeline_mode = #tpu.pipeline_mode<synchronous>, transform_indices = @transform_2, window_bounds = array<i64: 1, 384>}, {transform_indices = @transform_3, window_bounds = array<i64: 6, 384>}]} {
    %c0 = arith.constant 0 : index
    %c0_0 = arith.constant 0 : index
    %0 = vector.load %arg1[%c0, %c0_0] : memref<6x128xbf16, #tpu.memory_space<vmem>>, vector<6x128xbf16>
    %c0_1 = arith.constant 0 : index
    %c0_2 = arith.constant 0 : index
    %1 = vector.load %arg2[%c0_1, %c0_2] : memref<128x384xbf16, #tpu.memory_space<vmem>>, vector<128x384xbf16>
    %cst = arith.constant dense<0.000000e+00> : vector<6x384xf32>
    %2 = tpu.matmul %0, %1, %cst {dimension_numbers = #tpu.dot_dimension_numbers<[1], [0], [0], [1], [0, 0, 1, 1], [], []>} : vector<6x128xbf16>, vector<128x384xbf16>, vector<6x384xf32> -> vector<6x384xf32>
    %c0_3 = arith.constant 0 : index
    %c0_4 = arith.constant 0 : index
    %3 = vector.load %arg3[%c0_3, %c0_4] : memref<1x384xf32, #tpu.memory_space<vmem>>, vector<1x384xf32>
    %4 = vector.broadcast %3 : vector<1x384xf32> to vector<6x384xf32>
    %5 = arith.addf %2, %4 : vector<6x384xf32>
    %cst_5 = arith.constant 0.000000e+00 : f32
    %cst_6 = arith.constant 6.000000e+00 : f32
    %6 = vector.broadcast %cst_5 : f32 to vector<6x384xf32>
    %7 = arith.maximumf %6, %5 : vector<6x384xf32>
    %8 = vector.broadcast %cst_6 : f32 to vector<6x384xf32>
    %9 = arith.minimumf %8, %7 : vector<6x384xf32>
    %10 = arith.truncf %9 : vector<6x384xf32> to vector<6x384xbf16>
    %c0_7 = arith.constant 0 : index
    %c0_8 = arith.constant 0 : index
    %11 = vector.load %arg4[%c0_7, %c0_8] : memref<6x384xbf16, #tpu.memory_space<vmem>>, vector<6x384xbf16>
    tpu.vector_store %arg4[%c0_7, %c0_8], %10 {strides = array<i32>} : memref<6x384xbf16, #tpu.memory_space<vmem>>, vector<6x384xbf16>,
    return
  }
  func.func @transform_0(%arg0: i32) -> (i32, i32) {
    %c0_i32 = arith.constant 0 : i32
    %c0_i32_0 = arith.constant 0 : i32
    return %arg0, %c0_i32 : i32, i32
  }
  func.func @transform_1(%arg0: i32) -> (i32, i32) {
    %c0_i32 = arith.constant 0 : i32
    %c0_i32_0 = arith.constant 0 : i32
    %c0_i32_1 = arith.constant 0 : i32
    return %c0_i32, %c0_i32_0 : i32, i32
  }
  func.func @transform_2(%arg0: i32) -> (i32, i32) {
    %c0_i32 = arith.constant 0 : i32
    %c0_i32_0 = arith.constant 0 : i32
    %c0_i32_1 = arith.constant 0 : i32
    return %c0_i32, %c0_i32_0 : i32, i32
  }
  func.func @transform_3(%arg0: i32) -> (i32, i32) {
    %c0_i32 = arith.constant 0 : i32
    %c0_i32_0 = arith.constant 0 : i32
    return %arg0, %c0_i32 : i32, i32
  }
}

module attributes {stable_mosaic.version = 11 : i64} {
  func.func @_pointwise_kernel(%arg0: i32, %arg1: memref<6x384xbf16, #tpu.memory_space<vmem>>, %arg2: memref<1x384xf32, #tpu.memory_space<vmem>>, %arg3: memref<384x128xbf16, #tpu.memory_space<vmem>>, %arg4: memref<1x128xf32, #tpu.memory_space<vmem>>, %arg5: memref<6x128xbf16, #tpu.memory_space<vmem>>) attributes {dimension_semantics = [#tpu.dimension_semantics<parallel>], iteration_bounds = array<i64: 1>, scalar_prefetch = 0 : i64, scratch_operands = 0 : i64, tpu.core_type = #tpu.core_type<tc>, window_params = [{transform_indices = @transform_0, window_bounds = array<i64: 6, 384>}, {pipeline_mode = #tpu.pipeline_mode<synchronous>, transform_indices = @transform_1, window_bounds = array<i64: 1, 384>}, {pipeline_mode = #tpu.pipeline_mode<synchronous>, transform_indices = @transform_2, window_bounds = array<i64: 384, 128>}, {pipeline_mode = #tpu.pipeline_mode<synchronous>, transform_indices = @transform_3, window_bounds = array<i64: 1, 128>}, {transform_indices = @transform_4, window_bounds = array<i64: 6, 128>}]} {
    %c0 = arith.constant 0 : index
    %c0_0 = arith.constant 0 : index
    %0 = vector.load %arg1[%c0, %c0_0] : memref<6x384xbf16, #tpu.memory_space<vmem>>, vector<6x384xbf16>
    %1 = arith.extf %0 : vector<6x384xbf16> to vector<6x384xf32>
    %c0_1 = arith.constant 0 : index
    %c0_2 = arith.constant 0 : index
    %2 = vector.load %arg2[%c0_1, %c0_2] : memref<1x384xf32, #tpu.memory_space<vmem>>, vector<1x384xf32>
    %3 = vector.broadcast %2 : vector<1x384xf32> to vector<6x384xf32>
    %4 = arith.addf %1, %3 : vector<6x384xf32>
    %cst = arith.constant 0.000000e+00 : f32
    %cst_3 = arith.constant 6.000000e+00 : f32
    %5 = vector.broadcast %cst : f32 to vector<6x384xf32>
    %6 = arith.maximumf %5, %4 : vector<6x384xf32>
    %7 = vector.broadcast %cst_3 : f32 to vector<6x384xf32>
    %8 = arith.minimumf %7, %6 : vector<6x384xf32>
    %9 = arith.truncf %8 : vector<6x384xf32> to vector<6x384xbf16>
    %c0_4 = arith.constant 0 : index
    %c0_5 = arith.constant 0 : index
    %10 = vector.load %arg3[%c0_4, %c0_5] : memref<384x128xbf16, #tpu.memory_space<vmem>>, vector<384x128xbf16>
    %cst_6 = arith.constant dense<0.000000e+00> : vector<6x128xf32>
    %11 = tpu.matmul %9, %10, %cst_6 {dimension_numbers = #tpu.dot_dimension_numbers<[1], [0], [0], [1], [0, 0, 1, 1], [], []>} : vector<6x384xbf16>, vector<384x128xbf16>, vector<6x128xf32> -> vector<6x128xf32>
    %c0_7 = arith.constant 0 : index
    %c0_8 = arith.constant 0 : index
    %12 = vector.load %arg4[%c0_7, %c0_8] : memref<1x128xf32, #tpu.memory_space<vmem>>, vector<1x128xf32>
    %13 = vector.broadcast %12 : vector<1x128xf32> to vector<6x128xf32>
    %14 = arith.addf %11, %13 : vector<6x128xf32>
    %15 = arith.truncf %14 : vector<6x128xf32> to vector<6x128xbf16>
    %c0_9 = arith.constant 0 : index
    %c0_10 = arith.constant 0 : index
    %16 = vector.load %arg5[%c0_9, %c0_10] : memref<6x128xbf16, #tpu.memory_space<vmem>>, vector<6x128xbf16>
    tpu.vector_store %arg5[%c0_9, %c0_10], %15 {strides = array<i32>} : memref<6x128xbf16, #tpu.memory_space<vmem>>, vector<6x128xbf16>,
    return
  }
  func.func @transform_0(%arg0: i32) -> (i32, i32) {
    %c0_i32 = arith.constant 0 : i32
    %c0_i32_0 = arith.constant 0 : i32
    return %arg0, %c0_i32 : i32, i32
  }
  func.func @transform_1(%arg0: i32) -> (i32, i32) {
    %c0_i32 = arith.constant 0 : i32
    %c0_i32_0 = arith.constant 0 : i32
    %c0_i32_1 = arith.constant 0 : i32
    return %c0_i32, %c0_i32_0 : i32, i32
  }
  func.func @transform_2(%arg0: i32) -> (i32, i32) {
    %c0_i32 = arith.constant 0 : i32
    %c0_i32_0 = arith.constant 0 : i32
    %c0_i32_1 = arith.constant 0 : i32
    return %c0_i32, %c0_i32_0 : i32, i32
  }
  func.func @transform_3(%arg0: i32) -> (i32, i32) {
    %c0_i32 = arith.constant 0 : i32
    %c0_i32_0 = arith.constant 0 : i32
    %c0_i32_1 = arith.constant 0 : i32
    return %c0_i32, %c0_i32_0 : i32, i32
  }
  func.func @transform_4(%arg0: i32) -> (i32, i32) {
    %c0_i32 = arith.constant 0 : i32
    %c0_i32_0 = arith.constant 0 : i32
    return %arg0, %c0_i32 : i32, i32
  }
}

module attributes {stable_mosaic.version = 11 : i64} {
  func.func @_pointwise_kernel(%arg0: i32, %arg1: memref<6x384xbf16, #tpu.memory_space<vmem>>, %arg2: memref<1x384xf32, #tpu.memory_space<vmem>>, %arg3: memref<6x128xbf16, #tpu.memory_space<vmem>>, %arg4: memref<384x128xbf16, #tpu.memory_space<vmem>>, %arg5: memref<1x128xf32, #tpu.memory_space<vmem>>, %arg6: memref<6x128xbf16, #tpu.memory_space<vmem>>) attributes {dimension_semantics = [#tpu.dimension_semantics<parallel>], iteration_bounds = array<i64: 1>, scalar_prefetch = 0 : i64, scratch_operands = 0 : i64, tpu.core_type = #tpu.core_type<tc>, window_params = [{transform_indices = @transform_0, window_bounds = array<i64: 6, 384>}, {pipeline_mode = #tpu.pipeline_mode<synchronous>, transform_indices = @transform_1, window_bounds = array<i64: 1, 384>}, {transform_indices = @transform_2, window_bounds = array<i64: 6, 128>}, {pipeline_mode = #tpu.pipeline_mode<synchronous>, transform_indices = @transform_3, window_bounds = array<i64: 384, 128>}, {pipeline_mode = #tpu.pipeline_mode<synchronous>, transform_indices = @transform_4, window_bounds = array<i64: 1, 128>}, {transform_indices = @transform_5, window_bounds = array<i64: 6, 128>}]} {
    %c0 = arith.constant 0 : index
    %c0_0 = arith.constant 0 : index
    %0 = vector.load %arg1[%c0, %c0_0] : memref<6x384xbf16, #tpu.memory_space<vmem>>, vector<6x384xbf16>
    %1 = arith.extf %0 : vector<6x384xbf16> to vector<6x384xf32>
    %c0_1 = arith.constant 0 : index
    %c0_2 = arith.constant 0 : index
    %2 = vector.load %arg2[%c0_1, %c0_2] : memref<1x384xf32, #tpu.memory_space<vmem>>, vector<1x384xf32>
    %3 = vector.broadcast %2 : vector<1x384xf32> to vector<6x384xf32>
    %4 = arith.addf %1, %3 : vector<6x384xf32>
    %cst = arith.constant 0.000000e+00 : f32
    %cst_3 = arith.constant 6.000000e+00 : f32
    %5 = vector.broadcast %cst : f32 to vector<6x384xf32>
    %6 = arith.maximumf %5, %4 : vector<6x384xf32>
    %7 = vector.broadcast %cst_3 : f32 to vector<6x384xf32>
    %8 = arith.minimumf %7, %6 : vector<6x384xf32>
    %9 = arith.truncf %8 : vector<6x384xf32> to vector<6x384xbf16>
    %c0_4 = arith.constant 0 : index
    %c0_5 = arith.constant 0 : index
    %10 = vector.load %arg4[%c0_4, %c0_5] : memref<384x128xbf16, #tpu.memory_space<vmem>>, vector<384x128xbf16>
    %cst_6 = arith.constant dense<0.000000e+00> : vector<6x128xf32>
    %11 = tpu.matmul %9, %10, %cst_6 {dimension_numbers = #tpu.dot_dimension_numbers<[1], [0], [0], [1], [0, 0, 1, 1], [], []>} : vector<6x384xbf16>, vector<384x128xbf16>, vector<6x128xf32> -> vector<6x128xf32>
    %c0_7 = arith.constant 0 : index
    %c0_8 = arith.constant 0 : index
    %12 = vector.load %arg5[%c0_7, %c0_8] : memref<1x128xf32, #tpu.memory_space<vmem>>, vector<1x128xf32>
    %13 = vector.broadcast %12 : vector<1x128xf32> to vector<6x128xf32>
    %14 = arith.addf %11, %13 : vector<6x128xf32>
    %c0_9 = arith.constant 0 : index
    %c0_10 = arith.constant 0 : index
    %15 = vector.load %arg3[%c0_9, %c0_10] : memref<6x128xbf16, #tpu.memory_space<vmem>>, vector<6x128xbf16>
    %16 = arith.extf %15 : vector<6x128xbf16> to vector<6x128xf32>
    %17 = arith.addf %14, %16 : vector<6x128xf32>
    %18 = arith.truncf %17 : vector<6x128xf32> to vector<6x128xbf16>
    %c0_11 = arith.constant 0 : index
    %c0_12 = arith.constant 0 : index
    %19 = vector.load %arg6[%c0_11, %c0_12] : memref<6x128xbf16, #tpu.memory_space<vmem>>, vector<6x128xbf16>
    tpu.vector_store %arg6[%c0_11, %c0_12], %18 {strides = array<i32>} : memref<6x128xbf16, #tpu.memory_space<vmem>>, vector<6x128xbf16>,
    return
  }
  func.func @transform_0(%arg0: i32) -> (i32, i32) {
    %c0_i32 = arith.constant 0 : i32
    %c0_i32_0 = arith.constant 0 : i32
    return %arg0, %c0_i32 : i32, i32
  }
  func.func @transform_1(%arg0: i32) -> (i32, i32) {
    %c0_i32 = arith.constant 0 : i32
    %c0_i32_0 = arith.constant 0 : i32
    %c0_i32_1 = arith.constant 0 : i32
    return %c0_i32, %c0_i32_0 : i32, i32
  }
  func.func @transform_2(%arg0: i32) -> (i32, i32) {
    %c0_i32 = arith.constant 0 : i32
    %c0_i32_0 = arith.constant 0 : i32
    return %arg0, %c0_i32 : i32, i32
  }
  func.func @transform_3(%arg0: i32) -> (i32, i32) {
    %c0_i32 = arith.constant 0 : i32
    %c0_i32_0 = arith.constant 0 : i32
    %c0_i32_1 = arith.constant 0 : i32
    return %c0_i32, %c0_i32_0 : i32, i32
  }
  func.func @transform_4(%arg0: i32) -> (i32, i32) {
    %c0_i32 = arith.constant 0 : i32
    %c0_i32_0 = arith.constant 0 : i32
    %c0_i32_1 = arith.constant 0 : i32
    return %c0_i32, %c0_i32_0 : i32, i32
  }
  func.func @transform_5(%arg0: i32) -> (i32, i32) {
    %c0_i32 = arith.constant 0 : i32
    %c0_i32_0 = arith.constant 0 : i32
    return %arg0, %c0_i32 : i32, i32
  }
}

module attributes {stable_mosaic.version = 11 : i64} {
  func.func @_pointwise_kernel(%arg0: i32, %arg1: memref<6x128xbf16, #tpu.memory_space<vmem>>, %arg2: memref<128x640xbf16, #tpu.memory_space<vmem>>, %arg3: memref<1x640xf32, #tpu.memory_space<vmem>>, %arg4: memref<6x640xbf16, #tpu.memory_space<vmem>>) attributes {dimension_semantics = [#tpu.dimension_semantics<parallel>], iteration_bounds = array<i64: 1>, scalar_prefetch = 0 : i64, scratch_operands = 0 : i64, tpu.core_type = #tpu.core_type<tc>, window_params = [{transform_indices = @transform_0, window_bounds = array<i64: 6, 128>}, {pipeline_mode = #tpu.pipeline_mode<synchronous>, transform_indices = @transform_1, window_bounds = array<i64: 128, 640>}, {pipeline_mode = #tpu.pipeline_mode<synchronous>, transform_indices = @transform_2, window_bounds = array<i64: 1, 640>}, {transform_indices = @transform_3, window_bounds = array<i64: 6, 640>}]} {
    %c0 = arith.constant 0 : index
    %c0_0 = arith.constant 0 : index
    %0 = vector.load %arg1[%c0, %c0_0] : memref<6x128xbf16, #tpu.memory_space<vmem>>, vector<6x128xbf16>
    %c0_1 = arith.constant 0 : index
    %c0_2 = arith.constant 0 : index
    %1 = vector.load %arg2[%c0_1, %c0_2] : memref<128x640xbf16, #tpu.memory_space<vmem>>, vector<128x640xbf16>
    %cst = arith.constant dense<0.000000e+00> : vector<6x640xf32>
    %2 = tpu.matmul %0, %1, %cst {dimension_numbers = #tpu.dot_dimension_numbers<[1], [0], [0], [1], [0, 0, 1, 1], [], []>} : vector<6x128xbf16>, vector<128x640xbf16>, vector<6x640xf32> -> vector<6x640xf32>
    %c0_3 = arith.constant 0 : index
    %c0_4 = arith.constant 0 : index
    %3 = vector.load %arg3[%c0_3, %c0_4] : memref<1x640xf32, #tpu.memory_space<vmem>>, vector<1x640xf32>
    %4 = vector.broadcast %3 : vector<1x640xf32> to vector<6x640xf32>
    %5 = arith.addf %2, %4 : vector<6x640xf32>
    %cst_5 = arith.constant 0.000000e+00 : f32
    %cst_6 = arith.constant 6.000000e+00 : f32
    %6 = vector.broadcast %cst_5 : f32 to vector<6x640xf32>
    %7 = arith.maximumf %6, %5 : vector<6x640xf32>
    %8 = vector.broadcast %cst_6 : f32 to vector<6x640xf32>
    %9 = arith.minimumf %8, %7 : vector<6x640xf32>
    %10 = arith.truncf %9 : vector<6x640xf32> to vector<6x640xbf16>
    %c0_7 = arith.constant 0 : index
    %c0_8 = arith.constant 0 : index
    %11 = vector.load %arg4[%c0_7, %c0_8] : memref<6x640xbf16, #tpu.memory_space<vmem>>, vector<6x640xbf16>
    tpu.vector_store %arg4[%c0_7, %c0_8], %10 {strides = array<i32>} : memref<6x640xbf16, #tpu.memory_space<vmem>>, vector<6x640xbf16>,
    return
  }
  func.func @transform_0(%arg0: i32) -> (i32, i32) {
    %c0_i32 = arith.constant 0 : i32
    %c0_i32_0 = arith.constant 0 : i32
    return %arg0, %c0_i32 : i32, i32
  }
  func.func @transform_1(%arg0: i32) -> (i32, i32) {
    %c0_i32 = arith.constant 0 : i32
    %c0_i32_0 = arith.constant 0 : i32
    %c0_i32_1 = arith.constant 0 : i32
    return %c0_i32, %c0_i32_0 : i32, i32
  }
  func.func @transform_2(%arg0: i32) -> (i32, i32) {
    %c0_i32 = arith.constant 0 : i32
    %c0_i32_0 = arith.constant 0 : i32
    %c0_i32_1 = arith.constant 0 : i32
    return %c0_i32, %c0_i32_0 : i32, i32
  }
  func.func @transform_3(%arg0: i32) -> (i32, i32) {
    %c0_i32 = arith.constant 0 : i32
    %c0_i32_0 = arith.constant 0 : i32
    return %arg0, %c0_i32 : i32, i32
  }
}

module attributes {stable_mosaic.version = 11 : i64} {
  func.func @_pointwise_kernel(%arg0: i32, %arg1: memref<6x640xbf16, #tpu.memory_space<vmem>>, %arg2: memref<1x640xf32, #tpu.memory_space<vmem>>, %arg3: memref<6x128xbf16, #tpu.memory_space<vmem>>, %arg4: memref<640x128xbf16, #tpu.memory_space<vmem>>, %arg5: memref<1x128xf32, #tpu.memory_space<vmem>>, %arg6: memref<6x128xbf16, #tpu.memory_space<vmem>>) attributes {dimension_semantics = [#tpu.dimension_semantics<parallel>], iteration_bounds = array<i64: 1>, scalar_prefetch = 0 : i64, scratch_operands = 0 : i64, tpu.core_type = #tpu.core_type<tc>, window_params = [{transform_indices = @transform_0, window_bounds = array<i64: 6, 640>}, {pipeline_mode = #tpu.pipeline_mode<synchronous>, transform_indices = @transform_1, window_bounds = array<i64: 1, 640>}, {transform_indices = @transform_2, window_bounds = array<i64: 6, 128>}, {pipeline_mode = #tpu.pipeline_mode<synchronous>, transform_indices = @transform_3, window_bounds = array<i64: 640, 128>}, {pipeline_mode = #tpu.pipeline_mode<synchronous>, transform_indices = @transform_4, window_bounds = array<i64: 1, 128>}, {transform_indices = @transform_5, window_bounds = array<i64: 6, 128>}]} {
    %c0 = arith.constant 0 : index
    %c0_0 = arith.constant 0 : index
    %0 = vector.load %arg1[%c0, %c0_0] : memref<6x640xbf16, #tpu.memory_space<vmem>>, vector<6x640xbf16>
    %1 = arith.extf %0 : vector<6x640xbf16> to vector<6x640xf32>
    %c0_1 = arith.constant 0 : index
    %c0_2 = arith.constant 0 : index
    %2 = vector.load %arg2[%c0_1, %c0_2] : memref<1x640xf32, #tpu.memory_space<vmem>>, vector<1x640xf32>
    %3 = vector.broadcast %2 : vector<1x640xf32> to vector<6x640xf32>
    %4 = arith.addf %1, %3 : vector<6x640xf32>
    %cst = arith.constant 0.000000e+00 : f32
    %cst_3 = arith.constant 6.000000e+00 : f32
    %5 = vector.broadcast %cst : f32 to vector<6x640xf32>
    %6 = arith.maximumf %5, %4 : vector<6x640xf32>
    %7 = vector.broadcast %cst_3 : f32 to vector<6x640xf32>
    %8 = arith.minimumf %7, %6 : vector<6x640xf32>
    %9 = arith.truncf %8 : vector<6x640xf32> to vector<6x640xbf16>
    %c0_4 = arith.constant 0 : index
    %c0_5 = arith.constant 0 : index
    %10 = vector.load %arg4[%c0_4, %c0_5] : memref<640x128xbf16, #tpu.memory_space<vmem>>, vector<640x128xbf16>
    %cst_6 = arith.constant dense<0.000000e+00> : vector<6x128xf32>
    %11 = tpu.matmul %9, %10, %cst_6 {dimension_numbers = #tpu.dot_dimension_numbers<[1], [0], [0], [1], [0, 0, 1, 1], [], []>} : vector<6x640xbf16>, vector<640x128xbf16>, vector<6x128xf32> -> vector<6x128xf32>
    %c0_7 = arith.constant 0 : index
    %c0_8 = arith.constant 0 : index
    %12 = vector.load %arg5[%c0_7, %c0_8] : memref<1x128xf32, #tpu.memory_space<vmem>>, vector<1x128xf32>
    %13 = vector.broadcast %12 : vector<1x128xf32> to vector<6x128xf32>
    %14 = arith.addf %11, %13 : vector<6x128xf32>
    %c0_9 = arith.constant 0 : index
    %c0_10 = arith.constant 0 : index
    %15 = vector.load %arg3[%c0_9, %c0_10] : memref<6x128xbf16, #tpu.memory_space<vmem>>, vector<6x128xbf16>
    %16 = arith.extf %15 : vector<6x128xbf16> to vector<6x128xf32>
    %17 = arith.addf %14, %16 : vector<6x128xf32>
    %18 = arith.truncf %17 : vector<6x128xf32> to vector<6x128xbf16>
    %c0_11 = arith.constant 0 : index
    %c0_12 = arith.constant 0 : index
    %19 = vector.load %arg6[%c0_11, %c0_12] : memref<6x128xbf16, #tpu.memory_space<vmem>>, vector<6x128xbf16>
    tpu.vector_store %arg6[%c0_11, %c0_12], %18 {strides = array<i32>} : memref<6x128xbf16, #tpu.memory_space<vmem>>, vector<6x128xbf16>,
    return
  }
  func.func @transform_0(%arg0: i32) -> (i32, i32) {
    %c0_i32 = arith.constant 0 : i32
    %c0_i32_0 = arith.constant 0 : i32
    return %arg0, %c0_i32 : i32, i32
  }
  func.func @transform_1(%arg0: i32) -> (i32, i32) {
    %c0_i32 = arith.constant 0 : i32
    %c0_i32_0 = arith.constant 0 : i32
    %c0_i32_1 = arith.constant 0 : i32
    return %c0_i32, %c0_i32_0 : i32, i32
  }
  func.func @transform_2(%arg0: i32) -> (i32, i32) {
    %c0_i32 = arith.constant 0 : i32
    %c0_i32_0 = arith.constant 0 : i32
    return %arg0, %c0_i32 : i32, i32
  }
  func.func @transform_3(%arg0: i32) -> (i32, i32) {
    %c0_i32 = arith.constant 0 : i32
    %c0_i32_0 = arith.constant 0 : i32
    %c0_i32_1 = arith.constant 0 : i32
    return %c0_i32, %c0_i32_0 : i32, i32
  }
  func.func @transform_4(%arg0: i32) -> (i32, i32) {
    %c0_i32 = arith.constant 0 : i32
    %c0_i32_0 = arith.constant 0 : i32
    %c0_i32_1 = arith.constant 0 : i32
    return %c0_i32, %c0_i32_0 : i32, i32
  }
  func.func @transform_5(%arg0: i32) -> (i32, i32) {
    %c0_i32 = arith.constant 0 : i32
    %c0_i32_0 = arith.constant 0 : i32
    return %arg0, %c0_i32 : i32, i32
  }
}

module attributes {stable_mosaic.version = 11 : i64} {
  func.func @_pointwise_kernel(%arg0: i32, %arg1: memref<6x640xbf16, #tpu.memory_space<vmem>>, %arg2: memref<1x640xf32, #tpu.memory_space<vmem>>, %arg3: memref<640x256xbf16, #tpu.memory_space<vmem>>, %arg4: memref<1x256xf32, #tpu.memory_space<vmem>>, %arg5: memref<6x256xbf16, #tpu.memory_space<vmem>>) attributes {dimension_semantics = [#tpu.dimension_semantics<parallel>], iteration_bounds = array<i64: 1>, scalar_prefetch = 0 : i64, scratch_operands = 0 : i64, tpu.core_type = #tpu.core_type<tc>, window_params = [{transform_indices = @transform_0, window_bounds = array<i64: 6, 640>}, {pipeline_mode = #tpu.pipeline_mode<synchronous>, transform_indices = @transform_1, window_bounds = array<i64: 1, 640>}, {pipeline_mode = #tpu.pipeline_mode<synchronous>, transform_indices = @transform_2, window_bounds = array<i64: 640, 256>}, {pipeline_mode = #tpu.pipeline_mode<synchronous>, transform_indices = @transform_3, window_bounds = array<i64: 1, 256>}, {transform_indices = @transform_4, window_bounds = array<i64: 6, 256>}]} {
    %c0 = arith.constant 0 : index
    %c0_0 = arith.constant 0 : index
    %0 = vector.load %arg1[%c0, %c0_0] : memref<6x640xbf16, #tpu.memory_space<vmem>>, vector<6x640xbf16>
    %1 = arith.extf %0 : vector<6x640xbf16> to vector<6x640xf32>
    %c0_1 = arith.constant 0 : index
    %c0_2 = arith.constant 0 : index
    %2 = vector.load %arg2[%c0_1, %c0_2] : memref<1x640xf32, #tpu.memory_space<vmem>>, vector<1x640xf32>
    %3 = vector.broadcast %2 : vector<1x640xf32> to vector<6x640xf32>
    %4 = arith.addf %1, %3 : vector<6x640xf32>
    %cst = arith.constant 0.000000e+00 : f32
    %cst_3 = arith.constant 6.000000e+00 : f32
    %5 = vector.broadcast %cst : f32 to vector<6x640xf32>
    %6 = arith.maximumf %5, %4 : vector<6x640xf32>
    %7 = vector.broadcast %cst_3 : f32 to vector<6x640xf32>
    %8 = arith.minimumf %7, %6 : vector<6x640xf32>
    %9 = arith.truncf %8 : vector<6x640xf32> to vector<6x640xbf16>
    %c0_4 = arith.constant 0 : index
    %c0_5 = arith.constant 0 : index
    %10 = vector.load %arg3[%c0_4, %c0_5] : memref<640x256xbf16, #tpu.memory_space<vmem>>, vector<640x256xbf16>
    %cst_6 = arith.constant dense<0.000000e+00> : vector<6x256xf32>
    %11 = tpu.matmul %9, %10, %cst_6 {dimension_numbers = #tpu.dot_dimension_numbers<[1], [0], [0], [1], [0, 0, 1, 1], [], []>} : vector<6x640xbf16>, vector<640x256xbf16>, vector<6x256xf32> -> vector<6x256xf32>
    %c0_7 = arith.constant 0 : index
    %c0_8 = arith.constant 0 : index
    %12 = vector.load %arg4[%c0_7, %c0_8] : memref<1x256xf32, #tpu.memory_space<vmem>>, vector<1x256xf32>
    %13 = vector.broadcast %12 : vector<1x256xf32> to vector<6x256xf32>
    %14 = arith.addf %11, %13 : vector<6x256xf32>
    %15 = arith.truncf %14 : vector<6x256xf32> to vector<6x256xbf16>
    %c0_9 = arith.constant 0 : index
    %c0_10 = arith.constant 0 : index
    %16 = vector.load %arg5[%c0_9, %c0_10] : memref<6x256xbf16, #tpu.memory_space<vmem>>, vector<6x256xbf16>
    tpu.vector_store %arg5[%c0_9, %c0_10], %15 {strides = array<i32>} : memref<6x256xbf16, #tpu.memory_space<vmem>>, vector<6x256xbf16>,
    return
  }
  func.func @transform_0(%arg0: i32) -> (i32, i32) {
    %c0_i32 = arith.constant 0 : i32
    %c0_i32_0 = arith.constant 0 : i32
    return %arg0, %c0_i32 : i32, i32
  }
  func.func @transform_1(%arg0: i32) -> (i32, i32) {
    %c0_i32 = arith.constant 0 : i32
    %c0_i32_0 = arith.constant 0 : i32
    %c0_i32_1 = arith.constant 0 : i32
    return %c0_i32, %c0_i32_0 : i32, i32
  }
  func.func @transform_2(%arg0: i32) -> (i32, i32) {
    %c0_i32 = arith.constant 0 : i32
    %c0_i32_0 = arith.constant 0 : i32
    %c0_i32_1 = arith.constant 0 : i32
    return %c0_i32, %c0_i32_0 : i32, i32
  }
  func.func @transform_3(%arg0: i32) -> (i32, i32) {
    %c0_i32 = arith.constant 0 : i32
    %c0_i32_0 = arith.constant 0 : i32
    %c0_i32_1 = arith.constant 0 : i32
    return %c0_i32, %c0_i32_0 : i32, i32
  }
  func.func @transform_4(%arg0: i32) -> (i32, i32) {
    %c0_i32 = arith.constant 0 : i32
    %c0_i32_0 = arith.constant 0 : i32
    return %arg0, %c0_i32 : i32, i32
  }
}

module attributes {stable_mosaic.version = 11 : i64} {
  func.func @_pointwise_kernel(%arg0: i32, %arg1: memref<6x256xbf16, #tpu.memory_space<vmem>>, %arg2: memref<256x1024xbf16, #tpu.memory_space<vmem>>, %arg3: memref<1x1024xf32, #tpu.memory_space<vmem>>, %arg4: memref<6x1024xbf16, #tpu.memory_space<vmem>>) attributes {dimension_semantics = [#tpu.dimension_semantics<parallel>], iteration_bounds = array<i64: 1>, scalar_prefetch = 0 : i64, scratch_operands = 0 : i64, tpu.core_type = #tpu.core_type<tc>, window_params = [{transform_indices = @transform_0, window_bounds = array<i64: 6, 256>}, {pipeline_mode = #tpu.pipeline_mode<synchronous>, transform_indices = @transform_1, window_bounds = array<i64: 256, 1024>}, {pipeline_mode = #tpu.pipeline_mode<synchronous>, transform_indices = @transform_2, window_bounds = array<i64: 1, 1024>}, {transform_indices = @transform_3, window_bounds = array<i64: 6, 1024>}]} {
    %c0 = arith.constant 0 : index
    %c0_0 = arith.constant 0 : index
    %0 = vector.load %arg1[%c0, %c0_0] : memref<6x256xbf16, #tpu.memory_space<vmem>>, vector<6x256xbf16>
    %c0_1 = arith.constant 0 : index
    %c0_2 = arith.constant 0 : index
    %1 = vector.load %arg2[%c0_1, %c0_2] : memref<256x1024xbf16, #tpu.memory_space<vmem>>, vector<256x1024xbf16>
    %cst = arith.constant dense<0.000000e+00> : vector<6x1024xf32>
    %2 = tpu.matmul %0, %1, %cst {dimension_numbers = #tpu.dot_dimension_numbers<[1], [0], [0], [1], [0, 0, 1, 1], [], []>} : vector<6x256xbf16>, vector<256x1024xbf16>, vector<6x1024xf32> -> vector<6x1024xf32>
    %c0_3 = arith.constant 0 : index
    %c0_4 = arith.constant 0 : index
    %3 = vector.load %arg3[%c0_3, %c0_4] : memref<1x1024xf32, #tpu.memory_space<vmem>>, vector<1x1024xf32>
    %4 = vector.broadcast %3 : vector<1x1024xf32> to vector<6x1024xf32>
    %5 = arith.addf %2, %4 : vector<6x1024xf32>
    %cst_5 = arith.constant 0.000000e+00 : f32
    %cst_6 = arith.constant 6.000000e+00 : f32
    %6 = vector.broadcast %cst_5 : f32 to vector<6x1024xf32>
    %7 = arith.maximumf %6, %5 : vector<6x1024xf32>
    %8 = vector.broadcast %cst_6 : f32 to vector<6x1024xf32>
    %9 = arith.minimumf %8, %7 : vector<6x1024xf32>
    %10 = arith.truncf %9 : vector<6x1024xf32> to vector<6x1024xbf16>
    %c0_7 = arith.constant 0 : index
    %c0_8 = arith.constant 0 : index
    %11 = vector.load %arg4[%c0_7, %c0_8] : memref<6x1024xbf16, #tpu.memory_space<vmem>>, vector<6x1024xbf16>
    tpu.vector_store %arg4[%c0_7, %c0_8], %10 {strides = array<i32>} : memref<6x1024xbf16, #tpu.memory_space<vmem>>, vector<6x1024xbf16>,
    return
  }
  func.func @transform_0(%arg0: i32) -> (i32, i32) {
    %c0_i32 = arith.constant 0 : i32
    %c0_i32_0 = arith.constant 0 : i32
    return %arg0, %c0_i32 : i32, i32
  }
  func.func @transform_1(%arg0: i32) -> (i32, i32) {
    %c0_i32 = arith.constant 0 : i32
    %c0_i32_0 = arith.constant 0 : i32
    %c0_i32_1 = arith.constant 0 : i32
    return %c0_i32, %c0_i32_0 : i32, i32
  }
  func.func @transform_2(%arg0: i32) -> (i32, i32) {
    %c0_i32 = arith.constant 0 : i32
    %c0_i32_0 = arith.constant 0 : i32
    %c0_i32_1 = arith.constant 0 : i32
    return %c0_i32, %c0_i32_0 : i32, i32
  }
  func.func @transform_3(%arg0: i32) -> (i32, i32) {
    %c0_i32 = arith.constant 0 : i32
    %c0_i32_0 = arith.constant 0 : i32
    return %arg0, %c0_i32 : i32, i32
  }
}

module attributes {stable_mosaic.version = 11 : i64} {
  func.func @_pointwise_kernel(%arg0: i32, %arg1: memref<6x1024xbf16, #tpu.memory_space<vmem>>, %arg2: memref<1x1024xf32, #tpu.memory_space<vmem>>, %arg3: memref<6x256xbf16, #tpu.memory_space<vmem>>, %arg4: memref<1024x256xbf16, #tpu.memory_space<vmem>>, %arg5: memref<1x256xf32, #tpu.memory_space<vmem>>, %arg6: memref<6x256xbf16, #tpu.memory_space<vmem>>) attributes {dimension_semantics = [#tpu.dimension_semantics<parallel>], iteration_bounds = array<i64: 1>, scalar_prefetch = 0 : i64, scratch_operands = 0 : i64, tpu.core_type = #tpu.core_type<tc>, window_params = [{transform_indices = @transform_0, window_bounds = array<i64: 6, 1024>}, {pipeline_mode = #tpu.pipeline_mode<synchronous>, transform_indices = @transform_1, window_bounds = array<i64: 1, 1024>}, {transform_indices = @transform_2, window_bounds = array<i64: 6, 256>}, {pipeline_mode = #tpu.pipeline_mode<synchronous>, transform_indices = @transform_3, window_bounds = array<i64: 1024, 256>}, {pipeline_mode = #tpu.pipeline_mode<synchronous>, transform_indices = @transform_4, window_bounds = array<i64: 1, 256>}, {transform_indices = @transform_5, window_bounds = array<i64: 6, 256>}]} {
    %c0 = arith.constant 0 : index
    %c0_0 = arith.constant 0 : index
    %0 = vector.load %arg1[%c0, %c0_0] : memref<6x1024xbf16, #tpu.memory_space<vmem>>, vector<6x1024xbf16>
    %1 = arith.extf %0 : vector<6x1024xbf16> to vector<6x1024xf32>
    %c0_1 = arith.constant 0 : index
    %c0_2 = arith.constant 0 : index
    %2 = vector.load %arg2[%c0_1, %c0_2] : memref<1x1024xf32, #tpu.memory_space<vmem>>, vector<1x1024xf32>
    %3 = vector.broadcast %2 : vector<1x1024xf32> to vector<6x1024xf32>
    %4 = arith.addf %1, %3 : vector<6x1024xf32>
    %cst = arith.constant 0.000000e+00 : f32
    %cst_3 = arith.constant 6.000000e+00 : f32
    %5 = vector.broadcast %cst : f32 to vector<6x1024xf32>
    %6 = arith.maximumf %5, %4 : vector<6x1024xf32>
    %7 = vector.broadcast %cst_3 : f32 to vector<6x1024xf32>
    %8 = arith.minimumf %7, %6 : vector<6x1024xf32>
    %9 = arith.truncf %8 : vector<6x1024xf32> to vector<6x1024xbf16>
    %c0_4 = arith.constant 0 : index
    %c0_5 = arith.constant 0 : index
    %10 = vector.load %arg4[%c0_4, %c0_5] : memref<1024x256xbf16, #tpu.memory_space<vmem>>, vector<1024x256xbf16>
    %cst_6 = arith.constant dense<0.000000e+00> : vector<6x256xf32>
    %11 = tpu.matmul %9, %10, %cst_6 {dimension_numbers = #tpu.dot_dimension_numbers<[1], [0], [0], [1], [0, 0, 1, 1], [], []>} : vector<6x1024xbf16>, vector<1024x256xbf16>, vector<6x256xf32> -> vector<6x256xf32>
    %c0_7 = arith.constant 0 : index
    %c0_8 = arith.constant 0 : index
    %12 = vector.load %arg5[%c0_7, %c0_8] : memref<1x256xf32, #tpu.memory_space<vmem>>, vector<1x256xf32>
    %13 = vector.broadcast %12 : vector<1x256xf32> to vector<6x256xf32>
    %14 = arith.addf %11, %13 : vector<6x256xf32>
    %c0_9 = arith.constant 0 : index
    %c0_10 = arith.constant 0 : index
    %15 = vector.load %arg3[%c0_9, %c0_10] : memref<6x256xbf16, #tpu.memory_space<vmem>>, vector<6x256xbf16>
    %16 = arith.extf %15 : vector<6x256xbf16> to vector<6x256xf32>
    %17 = arith.addf %14, %16 : vector<6x256xf32>
    %18 = arith.truncf %17 : vector<6x256xf32> to vector<6x256xbf16>
    %c0_11 = arith.constant 0 : index
    %c0_12 = arith.constant 0 : index
    %19 = vector.load %arg6[%c0_11, %c0_12] : memref<6x256xbf16, #tpu.memory_space<vmem>>, vector<6x256xbf16>
    tpu.vector_store %arg6[%c0_11, %c0_12], %18 {strides = array<i32>} : memref<6x256xbf16, #tpu.memory_space<vmem>>, vector<6x256xbf16>,
    return
  }
  func.func @transform_0(%arg0: i32) -> (i32, i32) {
    %c0_i32 = arith.constant 0 : i32
    %c0_i32_0 = arith.constant 0 : i32
    return %arg0, %c0_i32 : i32, i32
  }
  func.func @transform_1(%arg0: i32) -> (i32, i32) {
    %c0_i32 = arith.constant 0 : i32
    %c0_i32_0 = arith.constant 0 : i32
    %c0_i32_1 = arith.constant 0 : i32
    return %c0_i32, %c0_i32_0 : i32, i32
  }
  func.func @transform_2(%arg0: i32) -> (i32, i32) {
    %c0_i32 = arith.constant 0 : i32
    %c0_i32_0 = arith.constant 0 : i32
    return %arg0, %c0_i32 : i32, i32
  }
  func.func @transform_3(%arg0: i32) -> (i32, i32) {
    %c0_i32 = arith.constant 0 : i32
    %c0_i32_0 = arith.constant 0 : i32
    %c0_i32_1 = arith.constant 0 : i32
    return %c0_i32, %c0_i32_0 : i32, i32
  }
  func.func @transform_4(%arg0: i32) -> (i32, i32) {
    %c0_i32 = arith.constant 0 : i32
    %c0_i32_0 = arith.constant 0 : i32
    %c0_i32_1 = arith.constant 0 : i32
    return %c0_i32, %c0_i32_0 : i32, i32
  }
  func.func @transform_5(%arg0: i32) -> (i32, i32) {
    %c0_i32 = arith.constant 0 : i32
    %c0_i32_0 = arith.constant 0 : i32
    return %arg0, %c0_i32 : i32, i32
  }
}

module attributes {stable_mosaic.version = 11 : i64} {
  func.func @_pointwise_kernel(%arg0: i32, %arg1: memref<6x1024xbf16, #tpu.memory_space<vmem>>, %arg2: memref<1x1024xf32, #tpu.memory_space<vmem>>, %arg3: memref<1024x384xbf16, #tpu.memory_space<vmem>>, %arg4: memref<1x384xf32, #tpu.memory_space<vmem>>, %arg5: memref<6x384xbf16, #tpu.memory_space<vmem>>) attributes {dimension_semantics = [#tpu.dimension_semantics<parallel>], iteration_bounds = array<i64: 1>, scalar_prefetch = 0 : i64, scratch_operands = 0 : i64, tpu.core_type = #tpu.core_type<tc>, window_params = [{transform_indices = @transform_0, window_bounds = array<i64: 6, 1024>}, {pipeline_mode = #tpu.pipeline_mode<synchronous>, transform_indices = @transform_1, window_bounds = array<i64: 1, 1024>}, {pipeline_mode = #tpu.pipeline_mode<synchronous>, transform_indices = @transform_2, window_bounds = array<i64: 1024, 384>}, {pipeline_mode = #tpu.pipeline_mode<synchronous>, transform_indices = @transform_3, window_bounds = array<i64: 1, 384>}, {transform_indices = @transform_4, window_bounds = array<i64: 6, 384>}]} {
    %c0 = arith.constant 0 : index
    %c0_0 = arith.constant 0 : index
    %0 = vector.load %arg1[%c0, %c0_0] : memref<6x1024xbf16, #tpu.memory_space<vmem>>, vector<6x1024xbf16>
    %1 = arith.extf %0 : vector<6x1024xbf16> to vector<6x1024xf32>
    %c0_1 = arith.constant 0 : index
    %c0_2 = arith.constant 0 : index
    %2 = vector.load %arg2[%c0_1, %c0_2] : memref<1x1024xf32, #tpu.memory_space<vmem>>, vector<1x1024xf32>
    %3 = vector.broadcast %2 : vector<1x1024xf32> to vector<6x1024xf32>
    %4 = arith.addf %1, %3 : vector<6x1024xf32>
    %cst = arith.constant 0.000000e+00 : f32
    %cst_3 = arith.constant 6.000000e+00 : f32
    %5 = vector.broadcast %cst : f32 to vector<6x1024xf32>
    %6 = arith.maximumf %5, %4 : vector<6x1024xf32>
    %7 = vector.broadcast %cst_3 : f32 to vector<6x1024xf32>
    %8 = arith.minimumf %7, %6 : vector<6x1024xf32>
    %9 = arith.truncf %8 : vector<6x1024xf32> to vector<6x1024xbf16>
    %c0_4 = arith.constant 0 : index
    %c0_5 = arith.constant 0 : index
    %10 = vector.load %arg3[%c0_4, %c0_5] : memref<1024x384xbf16, #tpu.memory_space<vmem>>, vector<1024x384xbf16>
    %cst_6 = arith.constant dense<0.000000e+00> : vector<6x384xf32>
    %11 = tpu.matmul %9, %10, %cst_6 {dimension_numbers = #tpu.dot_dimension_numbers<[1], [0], [0], [1], [0, 0, 1, 1], [], []>} : vector<6x1024xbf16>, vector<1024x384xbf16>, vector<6x384xf32> -> vector<6x384xf32>
    %c0_7 = arith.constant 0 : index
    %c0_8 = arith.constant 0 : index
    %12 = vector.load %arg4[%c0_7, %c0_8] : memref<1x384xf32, #tpu.memory_space<vmem>>, vector<1x384xf32>
    %13 = vector.broadcast %12 : vector<1x384xf32> to vector<6x384xf32>
    %14 = arith.addf %11, %13 : vector<6x384xf32>
    %15 = arith.truncf %14 : vector<6x384xf32> to vector<6x384xbf16>
    %c0_9 = arith.constant 0 : index
    %c0_10 = arith.constant 0 : index
    %16 = vector.load %arg5[%c0_9, %c0_10] : memref<6x384xbf16, #tpu.memory_space<vmem>>, vector<6x384xbf16>
    tpu.vector_store %arg5[%c0_9, %c0_10], %15 {strides = array<i32>} : memref<6x384xbf16, #tpu.memory_space<vmem>>, vector<6x384xbf16>,
    return
  }
  func.func @transform_0(%arg0: i32) -> (i32, i32) {
    %c0_i32 = arith.constant 0 : i32
    %c0_i32_0 = arith.constant 0 : i32
    return %arg0, %c0_i32 : i32, i32
  }
  func.func @transform_1(%arg0: i32) -> (i32, i32) {
    %c0_i32 = arith.constant 0 : i32
    %c0_i32_0 = arith.constant 0 : i32
    %c0_i32_1 = arith.constant 0 : i32
    return %c0_i32, %c0_i32_0 : i32, i32
  }
  func.func @transform_2(%arg0: i32) -> (i32, i32) {
    %c0_i32 = arith.constant 0 : i32
    %c0_i32_0 = arith.constant 0 : i32
    %c0_i32_1 = arith.constant 0 : i32
    return %c0_i32, %c0_i32_0 : i32, i32
  }
  func.func @transform_3(%arg0: i32) -> (i32, i32) {
    %c0_i32 = arith.constant 0 : i32
    %c0_i32_0 = arith.constant 0 : i32
    %c0_i32_1 = arith.constant 0 : i32
    return %c0_i32, %c0_i32_0 : i32, i32
  }
  func.func @transform_4(%arg0: i32) -> (i32, i32) {
    %c0_i32 = arith.constant 0 : i32
    %c0_i32_0 = arith.constant 0 : i32
    return %arg0, %c0_i32 : i32, i32
  }
}

module attributes {stable_mosaic.version = 11 : i64} {
  func.func @_last_conv_pool_kernel(%arg0: i32, %arg1: memref<6x1x384xbf16, #tpu.memory_space<vmem>>, %arg2: memref<384x1280xbf16, #tpu.memory_space<vmem>>, %arg3: memref<1x1280xf32, #tpu.memory_space<vmem>>, %arg4: memref<6x1280xf32, #tpu.memory_space<vmem>>) attributes {dimension_semantics = [#tpu.dimension_semantics<parallel>], iteration_bounds = array<i64: 1>, scalar_prefetch = 0 : i64, scratch_operands = 0 : i64, tpu.core_type = #tpu.core_type<tc>, window_params = [{transform_indices = @transform_0, window_bounds = array<i64: 6, 1, 384>}, {pipeline_mode = #tpu.pipeline_mode<synchronous>, transform_indices = @transform_1, window_bounds = array<i64: 384, 1280>}, {pipeline_mode = #tpu.pipeline_mode<synchronous>, transform_indices = @transform_2, window_bounds = array<i64: 1, 1280>}, {transform_indices = @transform_3, window_bounds = array<i64: 6, 1280>}]} {
    %c0 = arith.constant 0 : index
    %c0_0 = arith.constant 0 : index
    %c0_1 = arith.constant 0 : index
    %0 = vector.load %arg1[%c0, %c0_0, %c0_1] : memref<6x1x384xbf16, #tpu.memory_space<vmem>>, vector<6x1x384xbf16>
    %1 = vector.shape_cast %0 : vector<6x1x384xbf16> to vector<6x384xbf16>
    %c0_2 = arith.constant 0 : index
    %c0_3 = arith.constant 0 : index
    %2 = vector.load %arg2[%c0_2, %c0_3] : memref<384x1280xbf16, #tpu.memory_space<vmem>>, vector<384x1280xbf16>
    %cst = arith.constant dense<0.000000e+00> : vector<6x1280xf32>
    %3 = tpu.matmul %1, %2, %cst {dimension_numbers = #tpu.dot_dimension_numbers<[1], [0], [0], [1], [0, 0, 1, 1], [], []>} : vector<6x384xbf16>, vector<384x1280xbf16>, vector<6x1280xf32> -> vector<6x1280xf32>
    %c0_4 = arith.constant 0 : index
    %c0_5 = arith.constant 0 : index
    %4 = vector.load %arg3[%c0_4, %c0_5] : memref<1x1280xf32, #tpu.memory_space<vmem>>, vector<1x1280xf32>
    %5 = vector.broadcast %4 : vector<1x1280xf32> to vector<6x1280xf32>
    %6 = arith.addf %3, %5 : vector<6x1280xf32>
    %cst_6 = arith.constant 0.000000e+00 : f32
    %cst_7 = arith.constant 6.000000e+00 : f32
    %7 = vector.broadcast %cst_6 : f32 to vector<6x1280xf32>
    %8 = arith.maximumf %7, %6 : vector<6x1280xf32>
    %9 = vector.broadcast %cst_7 : f32 to vector<6x1280xf32>
    %10 = arith.minimumf %9, %8 : vector<6x1280xf32>
    %11 = vector.shape_cast %10 : vector<6x1280xf32> to vector<6x1x1280xf32>
    %cst_8 = arith.constant dense<0.000000e+00> : vector<6x1280xf32>
    %12 = vector.multi_reduction <add>, %11, %cst_8 [1] : vector<6x1x1280xf32> to vector<6x1280xf32>
    %cst_9 = arith.constant 1.000000e+00 : f32
    %13 = vector.broadcast %cst_9 : f32 to vector<6x1280xf32>
    %14 = arith.mulf %12, %13 : vector<6x1280xf32>
    %c0_10 = arith.constant 0 : index
    %c0_11 = arith.constant 0 : index
    %15 = vector.load %arg4[%c0_10, %c0_11] : memref<6x1280xf32, #tpu.memory_space<vmem>>, vector<6x1280xf32>
    tpu.vector_store %arg4[%c0_10, %c0_11], %14 {strides = array<i32>} : memref<6x1280xf32, #tpu.memory_space<vmem>>, vector<6x1280xf32>,
    return
  }
  func.func @transform_0(%arg0: i32) -> (i32, i32, i32) {
    %c0_i32 = arith.constant 0 : i32
    %c0_i32_0 = arith.constant 0 : i32
    %c0_i32_1 = arith.constant 0 : i32
    return %arg0, %c0_i32, %c0_i32_0 : i32, i32, i32
  }
  func.func @transform_1(%arg0: i32) -> (i32, i32) {
    %c0_i32 = arith.constant 0 : i32
    %c0_i32_0 = arith.constant 0 : i32
    %c0_i32_1 = arith.constant 0 : i32
    return %c0_i32, %c0_i32_0 : i32, i32
  }
  func.func @transform_2(%arg0: i32) -> (i32, i32) {
    %c0_i32 = arith.constant 0 : i32
    %c0_i32_0 = arith.constant 0 : i32
    %c0_i32_1 = arith.constant 0 : i32
    return %c0_i32, %c0_i32_0 : i32, i32
  }
  func.func @transform_3(%arg0: i32) -> (i32, i32) {
    %c0_i32 = arith.constant 0 : i32
    %c0_i32_0 = arith.constant 0 : i32
    return %arg0, %c0_i32 : i32, i32
  }
}

module attributes {stable_mosaic.version = 11 : i64} {
  func.func @_head_kernel(%arg0: memref<2x1280xf32, #tpu.memory_space<vmem>>, %arg1: memref<2x32xf32, #tpu.memory_space<vmem>>, %arg2: memref<1280x128xf32, #tpu.memory_space<vmem>>, %arg3: memref<1x128xf32, #tpu.memory_space<vmem>>, %arg4: memref<32x64xf32, #tpu.memory_space<vmem>>, %arg5: memref<1x64xf32, #tpu.memory_space<vmem>>, %arg6: memref<64x32xf32, #tpu.memory_space<vmem>>, %arg7: memref<1x32xf32, #tpu.memory_space<vmem>>, %arg8: memref<128x64xf32, #tpu.memory_space<vmem>>, %arg9: memref<32x64xf32, #tpu.memory_space<vmem>>, %arg10: memref<1x64xf32, #tpu.memory_space<vmem>>, %arg11: memref<1x64xf32, #tpu.memory_space<vmem>>, %arg12: memref<1x1xf32, #tpu.memory_space<vmem>>, %arg13: memref<2x1xf32, #tpu.memory_space<vmem>>) attributes {dimension_semantics = [], scalar_prefetch = 0 : i64, scratch_operands = 0 : i64, tpu.core_type = #tpu.core_type<tc>} {
    %c0 = arith.constant 0 : index
    %c0_0 = arith.constant 0 : index
    %0 = vector.load %arg0[%c0, %c0_0] : memref<2x1280xf32, #tpu.memory_space<vmem>>, vector<2x1280xf32>
    %c0_1 = arith.constant 0 : index
    %c0_2 = arith.constant 0 : index
    %1 = vector.load %arg2[%c0_1, %c0_2] : memref<1280x128xf32, #tpu.memory_space<vmem>>, vector<1280x128xf32>
    %cst = arith.constant dense<0.000000e+00> : vector<2x128xf32>
    %2 = tpu.matmul %0, %1, %cst {dimension_numbers = #tpu.dot_dimension_numbers<[1], [0], [0], [1], [0, 0, 1, 1], [], []>} : vector<2x1280xf32>, vector<1280x128xf32>, vector<2x128xf32> -> vector<2x128xf32>
    %c0_3 = arith.constant 0 : index
    %c0_4 = arith.constant 0 : index
    %3 = vector.load %arg3[%c0_3, %c0_4] : memref<1x128xf32, #tpu.memory_space<vmem>>, vector<1x128xf32>
    %4 = vector.broadcast %3 : vector<1x128xf32> to vector<2x128xf32>
    %5 = arith.addf %2, %4 : vector<2x128xf32>
    %c0_5 = arith.constant 0 : index
    %c0_6 = arith.constant 0 : index
    %6 = vector.load %arg1[%c0_5, %c0_6] : memref<2x32xf32, #tpu.memory_space<vmem>>, vector<2x32xf32>
    %c0_7 = arith.constant 0 : index
    %c0_8 = arith.constant 0 : index
    %7 = vector.load %arg4[%c0_7, %c0_8] : memref<32x64xf32, #tpu.memory_space<vmem>>, vector<32x64xf32>
    %cst_9 = arith.constant dense<0.000000e+00> : vector<2x64xf32>
    %8 = tpu.matmul %6, %7, %cst_9 {dimension_numbers = #tpu.dot_dimension_numbers<[1], [0], [0], [1], [0, 0, 1, 1], [], []>} : vector<2x32xf32>, vector<32x64xf32>, vector<2x64xf32> -> vector<2x64xf32>
    %c0_10 = arith.constant 0 : index
    %c0_11 = arith.constant 0 : index
    %9 = vector.load %arg5[%c0_10, %c0_11] : memref<1x64xf32, #tpu.memory_space<vmem>>, vector<1x64xf32>
    %10 = vector.broadcast %9 : vector<1x64xf32> to vector<2x64xf32>
    %11 = arith.addf %8, %10 : vector<2x64xf32>
    %cst_12 = arith.constant 0.000000e+00 : f32
    %12 = vector.broadcast %cst_12 : f32 to vector<2x64xf32>
    %13 = arith.maximumf %11, %12 : vector<2x64xf32>
    %c0_13 = arith.constant 0 : index
    %c0_14 = arith.constant 0 : index
    %14 = vector.load %arg6[%c0_13, %c0_14] : memref<64x32xf32, #tpu.memory_space<vmem>>, vector<64x32xf32>
    %cst_15 = arith.constant dense<0.000000e+00> : vector<2x32xf32>
    %15 = tpu.matmul %13, %14, %cst_15 {dimension_numbers = #tpu.dot_dimension_numbers<[1], [0], [0], [1], [0, 0, 1, 1], [], []>} : vector<2x64xf32>, vector<64x32xf32>, vector<2x32xf32> -> vector<2x32xf32>
    %c0_16 = arith.constant 0 : index
    %c0_17 = arith.constant 0 : index
    %16 = vector.load %arg7[%c0_16, %c0_17] : memref<1x32xf32, #tpu.memory_space<vmem>>, vector<1x32xf32>
    %17 = vector.broadcast %16 : vector<1x32xf32> to vector<2x32xf32>
    %18 = arith.addf %15, %17 : vector<2x32xf32>
    %c0_18 = arith.constant 0 : index
    %c0_19 = arith.constant 0 : index
    %19 = vector.load %arg8[%c0_18, %c0_19] : memref<128x64xf32, #tpu.memory_space<vmem>>, vector<128x64xf32>
    %cst_20 = arith.constant dense<0.000000e+00> : vector<2x64xf32>
    %20 = tpu.matmul %5, %19, %cst_20 {dimension_numbers = #tpu.dot_dimension_numbers<[1], [0], [0], [1], [0, 0, 1, 1], [], []>} : vector<2x128xf32>, vector<128x64xf32>, vector<2x64xf32> -> vector<2x64xf32>
    %c0_21 = arith.constant 0 : index
    %c0_22 = arith.constant 0 : index
    %21 = vector.load %arg9[%c0_21, %c0_22] : memref<32x64xf32, #tpu.memory_space<vmem>>, vector<32x64xf32>
    %cst_23 = arith.constant dense<0.000000e+00> : vector<2x64xf32>
    %22 = tpu.matmul %18, %21, %cst_23 {dimension_numbers = #tpu.dot_dimension_numbers<[1], [0], [0], [1], [0, 0, 1, 1], [], []>} : vector<2x32xf32>, vector<32x64xf32>, vector<2x64xf32> -> vector<2x64xf32>
    %23 = arith.addf %20, %22 : vector<2x64xf32>
    %c0_24 = arith.constant 0 : index
    %c0_25 = arith.constant 0 : index
    %24 = vector.load %arg10[%c0_24, %c0_25] : memref<1x64xf32, #tpu.memory_space<vmem>>, vector<1x64xf32>
    %25 = vector.broadcast %24 : vector<1x64xf32> to vector<2x64xf32>
    %26 = arith.addf %23, %25 : vector<2x64xf32>
    %cst_26 = arith.constant 0.000000e+00 : f32
    %27 = vector.broadcast %cst_26 : f32 to vector<2x64xf32>
    %28 = arith.maximumf %26, %27 : vector<2x64xf32>
    %c0_27 = arith.constant 0 : index
    %c0_28 = arith.constant 0 : index
    %29 = vector.load %arg11[%c0_27, %c0_28] : memref<1x64xf32, #tpu.memory_space<vmem>>, vector<1x64xf32>
    %30 = vector.broadcast %29 : vector<1x64xf32> to vector<2x64xf32>
    %31 = arith.mulf %28, %30 : vector<2x64xf32>
    %cst_29 = arith.constant dense<0.000000e+00> : vector<2xf32>
    %32 = vector.multi_reduction <add>, %31, %cst_29 [1] : vector<2x64xf32> to vector<2xf32>
    %33 = vector.shape_cast %32 : vector<2xf32> to vector<2x1xf32>
    %c0_30 = arith.constant 0 : index
    %c0_31 = arith.constant 0 : index
    %34 = vector.load %arg12[%c0_30, %c0_31] : memref<1x1xf32, #tpu.memory_space<vmem>>, vector<1x1xf32>
    %35 = vector.broadcast %34 : vector<1x1xf32> to vector<2x1xf32>
    %36 = arith.addf %33, %35 : vector<2x1xf32>
    %c0_32 = arith.constant 0 : index
    %c0_33 = arith.constant 0 : index
    %37 = vector.load %arg13[%c0_32, %c0_33] : memref<2x1xf32, #tpu.memory_space<vmem>>, vector<2x1xf32>
    tpu.vector_store %arg13[%c0_32, %c0_33], %36 {strides = array<i32>} : memref<2x1xf32, #tpu.memory_space<vmem>>, vector<2x1xf32>,
    return
  }
}

</mosaic_0001>

<bundles_post_ra>
// kernel: forward.36
= control target key start
LH: loop header
LB: loop body
LE: loop exit
PB: predicated region body
PF: predicated region fallthrough
CT: control target
= control target key end

     0   :  { %s976_s12 = smov 0   ;;  %s1081_s0 = inlined_call_operand.vmem [shape: bf16[384,128], index: 0, kind: input, shape index: {}]   ;;  %s1082_s1 = inlined_call_operand.vmem [shape: bf16[128,128], index: 1, kind: input, shape index: {}]   ;;  %s1083_s2 = inlined_call_operand.vmem [shape: f32[1,128], index: 2, kind: input, shape index: {}]   ;;  %s1084_s3 = inlined_call_operand.vmem [shape: bf16[384,128], index: 3, kind: output, shape index: {}]  }
   0x1 LB: > { %s695_s13 = sadd.s32 4294967295, %s954_s12   ;;  %p699_p0 = scmp.ge.s32.totalorder %s954_s12, 1  ;;  %s954_s12 = sphi %s976_s12, %s13_s12  }
   0x2   : > { %p138_p1 = scmp.lt.s32.totalorder %s954_s12, 3 }
   0x4   : > { %p139_p2 = pnand %p699_p0, %p138_p1 }
   0x5   : > { %v928_v0 = vld [vmem:[%s1082_s1] sm:$0xff] (!%p139_p2)   ;;  %s162_s16 = smul.u32 (!%p139_p2), 24, %s695_s13  ;;  %v929_v1 = vld [vmem:[%s1082_s1 + $0x8] sm:$0xff] (!%p139_p2)   ;;  %v930_v2 = vld [vmem:[%s1082_s1 + $0x10] sm:$0xff] (!%p139_p2)  }
   0x6   : > { %142 = sbr.rel (%p139_p2) target bundleno = 278 (0x116), region = 32  ;;  %864 = vmatprep.subr.bf16.mxu0 (!%p139_p2), %v928_v0  ;;  %904 = vmatprep.subr.bf16.mxu1 (!%p139_p2), %v928_v0  ;;  %v931_v3 = vld [vmem:[%s1082_s1 + $0x18] sm:$0xff] (!%p139_p2)   ;;  %v932_v6 = vld [vmem:[%s1082_s1 + $0x20] sm:$0xff] (!%p139_p2)   ;;  %v933_v7 = vld [vmem:[%s1082_s1 + $0x28] sm:$0xff] (!%p139_p2)  }
   0x7   : > { %p163_p3 = scmp.lt.s32.totalorder (!%p139_p2), %s162_s16, 47  ;;  %865 = vmatpush3.bf16.msra.mxu0 (!%p139_p2), %v928_v0  ;;  %912 = vmatpush3.bf16.msra.mxu1 (!%p139_p2), %v928_v0  ;;  %v934_v8 = vld [vmem:[%s1082_s1 + $0x30] sm:$0xff] (!%p139_p2)   ;;  %v935_v9 = vld [vmem:[%s1082_s1 + $0x38] sm:$0xff] (!%p139_p2)   ;;  %v1033_v20 = vld [vmem:[%s1083_s2] ss:$0 sm:$0xff] (!%p139_p2) }
   0x8   : > { %866 = vmatprep.subr.bf16.mxu0 (!%p139_p2), %v929_v1  ;;  %905 = vmatprep.subr.bf16.mxu1 (!%p139_p2), %v929_v1 }
   0xb   : > { %867 = vmatpush3.bf16.msra.mxu0 (!%p139_p2), %v929_v1  ;;  %913 = vmatpush3.bf16.msra.mxu1 (!%p139_p2), %v929_v1 }
   0xc   : > { %868 = vmatprep.subr.bf16.mxu0 (!%p139_p2), %v930_v2  ;;  %906 = vmatprep.subr.bf16.mxu1 (!%p139_p2), %v930_v2 }
   0xd   : > { %s1086_s16 = smov (!%p163_p3, %s162_s16), 47 }
   0xe   : > { %s700_s21 = sshll.u32 %s1086_s16, 2 }
   0xf   : > { %s1004_s26 = scalar_lea.vmem %s1081_s0, %s700_s21  ;;  %869 = vmatpush3.bf16.msra.mxu0 %v930_v2  ;;  %914 = vmatpush3.bf16.msra.mxu1 %v930_v2  ;;  %s1048_s13 = scalar_lea.vmem %s1084_s3, %s700_s21 }
  0x10   : > { %v936_v4 = vld [vmem:[%s1004_s26] sm:$0xff]   ;;  %v937_v5 = vld [vmem:[%s1004_s26 + $0x30] sm:$0xff]   ;;  %870 = vmatprep.subr.bf16.mxu0 %v931_v3  ;;  %907 = vmatprep.subr.bf16.mxu1 %v931_v3  ;;  %v938_v10 = vld [vmem:[%s1004_s26 + $0x8] sm:$0xff]  }
  0x11   : > { %880 = vmatprep.mubr.bf16.mxu0 %v936_v4  ;;  %892 = vmatprep.mubr.bf16.mxu1 %v937_v5  ;;  %v939_v11 = vld [vmem:[%s1004_s26 + $0x38] sm:$0xff]   ;;  %v940_v12 = vld [vmem:[%s1004_s26 + $0x10] sm:$0xff]   ;;  %v941_v13 = vld [vmem:[%s1004_s26 + $0x40] sm:$0xff]  }
  0x12   : > { %v942_v14 = vld [vmem:[%s1004_s26 + $0x18] sm:$0xff]   ;;  %v943_v15 = vld [vmem:[%s1004_s26 + $0x48] sm:$0xff]   ;;  %v944_v16 = vld [vmem:[%s1004_s26 + $0x20] sm:$0xff]  }
  0x13   : > { %871 = vmatpush3.bf16.msra.mxu0 %v931_v3  ;;  %915 = vmatpush3.bf16.msra.mxu1 %v931_v3  ;;  %v945_v17 = vld [vmem:[%s1004_s26 + $0x50] sm:$0xff]   ;;  %v946_v18 = vld [vmem:[%s1004_s26 + $0x28] sm:$0xff]   ;;  %v947_v19 = vld [vmem:[%s1004_s26 + $0x58] sm:$0xff]  }
  0x14   : > { %872 = vmatprep.subr.bf16.mxu0 %v932_v6  ;;  %908 = vmatprep.subr.bf16.mxu1 %v932_v6 }
  0x17   : > { %873 = vmatpush3.bf16.msra.mxu0 %v932_v6  ;;  %916 = vmatpush3.bf16.msra.mxu1 %v932_v6 }
  0x18   : > { %874 = vmatprep.subr.bf16.mxu0 %v933_v7  ;;  %909 = vmatprep.subr.bf16.mxu1 %v933_v7 }
  0x1b   : > { %875 = vmatpush3.bf16.msra.mxu0 %v933_v7  ;;  %917 = vmatpush3.bf16.msra.mxu1 %v933_v7 }
  0x1c   : > { %876 = vmatprep.subr.bf16.mxu0 %v934_v8  ;;  %910 = vmatprep.subr.bf16.mxu1 %v934_v8 }
  0x1f   : > { %877 = vmatpush3.bf16.msra.mxu0 %v934_v8  ;;  %918 = vmatpush3.bf16.msra.mxu1 %v934_v8 }
  0x20   : > { %878 = vmatprep.subr.bf16.mxu0 %v935_v9  ;;  %911 = vmatprep.subr.bf16.mxu1 %v935_v9 }
  0x23   : > { %879 = vmatpush3.bf16.msra.mxu0 %v935_v9  ;;  %919 = vmatpush3.bf16.msra.mxu1 %v935_v9 }
  0x26   : > { %881 = vmatmul.mubr.bf16.vlgmr.msra.gmra.mrb[0].mxu0 %v938_v10  ;;  %893 = vmatmul.mubr.bf16.vlgmr.msra.gmra.mrb[0].mxu1 %v939_v11 }
  0x27   : > { %884 = vmatprep.mubr.bf16.mxu0 %v940_v12  ;;  %896 = vmatprep.mubr.bf16.mxu1 %v941_v13 }
  0x2e   : > { %885 = vmatmul.mubr.bf16.gmra.mrb[4].mxu0 %v942_v14  ;;  %897 = vmatmul.mubr.bf16.gmra.mrb[4].mxu1 %v943_v15 }
  0x2f   : > { %888 = vmatprep.mubr.bf16.mxu0 %v944_v16  ;;  %900 = vmatprep.mubr.bf16.mxu1 %v945_v17 }
  0x36   : > { %889 = vmatmul.mubr.bf16.gmra.mrb[8].mxu0 %v946_v18  ;;  %901 = vmatmul.mubr.bf16.gmra.mrb[8].mxu1 %v947_v19 }
  0xf9   : > { %v882_v21 = vpop.f32.mrb[0].mxu0  ;;  %v894_v22 = vpop.f32.mrb[0].mxu1 }
  0xfa   : > { %v385_v23 = vadd.f32 %v882_v21, %v1033_v20  ;;  %v433_v24 = vadd.f32 %v894_v22, %v1033_v20  ;;  %v376_v25 = vpop.f32.mrb[1].mxu0  ;;  %v424_v26 = vpop.f32.mrb[1].mxu1 }
  0xfb   : > { %v377_v27 = vadd.f32 %v1033_v20, %v376_v25  ;;  %v425_v28 = vadd.f32 %v1033_v20, %v424_v26  ;;  %v883_v29 = vpop.f32.mrb[2].mxu0  ;;  %v895_v30 = vpop.f32.mrb[2].mxu1 }
  0xfc   : > { %v473_v31 = vmax.f32 %v385_v23, 0.0  ;;  %v485_v32 = vmax.f32 %v433_v24, 0.0  ;;  %v388_v33 = vadd.f32 %v883_v29, %v1033_v20  ;;  %v436_v34 = vadd.f32 %v895_v30, %v1033_v20  ;;  %v379_v35 = vpop.f32.mrb[3].mxu0  ;;  %v427_v36 = vpop.f32.mrb[3].mxu1 }
  0xfd   : > { %v471_v37 = vmax.f32 %v377_v27, 0.0  ;;  %v483_v38 = vmax.f32 %v425_v28, 0.0  ;;  %v380_v39 = vadd.f32 %v1033_v20, %v379_v35  ;;  %v428_v40 = vadd.f32 %v1033_v20, %v427_v36 }
  0xfe   : > { %v474_v41 = vmax.f32 %v388_v33, 0.0  ;;  %v486_v42 = vmax.f32 %v436_v34, 0.0  ;;  %v497_v45 = vmin.f32 %v473_v31, 6.0  ;;  %v509_v46 = vmin.f32 %v485_v32, 6.0 }
  0xff   : > { %v472_v43 = vmax.f32 %v380_v39, 0.0  ;;  %v484_v44 = vmax.f32 %v428_v40, 0.0  ;;  %v495_v49 = vmin.f32 %v471_v37, 6.0  ;;  %v507_v50 = vmin.f32 %v483_v38, 6.0 }
 0x100   : > { %v498_v47 = vmin.f32 %v474_v41, 6.0  ;;  %v510_v48 = vmin.f32 %v486_v42, 6.0 }
 0x101   : > { %v496_v51 = vmin.f32 %v472_v43, 6.0  ;;  %v508_v52 = vmin.f32 %v484_v44, 6.0  ;;  %v886_v53 = vpop.f32.mrb[4].mxu0  ;;  %v898_v54 = vpop.f32.mrb[4].mxu1 }
 0x102   : > { %v781_v55 = vpack.c.bf16 %v498_v47, %v497_v45  ;;  %v811_v56 = vpack.c.bf16 %v510_v48, %v509_v46  ;;  %v401_v57 = vadd.f32 %v886_v53, %v1033_v20  ;;  %v449_v58 = vadd.f32 %v898_v54, %v1033_v20  ;;  %v392_v59 = vpop.f32.mrb[5].mxu0  ;;  %v440_v60 = vpop.f32.mrb[5].mxu1 }
 0x103   : > { %v776_v61 = vpack.c.bf16 %v496_v51, %v495_v49  ;;  %v806_v62 = vpack.c.bf16 %v508_v52, %v507_v50  ;;  %v393_v63 = vadd.f32 %v1033_v20, %v392_v59  ;;  %v441_v0 = vadd.f32 %v1033_v20, %v440_v60  ;;  %v887_v1 = vpop.f32.mrb[6].mxu0  ;;  %v899_v2 = vpop.f32.mrb[6].mxu1 }
 0x104   : > { %833 = vst [vmem:[%s1048_s13 + $0x8] sm:$0xff] %v781_v55   ;;  %839 = vst [vmem:[%s1048_s13 + $0x38] sm:$0xff] %v811_v56   ;;  %v477_v3 = vmax.f32 %v401_v57, 0.0  ;;  %v489_v4 = vmax.f32 %v449_v58, 0.0  ;;  %v404_v5 = vadd.f32 %v887_v1, %v1033_v20  ;;  %v452_v6 = vadd.f32 %v899_v2, %v1033_v20  ;;  %v395_v7 = vpop.f32.mrb[7].mxu0  ;;  %v443_v8 = vpop.f32.mrb[7].mxu1 }
 0x105   : > { %777 = vst [vmem:[%s1048_s13] sm:$0xff] %v776_v61   ;;  %838 = vst [vmem:[%s1048_s13 + $0x30] sm:$0xff] %v806_v62   ;;  %v475_v9 = vmax.f32 %v393_v63, 0.0  ;;  %v487_v10 = vmax.f32 %v441_v0, 0.0  ;;  %v396_v11 = vadd.f32 %v1033_v20, %v395_v7  ;;  %v444_v12 = vadd.f32 %v1033_v20, %v443_v8 }
 0x106   : > { %v478_v13 = vmax.f32 %v404_v5, 0.0  ;;  %v490_v14 = vmax.f32 %v452_v6, 0.0  ;;  %v501_v17 = vmin.f32 %v477_v3, 6.0  ;;  %v513_v18 = vmin.f32 %v489_v4, 6.0 }
 0x107   : > { %v476_v15 = vmax.f32 %v396_v11, 0.0  ;;  %v488_v16 = vmax.f32 %v444_v12, 0.0  ;;  %v499_v22 = vmin.f32 %v475_v9, 6.0  ;;  %v511_v23 = vmin.f32 %v487_v10, 6.0 }
 0x108   : > { %v502_v19 = vmin.f32 %v478_v13, 6.0  ;;  %v514_v21 = vmin.f32 %v490_v14, 6.0 }
 0x109   : > { %v500_v24 = vmin.f32 %v476_v15, 6.0  ;;  %v512_v25 = vmin.f32 %v488_v16, 6.0  ;;  %v890_v26 = vpop.f32.mrb[8].mxu0  ;;  %v902_v27 = vpop.f32.mrb[8].mxu1 }
 0x10a   : > { %v791_v28 = vpack.c.bf16 %v502_v19, %v501_v17  ;;  %v821_v29 = vpack.c.bf16 %v514_v21, %v513_v18  ;;  %v417_v30 = vadd.f32 %v890_v26, %v1033_v20  ;;  %v465_v31 = vadd.f32 %v902_v27, %v1033_v20  ;;  %v408_v32 = vpop.f32.mrb[9].mxu0  ;;  %v456_v33 = vpop.f32.mrb[9].mxu1 }
 0x10b   : > { %v786_v34 = vpack.c.bf16 %v500_v24, %v499_v22  ;;  %v816_v35 = vpack.c.bf16 %v512_v25, %v511_v23  ;;  %v409_v36 = vadd.f32 %v1033_v20, %v408_v32  ;;  %v457_v37 = vadd.f32 %v1033_v20, %v456_v33  ;;  %v891_v38 = vpop.f32.mrb[10].mxu0  ;;  %v903_v39 = vpop.f32.mrb[10].mxu1 }
 0x10c   : > { %835 = vst [vmem:[%s1048_s13 + $0x18] sm:$0xff] %v791_v28   ;;  %841 = vst [vmem:[%s1048_s13 + $0x48] sm:$0xff] %v821_v29   ;;  %v481_v40 = vmax.f32 %v417_v30, 0.0  ;;  %v493_v41 = vmax.f32 %v465_v31, 0.0  ;;  %v420_v42 = vadd.f32 %v891_v38, %v1033_v20  ;;  %v468_v43 = vadd.f32 %v903_v39, %v1033_v20  ;;  %v411_v44 = vpop.f32.mrb[11].mxu0  ;;  %v459_v45 = vpop.f32.mrb[11].mxu1 }
 0x10d   : > { %834 = vst [vmem:[%s1048_s13 + $0x10] sm:$0xff] %v786_v34   ;;  %840 = vst [vmem:[%s1048_s13 + $0x40] sm:$0xff] %v816_v35   ;;  %v479_v46 = vmax.f32 %v409_v36, 0.0  ;;  %v491_v47 = vmax.f32 %v457_v37, 0.0  ;;  %v412_v48 = vadd.f32 %v1033_v20, %v411_v44  ;;  %v460_v49 = vadd.f32 %v1033_v20, %v459_v45 }
 0x10e   : > { %v482_v50 = vmax.f32 %v420_v42, 0.0  ;;  %v494_v51 = vmax.f32 %v468_v43, 0.0  ;;  %v505_v54 = vmin.f32 %v481_v40, 6.0  ;;  %v517_v55 = vmin.f32 %v493_v41, 6.0 }
 0x10f   : > { %v480_v52 = vmax.f32 %v412_v48, 0.0  ;;  %v492_v53 = vmax.f32 %v460_v49, 0.0  ;;  %v503_v58 = vmin.f32 %v479_v46, 6.0  ;;  %v515_v59 = vmin.f32 %v491_v47, 6.0 }
 0x110   : > { %v506_v56 = vmin.f32 %v482_v50, 6.0  ;;  %v518_v57 = vmin.f32 %v494_v51, 6.0 }
 0x111   : > { %v504_v60 = vmin.f32 %v480_v52, 6.0  ;;  %v516_v61 = vmin.f32 %v492_v53, 6.0 }
 0x112   : > { %v801_v62 = vpack.c.bf16 %v506_v56, %v505_v54  ;;  %v831_v63 = vpack.c.bf16 %v518_v57, %v517_v55 }
 0x113   : > { %v796_v0 = vpack.c.bf16 %v504_v60, %v503_v58  ;;  %v826_v20 = vpack.c.bf16 %v516_v61, %v515_v59 }
 0x114   : > { %837 = vst [vmem:[%s1048_s13 + $0x28] sm:$0xff] %v801_v62   ;;  %843 = vst [vmem:[%s1048_s13 + $0x58] sm:$0xff] %v831_v63  }
 0x115   : > { %836 = vst [vmem:[%s1048_s13 + $0x20] sm:$0xff] %v796_v0   ;;  %842 = vst [vmem:[%s1048_s13 + $0x50] sm:$0xff] %v826_v20  }
 0x116 PF: > { %s13_s12 = sadd.s32 1, %s954_s12  }
 0x117   : > { %p10_p4 = scmp.ge.s32.totalorder %s13_s12, 4  }
 0x119   :  { %12 = sbr.rel (!%p10_p4) target bundleno = 1 (0x1), region = 62 }

// kernel: forward.35
= control target key start
LH: loop header
LB: loop body
LE: loop exit
PB: predicated region body
PF: predicated region fallthrough
CT: control target
= control target key end

     0   :  { %s1039_s15 = smov 0   ;;  %s1173_s0 = inlined_call_operand.vmem [shape: bf16[384,128], index: 0, kind: input, shape index: {}]   ;;  %s1174_s1 = inlined_call_operand.vmem [shape: f32[1,128], index: 1, kind: input, shape index: {}]   ;;  %s1175_s2 = inlined_call_operand.vmem [shape: bf16[128,128], index: 2, kind: input, shape index: {}]   ;;  %s1176_s3 = inlined_call_operand.vmem [shape: f32[1,128], index: 3, kind: input, shape index: {}]   ;;  %s1177_s4 = inlined_call_operand.vmem [shape: bf16[384,128], index: 4, kind: output, shape index: {}]  }
   0x1 LB: > { %s717_s16 = sadd.s32 4294967295, %s1012_s15   ;;  %p721_p0 = scmp.ge.s32.totalorder %s1012_s15, 1  ;;  %s1012_s15 = sphi %s1039_s15, %s14_s15  }
   0x2   : > { %p163_p1 = scmp.lt.s32.totalorder %s1012_s15, 3 }
   0x4   : > { %p164_p2 = pnand %p721_p0, %p163_p1 }
   0x5   : > { %v998_v0 = vld [vmem:[%s1175_s2] sm:$0xff] (!%p164_p2)   ;;  %s189_s19 = smul.u32 (!%p164_p2), 24, %s717_s16  ;;  %v999_v1 = vld [vmem:[%s1175_s2 + $0x8] sm:$0xff] (!%p164_p2)   ;;  %v1000_v2 = vld [vmem:[%s1175_s2 + $0x10] sm:$0xff] (!%p164_p2)  }
   0x6   : > { %167 = sbr.rel (%p164_p2) target bundleno = 275 (0x113), region = 36  ;;  %934 = vmatprep.subr.bf16.mxu0 (!%p164_p2), %v998_v0  ;;  %974 = vmatprep.subr.bf16.mxu1 (!%p164_p2), %v998_v0  ;;  %v1001_v3 = vld [vmem:[%s1175_s2 + $0x18] sm:$0xff] (!%p164_p2)   ;;  %v1073_v5 = vld [vmem:[%s1174_s1] ss:$0 sm:$0xff] (!%p164_p2)  ;;  %v1003_v37 = vld [vmem:[%s1175_s2 + $0x28] sm:$0xff] (!%p164_p2)  }
   0x7   : > { %p190_p3 = scmp.lt.s32.totalorder (!%p164_p2), %s189_s19, 47  ;;  %935 = vmatpush3.bf16.msra.mxu0 (!%p164_p2), %v998_v0  ;;  %982 = vmatpush3.bf16.msra.mxu1 (!%p164_p2), %v998_v0  ;;  %v1002_v21 = vld [vmem:[%s1175_s2 + $0x20] sm:$0xff] (!%p164_p2)   ;;  %v1004_v52 = vld [vmem:[%s1175_s2 + $0x30] sm:$0xff] (!%p164_p2)  }
   0x8   : > { %936 = vmatprep.subr.bf16.mxu0 (!%p164_p2), %v999_v1  ;;  %975 = vmatprep.subr.bf16.mxu1 (!%p164_p2), %v999_v1 }
   0xb   : > { %937 = vmatpush3.bf16.msra.mxu0 (!%p164_p2), %v999_v1  ;;  %983 = vmatpush3.bf16.msra.mxu1 (!%p164_p2), %v999_v1 }
   0xc   : > { %938 = vmatprep.subr.bf16.mxu0 (!%p164_p2), %v1000_v2  ;;  %976 = vmatprep.subr.bf16.mxu1 (!%p164_p2), %v1000_v2 }
   0xd   : > { %s1179_s19 = smov (!%p190_p3, %s189_s19), 47 }
   0xe   : > { %s722_s24 = sshll.u32 %s1179_s19, 2 }
   0xf   : > { %s1067_s29 = scalar_lea.vmem %s1173_s0, %s722_s24  ;;  %939 = vmatpush3.bf16.msra.mxu0 %v1000_v2  ;;  %984 = vmatpush3.bf16.msra.mxu1 %v1000_v2  ;;  %s1138_s20 = scalar_lea.vmem %s1177_s4, %s722_s24 }
  0x10   : > { %v785_v4 = vld [vmem:[%s1067_s29] sm:$0xff]   ;;  %v897_v6 = vld [vmem:[%s1067_s29 + $0x30] sm:$0xff]   ;;  %v892_v11 = vld [vmem:[%s1067_s29 + $0x8] sm:$0xff]   ;;  %940 = vmatprep.subr.bf16.mxu0 %v1001_v3  ;;  %977 = vmatprep.subr.bf16.mxu1 %v1001_v3 }
  0x11   : > { %v786_v7 = vunpack.c.l.bf16 %v785_v4  ;;  %v787_v8 = vunpack.c.h.bf16 %v785_v4  ;;  %v810_v9 = vunpack.c.l.bf16 %v897_v6  ;;  %v811_v10 = vunpack.c.h.bf16 %v897_v6  ;;  %v898_v12 = vld [vmem:[%s1067_s29 + $0x38] sm:$0xff]   ;;  %v893_v13 = vld [vmem:[%s1067_s29 + $0x10] sm:$0xff]   ;;  %v899_v36 = vld [vmem:[%s1067_s29 + $0x40] sm:$0xff]  }
  0x12   : > { %v790_v14 = vunpack.c.l.bf16 %v892_v11  ;;  %v791_v15 = vunpack.c.h.bf16 %v892_v11  ;;  %v814_v16 = vunpack.c.l.bf16 %v898_v12  ;;  %v815_v20 = vunpack.c.h.bf16 %v898_v12  ;;  %v894_v42 = vld [vmem:[%s1067_s29 + $0x18] sm:$0xff]   ;;  %v900_v47 = vld [vmem:[%s1067_s29 + $0x48] sm:$0xff]   ;;  %v895_v57 = vld [vmem:[%s1067_s29 + $0x20] sm:$0xff]  }
  0x13   : > { %v257_v17 = vadd.f32 %v786_v7, %v1073_v5  ;;  %v258_v18 = vadd.f32 %v787_v8, %v1073_v5  ;;  %v269_v19 = vadd.f32 %v810_v9, %v1073_v5  ;;  %v270_v22 = vadd.f32 %v811_v10, %v1073_v5  ;;  %941 = vmatpush3.bf16.msra.mxu0 %v1001_v3  ;;  %v901_v4 = vld [vmem:[%s1067_s29 + $0x50] sm:$0xff]   ;;  %v1005_v6 = vld [vmem:[%s1175_s2 + $0x38] sm:$0xff]  }
  0x14   : > { %v794_v23 = vunpack.c.l.bf16 %v893_v13  ;;  %v795_v27 = vunpack.c.h.bf16 %v893_v13  ;;  %v259_v29 = vadd.f32 %v790_v14, %v1073_v5  ;;  %v260_v30 = vadd.f32 %v791_v15, %v1073_v5  ;;  %985 = vmatpush3.bf16.msra.mxu1 %v1001_v3  ;;  %942 = vmatprep.subr.bf16.mxu0 %v1002_v21 }
  0x15   : > { %v281_v24 = vmax.f32 %v257_v17, 0.0  ;;  %v282_v25 = vmax.f32 %v258_v18, 0.0  ;;  %v293_v26 = vmax.f32 %v269_v19, 0.0  ;;  %v294_v28 = vmax.f32 %v270_v22, 0.0  ;;  %978 = vmatprep.subr.bf16.mxu1 %v1002_v21  ;;  %v896_v18 = vld [vmem:[%s1067_s29 + $0x28] sm:$0xff]  }
  0x16   : > { %v271_v31 = vadd.f32 %v814_v16, %v1073_v5  ;;  %v272_v35 = vadd.f32 %v815_v20, %v1073_v5  ;;  %v261_v40 = vadd.f32 %v794_v23, %v1073_v5  ;;  %v262_v41 = vadd.f32 %v795_v27, %v1073_v5  ;;  %v902_v23 = vld [vmem:[%s1067_s29 + $0x58] sm:$0xff]  }
  0x17   : > { %v305_v32 = vmin.f32 %v281_v24, 6.0  ;;  %v306_v33 = vmin.f32 %v282_v25, 6.0  ;;  %v317_v34 = vmin.f32 %v293_v26, 6.0  ;;  %v318_v38 = vmin.f32 %v294_v28, 6.0  ;;  %943 = vmatpush3.bf16.msra.mxu0 %v1002_v21 }
  0x18   : > { %v283_v44 = vmax.f32 %v259_v29, 0.0  ;;  %v284_v45 = vmax.f32 %v260_v30, 0.0  ;;  %v818_v46 = vunpack.c.l.bf16 %v899_v36  ;;  %986 = vmatpush3.bf16.msra.mxu1 %v1002_v21  ;;  %v295_v48 = vmax.f32 %v271_v31, 0.0  ;;  %944 = vmatprep.subr.bf16.mxu0 %v1003_v37 }
  0x19   : > { %v329_v39 = vpack.c.bf16 %v306_v33, %v305_v32  ;;  %v335_v43 = vpack.c.bf16 %v318_v38, %v317_v34  ;;  %v296_v49 = vmax.f32 %v272_v35, 0.0  ;;  %v285_v50 = vmax.f32 %v261_v40, 0.0  ;;  %979 = vmatprep.subr.bf16.mxu1 %v1003_v37 }
  0x1a   : > { %v819_v51 = vunpack.c.h.bf16 %v899_v36  ;;  %v286_v53 = vmax.f32 %v262_v41, 0.0  ;;  %v273_v54 = vadd.f32 %v818_v46, %v1073_v5  ;;  %v798_v55 = vunpack.c.l.bf16 %v894_v42 }
  0x1b   : > { %v799_v56 = vunpack.c.h.bf16 %v894_v42  ;;  %950 = vmatprep.mubr.bf16.mxu0 %v329_v39  ;;  %962 = vmatprep.mubr.bf16.mxu1 %v335_v43  ;;  %v822_v59 = vunpack.c.l.bf16 %v900_v47  ;;  %v307_v60 = vmin.f32 %v283_v44, 6.0  ;;  %v308_v61 = vmin.f32 %v284_v45, 6.0 }
  0x1c   : > { %v274_v58 = vadd.f32 %v819_v51, %v1073_v5  ;;  %v297_v62 = vmax.f32 %v273_v54, 0.0  ;;  %v823_v63 = vunpack.c.h.bf16 %v900_v47  ;;  %945 = vmatpush3.bf16.msra.mxu0 %v1003_v37  ;;  %987 = vmatpush3.bf16.msra.mxu1 %v1003_v37  ;;  %v319_v0 = vmin.f32 %v295_v48, 6.0 }
  0x1d   : > { %v320_v1 = vmin.f32 %v296_v49, 6.0  ;;  %v802_v3 = vunpack.c.l.bf16 %v895_v57  ;;  %946 = vmatprep.subr.bf16.mxu0 %v1004_v52  ;;  %980 = vmatprep.subr.bf16.mxu1 %v1004_v52  ;;  %v309_v7 = vmin.f32 %v285_v50, 6.0  ;;  %v310_v8 = vmin.f32 %v286_v53, 6.0 }
  0x1e   : > { %v298_v2 = vmax.f32 %v274_v58, 0.0  ;;  %v263_v9 = vadd.f32 %v798_v55, %v1073_v5  ;;  %v264_v10 = vadd.f32 %v799_v56, %v1073_v5  ;;  %v275_v11 = vadd.f32 %v822_v59, %v1073_v5 }
  0x1f   : > { %v276_v12 = vadd.f32 %v823_v63, %v1073_v5  ;;  %v803_v13 = vunpack.c.h.bf16 %v895_v57  ;;  %v321_v14 = vmin.f32 %v297_v62, 6.0  ;;  %v265_v16 = vadd.f32 %v802_v3, %v1073_v5 }
  0x20   : > { %v322_v15 = vmin.f32 %v298_v2, 6.0  ;;  %v826_v17 = vunpack.c.l.bf16 %v901_v4  ;;  %947 = vmatpush3.bf16.msra.mxu0 %v1004_v52  ;;  %988 = vmatpush3.bf16.msra.mxu1 %v1004_v52  ;;  %v330_v19 = vpack.c.bf16 %v308_v61, %v307_v60  ;;  %v336_v20 = vpack.c.bf16 %v320_v1, %v319_v0  ;;  %v1125_v2 = vld [vmem:[%s1176_s3] ss:$0 sm:$0xff] }
  0x21   : > { %v266_v21 = vadd.f32 %v803_v13, %v1073_v5  ;;  %v827_v22 = vunpack.c.h.bf16 %v901_v4  ;;  %948 = vmatprep.subr.bf16.mxu0 %v1005_v6  ;;  %981 = vmatprep.subr.bf16.mxu1 %v1005_v6  ;;  %v331_v24 = vpack.c.bf16 %v310_v8, %v309_v7  ;;  %v287_v25 = vmax.f32 %v263_v9, 0.0 }
  0x22   : > { %v288_v26 = vmax.f32 %v264_v10, 0.0  ;;  %v277_v27 = vadd.f32 %v826_v17, %v1073_v5  ;;  %v299_v28 = vmax.f32 %v275_v11, 0.0  ;;  %v300_v29 = vmax.f32 %v276_v12, 0.0 }
  0x23   : > { %v278_v30 = vadd.f32 %v827_v22, %v1073_v5  ;;  %v806_v31 = vunpack.c.l.bf16 %v896_v18  ;;  %v337_v32 = vpack.c.bf16 %v322_v15, %v321_v14  ;;  %v289_v33 = vmax.f32 %v265_v16, 0.0 }
  0x24   : > { %v807_v34 = vunpack.c.h.bf16 %v896_v18  ;;  %v830_v35 = vunpack.c.l.bf16 %v902_v23  ;;  %949 = vmatpush3.bf16.msra.mxu0 %v1005_v6  ;;  %989 = vmatpush3.bf16.msra.mxu1 %v1005_v6  ;;  %v290_v36 = vmax.f32 %v266_v21, 0.0  ;;  %v301_v37 = vmax.f32 %v277_v27, 0.0 }
  0x25   : > { %v302_v38 = vmax.f32 %v278_v30, 0.0  ;;  %v831_v39 = vunpack.c.h.bf16 %v902_v23  ;;  %v311_v40 = vmin.f32 %v287_v25, 6.0  ;;  %v312_v41 = vmin.f32 %v288_v26, 6.0 }
  0x26   : > { %v323_v42 = vmin.f32 %v299_v28, 6.0  ;;  %v324_v43 = vmin.f32 %v300_v29, 6.0  ;;  %v267_v44 = vadd.f32 %v806_v31, %v1073_v5  ;;  %v268_v45 = vadd.f32 %v807_v34, %v1073_v5 }
  0x27   : > { %951 = vmatmul.mubr.bf16.vlgmr.msra.gmra.mrb[0].mxu0 %v330_v19  ;;  %963 = vmatmul.mubr.bf16.vlgmr.msra.gmra.mrb[0].mxu1 %v336_v20  ;;  %v279_v46 = vadd.f32 %v830_v35, %v1073_v5  ;;  %v280_v47 = vadd.f32 %v831_v39, %v1073_v5  ;;  %v313_v48 = vmin.f32 %v289_v33, 6.0  ;;  %v314_v49 = vmin.f32 %v290_v36, 6.0 }
  0x28   : > { %954 = vmatprep.mubr.bf16.mxu0 %v331_v24  ;;  %966 = vmatprep.mubr.bf16.mxu1 %v337_v32  ;;  %v325_v50 = vmin.f32 %v301_v37, 6.0  ;;  %v326_v51 = vmin.f32 %v302_v38, 6.0  ;;  %v332_v52 = vpack.c.bf16 %v312_v41, %v311_v40  ;;  %v338_v53 = vpack.c.bf16 %v324_v43, %v323_v42 }
  0x29   : > { %v291_v54 = vmax.f32 %v267_v44, 0.0  ;;  %v292_v55 = vmax.f32 %v268_v45, 0.0  ;;  %v303_v56 = vmax.f32 %v279_v46, 0.0  ;;  %v304_v57 = vmax.f32 %v280_v47, 0.0 }
  0x2a   : > { %v333_v58 = vpack.c.bf16 %v314_v49, %v313_v48  ;;  %v339_v59 = vpack.c.bf16 %v326_v51, %v325_v50 }
  0x2b   : > { %v315_v60 = vmin.f32 %v291_v54, 6.0  ;;  %v316_v61 = vmin.f32 %v292_v55, 6.0  ;;  %v327_v62 = vmin.f32 %v303_v56, 6.0  ;;  %v328_v5 = vmin.f32 %v304_v57, 6.0 }
  0x2d   : > { %v334_v63 = vpack.c.bf16 %v316_v61, %v315_v60  ;;  %v340_v0 = vpack.c.bf16 %v328_v5, %v327_v62 }
  0x2f   : > { %955 = vmatmul.mubr.bf16.gmra.mrb[4].mxu0 %v332_v52  ;;  %967 = vmatmul.mubr.bf16.gmra.mrb[4].mxu1 %v338_v53 }
  0x30   : > { %958 = vmatprep.mubr.bf16.mxu0 %v333_v58  ;;  %970 = vmatprep.mubr.bf16.mxu1 %v339_v59 }
  0x37   : > { %959 = vmatmul.mubr.bf16.gmra.mrb[8].mxu0 %v334_v63  ;;  %971 = vmatmul.mubr.bf16.gmra.mrb[8].mxu1 %v340_v0 }
  0xfa   : > { %v952_v1 = vpop.f32.mrb[0].mxu0  ;;  %v964_v3 = vpop.f32.mrb[0].mxu1 }
  0xfb   : > { %v446_v4 = vpop.f32.mrb[1].mxu0  ;;  %v494_v6 = vpop.f32.mrb[1].mxu1  ;;  %v455_v9 = vadd.f32 %v952_v1, %v1125_v2  ;;  %v503_v10 = vadd.f32 %v964_v3, %v1125_v2 }
  0xfc   : > { %v953_v7 = vpop.f32.mrb[2].mxu0  ;;  %v965_v8 = vpop.f32.mrb[2].mxu1  ;;  %v447_v15 = vadd.f32 %v1125_v2, %v446_v4  ;;  %v495_v16 = vadd.f32 %v1125_v2, %v494_v6 }
  0xfd   : > { %v458_v11 = vadd.f32 %v953_v7, %v1125_v2  ;;  %v506_v12 = vadd.f32 %v965_v8, %v1125_v2  ;;  %v449_v13 = vpop.f32.mrb[3].mxu0  ;;  %v497_v14 = vpop.f32.mrb[3].mxu1 }
  0xfe   : > { %v450_v17 = vadd.f32 %v1125_v2, %v449_v13  ;;  %v498_v18 = vadd.f32 %v1125_v2, %v497_v14 }
  0xff   : > { %v840_v19 = vpack.c.bf16 %v458_v11, %v455_v9  ;;  %v870_v20 = vpack.c.bf16 %v506_v12, %v503_v10 }
 0x100   : > { %v835_v21 = vpack.c.bf16 %v450_v17, %v447_v15  ;;  %v865_v22 = vpack.c.bf16 %v498_v18, %v495_v16 }
 0x101   : > { %903 = vst [vmem:[%s1138_s20 + $0x8] sm:$0xff] %v840_v19   ;;  %909 = vst [vmem:[%s1138_s20 + $0x38] sm:$0xff] %v870_v20  }
 0x102   : > { %836 = vst [vmem:[%s1138_s20] sm:$0xff] %v835_v21   ;;  %908 = vst [vmem:[%s1138_s20 + $0x30] sm:$0xff] %v865_v22   ;;  %v956_v23 = vpop.f32.mrb[4].mxu0  ;;  %v968_v24 = vpop.f32.mrb[4].mxu1 }
 0x103   : > { %v462_v25 = vpop.f32.mrb[5].mxu0  ;;  %v510_v26 = vpop.f32.mrb[5].mxu1  ;;  %v471_v29 = vadd.f32 %v956_v23, %v1125_v2  ;;  %v519_v30 = vadd.f32 %v968_v24, %v1125_v2 }
 0x104   : > { %v957_v27 = vpop.f32.mrb[6].mxu0  ;;  %v969_v28 = vpop.f32.mrb[6].mxu1  ;;  %v463_v35 = vadd.f32 %v1125_v2, %v462_v25  ;;  %v511_v36 = vadd.f32 %v1125_v2, %v510_v26 }
 0x105   : > { %v474_v31 = vadd.f32 %v957_v27, %v1125_v2  ;;  %v522_v32 = vadd.f32 %v969_v28, %v1125_v2  ;;  %v465_v33 = vpop.f32.mrb[7].mxu0  ;;  %v513_v34 = vpop.f32.mrb[7].mxu1 }
 0x106   : > { %v466_v37 = vadd.f32 %v1125_v2, %v465_v33  ;;  %v514_v38 = vadd.f32 %v1125_v2, %v513_v34 }
 0x107   : > { %v850_v39 = vpack.c.bf16 %v474_v31, %v471_v29  ;;  %v880_v40 = vpack.c.bf16 %v522_v32, %v519_v30 }
 0x108   : > { %v845_v41 = vpack.c.bf16 %v466_v37, %v463_v35  ;;  %v875_v42 = vpack.c.bf16 %v514_v38, %v511_v36 }
 0x109   : > { %905 = vst [vmem:[%s1138_s20 + $0x18] sm:$0xff] %v850_v39   ;;  %911 = vst [vmem:[%s1138_s20 + $0x48] sm:$0xff] %v880_v40  }
 0x10a   : > { %904 = vst [vmem:[%s1138_s20 + $0x10] sm:$0xff] %v845_v41   ;;  %910 = vst [vmem:[%s1138_s20 + $0x40] sm:$0xff] %v875_v42   ;;  %v960_v43 = vpop.f32.mrb[8].mxu0  ;;  %v972_v44 = vpop.f32.mrb[8].mxu1 }
 0x10b   : > { %v478_v45 = vpop.f32.mrb[9].mxu0  ;;  %v526_v46 = vpop.f32.mrb[9].mxu1  ;;  %v487_v49 = vadd.f32 %v960_v43, %v1125_v2  ;;  %v535_v50 = vadd.f32 %v972_v44, %v1125_v2 }
 0x10c   : > { %v961_v47 = vpop.f32.mrb[10].mxu0  ;;  %v973_v48 = vpop.f32.mrb[10].mxu1  ;;  %v479_v55 = vadd.f32 %v1125_v2, %v478_v45  ;;  %v527_v56 = vadd.f32 %v1125_v2, %v526_v46 }
 0x10d   : > { %v490_v51 = vadd.f32 %v961_v47, %v1125_v2  ;;  %v538_v52 = vadd.f32 %v973_v48, %v1125_v2  ;;  %v481_v53 = vpop.f32.mrb[11].mxu0  ;;  %v529_v54 = vpop.f32.mrb[11].mxu1 }
 0x10e   : > { %v482_v57 = vadd.f32 %v1125_v2, %v481_v53  ;;  %v530_v58 = vadd.f32 %v1125_v2, %v529_v54 }
 0x10f   : > { %v860_v59 = vpack.c.bf16 %v490_v51, %v487_v49  ;;  %v890_v60 = vpack.c.bf16 %v538_v52, %v535_v50 }
 0x110   : > { %v855_v61 = vpack.c.bf16 %v482_v57, %v479_v55  ;;  %v885_v62 = vpack.c.bf16 %v530_v58, %v527_v56 }
 0x111   : > { %907 = vst [vmem:[%s1138_s20 + $0x28] sm:$0xff] %v860_v59   ;;  %913 = vst [vmem:[%s1138_s20 + $0x58] sm:$0xff] %v890_v60  }
 0x112   : > { %906 = vst [vmem:[%s1138_s20 + $0x20] sm:$0xff] %v855_v61   ;;  %912 = vst [vmem:[%s1138_s20 + $0x50] sm:$0xff] %v885_v62  }
 0x113 PF: > { %s14_s15 = sadd.s32 1, %s1012_s15  }
 0x114   : > { %p11_p4 = scmp.ge.s32.totalorder %s14_s15, 4  }
 0x116   :  { %13 = sbr.rel (!%p11_p4) target bundleno = 1 (0x1), region = 66 }

// kernel: forward.37
= control target key start
LH: loop header
LB: loop body
LE: loop exit
PB: predicated region body
PF: predicated region fallthrough
CT: control target
= control target key end

     0   :  { %s626_s15 = smov 0   ;;  %s702_s0 = inlined_call_operand.vmem [shape: bf16[96,128], index: 0, kind: input, shape index: {}]   ;;  %s703_s1 = inlined_call_operand.vmem [shape: f32[1,128], index: 1, kind: input, shape index: {}]   ;;  %s704_s2 = inlined_call_operand.vmem [shape: bf16[128,128], index: 2, kind: input, shape index: {}]   ;;  %s705_s3 = inlined_call_operand.vmem [shape: f32[1,128], index: 3, kind: input, shape index: {}]   ;;  %s706_s4 = inlined_call_operand.vmem [shape: bf16[96,128], index: 4, kind: output, shape index: {}]  }
   0x1 LB: > { %s456_s16 = sadd.s32 4294967295, %s597_s15   ;;  %p460_p0 = scmp.ge.s32.totalorder %s597_s15, 1  ;;  %s597_s15 = sphi %s626_s15, %s14_s15  }
   0x2   : > { %p163_p1 = scmp.lt.s32.totalorder %s597_s15, 3 }
   0x4   : > { %p164_p2 = pnand %p460_p0, %p163_p1 }
   0x5   : > { %v583_v0 = vld [vmem:[%s704_s2] sm:$0xff] (!%p164_p2)   ;;  %v599_v1 = vmov (!%p164_p2), 0.0   ;;  %v584_v2 = vld [vmem:[%s704_s2 + $0x8] sm:$0xff] (!%p164_p2)   ;;  %s189_s21 = smul.u32 (!%p164_p2), 6, %s456_s16  ;;  %vm600_vm0 = vmmov (!%p164_p2), 0   ;;  %v585_v3 = vld [vmem:[%s704_s2 + $0x10] sm:$0xff] (!%p164_p2)  }
   0x6   : > { %167 = sbr.rel (%p164_p2) target bundleno = 265 (0x109), region = 36  ;;  %557 = vmatprep.subr.bf16.mxu1 (!%p164_p2), %v599_v1  ;;  %529 = vmatprep.subr.bf16.mxu0 (!%p164_p2), %v599_v1  ;;  %v586_v4 = vld [vmem:[%s704_s2 + $0x18] sm:$0xff] (!%p164_p2)   ;;  %v587_v11 = vld [vmem:[%s704_s2 + $0x20] sm:$0xff] (!%p164_p2)   ;;  %v588_v18 = vld [vmem:[%s704_s2 + $0x28] sm:$0xff] (!%p164_p2)  }
   0x7   : > { %565 = vmatpush3.bf16.msra.mxu1 (!%p164_p2), %v583_v0  ;;  %530 = vmatpush3.bf16.msra.mxu0 (!%p164_p2), %v583_v0  ;;  %p190_p3 = scmp.lt.s32.totalorder (!%p164_p2), %s189_s21, 11  ;;  %v463_v12 = vld [vmem:[%s703_s1] ss:$0 sm:$0xff] (!%p164_p2)  ;;  %v589_v25 = vld [vmem:[%s704_s2 + $0x30] sm:$0xff] (!%p164_p2)   ;;  %v590_v32 = vld [vmem:[%s704_s2 + $0x38] sm:$0xff] (!%p164_p2)  }
   0x8   : > { %558 = vmatprep.subr.bf16.mxu1 (!%p164_p2), %v599_v1  ;;  %531 = vmatprep.subr.bf16.mxu0 (!%p164_p2), %v599_v1  ;;  %v464_v40 = vld [vmem:[%s705_s3] ss:$0 sm:$0xff] (!%p164_p2) }
   0x9   : > { %549 = vmatprep.mubr.msk.bf16.mxu1 (!%p164_p2), %vm600_vm0, %v599_v1  ;;  %545 = vmatprep.mubr.msk.bf16.mxu0 (!%p164_p2), %vm600_vm0, %v599_v1 }
   0xb   : > { %566 = vmatpush3.bf16.msra.mxu1 (!%p164_p2), %v584_v2  ;;  %532 = vmatpush3.bf16.msra.mxu0 (!%p164_p2), %v584_v2 }
   0xc   : > { %559 = vmatprep.subr.bf16.mxu1 (!%p164_p2), %v599_v1  ;;  %533 = vmatprep.subr.bf16.mxu0 (!%p164_p2), %v599_v1 }
   0xd   : > { %s708_s21 = smov (!%p190_p3, %s189_s21), 11 }
   0xe   : > { %s461_s24 = sshll.u32 %s708_s21, 2 }
   0xf   : > { %s193_s27 = scalar_lea.vmem %s702_s0, %s461_s24  ;;  %567 = vmatpush3.bf16.msra.mxu1 %v585_v3  ;;  %534 = vmatpush3.bf16.msra.mxu0 %v585_v3  ;;  %s199_s19 = scalar_lea.vmem %s706_s4, %s461_s24 }
  0x10   : > { %v514_v5 = vld [vmem:[%s193_s27 + $0x8] sm:$0xff]   ;;  %v488_v6 = vld [vmem:[%s193_s27] sm:$0xff]   ;;  %560 = vmatprep.subr.bf16.mxu1 %v599_v1  ;;  %535 = vmatprep.subr.bf16.mxu0 %v599_v1  ;;  %v515_v17 = vld [vmem:[%s193_s27 + $0x10] sm:$0xff]  }
  0x11   : > { %v493_v7 = vunpack.c.l.bf16 %v514_v5  ;;  %v494_v8 = vunpack.c.h.bf16 %v514_v5  ;;  %v489_v9 = vunpack.c.l.bf16 %v488_v6  ;;  %v490_v10 = vunpack.c.h.bf16 %v488_v6 }
  0x12   : > { %v497_v19 = vunpack.c.l.bf16 %v515_v17  ;;  %v498_v20 = vunpack.c.h.bf16 %v515_v17 }
  0x13   : > { %568 = vmatpush3.bf16.msra.mxu1 %v586_v4  ;;  %536 = vmatpush3.bf16.msra.mxu0 %v586_v4  ;;  %v223_v13 = vadd.f32 %v493_v7, %v463_v12  ;;  %v224_v14 = vadd.f32 %v494_v8, %v463_v12  ;;  %v221_v15 = vadd.f32 %v489_v9, %v463_v12 }
  0x14   : > { %561 = vmatprep.subr.bf16.mxu1 %v599_v1  ;;  %537 = vmatprep.subr.bf16.mxu0 %v599_v1  ;;  %v222_v16 = vadd.f32 %v490_v10, %v463_v12  ;;  %v225_v26 = vadd.f32 %v497_v19, %v463_v12  ;;  %v226_v27 = vadd.f32 %v498_v20, %v463_v12 }
  0x15   : > { %v229_v21 = vmax.f32 %v223_v13, 0.0  ;;  %v230_v22 = vmax.f32 %v224_v14, 0.0  ;;  %v227_v23 = vmax.f32 %v221_v15, 0.0 }
  0x16   : > { %v228_v24 = vmax.f32 %v222_v16, 0.0  ;;  %v231_v35 = vmax.f32 %v225_v26, 0.0  ;;  %v232_v36 = vmax.f32 %v226_v27, 0.0 }
  0x17   : > { %569 = vmatpush3.bf16.msra.mxu1 %v587_v11  ;;  %538 = vmatpush3.bf16.msra.mxu0 %v587_v11  ;;  %v235_v28 = vmin.f32 %v229_v21, 6.0  ;;  %v236_v29 = vmin.f32 %v230_v22, 6.0  ;;  %v233_v30 = vmin.f32 %v227_v23, 6.0 }
  0x18   : > { %562 = vmatprep.subr.bf16.mxu1 %v599_v1  ;;  %539 = vmatprep.subr.bf16.mxu0 %v599_v1  ;;  %v234_v31 = vmin.f32 %v228_v24, 6.0  ;;  %v237_v37 = vmin.f32 %v231_v35, 6.0  ;;  %v238_v38 = vmin.f32 %v232_v36, 6.0 }
  0x19   : > { %v240_v33 = vpack.c.bf16 %v236_v29, %v235_v28 }
  0x1a   : > { %v239_v34 = vpack.c.bf16 %v234_v31, %v233_v30  ;;  %v241_v39 = vpack.c.bf16 %v238_v38, %v237_v37 }
  0x1b   : > { %570 = vmatpush3.bf16.msra.mxu1 %v588_v18  ;;  %540 = vmatpush3.bf16.msra.mxu0 %v588_v18 }
  0x1c   : > { %563 = vmatprep.subr.bf16.mxu1 %v599_v1  ;;  %541 = vmatprep.subr.bf16.mxu0 %v599_v1 }
  0x1f   : > { %571 = vmatpush3.bf16.msra.mxu1 %v589_v25  ;;  %542 = vmatpush3.bf16.msra.mxu0 %v589_v25 }
  0x20   : > { %564 = vmatprep.subr.bf16.mxu1 %v599_v1  ;;  %543 = vmatprep.subr.bf16.mxu0 %v599_v1 }
  0x23   : > { %572 = vmatpush3.bf16.msra.mxu1 %v590_v32  ;;  %544 = vmatpush3.bf16.msra.mxu0 %v590_v32 }
  0x26   : > { %550 = vmatmul.mubr.bf16.vlgmr.msra.gmra.mrb[0].mxu1 %v240_v33  ;;  %546 = vmatmul.mubr.bf16.vlgmr.msra.gmra.mrb[0].mxu0 %v239_v34 }
  0x27   : > { %553 = vmatprep.mubr.msk.bf16.mxu1 %vm600_vm0, %v599_v1 }
  0x2e   : > { %554 = vmatmul.mubr.bf16.gmra.mrb[4].mxu1 %v241_v39 }
  0xf9   : > { %v355_v41 = vpop.f32.mrb[0].mxu1  ;;  %v347_v42 = vpop.f32.mrb[0].mxu0 }
  0xfa   : > { %v551_v43 = vpop.f32.mrb[1].mxu1  ;;  %v348_v44 = vadd.f32 %v464_v40, %v347_v42  ;;  %v547_v45 = vpop.f32.mrb[1].mxu0  ;;  %v356_v48 = vadd.f32 %v464_v40, %v355_v41 }
  0xfb   : > { %v358_v46 = vpop.f32.mrb[2].mxu1  ;;  %v350_v47 = vpop.f32.mrb[2].mxu0 }
  0xfc   : > { %v359_v49 = vadd.f32 %v464_v40, %v358_v46  ;;  %v552_v50 = vpop.f32.mrb[3].mxu1  ;;  %v351_v51 = vadd.f32 %v464_v40, %v350_v47  ;;  %v548_v52 = vpop.f32.mrb[3].mxu0 }
  0xfe   : > { %v507_v53 = vpack.c.bf16 %v359_v49, %v356_v48  ;;  %v502_v54 = vpack.c.bf16 %v351_v51, %v348_v44 }
 0x100   : > { %516 = vst [vmem:[%s199_s19 + $0x8] sm:$0xff] %v507_v53   ;;  %503 = vst [vmem:[%s199_s19] sm:$0xff] %v502_v54  }
 0x101   : > { %v363_v55 = vpop.f32.mrb[4].mxu1 }
 0x102   : > { %v555_v56 = vpop.f32.mrb[5].mxu1  ;;  %v364_v58 = vadd.f32 %v464_v40, %v363_v55 }
 0x103   : > { %v366_v57 = vpop.f32.mrb[6].mxu1 }
 0x104   : > { %v367_v59 = vadd.f32 %v464_v40, %v366_v57  ;;  %v556_v60 = vpop.f32.mrb[7].mxu1 }
 0x106   : > { %v512_v61 = vpack.c.bf16 %v367_v59, %v364_v58 }
 0x108   : > { %517 = vst [vmem:[%s199_s19 + $0x10] sm:$0xff] %v512_v61  }
 0x109 PF: > { %s14_s15 = sadd.s32 1, %s597_s15  }
 0x10a   : > { %p11_p4 = scmp.ge.s32.totalorder %s14_s15, 4  }
 0x10c   :  { %13 = sbr.rel (!%p11_p4) target bundleno = 1 (0x1), region = 66 }

// kernel: forward.38
= control target key start
LH: loop header
LB: loop body
LE: loop exit
PB: predicated region body
PF: predicated region fallthrough
CT: control target
= control target key end

     0   :  { %s619_s12 = smov 0   ;;  %s704_s0 = inlined_call_operand.vmem [shape: bf16[96,128], index: 0, kind: input, shape index: {}]   ;;  %s705_s1 = inlined_call_operand.vmem [shape: bf16[128,256], index: 1, kind: input, shape index: {}]   ;;  %s706_s2 = inlined_call_operand.vmem [shape: f32[1,256], index: 2, kind: input, shape index: {}]   ;;  %s707_s3 = inlined_call_operand.vmem [shape: bf16[96,256], index: 3, kind: output, shape index: {}]  }
   0x1 LB: > { %s496_s13 = sadd.s32 4294967295, %s596_s12   ;;  %p500_p0 = scmp.ge.s32.totalorder %s596_s12, 1  ;;  %s596_s12 = sphi %s619_s12, %s13_s12  }
   0x2   : > { %p138_p1 = scmp.lt.s32.totalorder %s596_s12, 3 }
   0x4   : > { %p139_p2 = pnand %p500_p0, %p138_p1 }
   0x5   : > { %v563_v0 = vld [vmem:[%s705_s1 + $0x4] ss:$8 sps:$4 sm:$0xff] (!%p139_p2)   ;;  %s163_s16 = smul.u32 (!%p139_p2), 6, %s496_s13  ;;  %v565_v1 = vld [vmem:[%s705_s1] ss:$8 sps:$4 sm:$0xff] (!%p139_p2)   ;;  %v598_v2 = vmov (!%p139_p2), 0   ;;  %v201_v20 = vlaneseq (!%p139_p2) }
   0x6   : > { %142 = sbr.rel (%p139_p2) target bundleno = 271 (0x10f), region = 32  ;;  %351 = vmatprep.mubr.bf16.mxu1 (!%p139_p2), %v598_v2  ;;  %341 = vmatprep.mubr.bf16.mxu0 (!%p139_p2), %v598_v2  ;;  %v566_v3 = vld [vmem:[%s705_s1 + $0x14] ss:$8 sps:$4 sm:$0xff] (!%p139_p2)   ;;  %v568_v4 = vld [vmem:[%s705_s1 + $0x10] ss:$8 sps:$4 sm:$0xff] (!%p139_p2)  }
   0x7   : > { %538 = vmatprep.subr.bf16.mxu1 (!%p139_p2), %v563_v0  ;;  %309 = vmatprep.subr.bf16.mxu0 (!%p139_p2), %v563_v0  ;;  %p164_p3 = scmp.lt.s32.totalorder (!%p139_p2), %s163_s16, 11  ;;  %v569_v5 = vld [vmem:[%s705_s1 + $0x24] ss:$8 sps:$4 sm:$0xff] (!%p139_p2)   ;;  %v571_v6 = vld [vmem:[%s705_s1 + $0x20] ss:$8 sps:$4 sm:$0xff] (!%p139_p2)   ;;  %v202_v21 = vshrl.u32 (!%p139_p2), %v201_v20, 7 }
   0x8   : > { %546 = vmatpush1.bf16.msra.mxu1 (!%p139_p2), %v565_v1  ;;  %310 = vmatpush1.bf16.msra.mxu0 (!%p139_p2), %v565_v1  ;;  %v572_v7 = vld [vmem:[%s705_s1 + $0x34] ss:$8 sps:$4 sm:$0xff] (!%p139_p2)   ;;  %v574_v8 = vld [vmem:[%s705_s1 + $0x30] ss:$8 sps:$4 sm:$0xff] (!%p139_p2)   ;;  %v575_v9 = vld [vmem:[%s705_s1 + $0x44] ss:$8 sps:$4 sm:$0xff] (!%p139_p2)  }
   0x9   : > { %539 = vmatprep.subr.bf16.mxu1 (!%p139_p2), %v566_v3  ;;  %311 = vmatprep.subr.bf16.mxu0 (!%p139_p2), %v566_v3  ;;  %v577_v10 = vld [vmem:[%s705_s1 + $0x40] ss:$8 sps:$4 sm:$0xff] (!%p139_p2)   ;;  %v578_v11 = vld [vmem:[%s705_s1 + $0x54] ss:$8 sps:$4 sm:$0xff] (!%p139_p2)   ;;  %v580_v12 = vld [vmem:[%s705_s1 + $0x50] ss:$8 sps:$4 sm:$0xff] (!%p139_p2)  }
   0xa   : > { %v581_v13 = vld [vmem:[%s705_s1 + $0x64] ss:$8 sps:$4 sm:$0xff] (!%p139_p2)   ;;  %v583_v14 = vld [vmem:[%s705_s1 + $0x60] ss:$8 sps:$4 sm:$0xff] (!%p139_p2)   ;;  %v584_v15 = vld [vmem:[%s705_s1 + $0x74] ss:$8 sps:$4 sm:$0xff] (!%p139_p2)  }
   0xb   : > { %v586_v16 = vld [vmem:[%s705_s1 + $0x70] ss:$8 sps:$4 sm:$0xff] (!%p139_p2)   ;;  %v203_v22 = vsub.s32 (!%p139_p2), 0, %v202_v21  ;;  %v199_v23 = vld [vmem:[%s706_s2] sm:$0x3] (!%p139_p2)  ;;  %v207_v24 = vsub.s32 (!%p139_p2), 1, %v202_v21 }
   0xc   : > { %547 = vmatpush1.bf16.msra.mxu1 (!%p139_p2), %v568_v4  ;;  %312 = vmatpush1.bf16.msra.mxu0 (!%p139_p2), %v568_v4 }
   0xd   : > { %s709_s16 = smov (!%p164_p3, %s163_s16), 11  ;;  %540 = vmatprep.subr.bf16.mxu1 %v569_v5  ;;  %313 = vmatprep.subr.bf16.mxu0 %v569_v5  ;;  %v204_v25 = vrot.slane %v199_v23, %v203_v22  ;;  %v208_v26 = vrot.slane %v199_v23, %v207_v24 }
   0xe   : > { %s501_s25 = sshll.u32 %s709_s16, 2  ;;  %s531_s28 = sshll.u32 %s709_s16, 3 }
   0xf   : > { %s654_s5 = scalar_lea.vmem %s704_s0, %s501_s25  ;;  %s693_s4 = scalar_lea.vmem %s707_s3, %s531_s28 }
  0x10   : > { %548 = vmatpush1.bf16.msra.mxu1 %v571_v6  ;;  %314 = vmatpush1.bf16.msra.mxu0 %v571_v6  ;;  %v587_v17 = vld [vmem:[%s654_s5 + $0x8] sm:$0xff]   ;;  %v588_v18 = vld [vmem:[%s654_s5] sm:$0xff]   ;;  %v589_v19 = vld [vmem:[%s654_s5 + $0x10] sm:$0xff]  }
  0x11   : > { %541 = vmatprep.subr.bf16.mxu1 %v572_v7  ;;  %315 = vmatprep.subr.bf16.mxu0 %v572_v7 }
  0x14   : > { %549 = vmatpush1.bf16.msra.mxu1 %v574_v8  ;;  %316 = vmatpush1.bf16.msra.mxu0 %v574_v8 }
  0x15   : > { %542 = vmatprep.subr.bf16.mxu1 %v575_v9  ;;  %317 = vmatprep.subr.bf16.mxu0 %v575_v9 }
  0x18   : > { %550 = vmatpush1.bf16.msra.mxu1 %v577_v10  ;;  %318 = vmatpush1.bf16.msra.mxu0 %v577_v10 }
  0x19   : > { %543 = vmatprep.subr.bf16.mxu1 %v578_v11  ;;  %319 = vmatprep.subr.bf16.mxu0 %v578_v11 }
  0x1c   : > { %551 = vmatpush1.bf16.msra.mxu1 %v580_v12  ;;  %320 = vmatpush1.bf16.msra.mxu0 %v580_v12 }
  0x1d   : > { %544 = vmatprep.subr.bf16.mxu1 %v581_v13  ;;  %321 = vmatprep.subr.bf16.mxu0 %v581_v13 }
  0x20   : > { %552 = vmatpush1.bf16.msra.mxu1 %v583_v14  ;;  %322 = vmatpush1.bf16.msra.mxu0 %v583_v14 }
  0x21   : > { %545 = vmatprep.subr.bf16.mxu1 %v584_v15  ;;  %323 = vmatprep.subr.bf16.mxu0 %v584_v15 }
  0x24   : > { %553 = vmatpush1.bf16.msra.mxu1 %v586_v16  ;;  %324 = vmatpush1.bf16.msra.mxu0 %v586_v16 }
  0x27   : > { %352 = vmatmul.mubr.bf16.vlgmr.msra.gmra.mrb[0].mxu1 %v587_v17  ;;  %342 = vmatmul.mubr.bf16.vlgmr.msra.gmra.mrb[0].mxu0 %v588_v18 }
  0x28   : > { %361 = vmatprep.mubr.bf16.mxu1 %v598_v2 }
  0x2f   : > { %362 = vmatmul.mubr.bf16.gmra.mrb[4].mxu1 %v589_v19 }
  0xfa   : > { %v353_v27 = vpop.f32.mrb[0].mxu1  ;;  %v343_v28 = vpop.f32.mrb[0].mxu0 }
  0xfb   : > { %v354_v29 = vadd.f32 %v353_v27, %v204_v25  ;;  %v355_v30 = vpop.f32.mrb[1].mxu1  ;;  %v344_v31 = vadd.f32 %v343_v28, %v204_v25  ;;  %v345_v32 = vpop.f32.mrb[1].mxu0 }
  0xfc   : > { %v356_v33 = vadd.f32 %v355_v30, %v208_v26  ;;  %v357_v34 = vpop.f32.mrb[2].mxu1  ;;  %v346_v35 = vadd.f32 %v345_v32, %v208_v26  ;;  %v347_v36 = vpop.f32.mrb[2].mxu0 }
  0xfd   : > { %v376_v37 = vmax.f32 %v354_v29, 0.0  ;;  %v358_v38 = vadd.f32 %v357_v34, %v204_v25  ;;  %v359_v39 = vpop.f32.mrb[3].mxu1  ;;  %v372_v40 = vmax.f32 %v344_v31, 0.0  ;;  %v348_v41 = vadd.f32 %v347_v36, %v204_v25  ;;  %v349_v42 = vpop.f32.mrb[3].mxu0 }
  0xfe   : > { %v377_v43 = vmax.f32 %v356_v33, 0.0  ;;  %v360_v44 = vadd.f32 %v359_v39, %v208_v26  ;;  %v373_v45 = vmax.f32 %v346_v35, 0.0  ;;  %v350_v46 = vadd.f32 %v349_v42, %v208_v26 }
  0xff   : > { %v388_v47 = vmin.f32 %v376_v37, 6.0  ;;  %v378_v48 = vmax.f32 %v358_v38, 0.0  ;;  %v384_v49 = vmin.f32 %v372_v40, 6.0  ;;  %v374_v50 = vmax.f32 %v348_v41, 0.0 }
 0x100   : > { %v389_v51 = vmin.f32 %v377_v43, 6.0  ;;  %v379_v52 = vmax.f32 %v360_v44, 0.0  ;;  %v385_v53 = vmin.f32 %v373_v45, 6.0  ;;  %v375_v54 = vmax.f32 %v350_v46, 0.0 }
 0x101   : > { %v390_v55 = vmin.f32 %v378_v48, 6.0  ;;  %v386_v56 = vmin.f32 %v374_v50, 6.0 }
 0x102   : > { %v534_v57 = vpack.c.bf16 %v389_v51, %v388_v47  ;;  %v391_v58 = vmin.f32 %v379_v52, 6.0  ;;  %v532_v59 = vpack.c.bf16 %v385_v53, %v384_v49  ;;  %v387_v60 = vmin.f32 %v375_v54, 6.0  ;;  %v363_v61 = vpop.f32.mrb[4].mxu1 }
 0x103   : > { %v364_v62 = vadd.f32 %v363_v61, %v204_v25  ;;  %v365_v63 = vpop.f32.mrb[5].mxu1 }
 0x104   : > { %434 = vst [vmem:[%s693_s4 + $0x10] sm:$0xff] %v534_v57  ;;  %v535_v0 = vpack.c.bf16 %v391_v58, %v390_v55  ;;  %432 = vst [vmem:[%s693_s4] sm:$0xff] %v532_v59  ;;  %v533_v1 = vpack.c.bf16 %v387_v60, %v386_v56  ;;  %v366_v2 = vadd.f32 %v365_v63, %v208_v26  ;;  %v367_v3 = vpop.f32.mrb[6].mxu1 }
 0x105   : > { %v380_v4 = vmax.f32 %v364_v62, 0.0  ;;  %v368_v5 = vadd.f32 %v367_v3, %v204_v25  ;;  %v369_v6 = vpop.f32.mrb[7].mxu1 }
 0x106   : > { %435 = vst [vmem:[%s693_s4 + $0x18] sm:$0xff] %v535_v0  ;;  %433 = vst [vmem:[%s693_s4 + $0x8] sm:$0xff] %v533_v1  ;;  %v381_v7 = vmax.f32 %v366_v2, 0.0  ;;  %v370_v8 = vadd.f32 %v369_v6, %v208_v26 }
 0x107   : > { %v392_v9 = vmin.f32 %v380_v4, 6.0  ;;  %v382_v10 = vmax.f32 %v368_v5, 0.0 }
 0x108   : > { %v393_v11 = vmin.f32 %v381_v7, 6.0  ;;  %v383_v12 = vmax.f32 %v370_v8, 0.0 }
 0x109   : > { %v394_v13 = vmin.f32 %v382_v10, 6.0 }
 0x10a   : > { %v536_v14 = vpack.c.bf16 %v393_v11, %v392_v9  ;;  %v395_v15 = vmin.f32 %v383_v12, 6.0 }
 0x10c   : > { %436 = vst [vmem:[%s693_s4 + $0x20] sm:$0xff] %v536_v14  ;;  %v537_v16 = vpack.c.bf16 %v395_v15, %v394_v13 }
 0x10e   : > { %437 = vst [vmem:[%s693_s4 + $0x28] sm:$0xff] %v537_v16 }
 0x10f PF: > { %s13_s12 = sadd.s32 1, %s596_s12  }
 0x110   : > { %p10_p4 = scmp.ge.s32.totalorder %s13_s12, 4  }
 0x112   :  { %12 = sbr.rel (!%p10_p4) target bundleno = 1 (0x1), region = 62 }

// kernel: forward.41
= control target key start
LH: loop header
LB: loop body
LE: loop exit
PB: predicated region body
PF: predicated region fallthrough
CT: control target
= control target key end

     0   :  { %v29_v5 = vlaneseq  ;;  %s446_s2 = inlined_call_operand.vmem [shape: bf16[256,128], index: 2, kind: input, shape index: {}]   ;;  %s447_s0 = inlined_call_operand.vmem [shape: bf16[24,256], index: 0, kind: input, shape index: {}]   ;;  %s448_s1 = inlined_call_operand.vmem [shape: f32[1,256], index: 1, kind: input, shape index: {}]   ;;  %s449_s3 = inlined_call_operand.vmem [shape: f32[1,128], index: 3, kind: input, shape index: {}]   ;;  %s450_s4 = inlined_call_operand.vmem [shape: bf16[24,128], index: 4, kind: output, shape index: {}]  }
   0x1   :  { %v336_v0 = vld [vmem:[%s446_s2 + $0x40] sm:$0xff]   ;;  %v338_v2 = vld [vmem:[%s446_s2 + $0x48] sm:$0xff]   ;;  %v340_v4 = vld [vmem:[%s446_s2 + $0x50] sm:$0xff]  }
   0x2   :  { %v337_v1 = vld [vmem:[%s446_s2] sm:$0xff]   ;;  %292 = vmatprep.subr.bf16.mxu0 %v336_v0  ;;  %320 = vmatprep.subr.bf16.mxu1 %v336_v0  ;;  %v339_v3 = vld [vmem:[%s446_s2 + $0x8] sm:$0xff]   ;;  %v341_v6 = vld [vmem:[%s446_s2 + $0x10] sm:$0xff]   ;;  %v30_v8 = vshrl.u32 %v29_v5, 7 }
   0x3   :  { %293 = vmatpush3.bf16.msra.mxu0 %v337_v1  ;;  %328 = vmatpush3.bf16.msra.mxu1 %v337_v1  ;;  %v342_v7 = vld [vmem:[%s446_s2 + $0x58] sm:$0xff]   ;;  %v344_v10 = vld [vmem:[%s446_s2 + $0x60] sm:$0xff]   ;;  %v346_v14 = vld [vmem:[%s446_s2 + $0x68] sm:$0xff]  }
   0x4   :  { %294 = vmatprep.subr.bf16.mxu0 %v338_v2  ;;  %321 = vmatprep.subr.bf16.mxu1 %v338_v2  ;;  %v343_v9 = vld [vmem:[%s446_s2 + $0x18] sm:$0xff]   ;;  %v31_v11 = vsub.s32 0, %v30_v8  ;;  %v345_v12 = vld [vmem:[%s446_s2 + $0x20] sm:$0xff]   ;;  %v35_v13 = vsub.s32 1, %v30_v8  ;;  %v19_v16 = vld [vmem:[%s447_s0 + $0x8] sm:$0xff] }
   0x5   :  { %v18_v15 = vld [vmem:[%s447_s0] sm:$0xff]  ;;  %v23_v20 = vunpack.c.l.bf16 %v19_v16  ;;  %v24_v21 = vunpack.c.h.bf16 %v19_v16  ;;  %v20_v22 = vld [vmem:[%s447_s0 + $0x10] sm:$0xff]  ;;  %v347_v27 = vld [vmem:[%s446_s2 + $0x28] sm:$0xff]  }
   0x6   :  { %v27_v17 = vld [vmem:[%s448_s1] sm:$0x3]  ;;  %v21_v18 = vunpack.c.l.bf16 %v18_v15  ;;  %v22_v19 = vunpack.c.h.bf16 %v18_v15  ;;  %v25_v25 = vunpack.c.l.bf16 %v20_v22  ;;  %v26_v26 = vunpack.c.h.bf16 %v20_v22  ;;  %v348_v28 = vld [vmem:[%s446_s2 + $0x70] sm:$0xff]   ;;  %v350_v42 = vld [vmem:[%s446_s2 + $0x78] sm:$0xff]  }
   0x7   :  { %295 = vmatpush3.bf16.msra.mxu0 %v339_v3  ;;  %329 = vmatpush3.bf16.msra.mxu1 %v339_v3  ;;  %v32_v23 = vrot.slane %v27_v17, %v31_v11  ;;  %v36_v24 = vrot.slane %v27_v17, %v35_v13  ;;  %v349_v38 = vld [vmem:[%s446_s2 + $0x30] sm:$0xff]   ;;  %v351_v51 = vld [vmem:[%s446_s2 + $0x38] sm:$0xff]   ;;  %v264_v56 = vld [vmem:[%s449_s3] ss:$0 sm:$0xff] }
   0x8   :  { %296 = vmatprep.subr.bf16.mxu0 %v340_v4  ;;  %322 = vmatprep.subr.bf16.mxu1 %v340_v4 }
   0x9   :  { %v40_v29 = vadd.f32 %v36_v24, %v22_v19  ;;  %v42_v30 = vadd.f32 %v36_v24, %v24_v21  ;;  %v44_v31 = vadd.f32 %v36_v24, %v26_v26  ;;  %v39_v32 = vadd.f32 %v32_v23, %v21_v18 }
   0xa   :  { %v41_v33 = vadd.f32 %v32_v23, %v23_v20  ;;  %v43_v34 = vadd.f32 %v32_v23, %v25_v25 }
   0xb   :  { %297 = vmatpush3.bf16.msra.mxu0 %v341_v6  ;;  %330 = vmatpush3.bf16.msra.mxu1 %v341_v6  ;;  %v46_v35 = vmax.f32 %v40_v29, 0.0  ;;  %v48_v36 = vmax.f32 %v42_v30, 0.0  ;;  %v50_v37 = vmax.f32 %v44_v31, 0.0  ;;  %v45_v39 = vmax.f32 %v39_v32, 0.0 }
   0xc   :  { %298 = vmatprep.subr.bf16.mxu0 %v342_v7  ;;  %323 = vmatprep.subr.bf16.mxu1 %v342_v7  ;;  %v47_v40 = vmax.f32 %v41_v33, 0.0  ;;  %v49_v41 = vmax.f32 %v43_v34, 0.0 }
   0xd   :  { %v52_v43 = vmin.f32 %v46_v35, 6.0  ;;  %v54_v44 = vmin.f32 %v48_v36, 6.0  ;;  %v56_v45 = vmin.f32 %v50_v37, 6.0  ;;  %v51_v46 = vmin.f32 %v45_v39, 6.0 }
   0xe   :  { %v53_v49 = vmin.f32 %v47_v40, 6.0  ;;  %v55_v50 = vmin.f32 %v49_v41, 6.0 }
   0xf   :  { %299 = vmatpush3.bf16.msra.mxu0 %v343_v9  ;;  %331 = vmatpush3.bf16.msra.mxu1 %v343_v9  ;;  %v58_v47 = vpack.c.bf16 %v54_v44, %v52_v43  ;;  %v60_v48 = vpack.c.bf16 %v56_v45, %v56_v45 }
  0x10   :  { %300 = vmatprep.subr.bf16.mxu0 %v344_v10  ;;  %324 = vmatprep.subr.bf16.mxu1 %v344_v10  ;;  %v57_v52 = vpack.c.bf16 %v53_v49, %v51_v46  ;;  %v59_v53 = vpack.c.bf16 %v55_v50, %v55_v50 }
  0x11   :  { %228 = vmatprep.mubr.bf16.mxu0 %v58_v47  ;;  %236 = vmatprep.mubr.bf16.mxu1 %v60_v48 }
  0x13   :  { %301 = vmatpush3.bf16.msra.mxu0 %v345_v12  ;;  %332 = vmatpush3.bf16.msra.mxu1 %v345_v12 }
  0x14   :  { %302 = vmatprep.subr.bf16.mxu0 %v346_v14  ;;  %325 = vmatprep.subr.bf16.mxu1 %v346_v14 }
  0x17   :  { %303 = vmatpush3.bf16.msra.mxu0 %v347_v27  ;;  %333 = vmatpush3.bf16.msra.mxu1 %v347_v27 }
  0x18   :  { %304 = vmatprep.subr.bf16.mxu0 %v348_v28  ;;  %326 = vmatprep.subr.bf16.mxu1 %v348_v28 }
  0x1b   :  { %305 = vmatpush3.bf16.msra.mxu0 %v349_v38  ;;  %334 = vmatpush3.bf16.msra.mxu1 %v349_v38 }
  0x1c   :  { %306 = vmatprep.subr.bf16.mxu0 %v350_v42  ;;  %327 = vmatprep.subr.bf16.mxu1 %v350_v42 }
  0x1f   :  { %307 = vmatpush3.bf16.msra.mxu0 %v351_v51  ;;  %335 = vmatpush3.bf16.msra.mxu1 %v351_v51 }
  0x22   :  { %229 = vmatmul.mubr.bf16.vlgmr.msra.gmra.mrb[0].mxu0 %v57_v52  ;;  %237 = vmatmul.mubr.bf16.vlgmr.msra.gmra.mrb[0].mxu1 %v59_v53 }
  0xf5   :  { %v308_v54 = vpop.f32.mrb[0].mxu0  ;;  %v314_v55 = vpop.f32.mrb[0].mxu1 }
  0xf6   :  { %v309_v57 = vpop.f32.mrb[1].mxu0  ;;  %v315_v58 = vpop.f32.mrb[1].mxu1 }
  0xf7   :  { %v310_v59 = vadd.f32 %v309_v57, %v308_v54  ;;  %v316_v60 = vadd.f32 %v315_v58, %v314_v55  ;;  %v311_v61 = vpop.f32.mrb[2].mxu0  ;;  %v317_v62 = vpop.f32.mrb[2].mxu1 }
  0xf8   :  { %v312_v63 = vpop.f32.mrb[3].mxu0  ;;  %v318_v0 = vpop.f32.mrb[3].mxu1 }
  0xf9   :  { %v239_v1 = vadd.f32 %v316_v60, %v264_v56  ;;  %v313_v2 = vadd.f32 %v312_v63, %v311_v61  ;;  %v231_v3 = vadd.f32 %v310_v59, %v264_v56 }
  0xfb   :  { %v286_v4 = vpack.c.bf16 %v239_v1, %v239_v1  ;;  %v234_v5 = vadd.f32 %v313_v2, %v264_v56 }
  0xfd   :  { %259 = vst [vmem:[%s450_s4 + $0x8] sm:$0xf] %v286_v4  ;;  %v290_v6 = vpack.c.bf16 %v234_v5, %v231_v3 }
  0xff   :  { %291 = vst [vmem:[%s450_s4] sm:$0xff] %v290_v6  }

// kernel: forward.39
= control target key start
LH: loop header
LB: loop body
LE: loop exit
PB: predicated region body
PF: predicated region fallthrough
CT: control target
= control target key end

     0   :  { %s818_s18 = smov 0   ;;  %s905_s0 = inlined_call_operand.vmem [shape: bf16[96,256], index: 0, kind: input, shape index: {}]   ;;  %s906_s1 = inlined_call_operand.vmem [shape: f32[1,256], index: 1, kind: input, shape index: {}]   ;;  %s907_s2 = inlined_call_operand.vmem [shape: bf16[96,128], index: 2, kind: input, shape index: {}]   ;;  %s908_s3 = inlined_call_operand.vmem [shape: bf16[256,128], index: 3, kind: input, shape index: {}]   ;;  %s909_s4 = inlined_call_operand.vmem [shape: f32[1,128], index: 4, kind: input, shape index: {}]   ;;  %s910_s5 = inlined_call_operand.vmem [shape: bf16[96,128], index: 5, kind: output, shape index: {}]  }
   0x1 LB: > { %s634_s19 = sadd.s32 4294967295, %s786_s18   ;;  %p638_p0 = scmp.ge.s32.totalorder %s786_s18, 1  ;;  %s786_s18 = sphi %s818_s18, %s15_s18  }
   0x2   : > { %p200_p1 = scmp.lt.s32.totalorder %s786_s18, 3 }
   0x4   : > { %p201_p2 = pnand %p638_p0, %p200_p1 }
   0x5   : > { %v764_v0 = vld [vmem:[%s908_s3 + $0x40] sm:$0xff] (!%p201_p2)   ;;  %s234_s22 = smul.u32 (!%p201_p2), 6, %s634_s19  ;;  %v766_v2 = vld [vmem:[%s908_s3 + $0x48] sm:$0xff] (!%p201_p2)   ;;  %v768_v4 = vld [vmem:[%s908_s3 + $0x50] sm:$0xff] (!%p201_p2)   ;;  %v274_v5 = vlaneseq (!%p201_p2) }
   0x6   : > { %204 = sbr.rel (%p201_p2) target bundleno = 270 (0x10e), region = 40  ;;  %v765_v1 = vld [vmem:[%s908_s3] sm:$0xff] (!%p201_p2)   ;;  %740 = vmatprep.subr.bf16.mxu1 (!%p201_p2), %v764_v0  ;;  %706 = vmatprep.subr.bf16.mxu0 (!%p201_p2), %v764_v0  ;;  %v767_v3 = vld [vmem:[%s908_s3 + $0x8] sm:$0xff] (!%p201_p2)   ;;  %v769_v6 = vld [vmem:[%s908_s3 + $0x10] sm:$0xff] (!%p201_p2)  }
   0x7   : > { %p235_p3 = scmp.lt.s32.totalorder (!%p201_p2), %s234_s22, 11  ;;  %748 = vmatpush3.bf16.msra.mxu1 (!%p201_p2), %v765_v1  ;;  %707 = vmatpush3.bf16.msra.mxu0 (!%p201_p2), %v765_v1  ;;  %v770_v7 = vld [vmem:[%s908_s3 + $0x58] sm:$0xff] (!%p201_p2)   ;;  %v275_v8 = vshrl.u32 (!%p201_p2), %v274_v5, 7  ;;  %v772_v10 = vld [vmem:[%s908_s3 + $0x60] sm:$0xff] (!%p201_p2)   ;;  %v774_v14 = vld [vmem:[%s908_s3 + $0x68] sm:$0xff] (!%p201_p2)  }
   0x8   : > { %741 = vmatprep.subr.bf16.mxu1 (!%p201_p2), %v766_v2  ;;  %708 = vmatprep.subr.bf16.mxu0 (!%p201_p2), %v766_v2  ;;  %v771_v9 = vld [vmem:[%s908_s3 + $0x18] sm:$0xff] (!%p201_p2)   ;;  %v773_v12 = vld [vmem:[%s908_s3 + $0x20] sm:$0xff] (!%p201_p2)   ;;  %v775_v30 = vld [vmem:[%s908_s3 + $0x28] sm:$0xff] (!%p201_p2)  }
   0x9   : > { %v276_v11 = vsub.s32 (!%p201_p2), 0, %v275_v8  ;;  %v280_v13 = vsub.s32 (!%p201_p2), 1, %v275_v8  ;;  %v272_v17 = vld [vmem:[%s906_s1] sm:$0x3] (!%p201_p2)  ;;  %v776_v35 = vld [vmem:[%s908_s3 + $0x70] sm:$0xff] (!%p201_p2)   ;;  %v778_v53 = vld [vmem:[%s908_s3 + $0x78] sm:$0xff] (!%p201_p2)  }
   0xa   : > { %v777_v48 = vld [vmem:[%s908_s3 + $0x30] sm:$0xff] (!%p201_p2)   ;;  %v779_v2 = vld [vmem:[%s908_s3 + $0x38] sm:$0xff] (!%p201_p2)  }
   0xb   : > { %749 = vmatpush3.bf16.msra.mxu1 (!%p201_p2), %v767_v3  ;;  %709 = vmatpush3.bf16.msra.mxu0 (!%p201_p2), %v767_v3  ;;  %v277_v25 = vrot.slane (!%p201_p2), %v272_v17, %v276_v11  ;;  %v281_v26 = vrot.slane (!%p201_p2), %v272_v17, %v280_v13 }
   0xc   : > { %742 = vmatprep.subr.bf16.mxu1 (!%p201_p2), %v768_v4  ;;  %710 = vmatprep.subr.bf16.mxu0 (!%p201_p2), %v768_v4 }
   0xd   : > { %s912_s22 = smov (!%p235_p3, %s234_s22), 11 }
   0xe   : > { %s668_s10 = sshll.u32 %s912_s22, 3  ;;  %s641_s11 = sshll.u32 %s912_s22, 2 }
   0xf   : > { %750 = vmatpush3.bf16.msra.mxu1 %v769_v6  ;;  %711 = vmatpush3.bf16.msra.mxu0 %v769_v6  ;;  %s239_s17 = scalar_lea.vmem %s905_s0, %s668_s10  ;;  %s889_s14 = scalar_lea.vmem %s907_s2, %s641_s11 }
  0x10   : > { %743 = vmatprep.subr.bf16.mxu1 %v770_v7  ;;  %712 = vmatprep.subr.bf16.mxu0 %v770_v7  ;;  %v256_v15 = vld [vmem:[%s239_s17 + $0x10] sm:$0xff]  ;;  %v257_v16 = vld [vmem:[%s239_s17 + $0x18] sm:$0xff]  ;;  %v254_v22 = vld [vmem:[%s239_s17] sm:$0xff]  ;;  %s251_s20 = scalar_lea.vmem %s910_s5, %s641_s11 }
  0x11   : > { %v264_v18 = vunpack.c.l.bf16 %v256_v15  ;;  %v265_v19 = vunpack.c.h.bf16 %v256_v15  ;;  %v266_v20 = vunpack.c.l.bf16 %v257_v16  ;;  %v267_v21 = vunpack.c.h.bf16 %v257_v16  ;;  %v255_v23 = vld [vmem:[%s239_s17 + $0x8] sm:$0xff]  ;;  %v258_v24 = vld [vmem:[%s239_s17 + $0x20] sm:$0xff] }
  0x12   : > { %v260_v27 = vunpack.c.l.bf16 %v254_v22  ;;  %v261_v28 = vunpack.c.h.bf16 %v254_v22  ;;  %v259_v29 = vld [vmem:[%s239_s17 + $0x28] sm:$0xff]  ;;  %v262_v31 = vunpack.c.l.bf16 %v255_v23  ;;  %v263_v32 = vunpack.c.h.bf16 %v255_v23  ;;  %v643_v23 = vld [vmem:[%s909_s4] ss:$0 sm:$0xff] }
  0x13   : > { %751 = vmatpush3.bf16.msra.mxu1 %v771_v9  ;;  %713 = vmatpush3.bf16.msra.mxu0 %v771_v9  ;;  %v269_v33 = vunpack.c.h.bf16 %v258_v24  ;;  %v271_v34 = vunpack.c.h.bf16 %v259_v29  ;;  %v289_v36 = vadd.f32 %v281_v26, %v265_v19  ;;  %v291_v37 = vadd.f32 %v281_v26, %v267_v21  ;;  %v676_v19 = vld [vmem:[%s889_s14] sm:$0xff]   ;;  %v702_v21 = vld [vmem:[%s889_s14 + $0x8] sm:$0xff]  }
  0x14   : > { %744 = vmatprep.subr.bf16.mxu1 %v772_v10  ;;  %714 = vmatprep.subr.bf16.mxu0 %v772_v10  ;;  %v288_v38 = vadd.f32 %v277_v25, %v264_v18  ;;  %v268_v39 = vunpack.c.l.bf16 %v258_v24  ;;  %v290_v40 = vadd.f32 %v277_v25, %v266_v20  ;;  %v285_v41 = vadd.f32 %v281_v26, %v261_v28 }
  0x15   : > { %v287_v42 = vadd.f32 %v281_v26, %v263_v32  ;;  %v284_v43 = vadd.f32 %v277_v25, %v260_v27  ;;  %v301_v44 = vmax.f32 %v289_v36, 0.0  ;;  %v303_v45 = vmax.f32 %v291_v37, 0.0 }
  0x16   : > { %v300_v46 = vmax.f32 %v288_v38, 0.0  ;;  %v286_v47 = vadd.f32 %v277_v25, %v262_v31  ;;  %v302_v49 = vmax.f32 %v290_v40, 0.0  ;;  %v297_v50 = vmax.f32 %v285_v41, 0.0 }
  0x17   : > { %752 = vmatpush3.bf16.msra.mxu1 %v773_v12  ;;  %715 = vmatpush3.bf16.msra.mxu0 %v773_v12  ;;  %v299_v51 = vmax.f32 %v287_v42, 0.0  ;;  %v296_v52 = vmax.f32 %v284_v43, 0.0  ;;  %v313_v54 = vmin.f32 %v301_v44, 6.0  ;;  %v315_v55 = vmin.f32 %v303_v45, 6.0 }
  0x18   : > { %745 = vmatprep.subr.bf16.mxu1 %v774_v14  ;;  %716 = vmatprep.subr.bf16.mxu0 %v774_v14  ;;  %v312_v56 = vmin.f32 %v300_v46, 6.0  ;;  %v298_v57 = vmax.f32 %v286_v47, 0.0  ;;  %v314_v58 = vmin.f32 %v302_v49, 6.0  ;;  %v309_v59 = vmin.f32 %v297_v50, 6.0 }
  0x19   : > { %v311_v60 = vmin.f32 %v299_v51, 6.0  ;;  %v308_v61 = vmin.f32 %v296_v52, 6.0  ;;  %v323_v62 = vpack.c.bf16 %v315_v55, %v313_v54  ;;  %v293_v0 = vadd.f32 %v281_v26, %v269_v33 }
  0x1a   : > { %v310_v63 = vmin.f32 %v298_v57, 6.0  ;;  %v295_v1 = vadd.f32 %v281_v26, %v271_v34  ;;  %v270_v4 = vunpack.c.l.bf16 %v259_v29  ;;  %v292_v5 = vadd.f32 %v277_v25, %v268_v39 }
  0x1b   : > { %753 = vmatpush3.bf16.msra.mxu1 %v775_v30  ;;  %717 = vmatpush3.bf16.msra.mxu0 %v775_v30  ;;  %v321_v3 = vpack.c.bf16 %v311_v60, %v309_v59  ;;  %v305_v6 = vmax.f32 %v293_v0, 0.0  ;;  %v322_v8 = vpack.c.bf16 %v314_v58, %v312_v56  ;;  %v677_v29 = vunpack.c.l.bf16 %v676_v19 }
  0x1c   : > { %746 = vmatprep.subr.bf16.mxu1 %v776_v35  ;;  %718 = vmatprep.subr.bf16.mxu0 %v776_v35  ;;  %v307_v7 = vmax.f32 %v295_v1, 0.0  ;;  %v294_v9 = vadd.f32 %v277_v25, %v270_v4  ;;  %v320_v10 = vpack.c.bf16 %v310_v63, %v308_v61  ;;  %v304_v13 = vmax.f32 %v292_v5, 0.0 }
  0x1d   : > { %501 = vmatprep.mubr.bf16.mxu1 %v323_v62  ;;  %493 = vmatprep.mubr.bf16.mxu0 %v321_v3  ;;  %v317_v11 = vmin.f32 %v305_v6, 6.0  ;;  %v681_v31 = vunpack.c.l.bf16 %v702_v21  ;;  %v682_v33 = vunpack.c.h.bf16 %v702_v21  ;;  %v678_v35 = vunpack.c.h.bf16 %v676_v19 }
  0x1e   : > { %v319_v12 = vmin.f32 %v307_v7, 6.0  ;;  %v306_v14 = vmax.f32 %v294_v9, 0.0  ;;  %v316_v16 = vmin.f32 %v304_v13, 6.0 }
  0x1f   : > { %754 = vmatpush3.bf16.msra.mxu1 %v777_v48  ;;  %719 = vmatpush3.bf16.msra.mxu0 %v777_v48  ;;  %v703_v48 = vld [vmem:[%s889_s14 + $0x10] sm:$0xff]  }
  0x20   : > { %747 = vmatprep.subr.bf16.mxu1 %v778_v53  ;;  %720 = vmatprep.subr.bf16.mxu0 %v778_v53  ;;  %v325_v15 = vpack.c.bf16 %v319_v12, %v317_v11  ;;  %v318_v17 = vmin.f32 %v306_v14, 6.0  ;;  %v685_v55 = vunpack.c.l.bf16 %v703_v48  ;;  %v686_v57 = vunpack.c.h.bf16 %v703_v48 }
  0x22   : > { %v324_v18 = vpack.c.bf16 %v318_v17, %v316_v16 }
  0x23   : > { %755 = vmatpush3.bf16.msra.mxu1 %v779_v2  ;;  %721 = vmatpush3.bf16.msra.mxu0 %v779_v2 }
  0x26   : > { %502 = vmatmul.mubr.bf16.vlgmr.msra.gmra.mrb[0].mxu1 %v322_v8  ;;  %494 = vmatmul.mubr.bf16.vlgmr.msra.gmra.mrb[0].mxu0 %v320_v10 }
  0x27   : > { %509 = vmatprep.mubr.bf16.mxu1 %v325_v15 }
  0x2e   : > { %510 = vmatmul.mubr.bf16.gmra.mrb[4].mxu1 %v324_v18 }
  0xf9   : > { %v728_v20 = vpop.f32.mrb[0].mxu1  ;;  %v722_v22 = vpop.f32.mrb[0].mxu0 }
  0xfa   : > { %v729_v24 = vpop.f32.mrb[1].mxu1  ;;  %v723_v25 = vpop.f32.mrb[1].mxu0 }
  0xfb   : > { %v730_v26 = vadd.f32 %v729_v24, %v728_v20  ;;  %v731_v27 = vpop.f32.mrb[2].mxu1  ;;  %v724_v28 = vadd.f32 %v723_v25, %v722_v22  ;;  %v725_v30 = vpop.f32.mrb[2].mxu0 }
  0xfc   : > { %v732_v32 = vpop.f32.mrb[3].mxu1  ;;  %v726_v34 = vpop.f32.mrb[3].mxu0 }
  0xfd   : > { %v504_v36 = vadd.f32 %v730_v26, %v643_v23  ;;  %v733_v37 = vadd.f32 %v732_v32, %v731_v27  ;;  %v496_v38 = vadd.f32 %v724_v28, %v643_v23  ;;  %v727_v39 = vadd.f32 %v726_v34, %v725_v30 }
  0xff   : > { %v507_v40 = vadd.f32 %v733_v37, %v643_v23  ;;  %v530_v41 = vadd.f32 %v677_v29, %v496_v38  ;;  %v499_v42 = vadd.f32 %v727_v39, %v643_v23  ;;  %v532_v43 = vadd.f32 %v681_v31, %v504_v36 }
 0x101   : > { %v533_v44 = vadd.f32 %v682_v33, %v507_v40  ;;  %v531_v45 = vadd.f32 %v678_v35, %v499_v42  ;;  %v734_v46 = vpop.f32.mrb[4].mxu1 }
 0x102   : > { %v735_v47 = vpop.f32.mrb[5].mxu1 }
 0x103   : > { %v695_v49 = vpack.c.bf16 %v533_v44, %v532_v43  ;;  %v690_v50 = vpack.c.bf16 %v531_v45, %v530_v41  ;;  %v736_v51 = vadd.f32 %v735_v47, %v734_v46  ;;  %v737_v52 = vpop.f32.mrb[6].mxu1 }
 0x104   : > { %v738_v53 = vpop.f32.mrb[7].mxu1 }
 0x105   : > { %704 = vst [vmem:[%s251_s20 + $0x8] sm:$0xff] %v695_v49   ;;  %691 = vst [vmem:[%s251_s20] sm:$0xff] %v690_v50   ;;  %v512_v54 = vadd.f32 %v736_v51, %v643_v23  ;;  %v739_v56 = vadd.f32 %v738_v53, %v737_v52 }
 0x107   : > { %v515_v58 = vadd.f32 %v739_v56, %v643_v23  ;;  %v534_v59 = vadd.f32 %v685_v55, %v512_v54 }
 0x109   : > { %v535_v60 = vadd.f32 %v686_v57, %v515_v58 }
 0x10b   : > { %v700_v61 = vpack.c.bf16 %v535_v60, %v534_v59 }
 0x10d   : > { %705 = vst [vmem:[%s251_s20 + $0x10] sm:$0xff] %v700_v61  }
 0x10e PF: > { %s15_s18 = sadd.s32 1, %s786_s18  }
 0x10f   : > { %p12_p4 = scmp.ge.s32.totalorder %s15_s18, 4  }
 0x111   :  { %14 = sbr.rel (!%p12_p4) target bundleno = 1 (0x1), region = 73 }

// kernel: forward.42
= control target key start
LH: loop header
LB: loop body
LE: loop exit
PB: predicated region body
PF: predicated region fallthrough
CT: control target
= control target key end

     0   :  { %v293_v1 = vmov 0   ;;  %v36_v19 = vlaneseq  ;;  %s380_s1 = inlined_call_operand.vmem [shape: bf16[128,256], index: 1, kind: input, shape index: {}]   ;;  %s381_s0 = inlined_call_operand.vmem [shape: bf16[24,128], index: 0, kind: input, shape index: {}]   ;;  %s382_s2 = inlined_call_operand.vmem [shape: f32[1,256], index: 2, kind: input, shape index: {}]   ;;  %s383_s3 = inlined_call_operand.vmem [shape: bf16[24,256], index: 3, kind: output, shape index: {}]  }
   0x1   :  { %v267_v0 = vld [vmem:[%s380_s1 + $0x4] ss:$8 sps:$4 sm:$0xff]   ;;  %168 = vmatprep.mubr.bf16.mxu0 %v293_v1  ;;  %178 = vmatprep.mubr.bf16.mxu1 %v293_v1  ;;  %v269_v2 = vld [vmem:[%s380_s1] ss:$8 sps:$4 sm:$0xff]   ;;  %v270_v3 = vld [vmem:[%s380_s1 + $0x14] ss:$8 sps:$4 sm:$0xff]  }
   0x2   :  { %136 = vmatprep.subr.bf16.mxu0 %v267_v0  ;;  %250 = vmatprep.subr.bf16.mxu1 %v267_v0  ;;  %v272_v4 = vld [vmem:[%s380_s1 + $0x10] ss:$8 sps:$4 sm:$0xff]   ;;  %v273_v5 = vld [vmem:[%s380_s1 + $0x24] ss:$8 sps:$4 sm:$0xff]   ;;  %v275_v6 = vld [vmem:[%s380_s1 + $0x20] ss:$8 sps:$4 sm:$0xff]  }
   0x3   :  { %137 = vmatpush1.bf16.msra.mxu0 %v269_v2  ;;  %258 = vmatpush1.bf16.msra.mxu1 %v269_v2  ;;  %v276_v7 = vld [vmem:[%s380_s1 + $0x34] ss:$8 sps:$4 sm:$0xff]   ;;  %v278_v8 = vld [vmem:[%s380_s1 + $0x30] ss:$8 sps:$4 sm:$0xff]   ;;  %v279_v9 = vld [vmem:[%s380_s1 + $0x44] ss:$8 sps:$4 sm:$0xff]  }
   0x4   :  { %138 = vmatprep.subr.bf16.mxu0 %v270_v3  ;;  %251 = vmatprep.subr.bf16.mxu1 %v270_v3  ;;  %v281_v10 = vld [vmem:[%s380_s1 + $0x40] ss:$8 sps:$4 sm:$0xff]   ;;  %v282_v11 = vld [vmem:[%s380_s1 + $0x54] ss:$8 sps:$4 sm:$0xff]   ;;  %v284_v12 = vld [vmem:[%s380_s1 + $0x50] ss:$8 sps:$4 sm:$0xff]  }
   0x5   :  { %v285_v13 = vld [vmem:[%s380_s1 + $0x64] ss:$8 sps:$4 sm:$0xff]   ;;  %v287_v14 = vld [vmem:[%s380_s1 + $0x60] ss:$8 sps:$4 sm:$0xff]   ;;  %v288_v15 = vld [vmem:[%s380_s1 + $0x74] ss:$8 sps:$4 sm:$0xff]  }
   0x6   :  { %v290_v16 = vld [vmem:[%s380_s1 + $0x70] ss:$8 sps:$4 sm:$0xff]   ;;  %v291_v17 = vld [vmem:[%s381_s0] sm:$0xff]   ;;  %v292_v18 = vld [vmem:[%s381_s0 + $0x8] ss:$0 sps:$4 sm:$0xff]   ;;  %v37_v20 = vshrl.u32 %v36_v19, 7 }
   0x7   :  { %139 = vmatpush1.bf16.msra.mxu0 %v272_v4  ;;  %259 = vmatpush1.bf16.msra.mxu1 %v272_v4  ;;  %v34_v22 = vld [vmem:[%s382_s2] sm:$0x3] }
   0x8   :  { %140 = vmatprep.subr.bf16.mxu0 %v273_v5  ;;  %252 = vmatprep.subr.bf16.mxu1 %v273_v5  ;;  %v38_v21 = vsub.s32 0, %v37_v20  ;;  %v42_v23 = vsub.s32 1, %v37_v20 }
   0xa   :  { %v39_v24 = vrot.slane %v34_v22, %v38_v21  ;;  %v43_v25 = vrot.slane %v34_v22, %v42_v23 }
   0xb   :  { %141 = vmatpush1.bf16.msra.mxu0 %v275_v6  ;;  %260 = vmatpush1.bf16.msra.mxu1 %v275_v6 }
   0xc   :  { %142 = vmatprep.subr.bf16.mxu0 %v276_v7  ;;  %253 = vmatprep.subr.bf16.mxu1 %v276_v7 }
   0xf   :  { %143 = vmatpush1.bf16.msra.mxu0 %v278_v8  ;;  %261 = vmatpush1.bf16.msra.mxu1 %v278_v8 }
  0x10   :  { %144 = vmatprep.subr.bf16.mxu0 %v279_v9  ;;  %254 = vmatprep.subr.bf16.mxu1 %v279_v9 }
  0x13   :  { %145 = vmatpush1.bf16.msra.mxu0 %v281_v10  ;;  %262 = vmatpush1.bf16.msra.mxu1 %v281_v10 }
  0x14   :  { %146 = vmatprep.subr.bf16.mxu0 %v282_v11  ;;  %255 = vmatprep.subr.bf16.mxu1 %v282_v11 }
  0x17   :  { %147 = vmatpush1.bf16.msra.mxu0 %v284_v12  ;;  %263 = vmatpush1.bf16.msra.mxu1 %v284_v12 }
  0x18   :  { %148 = vmatprep.subr.bf16.mxu0 %v285_v13  ;;  %256 = vmatprep.subr.bf16.mxu1 %v285_v13 }
  0x1b   :  { %149 = vmatpush1.bf16.msra.mxu0 %v287_v14  ;;  %264 = vmatpush1.bf16.msra.mxu1 %v287_v14 }
  0x1c   :  { %150 = vmatprep.subr.bf16.mxu0 %v288_v15  ;;  %257 = vmatprep.subr.bf16.mxu1 %v288_v15 }
  0x1f   :  { %151 = vmatpush1.bf16.msra.mxu0 %v290_v16  ;;  %265 = vmatpush1.bf16.msra.mxu1 %v290_v16 }
  0x22   :  { %169 = vmatmul.mubr.bf16.vlgmr.msra.gmra.mrb[0].mxu0 %v291_v17  ;;  %179 = vmatmul.mubr.bf16.vlgmr.msra.gmra.mrb[0].mxu1 %v292_v18 }
  0xf5   :  { %v170_v26 = vpop.f32.mrb[0].mxu0  ;;  %v180_v27 = vpop.f32.mrb[0].mxu1 }
  0xf6   :  { %v171_v28 = vadd.f32 %v170_v26, %v39_v24  ;;  %v181_v29 = vadd.f32 %v180_v27, %v39_v24  ;;  %v172_v30 = vpop.f32.mrb[1].mxu0  ;;  %v182_v31 = vpop.f32.mrb[1].mxu1 }
  0xf7   :  { %v173_v32 = vadd.f32 %v172_v30, %v43_v25  ;;  %v183_v33 = vadd.f32 %v182_v31, %v43_v25  ;;  %v174_v34 = vpop.f32.mrb[2].mxu0  ;;  %v184_v35 = vpop.f32.mrb[2].mxu1 }
  0xf8   :  { %v187_v36 = vmax.f32 %v171_v28, 0.0  ;;  %v191_v37 = vmax.f32 %v181_v29, 0.0  ;;  %v175_v38 = vadd.f32 %v174_v34, %v39_v24  ;;  %v176_v39 = vpop.f32.mrb[3].mxu0  ;;  %v185_v40 = vpop.f32.mrb[3].mxu1 }
  0xf9   :  { %v188_v41 = vmax.f32 %v173_v32, 0.0  ;;  %v192_v42 = vmax.f32 %v183_v33, 0.0  ;;  %v177_v43 = vadd.f32 %v176_v39, %v43_v25 }
  0xfa   :  { %v193_v44 = vmin.f32 %v187_v36, 6.0  ;;  %v197_v45 = vmin.f32 %v191_v37, 6.0  ;;  %v189_v46 = vmax.f32 %v175_v38, 0.0 }
  0xfb   :  { %v194_v47 = vmin.f32 %v188_v41, 6.0  ;;  %v198_v48 = vmin.f32 %v192_v42, 6.0  ;;  %v190_v49 = vmax.f32 %v177_v43, 0.0 }
  0xfc   :  { %v195_v50 = vmin.f32 %v189_v46, 6.0 }
  0xfd   :  { %v247_v51 = vpack.c.bf16 %v194_v47, %v193_v44  ;;  %v249_v52 = vpack.c.bf16 %v198_v48, %v197_v45  ;;  %v196_v53 = vmin.f32 %v190_v49, 6.0 }
  0xff   :  { %219 = vst [vmem:[%s383_s3] sm:$0xff] %v247_v51  ;;  %221 = vst [vmem:[%s383_s3 + $0x10] sm:$0xff] %v249_v52  ;;  %v248_v54 = vpack.c.bf16 %v196_v53, %v195_v50 }
 0x101   :  { %220 = vst [vmem:[%s383_s3 + $0x8] sm:$0xff] %v248_v54 }

// kernel: forward.47
= control target key start
LH: loop header
LB: loop body
LE: loop exit
PB: predicated region body
PF: predicated region fallthrough
CT: control target
= control target key end

     0   :  { %v23_v5 = vlaneseq  ;;  %s362_s2 = inlined_call_operand.vmem [shape: bf16[256,128], index: 2, kind: input, shape index: {}]   ;;  %s363_s0 = inlined_call_operand.vmem [shape: bf16[6,256], index: 0, kind: input, shape index: {}]   ;;  %s364_s1 = inlined_call_operand.vmem [shape: f32[1,256], index: 1, kind: input, shape index: {}]   ;;  %s365_s3 = inlined_call_operand.vmem [shape: f32[1,128], index: 3, kind: input, shape index: {}]   ;;  %s366_s4 = inlined_call_operand.vmem [shape: bf16[6,128], index: 4, kind: output, shape index: {}]  }
   0x1   :  { %v261_v0 = vld [vmem:[%s362_s2 + $0x40] sm:$0xff]   ;;  %v263_v2 = vld [vmem:[%s362_s2 + $0x48] sm:$0xff]   ;;  %v265_v4 = vld [vmem:[%s362_s2 + $0x50] sm:$0xff]  }
   0x2   :  { %v262_v1 = vld [vmem:[%s362_s2] sm:$0xff]   ;;  %239 = vmatprep.subr.bf16.mxu0 %v261_v0  ;;  %v264_v3 = vld [vmem:[%s362_s2 + $0x8] sm:$0xff]   ;;  %v266_v6 = vld [vmem:[%s362_s2 + $0x10] sm:$0xff]   ;;  %v24_v8 = vshrl.u32 %v23_v5, 7 }
   0x3   :  { %240 = vmatpush3.bf16.msra.mxu0 %v262_v1  ;;  %v267_v7 = vld [vmem:[%s362_s2 + $0x58] sm:$0xff]   ;;  %v269_v10 = vld [vmem:[%s362_s2 + $0x60] sm:$0xff]   ;;  %v271_v14 = vld [vmem:[%s362_s2 + $0x68] sm:$0xff]  }
   0x4   :  { %241 = vmatprep.subr.bf16.mxu0 %v263_v2  ;;  %v268_v9 = vld [vmem:[%s362_s2 + $0x18] sm:$0xff]   ;;  %v25_v11 = vsub.s32 0, %v24_v8  ;;  %v29_v12 = vsub.s32 1, %v24_v8  ;;  %v270_v13 = vld [vmem:[%s362_s2 + $0x20] sm:$0xff]   ;;  %v272_v21 = vld [vmem:[%s362_s2 + $0x28] sm:$0xff]  }
   0x5   :  { %v18_v15 = vld [vmem:[%s363_s0] sm:$0x77]  ;;  %v273_v24 = vld [vmem:[%s362_s2 + $0x70] sm:$0xff]   ;;  %v275_v29 = vld [vmem:[%s362_s2 + $0x78] sm:$0xff]  }
   0x6   :  { %v21_v16 = vld [vmem:[%s364_s1] sm:$0x3]  ;;  %v19_v17 = vunpack.c.l.bf16 %v18_v15  ;;  %v20_v18 = vunpack.c.h.bf16 %v18_v15  ;;  %v274_v27 = vld [vmem:[%s362_s2 + $0x30] sm:$0xff]   ;;  %v276_v32 = vld [vmem:[%s362_s2 + $0x38] sm:$0xff]  }
   0x7   :  { %242 = vmatpush3.bf16.msra.mxu0 %v264_v3  ;;  %v26_v19 = vrot.slane %v21_v16, %v25_v11  ;;  %v30_v20 = vrot.slane %v21_v16, %v29_v12  ;;  %v222_v35 = vld [vmem:[%s365_s3] ss:$0 sm:$0xff] }
   0x8   :  { %243 = vmatprep.subr.bf16.mxu0 %v265_v4 }
   0x9   :  { %v34_v22 = vadd.f32 %v30_v20, %v20_v18  ;;  %v33_v23 = vadd.f32 %v26_v19, %v19_v17 }
   0xb   :  { %244 = vmatpush3.bf16.msra.mxu0 %v266_v6  ;;  %v36_v25 = vmax.f32 %v34_v22, 0.0  ;;  %v35_v26 = vmax.f32 %v33_v23, 0.0 }
   0xc   :  { %245 = vmatprep.subr.bf16.mxu0 %v267_v7 }
   0xd   :  { %v38_v28 = vmin.f32 %v36_v25, 6.0  ;;  %v37_v31 = vmin.f32 %v35_v26, 6.0 }
   0xf   :  { %246 = vmatpush3.bf16.msra.mxu0 %v268_v9  ;;  %v40_v30 = vpack.c.bf16 %v38_v28, %v38_v28  ;;  %v39_v33 = vpack.c.bf16 %v37_v31, %v37_v31 }
  0x10   :  { %247 = vmatprep.subr.bf16.mxu0 %v269_v10 }
  0x11   :  { %208 = vmatprep.mubr.bf16.mxu0 %v40_v30 }
  0x13   :  { %248 = vmatpush3.bf16.msra.mxu0 %v270_v13 }
  0x14   :  { %249 = vmatprep.subr.bf16.mxu0 %v271_v14 }
  0x17   :  { %250 = vmatpush3.bf16.msra.mxu0 %v272_v21 }
  0x18   :  { %251 = vmatprep.subr.bf16.mxu0 %v273_v24 }
  0x1b   :  { %252 = vmatpush3.bf16.msra.mxu0 %v274_v27 }
  0x1c   :  { %253 = vmatprep.subr.bf16.mxu0 %v275_v29 }
  0x1f   :  { %254 = vmatpush3.bf16.msra.mxu0 %v276_v32 }
  0x22   :  { %209 = vmatmul.mubr.bf16.vlgmr.msra.gmra.mrb[0].mxu0 %v39_v33 }
  0xf5   :  { %v255_v34 = vpop.f32.mrb[0].mxu0 }
  0xf6   :  { %v256_v36 = vpop.f32.mrb[1].mxu0 }
  0xf7   :  { %v257_v37 = vadd.f32 %v256_v36, %v255_v34  ;;  %v258_v38 = vpop.f32.mrb[2].mxu0 }
  0xf8   :  { %v259_v39 = vpop.f32.mrb[3].mxu0 }
  0xf9   :  { %v211_v40 = vadd.f32 %v257_v37, %v222_v35 }
  0xfb   :  { %v216_v41 = vpack.c.bf16 %v211_v40, %v211_v40 }
  0xfd   :  { %217 = vst [vmem:[%s366_s4] sm:$0x7] %v216_v41 }

// kernel: forward.43
= control target key start
LH: loop header
LB: loop body
LE: loop exit
PB: predicated region body
PF: predicated region fallthrough
CT: control target
= control target key end

     0   :  { %v32_v5 = vlaneseq  ;;  %s473_s3 = inlined_call_operand.vmem [shape: bf16[256,128], index: 3, kind: input, shape index: {}]   ;;  %s474_s0 = inlined_call_operand.vmem [shape: bf16[24,256], index: 0, kind: input, shape index: {}]   ;;  %s475_s1 = inlined_call_operand.vmem [shape: f32[1,256], index: 1, kind: input, shape index: {}]   ;;  %s476_s2 = inlined_call_operand.vmem [shape: bf16[24,128], index: 2, kind: input, shape index: {}]   ;;  %s477_s4 = inlined_call_operand.vmem [shape: f32[1,128], index: 4, kind: input, shape index: {}]   ;;  %s478_s5 = inlined_call_operand.vmem [shape: bf16[24,128], index: 5, kind: output, shape index: {}]  }
   0x1   :  { %v352_v0 = vld [vmem:[%s473_s3 + $0x40] sm:$0xff]   ;;  %v354_v2 = vld [vmem:[%s473_s3 + $0x48] sm:$0xff]   ;;  %v356_v4 = vld [vmem:[%s473_s3 + $0x50] sm:$0xff]  }
   0x2   :  { %v353_v1 = vld [vmem:[%s473_s3] sm:$0xff]   ;;  %308 = vmatprep.subr.bf16.mxu0 %v352_v0  ;;  %336 = vmatprep.subr.bf16.mxu1 %v352_v0  ;;  %v355_v3 = vld [vmem:[%s473_s3 + $0x8] sm:$0xff]   ;;  %v357_v6 = vld [vmem:[%s473_s3 + $0x10] sm:$0xff]   ;;  %v33_v8 = vshrl.u32 %v32_v5, 7 }
   0x3   :  { %309 = vmatpush3.bf16.msra.mxu0 %v353_v1  ;;  %344 = vmatpush3.bf16.msra.mxu1 %v353_v1  ;;  %v358_v7 = vld [vmem:[%s473_s3 + $0x58] sm:$0xff]   ;;  %v360_v10 = vld [vmem:[%s473_s3 + $0x60] sm:$0xff]   ;;  %v362_v14 = vld [vmem:[%s473_s3 + $0x68] sm:$0xff]  }
   0x4   :  { %310 = vmatprep.subr.bf16.mxu0 %v354_v2  ;;  %337 = vmatprep.subr.bf16.mxu1 %v354_v2  ;;  %v359_v9 = vld [vmem:[%s473_s3 + $0x18] sm:$0xff]   ;;  %v34_v11 = vsub.s32 0, %v33_v8  ;;  %v361_v12 = vld [vmem:[%s473_s3 + $0x20] sm:$0xff]   ;;  %v38_v13 = vsub.s32 1, %v33_v8  ;;  %v22_v16 = vld [vmem:[%s474_s0 + $0x8] sm:$0xff] }
   0x5   :  { %v21_v15 = vld [vmem:[%s474_s0] sm:$0xff]  ;;  %v26_v20 = vunpack.c.l.bf16 %v22_v16  ;;  %v27_v21 = vunpack.c.h.bf16 %v22_v16  ;;  %v23_v22 = vld [vmem:[%s474_s0 + $0x10] sm:$0xff]  ;;  %v363_v27 = vld [vmem:[%s473_s3 + $0x28] sm:$0xff]  }
   0x6   :  { %v30_v17 = vld [vmem:[%s475_s1] sm:$0x3]  ;;  %v24_v18 = vunpack.c.l.bf16 %v21_v15  ;;  %v25_v19 = vunpack.c.h.bf16 %v21_v15  ;;  %v28_v25 = vunpack.c.l.bf16 %v23_v22  ;;  %v29_v26 = vunpack.c.h.bf16 %v23_v22  ;;  %v364_v28 = vld [vmem:[%s473_s3 + $0x70] sm:$0xff]   ;;  %v366_v42 = vld [vmem:[%s473_s3 + $0x78] sm:$0xff]  }
   0x7   :  { %311 = vmatpush3.bf16.msra.mxu0 %v355_v3  ;;  %345 = vmatpush3.bf16.msra.mxu1 %v355_v3  ;;  %v35_v23 = vrot.slane %v30_v17, %v34_v11  ;;  %v39_v24 = vrot.slane %v30_v17, %v38_v13  ;;  %v365_v38 = vld [vmem:[%s473_s3 + $0x30] sm:$0xff]   ;;  %v367_v51 = vld [vmem:[%s473_s3 + $0x38] sm:$0xff]   ;;  %v249_v54 = vld [vmem:[%s476_s2 + $0x8] sm:$0xf] }
   0x8   :  { %312 = vmatprep.subr.bf16.mxu0 %v356_v4  ;;  %338 = vmatprep.subr.bf16.mxu1 %v356_v4  ;;  %v300_v57 = vld [vmem:[%s476_s2] sm:$0xff]   ;;  %v252_v63 = vunpack.c.l.bf16 %v249_v54 }
   0x9   :  { %v43_v29 = vadd.f32 %v39_v24, %v25_v19  ;;  %v45_v30 = vadd.f32 %v39_v24, %v27_v21  ;;  %v47_v31 = vadd.f32 %v39_v24, %v29_v26  ;;  %v42_v32 = vadd.f32 %v35_v23, %v24_v18  ;;  %v276_v58 = vld [vmem:[%s477_s4] ss:$0 sm:$0xff] }
   0xa   :  { %v44_v33 = vadd.f32 %v35_v23, %v26_v20  ;;  %v46_v34 = vadd.f32 %v35_v23, %v28_v25  ;;  %v301_v2 = vunpack.c.l.bf16 %v300_v57  ;;  %v302_v8 = vunpack.c.h.bf16 %v300_v57 }
   0xb   :  { %313 = vmatpush3.bf16.msra.mxu0 %v357_v6  ;;  %346 = vmatpush3.bf16.msra.mxu1 %v357_v6  ;;  %v49_v35 = vmax.f32 %v43_v29, 0.0  ;;  %v51_v36 = vmax.f32 %v45_v30, 0.0  ;;  %v53_v37 = vmax.f32 %v47_v31, 0.0  ;;  %v48_v39 = vmax.f32 %v42_v32, 0.0 }
   0xc   :  { %314 = vmatprep.subr.bf16.mxu0 %v358_v7  ;;  %339 = vmatprep.subr.bf16.mxu1 %v358_v7  ;;  %v50_v40 = vmax.f32 %v44_v33, 0.0  ;;  %v52_v41 = vmax.f32 %v46_v34, 0.0 }
   0xd   :  { %v55_v43 = vmin.f32 %v49_v35, 6.0  ;;  %v57_v44 = vmin.f32 %v51_v36, 6.0  ;;  %v59_v45 = vmin.f32 %v53_v37, 6.0  ;;  %v54_v46 = vmin.f32 %v48_v39, 6.0 }
   0xe   :  { %v56_v49 = vmin.f32 %v50_v40, 6.0  ;;  %v58_v50 = vmin.f32 %v52_v41, 6.0 }
   0xf   :  { %315 = vmatpush3.bf16.msra.mxu0 %v359_v9  ;;  %347 = vmatpush3.bf16.msra.mxu1 %v359_v9  ;;  %v61_v47 = vpack.c.bf16 %v57_v44, %v55_v43  ;;  %v63_v48 = vpack.c.bf16 %v59_v45, %v59_v45 }
  0x10   :  { %316 = vmatprep.subr.bf16.mxu0 %v360_v10  ;;  %340 = vmatprep.subr.bf16.mxu1 %v360_v10  ;;  %v60_v52 = vpack.c.bf16 %v56_v49, %v54_v46  ;;  %v62_v53 = vpack.c.bf16 %v58_v50, %v58_v50 }
  0x11   :  { %231 = vmatprep.mubr.bf16.mxu0 %v61_v47  ;;  %239 = vmatprep.mubr.bf16.mxu1 %v63_v48 }
  0x13   :  { %317 = vmatpush3.bf16.msra.mxu0 %v361_v12  ;;  %348 = vmatpush3.bf16.msra.mxu1 %v361_v12 }
  0x14   :  { %318 = vmatprep.subr.bf16.mxu0 %v362_v14  ;;  %341 = vmatprep.subr.bf16.mxu1 %v362_v14 }
  0x17   :  { %319 = vmatpush3.bf16.msra.mxu0 %v363_v27  ;;  %349 = vmatpush3.bf16.msra.mxu1 %v363_v27 }
  0x18   :  { %320 = vmatprep.subr.bf16.mxu0 %v364_v28  ;;  %342 = vmatprep.subr.bf16.mxu1 %v364_v28 }
  0x1b   :  { %321 = vmatpush3.bf16.msra.mxu0 %v365_v38  ;;  %350 = vmatpush3.bf16.msra.mxu1 %v365_v38 }
  0x1c   :  { %322 = vmatprep.subr.bf16.mxu0 %v366_v42  ;;  %343 = vmatprep.subr.bf16.mxu1 %v366_v42 }
  0x1f   :  { %323 = vmatpush3.bf16.msra.mxu0 %v367_v51  ;;  %351 = vmatpush3.bf16.msra.mxu1 %v367_v51 }
  0x22   :  { %232 = vmatmul.mubr.bf16.vlgmr.msra.gmra.mrb[0].mxu0 %v60_v52  ;;  %240 = vmatmul.mubr.bf16.vlgmr.msra.gmra.mrb[0].mxu1 %v62_v53 }
  0xf5   :  { %v324_v55 = vpop.f32.mrb[0].mxu0  ;;  %v330_v56 = vpop.f32.mrb[0].mxu1 }
  0xf6   :  { %v325_v59 = vpop.f32.mrb[1].mxu0  ;;  %v331_v60 = vpop.f32.mrb[1].mxu1 }
  0xf7   :  { %v326_v61 = vadd.f32 %v325_v59, %v324_v55  ;;  %v332_v62 = vadd.f32 %v331_v60, %v330_v56  ;;  %v327_v0 = vpop.f32.mrb[2].mxu0  ;;  %v333_v1 = vpop.f32.mrb[2].mxu1 }
  0xf8   :  { %v328_v3 = vpop.f32.mrb[3].mxu0  ;;  %v334_v4 = vpop.f32.mrb[3].mxu1 }
  0xf9   :  { %v234_v5 = vadd.f32 %v326_v61, %v276_v58  ;;  %v242_v6 = vadd.f32 %v332_v62, %v276_v58  ;;  %v329_v7 = vadd.f32 %v328_v3, %v327_v0 }
  0xfb   :  { %v255_v9 = vadd.f32 %v252_v63, %v242_v6  ;;  %v237_v10 = vadd.f32 %v329_v7, %v276_v58  ;;  %v253_v11 = vadd.f32 %v301_v2, %v234_v5 }
  0xfd   :  { %v298_v12 = vpack.c.bf16 %v255_v9, %v255_v9  ;;  %v254_v13 = vadd.f32 %v302_v8, %v237_v10 }
  0xff   :  { %271 = vst [vmem:[%s478_s5 + $0x8] sm:$0xf] %v298_v12  ;;  %v306_v14 = vpack.c.bf16 %v254_v13, %v253_v11 }
 0x101   :  { %307 = vst [vmem:[%s478_s5] sm:$0xff] %v306_v14  }

// kernel: forward.48
= control target key start
LH: loop header
LB: loop body
LE: loop exit
PB: predicated region body
PF: predicated region fallthrough
CT: control target
= control target key end

     0   :  { %v391_v0 = vmov 0.0   ;;  %vm392_vm0 = vmmov 0   ;;  %v393_v3 = vmov 0   ;;  %v50_v27 = vlaneseq  ;;  %s498_s1 = inlined_call_operand.vmem [shape: bf16[128,384], index: 1, kind: input, shape index: {}]   ;;  %s499_s0 = inlined_call_operand.vmem [shape: bf16[6,128], index: 0, kind: input, shape index: {}]   ;;  %s500_s2 = inlined_call_operand.vmem [shape: f32[1,384], index: 2, kind: input, shape index: {}]   ;;  %s501_s3 = inlined_call_operand.vmem [shape: bf16[6,384], index: 3, kind: output, shape index: {}]  }
   0x1   :  { %336 = vmatprep.subr.bf16.mxu1 %v391_v0  ;;  %v359_v1 = vld [vmem:[%s498_s1 + $0x4] ss:$12 sps:$4 sm:$0xff]   ;;  %352 = vmatprep.mubr.msk.bf16.mxu1 %vm392_vm0, %v391_v0  ;;  %v361_v2 = vld [vmem:[%s498_s1 + $0x8] ss:$12 sps:$4 sm:$0xff]   ;;  %v362_v4 = vld [vmem:[%s498_s1] ss:$12 sps:$4 sm:$0xff]  }
   0x2   :  { %225 = vmatprep.mubr.bf16.mxu0 %v393_v3  ;;  %193 = vmatprep.subr.bf16.mxu0 %v359_v1  ;;  %v363_v5 = vld [vmem:[%s498_s1 + $0x1c] ss:$12 sps:$4 sm:$0xff]   ;;  %v365_v6 = vld [vmem:[%s498_s1 + $0x20] ss:$12 sps:$4 sm:$0xff]   ;;  %v366_v7 = vld [vmem:[%s498_s1 + $0x18] ss:$12 sps:$4 sm:$0xff]  }
   0x3   :  { %337 = vmatpush3.bf16.msra.mxu1 %v361_v2  ;;  %194 = vmatpush1.bf16.msra.mxu0 %v362_v4  ;;  %v367_v8 = vld [vmem:[%s498_s1 + $0x34] ss:$12 sps:$4 sm:$0xff]   ;;  %v369_v9 = vld [vmem:[%s498_s1 + $0x38] ss:$12 sps:$4 sm:$0xff]   ;;  %v370_v10 = vld [vmem:[%s498_s1 + $0x30] ss:$12 sps:$4 sm:$0xff]  }
   0x4   :  { %338 = vmatprep.subr.bf16.mxu1 %v391_v0  ;;  %195 = vmatprep.subr.bf16.mxu0 %v363_v5  ;;  %v371_v11 = vld [vmem:[%s498_s1 + $0x4c] ss:$12 sps:$4 sm:$0xff]   ;;  %v373_v12 = vld [vmem:[%s498_s1 + $0x50] ss:$12 sps:$4 sm:$0xff]   ;;  %v374_v13 = vld [vmem:[%s498_s1 + $0x48] ss:$12 sps:$4 sm:$0xff]  }
   0x5   :  { %v375_v14 = vld [vmem:[%s498_s1 + $0x64] ss:$12 sps:$4 sm:$0xff]   ;;  %v377_v15 = vld [vmem:[%s498_s1 + $0x68] ss:$12 sps:$4 sm:$0xff]   ;;  %v378_v16 = vld [vmem:[%s498_s1 + $0x60] ss:$12 sps:$4 sm:$0xff]  }
   0x6   :  { %v379_v17 = vld [vmem:[%s498_s1 + $0x7c] ss:$12 sps:$4 sm:$0xff]   ;;  %v381_v18 = vld [vmem:[%s498_s1 + $0x80] ss:$12 sps:$4 sm:$0xff]   ;;  %v382_v19 = vld [vmem:[%s498_s1 + $0x78] ss:$12 sps:$4 sm:$0xff]  }
   0x7   :  { %339 = vmatpush3.bf16.msra.mxu1 %v365_v6  ;;  %196 = vmatpush1.bf16.msra.mxu0 %v366_v7  ;;  %v383_v20 = vld [vmem:[%s498_s1 + $0x94] ss:$12 sps:$4 sm:$0xff]   ;;  %v385_v21 = vld [vmem:[%s498_s1 + $0x98] ss:$12 sps:$4 sm:$0xff]   ;;  %v386_v22 = vld [vmem:[%s498_s1 + $0x90] ss:$12 sps:$4 sm:$0xff]  }
   0x8   :  { %340 = vmatprep.subr.bf16.mxu1 %v391_v0  ;;  %197 = vmatprep.subr.bf16.mxu0 %v367_v8  ;;  %v387_v23 = vld [vmem:[%s498_s1 + $0xac] ss:$12 sps:$4 sm:$0xff]   ;;  %v389_v24 = vld [vmem:[%s498_s1 + $0xb0] ss:$12 sps:$4 sm:$0xff]   ;;  %v390_v25 = vld [vmem:[%s498_s1 + $0xa8] ss:$12 sps:$4 sm:$0xff]  }
   0x9   :  { %v15_v26 = vld [vmem:[%s499_s0] sm:$0x7]  ;;  %v51_v28 = vshrl.u32 %v50_v27, 7 }
   0xa   :  { %v48_v30 = vld [vmem:[%s500_s2] sm:$0x7] }
   0xb   :  { %341 = vmatpush3.bf16.msra.mxu1 %v369_v9  ;;  %198 = vmatpush1.bf16.msra.mxu0 %v370_v10  ;;  %v60_v29 = vsub.s32 2, %v51_v28  ;;  %v52_v31 = vsub.s32 0, %v51_v28  ;;  %v56_v32 = vsub.s32 1, %v51_v28 }
   0xc   :  { %342 = vmatprep.subr.bf16.mxu1 %v391_v0  ;;  %199 = vmatprep.subr.bf16.mxu0 %v371_v11 }
   0xd   :  { %v61_v33 = vrot.slane %v48_v30, %v60_v29  ;;  %v53_v34 = vrot.slane %v48_v30, %v52_v31  ;;  %v57_v35 = vrot.slane %v48_v30, %v56_v32 }
   0xf   :  { %343 = vmatpush3.bf16.msra.mxu1 %v373_v12  ;;  %200 = vmatpush1.bf16.msra.mxu0 %v374_v13 }
  0x10   :  { %344 = vmatprep.subr.bf16.mxu1 %v391_v0  ;;  %201 = vmatprep.subr.bf16.mxu0 %v375_v14 }
  0x13   :  { %345 = vmatpush3.bf16.msra.mxu1 %v377_v15  ;;  %202 = vmatpush1.bf16.msra.mxu0 %v378_v16 }
  0x14   :  { %346 = vmatprep.subr.bf16.mxu1 %v391_v0  ;;  %203 = vmatprep.subr.bf16.mxu0 %v379_v17 }
  0x17   :  { %347 = vmatpush3.bf16.msra.mxu1 %v381_v18  ;;  %204 = vmatpush1.bf16.msra.mxu0 %v382_v19 }
  0x18   :  { %348 = vmatprep.subr.bf16.mxu1 %v391_v0  ;;  %205 = vmatprep.subr.bf16.mxu0 %v383_v20 }
  0x1b   :  { %349 = vmatpush3.bf16.msra.mxu1 %v385_v21  ;;  %206 = vmatpush1.bf16.msra.mxu0 %v386_v22 }
  0x1c   :  { %350 = vmatprep.subr.bf16.mxu1 %v391_v0  ;;  %207 = vmatprep.subr.bf16.mxu0 %v387_v23 }
  0x1f   :  { %351 = vmatpush3.bf16.msra.mxu1 %v389_v24  ;;  %208 = vmatpush1.bf16.msra.mxu0 %v390_v25 }
  0x22   :  { %353 = vmatmul.mubr.bf16.vlgmr.msra.gmra.mrb[0].mxu1 %v15_v26  ;;  %226 = vmatmul.mubr.bf16.vlgmr.msra.gmra.mrb[0].mxu0 %v15_v26 }
  0xf5   :  { %v268_v36 = vpop.f32.mrb[0].mxu1  ;;  %v227_v38 = vpop.f32.mrb[0].mxu0 }
  0xf6   :  { %v269_v37 = vadd.f32 %v268_v36, %v61_v33  ;;  %v354_v39 = vpop.f32.mrb[1].mxu1  ;;  %v228_v40 = vadd.f32 %v227_v38, %v53_v34  ;;  %v229_v41 = vpop.f32.mrb[1].mxu0 }
  0xf7   :  { %v271_v42 = vpop.f32.mrb[2].mxu1  ;;  %v230_v44 = vadd.f32 %v229_v41, %v57_v35  ;;  %v231_v45 = vpop.f32.mrb[2].mxu0 }
  0xf8   :  { %v276_v43 = vmax.f32 %v269_v37, 0.0  ;;  %v355_v46 = vpop.f32.mrb[3].mxu1  ;;  %v274_v47 = vmax.f32 %v228_v40, 0.0  ;;  %v232_v48 = vpop.f32.mrb[3].mxu0 }
  0xf9   :  { %v275_v50 = vmax.f32 %v230_v44, 0.0 }
  0xfa   :  { %v279_v49 = vmin.f32 %v276_v43, 6.0  ;;  %v277_v51 = vmin.f32 %v274_v47, 6.0 }
  0xfb   :  { %v278_v53 = vmin.f32 %v275_v50, 6.0 }
  0xfc   :  { %v326_v52 = vpack.c.bf16 %v279_v49, %v279_v49 }
  0xfd   :  { %v325_v54 = vpack.c.bf16 %v278_v53, %v277_v51 }
  0xfe   :  { %294 = vst [vmem:[%s501_s3 + $0x8] sm:$0x7] %v326_v52 }
  0xff   :  { %293 = vst [vmem:[%s501_s3] sm:$0x77] %v325_v54 }

// kernel: forward.55
= control target key start
LH: loop header
LB: loop body
LE: loop exit
PB: predicated region body
PF: predicated region fallthrough
CT: control target
= control target key end

     0   :  { %v439_v1 = vmov 0.0   ;;  %vm440_vm0 = vmmov 0   ;;  %v25_v13 = vlaneseq  ;;  %s562_s2 = inlined_call_operand.vmem [shape: bf16[384,128], index: 2, kind: input, shape index: {}]   ;;  %s563_s0 = inlined_call_operand.vmem [shape: bf16[6,384], index: 0, kind: input, shape index: {}]   ;;  %s564_s1 = inlined_call_operand.vmem [shape: f32[1,384], index: 1, kind: input, shape index: {}]   ;;  %s565_s3 = inlined_call_operand.vmem [shape: f32[1,128], index: 3, kind: input, shape index: {}]   ;;  %s566_s4 = inlined_call_operand.vmem [shape: bf16[6,128], index: 4, kind: output, shape index: {}]  }
   0x1   :  { %v415_v0 = vld [vmem:[%s562_s2 + $0x40] sm:$0xff]   ;;  %393 = vmatprep.subr.bf16.mxu1 %v439_v1  ;;  %409 = vmatprep.mubr.msk.bf16.mxu1 %vm440_vm0, %v439_v1  ;;  %v418_v4 = vld [vmem:[%s562_s2 + $0x48] sm:$0xff]   ;;  %v421_v7 = vld [vmem:[%s562_s2 + $0x50] sm:$0xff]  }
   0x2   :  { %v416_v2 = vld [vmem:[%s562_s2] sm:$0xff]   ;;  %362 = vmatprep.subr.bf16.mxu0 %v415_v0  ;;  %v419_v5 = vld [vmem:[%s562_s2 + $0x8] sm:$0xff]   ;;  %v422_v8 = vld [vmem:[%s562_s2 + $0x10] sm:$0xff]   ;;  %v26_v17 = vshrl.u32 %v25_v13, 7 }
   0x3   :  { %v417_v3 = vld [vmem:[%s562_s2 + $0x80] sm:$0xff]   ;;  %363 = vmatpush3.bf16.msra.mxu0 %v416_v2  ;;  %v420_v6 = vld [vmem:[%s562_s2 + $0x88] sm:$0xff]   ;;  %v423_v9 = vld [vmem:[%s562_s2 + $0x90] sm:$0xff]  }
   0x4   :  { %394 = vmatpush3.bf16.msra.mxu1 %v417_v3  ;;  %364 = vmatprep.subr.bf16.mxu0 %v418_v4  ;;  %v424_v10 = vld [vmem:[%s562_s2 + $0x58] sm:$0xff]   ;;  %v427_v14 = vld [vmem:[%s562_s2 + $0x60] sm:$0xff]   ;;  %v430_v18 = vld [vmem:[%s562_s2 + $0x68] sm:$0xff]   ;;  %v31_v21 = vsub.s32 1, %v26_v17  ;;  %v27_v23 = vsub.s32 0, %v26_v17  ;;  %v35_v25 = vsub.s32 2, %v26_v17 }
   0x5   :  { %395 = vmatprep.subr.bf16.mxu1 %v439_v1  ;;  %v425_v11 = vld [vmem:[%s562_s2 + $0x18] sm:$0xff]   ;;  %v428_v15 = vld [vmem:[%s562_s2 + $0x20] sm:$0xff]   ;;  %v431_v19 = vld [vmem:[%s562_s2 + $0x28] sm:$0xff]  }
   0x6   :  { %v426_v12 = vld [vmem:[%s562_s2 + $0x98] sm:$0xff]   ;;  %v429_v16 = vld [vmem:[%s562_s2 + $0xa0] sm:$0xff]   ;;  %v432_v20 = vld [vmem:[%s562_s2 + $0xa8] sm:$0xff]  }
   0x7   :  { %365 = vmatpush3.bf16.msra.mxu0 %v419_v5  ;;  %v433_v22 = vld [vmem:[%s562_s2 + $0x70] sm:$0xff]   ;;  %v18_v27 = vld [vmem:[%s563_s0] sm:$0x77]  ;;  %v19_v28 = vld [vmem:[%s563_s0 + $0x8] sm:$0x7] }
   0x8   :  { %396 = vmatpush3.bf16.msra.mxu1 %v420_v6  ;;  %366 = vmatprep.subr.bf16.mxu0 %v421_v7  ;;  %v434_v24 = vld [vmem:[%s562_s2 + $0x30] sm:$0xff]   ;;  %v23_v29 = vld [vmem:[%s564_s1] sm:$0x7]  ;;  %v436_v30 = vld [vmem:[%s562_s2 + $0x78] sm:$0xff]   ;;  %v20_v31 = vunpack.c.l.bf16 %v18_v27  ;;  %v21_v32 = vunpack.c.h.bf16 %v18_v27  ;;  %v22_v33 = vunpack.c.l.bf16 %v19_v28 }
   0x9   :  { %397 = vmatprep.subr.bf16.mxu1 %v439_v1  ;;  %v435_v26 = vld [vmem:[%s562_s2 + $0xb0] sm:$0xff]   ;;  %v32_v34 = vrot.slane %v23_v29, %v31_v21  ;;  %v28_v35 = vrot.slane %v23_v29, %v27_v23  ;;  %v36_v36 = vrot.slane %v23_v29, %v35_v25  ;;  %v437_v38 = vld [vmem:[%s562_s2 + $0x38] sm:$0xff]   ;;  %v337_v54 = vld [vmem:[%s565_s3] ss:$0 sm:$0xff] }
   0xa   :  { %v438_v42 = vld [vmem:[%s562_s2 + $0xb8] sm:$0xff]  }
   0xb   :  { %367 = vmatpush3.bf16.msra.mxu0 %v422_v8  ;;  %v41_v37 = vadd.f32 %v32_v34, %v21_v32  ;;  %v40_v39 = vadd.f32 %v28_v35, %v20_v31  ;;  %v42_v40 = vadd.f32 %v36_v36, %v22_v33 }
   0xc   :  { %398 = vmatpush3.bf16.msra.mxu1 %v423_v9  ;;  %368 = vmatprep.subr.bf16.mxu0 %v424_v10 }
   0xd   :  { %399 = vmatprep.subr.bf16.mxu1 %v439_v1  ;;  %v44_v41 = vmax.f32 %v41_v37, 0.0  ;;  %v43_v43 = vmax.f32 %v40_v39, 0.0  ;;  %v45_v44 = vmax.f32 %v42_v40, 0.0 }
   0xf   :  { %369 = vmatpush3.bf16.msra.mxu0 %v425_v11  ;;  %v47_v45 = vmin.f32 %v44_v41, 6.0  ;;  %v46_v46 = vmin.f32 %v43_v43, 6.0  ;;  %v48_v47 = vmin.f32 %v45_v44, 6.0 }
  0x10   :  { %400 = vmatpush3.bf16.msra.mxu1 %v426_v12  ;;  %370 = vmatprep.subr.bf16.mxu0 %v427_v14 }
  0x11   :  { %401 = vmatprep.subr.bf16.mxu1 %v439_v1  ;;  %v50_v48 = vpack.c.bf16 %v47_v45, %v47_v45  ;;  %v49_v49 = vpack.c.bf16 %v46_v46, %v46_v46  ;;  %v51_v50 = vpack.c.bf16 %v48_v47, %v48_v47 }
  0x13   :  { %371 = vmatpush3.bf16.msra.mxu0 %v428_v15  ;;  %283 = vmatprep.mubr.bf16.mxu0 %v50_v48 }
  0x14   :  { %402 = vmatpush3.bf16.msra.mxu1 %v429_v16  ;;  %372 = vmatprep.subr.bf16.mxu0 %v430_v18 }
  0x15   :  { %403 = vmatprep.subr.bf16.mxu1 %v439_v1 }
  0x17   :  { %373 = vmatpush3.bf16.msra.mxu0 %v431_v19 }
  0x18   :  { %404 = vmatpush3.bf16.msra.mxu1 %v432_v20  ;;  %374 = vmatprep.subr.bf16.mxu0 %v433_v22 }
  0x19   :  { %405 = vmatprep.subr.bf16.mxu1 %v439_v1 }
  0x1b   :  { %375 = vmatpush3.bf16.msra.mxu0 %v434_v24 }
  0x1c   :  { %406 = vmatpush3.bf16.msra.mxu1 %v435_v26  ;;  %376 = vmatprep.subr.bf16.mxu0 %v436_v30 }
  0x1d   :  { %407 = vmatprep.subr.bf16.mxu1 %v439_v1 }
  0x1f   :  { %377 = vmatpush3.bf16.msra.mxu0 %v437_v38 }
  0x20   :  { %408 = vmatpush3.bf16.msra.mxu1 %v438_v42 }
  0x22   :  { %284 = vmatmul.mubr.bf16.vlgmr.msra.gmra.mrb[0].mxu0 %v49_v49 }
  0x23   :  { %410 = vmatmul.mubr.bf16.vlgmr.msra.gmra.mrb[0].mxu1 %v51_v50 }
  0xf5   :  { %v378_v51 = vpop.f32.mrb[0].mxu0 }
  0xf6   :  { %v325_v52 = vpop.f32.mrb[0].mxu1  ;;  %v379_v53 = vpop.f32.mrb[1].mxu0 }
  0xf7   :  { %v411_v55 = vpop.f32.mrb[1].mxu1  ;;  %v380_v56 = vadd.f32 %v379_v53, %v378_v51  ;;  %v381_v57 = vpop.f32.mrb[2].mxu0 }
  0xf8   :  { %v328_v58 = vpop.f32.mrb[2].mxu1  ;;  %v382_v59 = vpop.f32.mrb[3].mxu0 }
  0xf9   :  { %v412_v60 = vpop.f32.mrb[3].mxu1  ;;  %v286_v61 = vadd.f32 %v380_v56, %v337_v54 }
  0xfb   :  { %v326_v62 = vadd.f32 %v325_v52, %v286_v61 }
  0xfd   :  { %v331_v63 = vpack.c.bf16 %v326_v62, %v326_v62 }
  0xff   :  { %332 = vst [vmem:[%s566_s4] sm:$0x7] %v331_v63 }

// kernel: forward.49
= control target key start
LH: loop header
LB: loop body
LE: loop exit
PB: predicated region body
PF: predicated region fallthrough
CT: control target
= control target key end

     0   :  { %v445_v1 = vmov 0.0   ;;  %vm446_vm0 = vmmov 0   ;;  %v28_v13 = vlaneseq  ;;  %s576_s3 = inlined_call_operand.vmem [shape: bf16[384,128], index: 3, kind: input, shape index: {}]   ;;  %s577_s0 = inlined_call_operand.vmem [shape: bf16[6,384], index: 0, kind: input, shape index: {}]   ;;  %s578_s1 = inlined_call_operand.vmem [shape: f32[1,384], index: 1, kind: input, shape index: {}]   ;;  %s579_s2 = inlined_call_operand.vmem [shape: bf16[6,128], index: 2, kind: input, shape index: {}]   ;;  %s580_s4 = inlined_call_operand.vmem [shape: f32[1,128], index: 4, kind: input, shape index: {}]   ;;  %s581_s5 = inlined_call_operand.vmem [shape: bf16[6,128], index: 5, kind: output, shape index: {}]  }
   0x1   :  { %v421_v0 = vld [vmem:[%s576_s3 + $0x40] sm:$0xff]   ;;  %399 = vmatprep.subr.bf16.mxu1 %v445_v1  ;;  %415 = vmatprep.mubr.msk.bf16.mxu1 %vm446_vm0, %v445_v1  ;;  %v424_v4 = vld [vmem:[%s576_s3 + $0x48] sm:$0xff]   ;;  %v427_v7 = vld [vmem:[%s576_s3 + $0x50] sm:$0xff]  }
   0x2   :  { %v422_v2 = vld [vmem:[%s576_s3] sm:$0xff]   ;;  %368 = vmatprep.subr.bf16.mxu0 %v421_v0  ;;  %v425_v5 = vld [vmem:[%s576_s3 + $0x8] sm:$0xff]   ;;  %v428_v8 = vld [vmem:[%s576_s3 + $0x10] sm:$0xff]   ;;  %v29_v17 = vshrl.u32 %v28_v13, 7 }
   0x3   :  { %v423_v3 = vld [vmem:[%s576_s3 + $0x80] sm:$0xff]   ;;  %369 = vmatpush3.bf16.msra.mxu0 %v422_v2  ;;  %v426_v6 = vld [vmem:[%s576_s3 + $0x88] sm:$0xff]   ;;  %v429_v9 = vld [vmem:[%s576_s3 + $0x90] sm:$0xff]  }
   0x4   :  { %400 = vmatpush3.bf16.msra.mxu1 %v423_v3  ;;  %370 = vmatprep.subr.bf16.mxu0 %v424_v4  ;;  %v430_v10 = vld [vmem:[%s576_s3 + $0x58] sm:$0xff]   ;;  %v433_v14 = vld [vmem:[%s576_s3 + $0x60] sm:$0xff]   ;;  %v436_v18 = vld [vmem:[%s576_s3 + $0x68] sm:$0xff]   ;;  %v34_v21 = vsub.s32 1, %v29_v17  ;;  %v30_v23 = vsub.s32 0, %v29_v17  ;;  %v38_v25 = vsub.s32 2, %v29_v17 }
   0x5   :  { %401 = vmatprep.subr.bf16.mxu1 %v445_v1  ;;  %v431_v11 = vld [vmem:[%s576_s3 + $0x18] sm:$0xff]   ;;  %v434_v15 = vld [vmem:[%s576_s3 + $0x20] sm:$0xff]   ;;  %v437_v19 = vld [vmem:[%s576_s3 + $0x28] sm:$0xff]  }
   0x6   :  { %v432_v12 = vld [vmem:[%s576_s3 + $0x98] sm:$0xff]   ;;  %v435_v16 = vld [vmem:[%s576_s3 + $0xa0] sm:$0xff]   ;;  %v438_v20 = vld [vmem:[%s576_s3 + $0xa8] sm:$0xff]  }
   0x7   :  { %371 = vmatpush3.bf16.msra.mxu0 %v425_v5  ;;  %v439_v22 = vld [vmem:[%s576_s3 + $0x70] sm:$0xff]   ;;  %v21_v27 = vld [vmem:[%s577_s0] sm:$0x77]  ;;  %v22_v28 = vld [vmem:[%s577_s0 + $0x8] sm:$0x7] }
   0x8   :  { %402 = vmatpush3.bf16.msra.mxu1 %v426_v6  ;;  %372 = vmatprep.subr.bf16.mxu0 %v427_v7  ;;  %v440_v24 = vld [vmem:[%s576_s3 + $0x30] sm:$0xff]   ;;  %v26_v29 = vld [vmem:[%s578_s1] sm:$0x7]  ;;  %v442_v30 = vld [vmem:[%s576_s3 + $0x78] sm:$0xff]   ;;  %v23_v31 = vunpack.c.l.bf16 %v21_v27  ;;  %v24_v32 = vunpack.c.h.bf16 %v21_v27  ;;  %v25_v33 = vunpack.c.l.bf16 %v22_v28 }
   0x9   :  { %403 = vmatprep.subr.bf16.mxu1 %v445_v1  ;;  %v441_v26 = vld [vmem:[%s576_s3 + $0xb0] sm:$0xff]   ;;  %v35_v34 = vrot.slane %v26_v29, %v34_v21  ;;  %v31_v35 = vrot.slane %v26_v29, %v30_v23  ;;  %v39_v36 = vrot.slane %v26_v29, %v38_v25  ;;  %v443_v38 = vld [vmem:[%s576_s3 + $0x38] sm:$0xff]   ;;  %v343_v54 = vld [vmem:[%s580_s4] ss:$0 sm:$0xff] }
   0xa   :  { %v444_v42 = vld [vmem:[%s576_s3 + $0xb8] sm:$0xff]   ;;  %v334_v55 = vld [vmem:[%s579_s2] sm:$0x7] }
   0xb   :  { %373 = vmatpush3.bf16.msra.mxu0 %v428_v8  ;;  %v44_v37 = vadd.f32 %v35_v34, %v24_v32  ;;  %v43_v39 = vadd.f32 %v31_v35, %v23_v31  ;;  %v45_v40 = vadd.f32 %v39_v36, %v25_v33  ;;  %v335_v63 = vunpack.c.l.bf16 %v334_v55 }
   0xc   :  { %404 = vmatpush3.bf16.msra.mxu1 %v429_v9  ;;  %374 = vmatprep.subr.bf16.mxu0 %v430_v10 }
   0xd   :  { %405 = vmatprep.subr.bf16.mxu1 %v445_v1  ;;  %v47_v41 = vmax.f32 %v44_v37, 0.0  ;;  %v46_v43 = vmax.f32 %v43_v39, 0.0  ;;  %v48_v44 = vmax.f32 %v45_v40, 0.0 }
   0xf   :  { %375 = vmatpush3.bf16.msra.mxu0 %v431_v11  ;;  %v50_v45 = vmin.f32 %v47_v41, 6.0  ;;  %v49_v46 = vmin.f32 %v46_v43, 6.0  ;;  %v51_v47 = vmin.f32 %v48_v44, 6.0 }
  0x10   :  { %406 = vmatpush3.bf16.msra.mxu1 %v432_v12  ;;  %376 = vmatprep.subr.bf16.mxu0 %v433_v14 }
  0x11   :  { %407 = vmatprep.subr.bf16.mxu1 %v445_v1  ;;  %v53_v48 = vpack.c.bf16 %v50_v45, %v50_v45  ;;  %v52_v49 = vpack.c.bf16 %v49_v46, %v49_v46  ;;  %v54_v50 = vpack.c.bf16 %v51_v47, %v51_v47 }
  0x13   :  { %377 = vmatpush3.bf16.msra.mxu0 %v434_v15  ;;  %286 = vmatprep.mubr.bf16.mxu0 %v53_v48 }
  0x14   :  { %408 = vmatpush3.bf16.msra.mxu1 %v435_v16  ;;  %378 = vmatprep.subr.bf16.mxu0 %v436_v18 }
  0x15   :  { %409 = vmatprep.subr.bf16.mxu1 %v445_v1 }
  0x17   :  { %379 = vmatpush3.bf16.msra.mxu0 %v437_v19 }
  0x18   :  { %410 = vmatpush3.bf16.msra.mxu1 %v438_v20  ;;  %380 = vmatprep.subr.bf16.mxu0 %v439_v22 }
  0x19   :  { %411 = vmatprep.subr.bf16.mxu1 %v445_v1 }
  0x1b   :  { %381 = vmatpush3.bf16.msra.mxu0 %v440_v24 }
  0x1c   :  { %412 = vmatpush3.bf16.msra.mxu1 %v441_v26  ;;  %382 = vmatprep.subr.bf16.mxu0 %v442_v30 }
  0x1d   :  { %413 = vmatprep.subr.bf16.mxu1 %v445_v1 }
  0x1f   :  { %383 = vmatpush3.bf16.msra.mxu0 %v443_v38 }
  0x20   :  { %414 = vmatpush3.bf16.msra.mxu1 %v444_v42 }
  0x22   :  { %287 = vmatmul.mubr.bf16.vlgmr.msra.gmra.mrb[0].mxu0 %v52_v49 }
  0x23   :  { %416 = vmatmul.mubr.bf16.vlgmr.msra.gmra.mrb[0].mxu1 %v54_v50 }
  0xf5   :  { %v384_v51 = vpop.f32.mrb[0].mxu0 }
  0xf6   :  { %v328_v52 = vpop.f32.mrb[0].mxu1  ;;  %v385_v53 = vpop.f32.mrb[1].mxu0 }
  0xf7   :  { %v417_v56 = vpop.f32.mrb[1].mxu1  ;;  %v386_v57 = vadd.f32 %v385_v53, %v384_v51  ;;  %v387_v58 = vpop.f32.mrb[2].mxu0 }
  0xf8   :  { %v331_v59 = vpop.f32.mrb[2].mxu1  ;;  %v388_v60 = vpop.f32.mrb[3].mxu0 }
  0xf9   :  { %v418_v61 = vpop.f32.mrb[3].mxu1  ;;  %v289_v62 = vadd.f32 %v386_v57, %v343_v54 }
  0xfb   :  { %v329_v0 = vadd.f32 %v328_v52, %v289_v62 }
  0xfd   :  { %v336_v1 = vadd.f32 %v335_v63, %v329_v0 }
  0xff   :  { %v337_v2 = vpack.c.bf16 %v336_v1, %v336_v1 }
 0x101   :  { %338 = vst [vmem:[%s581_s5] sm:$0x7] %v337_v2 }

// kernel: forward.56
= control target key start
LH: loop header
LB: loop body
LE: loop exit
PB: predicated region body
PF: predicated region fallthrough
CT: control target
= control target key end

     0   :  { %v593_v1 = vmov 0   ;;  %v594_v32 = vmov 0.0   ;;  %vm595_vm0 = vmmov 0   ;;  %v66_v43 = vlaneseq  ;;  %s751_s1 = inlined_call_operand.vmem [shape: bf16[128,640], index: 1, kind: input, shape index: {}]   ;;  %s752_s0 = inlined_call_operand.vmem [shape: bf16[6,128], index: 0, kind: input, shape index: {}]   ;;  %s753_s2 = inlined_call_operand.vmem [shape: f32[1,640], index: 2, kind: input, shape index: {}]   ;;  %s754_s3 = inlined_call_operand.vmem [shape: bf16[6,640], index: 3, kind: output, shape index: {}]  }
   0x1   :  { %v537_v0 = vld [vmem:[%s751_s1 + $0x4] ss:$20 sps:$4 sm:$0xff]   ;;  %331 = vmatprep.mubr.bf16.mxu0 %v593_v1  ;;  %372 = vmatprep.mubr.bf16.mxu1 %v593_v1  ;;  %v539_v2 = vld [vmem:[%s751_s1] ss:$20 sps:$4 sm:$0xff]   ;;  %v542_v4 = vld [vmem:[%s751_s1 + $0x28] ss:$20 sps:$4 sm:$0xff]  }
   0x2   :  { %299 = vmatprep.subr.bf16.mxu0 %v537_v0  ;;  %v540_v3 = vld [vmem:[%s751_s1 + $0x2c] ss:$20 sps:$4 sm:$0xff]   ;;  %v543_v5 = vld [vmem:[%s751_s1 + $0x54] ss:$20 sps:$4 sm:$0xff]   ;;  %v545_v6 = vld [vmem:[%s751_s1 + $0x50] ss:$20 sps:$4 sm:$0xff]  }
   0x3   :  { %300 = vmatpush1.bf16.msra.mxu0 %v539_v2  ;;  %v546_v7 = vld [vmem:[%s751_s1 + $0x7c] ss:$20 sps:$4 sm:$0xff]   ;;  %v548_v8 = vld [vmem:[%s751_s1 + $0x78] ss:$20 sps:$4 sm:$0xff]   ;;  %v564_v12 = vld [vmem:[%s751_s1 + $0x34] ss:$20 sps:$4 sm:$0xff]  }
   0x4   :  { %301 = vmatprep.subr.bf16.mxu0 %v540_v3  ;;  %v560_v9 = vld [vmem:[%s751_s1 + $0xc] ss:$20 sps:$4 sm:$0xff]   ;;  %v563_v10 = vld [vmem:[%s751_s1 + $0x8] ss:$20 sps:$4 sm:$0xff]   ;;  %v549_v11 = vld [vmem:[%s751_s1 + $0xa4] ss:$20 sps:$4 sm:$0xff]  }
   0x5   :  { %340 = vmatprep.subr.bf16.mxu1 %v560_v9  ;;  %v566_v13 = vld [vmem:[%s751_s1 + $0x30] ss:$20 sps:$4 sm:$0xff]   ;;  %v551_v14 = vld [vmem:[%s751_s1 + $0xa0] ss:$20 sps:$4 sm:$0xff]   ;;  %v554_v17 = vld [vmem:[%s751_s1 + $0xc8] ss:$20 sps:$4 sm:$0xff]  }
   0x6   :  { %341 = vmatpush1.bf16.msra.mxu1 %v563_v10  ;;  %v568_v15 = vld [vmem:[%s751_s1 + $0x5c] ss:$20 sps:$4 sm:$0xff]   ;;  %v552_v16 = vld [vmem:[%s751_s1 + $0xcc] ss:$20 sps:$4 sm:$0xff]   ;;  %v572_v19 = vld [vmem:[%s751_s1 + $0x84] ss:$20 sps:$4 sm:$0xff]  }
   0x7   :  { %302 = vmatpush1.bf16.msra.mxu0 %v542_v4  ;;  %342 = vmatprep.subr.bf16.mxu1 %v564_v12  ;;  %v570_v18 = vld [vmem:[%s751_s1 + $0x58] ss:$20 sps:$4 sm:$0xff]   ;;  %v555_v20 = vld [vmem:[%s751_s1 + $0xf4] ss:$20 sps:$4 sm:$0xff]   ;;  %v557_v21 = vld [vmem:[%s751_s1 + $0xf0] ss:$20 sps:$4 sm:$0xff]  }
   0x8   :  { %303 = vmatprep.subr.bf16.mxu0 %v543_v5  ;;  %v574_v22 = vld [vmem:[%s751_s1 + $0x80] ss:$20 sps:$4 sm:$0xff]   ;;  %v558_v24 = vld [vmem:[%s751_s1 + $0x11c] ss:$20 sps:$4 sm:$0xff]   ;;  %v562_v26 = vld [vmem:[%s751_s1 + $0x118] ss:$20 sps:$4 sm:$0xff]  }
   0x9   :  { %v576_v23 = vld [vmem:[%s751_s1 + $0xac] ss:$20 sps:$4 sm:$0xff]   ;;  %v578_v25 = vld [vmem:[%s751_s1 + $0xa8] ss:$20 sps:$4 sm:$0xff]   ;;  %v582_v28 = vld [vmem:[%s751_s1 + $0xd0] ss:$20 sps:$4 sm:$0xff]  }
   0xa   :  { %343 = vmatpush1.bf16.msra.mxu1 %v566_v13  ;;  %v580_v27 = vld [vmem:[%s751_s1 + $0xd4] ss:$20 sps:$4 sm:$0xff]   ;;  %v15_v29 = vld [vmem:[%s752_s0] sm:$0x7]  ;;  %v567_v30 = vld [vmem:[%s751_s1 + $0x10] ss:$20 sps:$4 sm:$0xff]  }
   0xb   :  { %304 = vmatpush1.bf16.msra.mxu0 %v545_v6  ;;  %344 = vmatprep.subr.bf16.mxu1 %v568_v15  ;;  %v584_v31 = vld [vmem:[%s751_s1 + $0xfc] ss:$20 sps:$4 sm:$0xff]   ;;  %v586_v33 = vld [vmem:[%s751_s1 + $0xf8] ss:$20 sps:$4 sm:$0xff]   ;;  %v590_v36 = vld [vmem:[%s751_s1 + $0x120] ss:$20 sps:$4 sm:$0xff]  }
   0xc   :  { %305 = vmatprep.subr.bf16.mxu0 %v546_v7  ;;  %v571_v34 = vld [vmem:[%s751_s1 + $0x38] ss:$20 sps:$4 sm:$0xff]   ;;  %v575_v37 = vld [vmem:[%s751_s1 + $0x60] ss:$20 sps:$4 sm:$0xff]   ;;  %v579_v38 = vld [vmem:[%s751_s1 + $0x88] ss:$20 sps:$4 sm:$0xff]  }
   0xd   :  { %v588_v35 = vld [vmem:[%s751_s1 + $0x124] ss:$20 sps:$4 sm:$0xff]   ;;  %v591_v41 = vld [vmem:[%s751_s1 + $0x100] ss:$20 sps:$4 sm:$0xff]   ;;  %v592_v42 = vld [vmem:[%s751_s1 + $0x128] ss:$20 sps:$4 sm:$0xff]  }
   0xe   :  { %345 = vmatpush1.bf16.msra.mxu1 %v570_v18  ;;  %v583_v39 = vld [vmem:[%s751_s1 + $0xb0] ss:$20 sps:$4 sm:$0xff]   ;;  %v587_v40 = vld [vmem:[%s751_s1 + $0xd8] ss:$20 sps:$4 sm:$0xff]   ;;  %v67_v44 = vshrl.u32 %v66_v43, 7 }
   0xf   :  { %306 = vmatpush1.bf16.msra.mxu0 %v548_v8  ;;  %346 = vmatprep.subr.bf16.mxu1 %v572_v19  ;;  %v64_v46 = vld [vmem:[%s753_s2] sm:$0x1f] }
  0x10   :  { %307 = vmatprep.subr.bf16.mxu0 %v549_v11  ;;  %v68_v45 = vsub.s32 0, %v67_v44  ;;  %v72_v47 = vsub.s32 1, %v67_v44  ;;  %v76_v58 = vsub.s32 2, %v67_v44  ;;  %v80_v60 = vsub.s32 3, %v67_v44 }
  0x11   :  { %v84_v12 = vsub.s32 4, %v67_v44 }
  0x12   :  { %347 = vmatpush1.bf16.msra.mxu1 %v574_v22  ;;  %v69_v48 = vrot.slane %v64_v46, %v68_v45  ;;  %v73_v49 = vrot.slane %v64_v46, %v72_v47  ;;  %v77_v63 = vrot.slane %v64_v46, %v76_v58  ;;  %v81_v0 = vrot.slane %v64_v46, %v80_v60 }
  0x13   :  { %308 = vmatpush1.bf16.msra.mxu0 %v551_v14  ;;  %348 = vmatprep.subr.bf16.mxu1 %v576_v23  ;;  %v85_v13 = vrot.slane %v64_v46, %v84_v12 }
  0x14   :  { %309 = vmatprep.subr.bf16.mxu0 %v552_v16 }
  0x16   :  { %349 = vmatpush1.bf16.msra.mxu1 %v578_v25 }
  0x17   :  { %310 = vmatpush1.bf16.msra.mxu0 %v554_v17  ;;  %350 = vmatprep.subr.bf16.mxu1 %v580_v27 }
  0x18   :  { %311 = vmatprep.subr.bf16.mxu0 %v555_v20 }
  0x1a   :  { %351 = vmatpush1.bf16.msra.mxu1 %v582_v28 }
  0x1b   :  { %312 = vmatpush1.bf16.msra.mxu0 %v557_v21  ;;  %352 = vmatprep.subr.bf16.mxu1 %v584_v31 }
  0x1c   :  { %313 = vmatprep.subr.bf16.mxu0 %v558_v24 }
  0x1e   :  { %353 = vmatpush1.bf16.msra.mxu1 %v586_v33 }
  0x1f   :  { %314 = vmatpush1.bf16.msra.mxu0 %v562_v26  ;;  %354 = vmatprep.subr.bf16.mxu1 %v588_v35 }
  0x20   :  { %514 = vmatprep.subr.bf16.mxu0 %v594_v32 }
  0x22   :  { %332 = vmatmul.mubr.bf16.vlgmr.msra.gmra.mrb[0].mxu0 %v15_v29  ;;  %355 = vmatpush1.bf16.msra.mxu1 %v590_v36 }
  0x23   :  { %515 = vmatpush3.bf16.msra.mxu0 %v567_v30  ;;  %530 = vmatprep.mubr.msk.bf16.mxu0 %vm595_vm0, %v594_v32 }
  0x24   :  { %516 = vmatprep.subr.bf16.mxu0 %v594_v32 }
  0x25   :  { %373 = vmatmul.mubr.bf16.vlgmr.msra.gmra.mrb[0].mxu1 %v15_v29 }
  0x27   :  { %517 = vmatpush3.bf16.msra.mxu0 %v571_v34 }
  0x28   :  { %518 = vmatprep.subr.bf16.mxu0 %v594_v32 }
  0x2b   :  { %519 = vmatpush3.bf16.msra.mxu0 %v575_v37 }
  0x2c   :  { %520 = vmatprep.subr.bf16.mxu0 %v594_v32 }
  0x2f   :  { %521 = vmatpush3.bf16.msra.mxu0 %v579_v38 }
  0x30   :  { %522 = vmatprep.subr.bf16.mxu0 %v594_v32 }
  0x33   :  { %523 = vmatpush3.bf16.msra.mxu0 %v583_v39 }
  0x34   :  { %524 = vmatprep.subr.bf16.mxu0 %v594_v32 }
  0x37   :  { %525 = vmatpush3.bf16.msra.mxu0 %v587_v40 }
  0x38   :  { %526 = vmatprep.subr.bf16.mxu0 %v594_v32 }
  0x3b   :  { %527 = vmatpush3.bf16.msra.mxu0 %v591_v41 }
  0x3c   :  { %528 = vmatprep.subr.bf16.mxu0 %v594_v32 }
  0x3f   :  { %529 = vmatpush3.bf16.msra.mxu0 %v592_v42 }
  0x42   :  { %531 = vmatmul.mubr.bf16.vlgmr.msra.gmra.mrb[4].mxu0 %v15_v29 }
  0xf5   :  { %v333_v50 = vpop.f32.mrb[0].mxu0 }
  0xf6   :  { %v334_v51 = vadd.f32 %v333_v50, %v69_v48  ;;  %v335_v52 = vpop.f32.mrb[1].mxu0 }
  0xf7   :  { %v336_v53 = vadd.f32 %v335_v52, %v73_v49  ;;  %v337_v54 = vpop.f32.mrb[2].mxu0 }
  0xf8   :  { %v421_v55 = vmax.f32 %v334_v51, 0.0  ;;  %v338_v56 = vpop.f32.mrb[3].mxu0  ;;  %v374_v1 = vpop.f32.mrb[0].mxu1 }
  0xf9   :  { %v422_v57 = vmax.f32 %v336_v53, 0.0  ;;  %v375_v2 = vadd.f32 %v374_v1, %v77_v63  ;;  %v376_v3 = vpop.f32.mrb[1].mxu1 }
  0xfa   :  { %v426_v59 = vmin.f32 %v421_v55, 6.0  ;;  %v377_v4 = vadd.f32 %v376_v3, %v81_v0  ;;  %v378_v5 = vpop.f32.mrb[2].mxu1 }
  0xfb   :  { %v427_v61 = vmin.f32 %v422_v57, 6.0  ;;  %v423_v6 = vmax.f32 %v375_v2, 0.0  ;;  %v379_v7 = vpop.f32.mrb[3].mxu1 }
  0xfc   :  { %v424_v8 = vmax.f32 %v377_v4, 0.0 }
  0xfd   :  { %v502_v62 = vpack.c.bf16 %v427_v61, %v426_v59  ;;  %v428_v9 = vmin.f32 %v423_v6, 6.0 }
  0xfe   :  { %v429_v10 = vmin.f32 %v424_v8, 6.0 }
  0xff   :  { %452 = vst [vmem:[%s754_s3] sm:$0x77] %v502_v62 }
 0x100   :  { %v503_v11 = vpack.c.bf16 %v429_v10, %v428_v9 }
 0x102   :  { %453 = vst [vmem:[%s754_s3 + $0x8] sm:$0x77] %v503_v11 }
 0x115   :  { %v415_v14 = vpop.f32.mrb[4].mxu0 }
 0x116   :  { %v416_v15 = vadd.f32 %v415_v14, %v85_v13  ;;  %v532_v16 = vpop.f32.mrb[5].mxu0 }
 0x117   :  { %v418_v17 = vpop.f32.mrb[6].mxu0 }
 0x118   :  { %v425_v18 = vmax.f32 %v416_v15, 0.0  ;;  %v533_v19 = vpop.f32.mrb[7].mxu0 }
 0x11a   :  { %v430_v20 = vmin.f32 %v425_v18, 6.0 }
 0x11c   :  { %v504_v21 = vpack.c.bf16 %v430_v20, %v430_v20 }
 0x11e   :  { %454 = vst [vmem:[%s754_s3 + $0x10] sm:$0x7] %v504_v21 }

// kernel: forward.57
= control target key start
LH: loop header
LB: loop body
LE: loop exit
PB: predicated region body
PF: predicated region fallthrough
CT: control target
= control target key end

     0   :  { %v31_v19 = vlaneseq  ;;  %v688_v43 = vmov 0.0   ;;  %vm689_vm0 = vmmov 0   ;;  %s868_s3 = inlined_call_operand.vmem [shape: bf16[640,128], index: 3, kind: input, shape index: {}]   ;;  %s869_s0 = inlined_call_operand.vmem [shape: bf16[6,640], index: 0, kind: input, shape index: {}]   ;;  %s870_s1 = inlined_call_operand.vmem [shape: f32[1,640], index: 1, kind: input, shape index: {}]   ;;  %s871_s4 = inlined_call_operand.vmem [shape: f32[1,128], index: 4, kind: input, shape index: {}]   ;;  %s872_s2 = inlined_call_operand.vmem [shape: bf16[6,128], index: 2, kind: input, shape index: {}]   ;;  %s873_s5 = inlined_call_operand.vmem [shape: bf16[6,128], index: 5, kind: output, shape index: {}]  }
   0x1   :  { %v648_v0 = vld [vmem:[%s868_s3 + $0x40] sm:$0xff]   ;;  %v652_v4 = vld [vmem:[%s868_s3 + $0x48] sm:$0xff]   ;;  %v656_v8 = vld [vmem:[%s868_s3 + $0x50] sm:$0xff]  }
   0x2   :  { %v649_v1 = vld [vmem:[%s868_s3] sm:$0xff]   ;;  %573 = vmatprep.subr.bf16.mxu0 %v648_v0  ;;  %v653_v5 = vld [vmem:[%s868_s3 + $0x8] sm:$0xff]   ;;  %v657_v9 = vld [vmem:[%s868_s3 + $0x10] sm:$0xff]   ;;  %v789_v24 = vshrl.u32 %v31_v19, 7 }
   0x3   :  { %v650_v2 = vld [vmem:[%s868_s3 + $0xc0] sm:$0xff]   ;;  %574 = vmatpush3.bf16.msra.mxu0 %v649_v1  ;;  %v654_v6 = vld [vmem:[%s868_s3 + $0xc8] sm:$0xff]   ;;  %v658_v10 = vld [vmem:[%s868_s3 + $0xd0] sm:$0xff]  }
   0x4   :  { %v651_v3 = vld [vmem:[%s868_s3 + $0x80] sm:$0xff]   ;;  %595 = vmatprep.subr.bf16.mxu1 %v650_v2  ;;  %575 = vmatprep.subr.bf16.mxu0 %v652_v4  ;;  %v655_v7 = vld [vmem:[%s868_s3 + $0x88] sm:$0xff]   ;;  %v659_v11 = vld [vmem:[%s868_s3 + $0x90] sm:$0xff]   ;;  %v37_v29 = vsub.s32 1, %v789_v24  ;;  %v33_v31 = vsub.s32 0, %v789_v24  ;;  %v45_v33 = vsub.s32 3, %v789_v24 }
   0x5   :  { %596 = vmatpush3.bf16.msra.mxu1 %v651_v3  ;;  %v660_v12 = vld [vmem:[%s868_s3 + $0x58] sm:$0xff]   ;;  %v664_v16 = vld [vmem:[%s868_s3 + $0x60] sm:$0xff]   ;;  %v668_v21 = vld [vmem:[%s868_s3 + $0x68] sm:$0xff]   ;;  %v41_v35 = vsub.s32 2, %v789_v24 }
   0x6   :  { %597 = vmatprep.subr.bf16.mxu1 %v654_v6  ;;  %v661_v13 = vld [vmem:[%s868_s3 + $0x18] sm:$0xff]   ;;  %v665_v17 = vld [vmem:[%s868_s3 + $0x20] sm:$0xff]   ;;  %v669_v22 = vld [vmem:[%s868_s3 + $0x28] sm:$0xff]  }
   0x7   :  { %576 = vmatpush3.bf16.msra.mxu0 %v653_v5  ;;  %v662_v14 = vld [vmem:[%s868_s3 + $0xd8] sm:$0xff]   ;;  %v666_v18 = vld [vmem:[%s868_s3 + $0xe0] sm:$0xff]   ;;  %v670_v23 = vld [vmem:[%s868_s3 + $0xe8] sm:$0xff]   ;;  %v49_v5 = vsub.s32 4, %v789_v24 }
   0x8   :  { %577 = vmatprep.subr.bf16.mxu0 %v656_v8  ;;  %v663_v15 = vld [vmem:[%s868_s3 + $0x98] sm:$0xff]   ;;  %v667_v20 = vld [vmem:[%s868_s3 + $0xa0] sm:$0xff]   ;;  %v671_v25 = vld [vmem:[%s868_s3 + $0xa8] sm:$0xff]  }
   0x9   :  { %598 = vmatpush3.bf16.msra.mxu1 %v655_v7  ;;  %v672_v26 = vld [vmem:[%s868_s3 + $0x70] sm:$0xff]   ;;  %v676_v32 = vld [vmem:[%s868_s3 + $0x78] sm:$0xff]   ;;  %v21_v37 = vld [vmem:[%s869_s0] sm:$0x77] }
   0xa   :  { %599 = vmatprep.subr.bf16.mxu1 %v658_v10  ;;  %v673_v27 = vld [vmem:[%s868_s3 + $0x30] sm:$0xff]   ;;  %v677_v34 = vld [vmem:[%s868_s3 + $0x38] sm:$0xff]   ;;  %v29_v38 = vld [vmem:[%s870_s1] sm:$0x1f]  ;;  %v24_v39 = vunpack.c.l.bf16 %v21_v37  ;;  %v25_v40 = vunpack.c.h.bf16 %v21_v37 }
   0xb   :  { %578 = vmatpush3.bf16.msra.mxu0 %v657_v9  ;;  %v674_v28 = vld [vmem:[%s868_s3 + $0xf0] sm:$0xff]   ;;  %v678_v36 = vld [vmem:[%s868_s3 + $0xf8] sm:$0xff]   ;;  %v38_v41 = vrot.slane %v29_v38, %v37_v29  ;;  %v34_v44 = vrot.slane %v29_v38, %v33_v31  ;;  %v22_v45 = vld [vmem:[%s869_s0 + $0x8] sm:$0x77]  ;;  %v46_v46 = vrot.slane %v29_v38, %v45_v33  ;;  %v42_v47 = vrot.slane %v29_v38, %v41_v35 }
   0xc   :  { %579 = vmatprep.subr.bf16.mxu0 %v660_v12  ;;  %v675_v30 = vld [vmem:[%s868_s3 + $0xb0] sm:$0xff]   ;;  %v679_v42 = vld [vmem:[%s868_s3 + $0xb8] sm:$0xff]   ;;  %v26_v49 = vunpack.c.l.bf16 %v22_v45  ;;  %v27_v50 = vunpack.c.h.bf16 %v22_v45  ;;  %v680_v62 = vld [vmem:[%s868_s3 + $0x100] sm:$0xff]   ;;  %v50_v9 = vrot.slane %v29_v38, %v49_v5 }
   0xd   :  { %600 = vmatpush3.bf16.msra.mxu1 %v659_v11  ;;  %v57_v48 = vadd.f32 %v38_v41, %v25_v40  ;;  %v56_v51 = vadd.f32 %v34_v44, %v24_v39  ;;  %v681_v3 = vld [vmem:[%s868_s3 + $0x108] sm:$0xff]   ;;  %v682_v4 = vld [vmem:[%s868_s3 + $0x110] sm:$0xff]   ;;  %v683_v7 = vld [vmem:[%s868_s3 + $0x118] sm:$0xff]  }
   0xe   :  { %601 = vmatprep.subr.bf16.mxu1 %v662_v14  ;;  %v59_v53 = vadd.f32 %v46_v46, %v27_v50  ;;  %v58_v54 = vadd.f32 %v42_v47, %v26_v49  ;;  %v23_v6 = vld [vmem:[%s869_s0 + $0x10] sm:$0x7]  ;;  %v684_v10 = vld [vmem:[%s868_s3 + $0x120] sm:$0xff]   ;;  %v685_v12 = vld [vmem:[%s868_s3 + $0x128] sm:$0xff]  }
   0xf   :  { %580 = vmatpush3.bf16.msra.mxu0 %v661_v13  ;;  %v62_v52 = vmax.f32 %v57_v48, 0.0  ;;  %v61_v55 = vmax.f32 %v56_v51, 0.0  ;;  %v28_v8 = vunpack.c.l.bf16 %v23_v6  ;;  %v686_v14 = vld [vmem:[%s868_s3 + $0x130] sm:$0xff]   ;;  %v532_v19 = vld [vmem:[%s871_s4] ss:$0 sm:$0xff] }
  0x10   :  { %581 = vmatprep.subr.bf16.mxu0 %v664_v16  ;;  %v64_v57 = vmax.f32 %v59_v53, 0.0  ;;  %v63_v58 = vmax.f32 %v58_v54, 0.0  ;;  %v687_v16 = vld [vmem:[%s868_s3 + $0x138] sm:$0xff]   ;;  %v523_v31 = vld [vmem:[%s872_s2] sm:$0x7] }
  0x11   :  { %602 = vmatpush3.bf16.msra.mxu1 %v663_v15  ;;  %v67_v56 = vmin.f32 %v62_v52, 6.0  ;;  %v66_v59 = vmin.f32 %v61_v55, 6.0  ;;  %v60_v11 = vadd.f32 %v50_v9, %v28_v8 }
  0x12   :  { %603 = vmatprep.subr.bf16.mxu1 %v666_v18  ;;  %v69_v61 = vmin.f32 %v64_v57, 6.0  ;;  %v68_v63 = vmin.f32 %v63_v58, 6.0 }
  0x13   :  { %582 = vmatpush3.bf16.msra.mxu0 %v665_v17  ;;  %v72_v60 = vpack.c.bf16 %v67_v56, %v67_v56  ;;  %v71_v0 = vpack.c.bf16 %v66_v59, %v66_v59  ;;  %v65_v13 = vmax.f32 %v60_v11, 0.0 }
  0x14   :  { %583 = vmatprep.subr.bf16.mxu0 %v668_v21  ;;  %v74_v1 = vpack.c.bf16 %v69_v61, %v69_v61  ;;  %v73_v2 = vpack.c.bf16 %v68_v63, %v68_v63 }
  0x15   :  { %604 = vmatpush3.bf16.msra.mxu1 %v667_v20  ;;  %435 = vmatprep.mubr.bf16.mxu0 %v72_v60  ;;  %v70_v15 = vmin.f32 %v65_v13, 6.0 }
  0x16   :  { %605 = vmatprep.subr.bf16.mxu1 %v670_v23  ;;  %475 = vmatprep.mubr.bf16.mxu1 %v74_v1 }
  0x17   :  { %584 = vmatpush3.bf16.msra.mxu0 %v669_v22  ;;  %v75_v17 = vpack.c.bf16 %v70_v15, %v70_v15 }
  0x18   :  { %585 = vmatprep.subr.bf16.mxu0 %v672_v26 }
  0x19   :  { %606 = vmatpush3.bf16.msra.mxu1 %v671_v25 }
  0x1a   :  { %607 = vmatprep.subr.bf16.mxu1 %v674_v28 }
  0x1b   :  { %586 = vmatpush3.bf16.msra.mxu0 %v673_v27 }
  0x1c   :  { %587 = vmatprep.subr.bf16.mxu0 %v676_v32  ;;  %v524_v32 = vunpack.c.l.bf16 %v523_v31 }
  0x1d   :  { %608 = vmatpush3.bf16.msra.mxu1 %v675_v30 }
  0x1e   :  { %609 = vmatprep.subr.bf16.mxu1 %v678_v36 }
  0x1f   :  { %588 = vmatpush3.bf16.msra.mxu0 %v677_v34 }
  0x20   :  { %626 = vmatprep.subr.bf16.mxu0 %v688_v43 }
  0x21   :  { %610 = vmatpush3.bf16.msra.mxu1 %v679_v42 }
  0x22   :  { %436 = vmatmul.mubr.bf16.vlgmr.msra.gmra.mrb[0].mxu0 %v71_v0 }
  0x23   :  { %627 = vmatpush3.bf16.msra.mxu0 %v680_v62  ;;  %642 = vmatprep.mubr.msk.bf16.mxu0 %vm689_vm0, %v688_v43 }
  0x24   :  { %476 = vmatmul.mubr.bf16.vlgmr.msra.gmra.mrb[0].mxu1 %v73_v2  ;;  %628 = vmatprep.subr.bf16.mxu0 %v688_v43 }
  0x27   :  { %629 = vmatpush3.bf16.msra.mxu0 %v681_v3 }
  0x28   :  { %630 = vmatprep.subr.bf16.mxu0 %v688_v43 }
  0x2b   :  { %631 = vmatpush3.bf16.msra.mxu0 %v682_v4 }
  0x2c   :  { %632 = vmatprep.subr.bf16.mxu0 %v688_v43 }
  0x2f   :  { %633 = vmatpush3.bf16.msra.mxu0 %v683_v7 }
  0x30   :  { %634 = vmatprep.subr.bf16.mxu0 %v688_v43 }
  0x33   :  { %635 = vmatpush3.bf16.msra.mxu0 %v684_v10 }
  0x34   :  { %636 = vmatprep.subr.bf16.mxu0 %v688_v43 }
  0x37   :  { %637 = vmatpush3.bf16.msra.mxu0 %v685_v12 }
  0x38   :  { %638 = vmatprep.subr.bf16.mxu0 %v688_v43 }
  0x3b   :  { %639 = vmatpush3.bf16.msra.mxu0 %v686_v14 }
  0x3c   :  { %640 = vmatprep.subr.bf16.mxu0 %v688_v43 }
  0x3f   :  { %641 = vmatpush3.bf16.msra.mxu0 %v687_v16 }
  0x42   :  { %643 = vmatmul.mubr.bf16.vlgmr.msra.gmra.mrb[4].mxu0 %v75_v17 }
  0xf5   :  { %v589_v18 = vpop.f32.mrb[0].mxu0 }
  0xf6   :  { %v590_v20 = vpop.f32.mrb[1].mxu0 }
  0xf7   :  { %v591_v21 = vadd.f32 %v590_v20, %v589_v18  ;;  %v592_v22 = vpop.f32.mrb[2].mxu0  ;;  %v611_v23 = vpop.f32.mrb[0].mxu1 }
  0xf8   :  { %v593_v24 = vpop.f32.mrb[3].mxu0  ;;  %v612_v25 = vpop.f32.mrb[1].mxu1 }
  0xf9   :  { %v438_v26 = vadd.f32 %v591_v21, %v532_v19  ;;  %v613_v27 = vadd.f32 %v612_v25, %v611_v23  ;;  %v614_v28 = vpop.f32.mrb[2].mxu1 }
  0xfa   :  { %v615_v29 = vpop.f32.mrb[3].mxu1 }
  0xfb   :  { %v478_v30 = vadd.f32 %v613_v27, %v438_v26 }
 0x115   :  { %v517_v33 = vpop.f32.mrb[4].mxu0 }
 0x116   :  { %v518_v34 = vadd.f32 %v517_v33, %v478_v30  ;;  %v644_v35 = vpop.f32.mrb[5].mxu0 }
 0x117   :  { %v520_v36 = vpop.f32.mrb[6].mxu0 }
 0x118   :  { %v525_v37 = vadd.f32 %v524_v32, %v518_v34  ;;  %v645_v38 = vpop.f32.mrb[7].mxu0 }
 0x11a   :  { %v526_v39 = vpack.c.bf16 %v525_v37, %v525_v37 }
 0x11c   :  { %527 = vst [vmem:[%s873_s5] sm:$0x7] %v526_v39 }

// kernel: forward.61
= control target key start
LH: loop header
LB: loop body
LE: loop exit
PB: predicated region body
PF: predicated region fallthrough
CT: control target
= control target key end

     0   :  { %v28_v24 = vlaneseq  ;;  %s1218_s2 = inlined_call_operand.vmem [shape: bf16[640,256], index: 2, kind: input, shape index: {}]   ;;  %s1219_s0 = inlined_call_operand.vmem [shape: bf16[6,640], index: 0, kind: input, shape index: {}]   ;;  %s1220_s1 = inlined_call_operand.vmem [shape: f32[1,640], index: 1, kind: input, shape index: {}]   ;;  %s1221_s3 = inlined_call_operand.vmem [shape: f32[1,256], index: 3, kind: input, shape index: {}]   ;;  %s1222_s4 = inlined_call_operand.vmem [shape: bf16[6,256], index: 4, kind: output, shape index: {}]  }
   0x1   :  { %v792_v0 = vld [vmem:[%s1218_s2 + $0x104] ss:$8 sps:$4 sm:$0xff]   ;;  %v794_v1 = vld [vmem:[%s1218_s2 + $0x100] ss:$8 sps:$4 sm:$0xff]   ;;  %v795_v2 = vld [vmem:[%s1218_s2 + $0x114] ss:$8 sps:$4 sm:$0xff]  }
   0x2   :  { %606 = vmatprep.subr.bf16.mxu0 %v792_v0  ;;  %v797_v3 = vld [vmem:[%s1218_s2 + $0x110] ss:$8 sps:$4 sm:$0xff]   ;;  %v798_v4 = vld [vmem:[%s1218_s2 + $0x124] ss:$8 sps:$4 sm:$0xff]   ;;  %v800_v5 = vld [vmem:[%s1218_s2 + $0x120] ss:$8 sps:$4 sm:$0xff]  }
   0x3   :  { %607 = vmatpush1.bf16.msra.mxu0 %v794_v1  ;;  %v801_v6 = vld [vmem:[%s1218_s2 + $0x134] ss:$8 sps:$4 sm:$0xff]   ;;  %v813_v7 = vld [vmem:[%s1218_s2 + $0x4] ss:$8 sps:$4 sm:$0xff]   ;;  %v815_v8 = vld [vmem:[%s1218_s2] ss:$8 sps:$4 sm:$0xff]  }
   0x4   :  { %608 = vmatprep.subr.bf16.mxu0 %v795_v2  ;;  %v803_v9 = vld [vmem:[%s1218_s2 + $0x130] ss:$8 sps:$4 sm:$0xff]   ;;  %v804_v10 = vld [vmem:[%s1218_s2 + $0x144] ss:$8 sps:$4 sm:$0xff]   ;;  %565 = vmatprep.subr.bf16.mxu1 %v813_v7  ;;  %v819_v11 = vld [vmem:[%s1218_s2 + $0x14] ss:$8 sps:$4 sm:$0xff]  }
   0x5   :  { %566 = vmatpush1.bf16.msra.mxu1 %v815_v8  ;;  %v821_v12 = vld [vmem:[%s1218_s2 + $0x10] ss:$8 sps:$4 sm:$0xff]   ;;  %v806_v13 = vld [vmem:[%s1218_s2 + $0x140] ss:$8 sps:$4 sm:$0xff]   ;;  %v825_v14 = vld [vmem:[%s1218_s2 + $0x24] ss:$8 sps:$4 sm:$0xff]  }
   0x6   :  { %567 = vmatprep.subr.bf16.mxu1 %v819_v11  ;;  %v807_v15 = vld [vmem:[%s1218_s2 + $0x154] ss:$8 sps:$4 sm:$0xff]   ;;  %v827_v16 = vld [vmem:[%s1218_s2 + $0x20] ss:$8 sps:$4 sm:$0xff]   ;;  %v809_v18 = vld [vmem:[%s1218_s2 + $0x150] ss:$8 sps:$4 sm:$0xff]  }
   0x7   :  { %609 = vmatpush1.bf16.msra.mxu0 %v797_v3  ;;  %v831_v17 = vld [vmem:[%s1218_s2 + $0x34] ss:$8 sps:$4 sm:$0xff]   ;;  %v810_v19 = vld [vmem:[%s1218_s2 + $0x164] ss:$8 sps:$4 sm:$0xff]   ;;  %v833_v20 = vld [vmem:[%s1218_s2 + $0x30] ss:$8 sps:$4 sm:$0xff]  }
   0x8   :  { %610 = vmatprep.subr.bf16.mxu0 %v798_v4  ;;  %v837_v21 = vld [vmem:[%s1218_s2 + $0x44] ss:$8 sps:$4 sm:$0xff]   ;;  %v812_v22 = vld [vmem:[%s1218_s2 + $0x160] ss:$8 sps:$4 sm:$0xff]   ;;  %v816_v23 = vld [vmem:[%s1218_s2 + $0x174] ss:$8 sps:$4 sm:$0xff]  }
   0x9   :  { %568 = vmatpush1.bf16.msra.mxu1 %v821_v12  ;;  %v839_v25 = vld [vmem:[%s1218_s2 + $0x40] ss:$8 sps:$4 sm:$0xff]   ;;  %v843_v26 = vld [vmem:[%s1218_s2 + $0x54] ss:$8 sps:$4 sm:$0xff]   ;;  %v818_v27 = vld [vmem:[%s1218_s2 + $0x170] ss:$8 sps:$4 sm:$0xff]  }
   0xa   :  { %569 = vmatprep.subr.bf16.mxu1 %v825_v14  ;;  %v822_v28 = vld [vmem:[%s1218_s2 + $0x184] ss:$8 sps:$4 sm:$0xff]   ;;  %v1022_v29 = vshrl.u32 %v28_v24, 7  ;;  %v845_v30 = vld [vmem:[%s1218_s2 + $0x50] ss:$8 sps:$4 sm:$0xff]  }
   0xb   :  { %611 = vmatpush1.bf16.msra.mxu0 %v800_v5  ;;  %v849_v31 = vld [vmem:[%s1218_s2 + $0x64] ss:$8 sps:$4 sm:$0xff]   ;;  %v824_v32 = vld [vmem:[%s1218_s2 + $0x180] ss:$8 sps:$4 sm:$0xff]   ;;  %v828_v33 = vld [vmem:[%s1218_s2 + $0x194] ss:$8 sps:$4 sm:$0xff]  }
   0xc   :  { %612 = vmatprep.subr.bf16.mxu0 %v801_v6  ;;  %v42_v34 = vsub.s32 3, %v1022_v29  ;;  %v851_v35 = vld [vmem:[%s1218_s2 + $0x60] ss:$8 sps:$4 sm:$0xff]   ;;  %v855_v36 = vld [vmem:[%s1218_s2 + $0x74] ss:$8 sps:$4 sm:$0xff]   ;;  %v38_v52 = vsub.s32 2, %v1022_v29 }
   0xd   :  { %570 = vmatpush1.bf16.msra.mxu1 %v827_v16  ;;  %v19_v37 = vld [vmem:[%s1219_s0 + $0x8] sm:$0x77]  ;;  %v830_v38 = vld [vmem:[%s1218_s2 + $0x190] ss:$8 sps:$4 sm:$0xff]   ;;  %v1052_v40 = vld [vmem:[%s1220_s1] sm:$0x1f] }
   0xe   :  { %571 = vmatprep.subr.bf16.mxu1 %v831_v17  ;;  %v24_v39 = vunpack.c.h.bf16 %v19_v37  ;;  %v834_v41 = vld [vmem:[%s1218_s2 + $0x1a4] ss:$8 sps:$4 sm:$0xff]   ;;  %v43_v42 = vrot.slane %v1052_v40, %v42_v34  ;;  %v857_v43 = vld [vmem:[%s1218_s2 + $0x70] ss:$8 sps:$4 sm:$0xff]   ;;  %v836_v46 = vld [vmem:[%s1218_s2 + $0x1a0] ss:$8 sps:$4 sm:$0xff]   ;;  %v23_v57 = vunpack.c.l.bf16 %v19_v37  ;;  %v39_v58 = vrot.slane %v1052_v40, %v38_v52 }
   0xf   :  { %613 = vmatpush1.bf16.msra.mxu0 %v803_v9  ;;  %v861_v44 = vld [vmem:[%s1218_s2 + $0x84] ss:$8 sps:$4 sm:$0xff]   ;;  %v840_v47 = vld [vmem:[%s1218_s2 + $0x1b4] ss:$8 sps:$4 sm:$0xff]   ;;  %v863_v49 = vld [vmem:[%s1218_s2 + $0x80] ss:$8 sps:$4 sm:$0xff]  }
  0x10   :  { %614 = vmatprep.subr.bf16.mxu0 %v804_v10  ;;  %v56_v45 = vadd.f32 %v43_v42, %v24_v39  ;;  %v867_v50 = vld [vmem:[%s1218_s2 + $0x94] ss:$8 sps:$4 sm:$0xff]   ;;  %v842_v53 = vld [vmem:[%s1218_s2 + $0x1b0] ss:$8 sps:$4 sm:$0xff]   ;;  %v846_v54 = vld [vmem:[%s1218_s2 + $0x1c4] ss:$8 sps:$4 sm:$0xff]   ;;  %v55_v0 = vadd.f32 %v39_v58, %v23_v57 }
  0x11   :  { %572 = vmatpush1.bf16.msra.mxu1 %v833_v20  ;;  %v869_v56 = vld [vmem:[%s1218_s2 + $0x90] ss:$8 sps:$4 sm:$0xff]   ;;  %v873_v59 = vld [vmem:[%s1218_s2 + $0xa4] ss:$8 sps:$4 sm:$0xff]   ;;  %v848_v60 = vld [vmem:[%s1218_s2 + $0x1c0] ss:$8 sps:$4 sm:$0xff]  }
  0x12   :  { %573 = vmatprep.subr.bf16.mxu1 %v837_v21  ;;  %v61_v48 = vmax.f32 %v56_v45, 0.0  ;;  %v852_v61 = vld [vmem:[%s1218_s2 + $0x1d4] ss:$8 sps:$4 sm:$0xff]   ;;  %v34_v62 = vsub.s32 1, %v1022_v29  ;;  %v875_v63 = vld [vmem:[%s1218_s2 + $0xa0] ss:$8 sps:$4 sm:$0xff]  }
  0x13   :  { %615 = vmatpush1.bf16.msra.mxu0 %v806_v13  ;;  %v879_v1 = vld [vmem:[%s1218_s2 + $0xb4] ss:$8 sps:$4 sm:$0xff]   ;;  %v854_v2 = vld [vmem:[%s1218_s2 + $0x1d0] ss:$8 sps:$4 sm:$0xff]   ;;  %v858_v3 = vld [vmem:[%s1218_s2 + $0x1e4] ss:$8 sps:$4 sm:$0xff]  }
  0x14   :  { %616 = vmatprep.subr.bf16.mxu0 %v807_v15  ;;  %v66_v51 = vmin.f32 %v61_v48, 6.0  ;;  %v881_v4 = vld [vmem:[%s1218_s2 + $0xb0] ss:$8 sps:$4 sm:$0xff]   ;;  %v35_v5 = vrot.slane %v1052_v40, %v34_v62  ;;  %v30_v6 = vsub.s32 0, %v1022_v29  ;;  %v18_v7 = vld [vmem:[%s1219_s0] sm:$0x77] }
  0x15   :  { %574 = vmatpush1.bf16.msra.mxu1 %v839_v25  ;;  %v60_v8 = vmax.f32 %v55_v0, 0.0  ;;  %v885_v9 = vld [vmem:[%s1218_s2 + $0xc4] ss:$8 sps:$4 sm:$0xff]   ;;  %v22_v10 = vunpack.c.h.bf16 %v18_v7  ;;  %v860_v11 = vld [vmem:[%s1218_s2 + $0x1e0] ss:$8 sps:$4 sm:$0xff]   ;;  %v21_v13 = vunpack.c.l.bf16 %v18_v7 }
  0x16   :  { %575 = vmatprep.subr.bf16.mxu1 %v843_v26  ;;  %v71_v55 = vpack.c.bf16 %v66_v51, %v66_v51  ;;  %v864_v12 = vld [vmem:[%s1218_s2 + $0x1f4] ss:$8 sps:$4 sm:$0xff]   ;;  %v31_v15 = vrot.slane %v1052_v40, %v30_v6  ;;  %v887_v16 = vld [vmem:[%s1218_s2 + $0xc0] ss:$8 sps:$4 sm:$0xff]   ;;  %v866_v20 = vld [vmem:[%s1218_s2 + $0x1f0] ss:$8 sps:$4 sm:$0xff]  }
  0x17   :  { %617 = vmatpush1.bf16.msra.mxu0 %v809_v18  ;;  %v54_v14 = vadd.f32 %v35_v5, %v22_v10  ;;  %v65_v17 = vmin.f32 %v60_v8, 6.0  ;;  %v891_v18 = vld [vmem:[%s1218_s2 + $0xd4] ss:$8 sps:$4 sm:$0xff]   ;;  %v872_v21 = vld [vmem:[%s1218_s2 + $0x204] ss:$8 sps:$4 sm:$0xff]  }
  0x18   :  { %618 = vmatprep.subr.bf16.mxu0 %v810_v19  ;;  %638 = vmatprep.mubr.bf16.mxu0 %v71_v55  ;;  %v893_v24 = vld [vmem:[%s1218_s2 + $0xd0] ss:$8 sps:$4 sm:$0xff]   ;;  %v897_v26 = vld [vmem:[%s1218_s2 + $0xe4] ss:$8 sps:$4 sm:$0xff]   ;;  %v882_v39 = vld [vmem:[%s1218_s2 + $0x220] ss:$8 sps:$4 sm:$0xff]  }
  0x19   :  { %576 = vmatpush1.bf16.msra.mxu1 %v845_v30  ;;  %v59_v19 = vmax.f32 %v54_v14, 0.0  ;;  %v70_v25 = vpack.c.bf16 %v65_v17, %v65_v17  ;;  %v878_v30 = vld [vmem:[%s1218_s2 + $0x214] ss:$8 sps:$4 sm:$0xff]   ;;  %v876_v34 = vld [vmem:[%s1218_s2 + $0x210] ss:$8 sps:$4 sm:$0xff]  }
  0x1a   :  { %577 = vmatprep.subr.bf16.mxu1 %v849_v31  ;;  %v888_v45 = vld [vmem:[%s1218_s2 + $0x230] ss:$8 sps:$4 sm:$0xff]   ;;  %v911_v55 = vld [vmem:[%s1218_s2 + $0x274] ss:$8 sps:$4 sm:$0xff]  }
  0x1b   :  { %619 = vmatpush1.bf16.msra.mxu0 %v812_v22  ;;  %v64_v22 = vmin.f32 %v59_v19, 6.0  ;;  %v900_v52 = vld [vmem:[%s1218_s2 + $0x250] ss:$8 sps:$4 sm:$0xff]  }
  0x1c   :  { %620 = vmatprep.subr.bf16.mxu0 %v816_v23  ;;  %v53_v23 = vadd.f32 %v31_v15, %v21_v13  ;;  %v909_v57 = vld [vmem:[%s1218_s2 + $0x270] ss:$8 sps:$4 sm:$0xff]  }
  0x1d   :  { %578 = vmatpush1.bf16.msra.mxu1 %v851_v35  ;;  %v912_v35 = vmov 0  }
  0x1e   :  { %579 = vmatprep.subr.bf16.mxu1 %v855_v36  ;;  %v58_v31 = vmax.f32 %v53_v23, 0.0  ;;  %v884_v36 = vld [vmem:[%s1218_s2 + $0x224] ss:$8 sps:$4 sm:$0xff]  }
  0x1f   :  { %621 = vmatpush1.bf16.msra.mxu0 %v818_v27  ;;  %v69_v27 = vpack.c.bf16 %v64_v22, %v64_v22 }
  0x20   :  { %622 = vmatprep.subr.bf16.mxu0 %v822_v28  ;;  %v870_v28 = vld [vmem:[%s1218_s2 + $0x200] ss:$8 sps:$4 sm:$0xff]   ;;  %v63_v37 = vmin.f32 %v58_v31, 6.0 }
  0x21   :  { %580 = vmatpush1.bf16.msra.mxu1 %v857_v43  ;;  %597 = vmatprep.mubr.bf16.mxu1 %v69_v27  ;;  %v46_v43 = vsub.s32 4, %v1022_v29 }
  0x22   :  { %581 = vmatprep.subr.bf16.mxu1 %v861_v44  ;;  %v68_v42 = vpack.c.bf16 %v63_v37, %v63_v37  ;;  %v20_v44 = vld [vmem:[%s1219_s0 + $0x10] sm:$0x7] }
  0x23   :  { %623 = vmatpush1.bf16.msra.mxu0 %v824_v32  ;;  %v899_v32 = vld [vmem:[%s1218_s2 + $0xe0] ss:$8 sps:$4 sm:$0xff]   ;;  %v47_v48 = vrot.slane %v1052_v40, %v46_v43  ;;  %v908_v40 = vld [vmem:[%s1218_s2 + $0x264] ss:$8 sps:$4 sm:$0xff]  }
  0x24   :  { %624 = vmatprep.subr.bf16.mxu0 %v828_v33  ;;  %v903_v33 = vld [vmem:[%s1218_s2 + $0xf4] ss:$8 sps:$4 sm:$0xff]  }
  0x25   :  { %582 = vmatpush1.bf16.msra.mxu1 %v863_v49  ;;  %v894_v49 = vld [vmem:[%s1218_s2 + $0x240] ss:$8 sps:$4 sm:$0xff]  }
  0x26   :  { %583 = vmatprep.subr.bf16.mxu1 %v867_v50  ;;  %v902_v50 = vld [vmem:[%s1218_s2 + $0x254] ss:$8 sps:$4 sm:$0xff]  }
  0x27   :  { %625 = vmatpush1.bf16.msra.mxu0 %v830_v38  ;;  %v905_v38 = vld [vmem:[%s1218_s2 + $0xf0] ss:$8 sps:$4 sm:$0xff]  }
  0x28   :  { %626 = vmatprep.subr.bf16.mxu0 %v834_v41  ;;  %v890_v41 = vld [vmem:[%s1218_s2 + $0x234] ss:$8 sps:$4 sm:$0xff]  }
  0x29   :  { %584 = vmatpush1.bf16.msra.mxu1 %v869_v56 }
  0x2a   :  { %585 = vmatprep.subr.bf16.mxu1 %v873_v59  ;;  %v153_v59 = vld [vmem:[%s1221_s3] sm:$0x3] }
  0x2b   :  { %627 = vmatpush1.bf16.msra.mxu0 %v836_v46  ;;  %v896_v46 = vld [vmem:[%s1218_s2 + $0x244] ss:$8 sps:$4 sm:$0xff]  }
  0x2c   :  { %628 = vmatprep.subr.bf16.mxu0 %v840_v47  ;;  %v25_v47 = vunpack.c.l.bf16 %v20_v44 }
  0x2d   :  { %586 = vmatpush1.bf16.msra.mxu1 %v875_v63 }
  0x2e   :  { %587 = vmatprep.subr.bf16.mxu1 %v879_v1  ;;  %v57_v51 = vadd.f32 %v47_v48, %v25_v47 }
  0x2f   :  { %629 = vmatpush1.bf16.msra.mxu0 %v842_v53 }
  0x30   :  { %630 = vmatprep.subr.bf16.mxu0 %v846_v54  ;;  %v62_v53 = vmax.f32 %v57_v51, 0.0  ;;  %v906_v54 = vld [vmem:[%s1218_s2 + $0x260] ss:$8 sps:$4 sm:$0xff]  }
  0x31   :  { %588 = vmatpush1.bf16.msra.mxu1 %v881_v4 }
  0x32   :  { %589 = vmatprep.subr.bf16.mxu1 %v885_v9  ;;  %v67_v56 = vmin.f32 %v62_v53, 6.0 }
  0x33   :  { %631 = vmatpush1.bf16.msra.mxu0 %v848_v60  ;;  %v158_v60 = vrot.slane %v153_v59, %v30_v6 }
  0x34   :  { %632 = vmatprep.subr.bf16.mxu0 %v852_v61  ;;  %v72_v58 = vpack.c.bf16 %v67_v56, %v67_v56 }
  0x35   :  { %590 = vmatpush1.bf16.msra.mxu1 %v887_v16 }
  0x36   :  { %591 = vmatprep.subr.bf16.mxu1 %v891_v18 }
  0x37   :  { %633 = vmatpush1.bf16.msra.mxu0 %v854_v2 }
  0x38   :  { %634 = vmatprep.subr.bf16.mxu0 %v858_v3  ;;  %v162_v3 = vrot.slane %v153_v59, %v34_v62 }
  0x39   :  { %592 = vmatpush1.bf16.msra.mxu1 %v893_v24 }
  0x3a   :  { %593 = vmatprep.subr.bf16.mxu1 %v897_v26 }
  0x3b   :  { %635 = vmatpush1.bf16.msra.mxu0 %v860_v11 }
  0x3c   :  { %636 = vmatprep.subr.bf16.mxu0 %v864_v12 }
  0x3d   :  { %594 = vmatpush1.bf16.msra.mxu1 %v899_v32 }
  0x3e   :  { %595 = vmatprep.subr.bf16.mxu1 %v903_v33 }
  0x3f   :  { %637 = vmatpush1.bf16.msra.mxu0 %v866_v20 }
  0x40   :  { %647 = vmatprep.subr.bf16.mxu0 %v872_v21 }
  0x41   :  { %596 = vmatpush1.bf16.msra.mxu1 %v905_v38 }
  0x42   :  { %639 = vmatmul.mubr.bf16.vlgmr.msra.gmra.mrb[0].mxu0 %v70_v25 }
  0x43   :  { %648 = vmatpush1.bf16.msra.mxu0 %v870_v28  ;;  %679 = vmatprep.mubr.bf16.mxu0 %v912_v35 }
  0x44   :  { %649 = vmatprep.subr.bf16.mxu0 %v878_v30  ;;  %598 = vmatmul.mubr.bf16.vlgmr.msra.gmra.mrb[0].mxu1 %v68_v42 }
  0x47   :  { %650 = vmatpush1.bf16.msra.mxu0 %v876_v34 }
  0x48   :  { %651 = vmatprep.subr.bf16.mxu0 %v884_v36 }
  0x4b   :  { %652 = vmatpush1.bf16.msra.mxu0 %v882_v39 }
  0x4c   :  { %653 = vmatprep.subr.bf16.mxu0 %v890_v41 }
  0x4f   :  { %654 = vmatpush1.bf16.msra.mxu0 %v888_v45 }
  0x50   :  { %655 = vmatprep.subr.bf16.mxu0 %v896_v46 }
  0x53   :  { %656 = vmatpush1.bf16.msra.mxu0 %v894_v49 }
  0x54   :  { %657 = vmatprep.subr.bf16.mxu0 %v902_v50 }
  0x57   :  { %658 = vmatpush1.bf16.msra.mxu0 %v900_v52 }
  0x58   :  { %659 = vmatprep.subr.bf16.mxu0 %v908_v40 }
  0x5b   :  { %660 = vmatpush1.bf16.msra.mxu0 %v906_v54 }
  0x5c   :  { %661 = vmatprep.subr.bf16.mxu0 %v911_v55 }
  0x5f   :  { %662 = vmatpush1.bf16.msra.mxu0 %v909_v57 }
  0x62   :  { %680 = vmatmul.mubr.bf16.vlgmr.msra.gmra.mrb[0].mxu0 %v72_v58 }
 0x117   :  { %v599_v61 = vpop.f32.mrb[0].mxu1 }
 0x118   :  { %v600_v63 = vadd.f32 %v599_v61, %v158_v60  ;;  %v601_v0 = vpop.f32.mrb[1].mxu1 }
 0x119   :  { %v603_v1 = vpop.f32.mrb[2].mxu1  ;;  %v602_v4 = vadd.f32 %v601_v0, %v162_v3 }
 0x11a   :  { %v604_v2 = vpop.f32.mrb[3].mxu1 }
 0x135   :  { %v681_v5 = vpop.f32.mrb[0].mxu0 }
 0x136   :  { %v784_v7 = vadd.f32 %v681_v5, %v600_v63  ;;  %v683_v8 = vpop.f32.mrb[1].mxu0 }
 0x137   :  { %v786_v9 = vadd.f32 %v683_v8, %v602_v4  ;;  %v685_v10 = vpop.f32.mrb[2].mxu0 }
 0x138   :  { %v686_v11 = vpop.f32.mrb[3].mxu0 }
 0x139   :  { %v782_v12 = vpack.c.bf16 %v786_v9, %v784_v7 }
 0x13b   :  { %696 = vst [vmem:[%s1222_s4] sm:$0x77] %v782_v12 }

// kernel: forward.62
= control target key start
LH: loop header
LB: loop body
LE: loop exit
PB: predicated region body
PF: predicated region fallthrough
CT: control target
= control target key end

     0   :  { %s1632_s1 = inlined_call_operand.vmem [shape: bf16[256,1024], index: 1, kind: input, shape index: {}]   ;;  %s1633_s0 = inlined_call_operand.vmem [shape: bf16[6,256], index: 0, kind: input, shape index: {}]   ;;  %s1634_s2 = inlined_call_operand.vmem [shape: f32[1,1024], index: 2, kind: input, shape index: {}]   ;;  %s1635_s3 = inlined_call_operand.vmem [shape: bf16[6,1024], index: 3, kind: output, shape index: {}]  }
   0x1   :  { %v15_v0 = vld [vmem:[%s1632_s1] sm:$0xff]  ;;  %v16_v2 = vld [vmem:[%s1632_s1 + $0x8] sm:$0xff] }
   0x2   :  { %v19_v1 = vld [vmem:[%s1632_s1 + $0x20] sm:$0xff]  ;;  %v20_v4 = vld [vmem:[%s1632_s1 + $0x28] sm:$0xff] }
   0x3   :  { %v1055_v3 = vcombine.high %v15_v0, %v19_v1  ;;  %v1054_v5 = vcombine.low %v15_v0, %v19_v1  ;;  %v23_v6 = vld [vmem:[%s1632_s1 + $0x40] sm:$0xff]  ;;  %v1057_v8 = vcombine.high %v16_v2, %v20_v4  ;;  %v1056_v9 = vcombine.low %v16_v2, %v20_v4  ;;  %v24_v11 = vld [vmem:[%s1632_s1 + $0x48] sm:$0xff] }
   0x4   :  { %v27_v7 = vld [vmem:[%s1632_s1 + $0x60] sm:$0xff]  ;;  %v28_v12 = vld [vmem:[%s1632_s1 + $0x68] sm:$0xff] }
   0x5   :  { %v1063_v10 = vcombine.high %v23_v6, %v27_v7  ;;  %v31_v13 = vld [vmem:[%s1632_s1 + $0x80] sm:$0xff]  ;;  %832 = vmatprep.subr.bf16.mxu0 %v1055_v3  ;;  %v1065_v14 = vcombine.high %v24_v11, %v28_v12  ;;  %v32_v16 = vld [vmem:[%s1632_s1 + $0x88] sm:$0xff]  ;;  %873 = vmatprep.subr.bf16.mxu1 %v1057_v8  ;;  %v1062_v18 = vcombine.low %v23_v6, %v27_v7 }
   0x6   :  { %v35_v15 = vld [vmem:[%s1632_s1 + $0xa0] sm:$0xff]  ;;  %v36_v17 = vld [vmem:[%s1632_s1 + $0xa8] sm:$0xff]  ;;  %833 = vmatpush1.bf16.msra.mxu0 %v1054_v5  ;;  %874 = vmatpush1.bf16.msra.mxu1 %v1056_v9  ;;  %v1064_v19 = vcombine.low %v24_v11, %v28_v12 }
   0x7   :  { %834 = vmatprep.subr.bf16.mxu0 %v1063_v10  ;;  %v1071_v20 = vcombine.high %v31_v13, %v35_v15  ;;  %875 = vmatprep.subr.bf16.mxu1 %v1065_v14  ;;  %v1073_v21 = vcombine.high %v32_v16, %v36_v17  ;;  %v39_v22 = vld [vmem:[%s1632_s1 + $0xc0] sm:$0xff]  ;;  %v40_v24 = vld [vmem:[%s1632_s1 + $0xc8] sm:$0xff]  ;;  %v1070_v26 = vcombine.low %v31_v13, %v35_v15 }
   0x8   :  { %v43_v23 = vld [vmem:[%s1632_s1 + $0xe0] sm:$0xff]  ;;  %v44_v25 = vld [vmem:[%s1632_s1 + $0xe8] sm:$0xff]  ;;  %v1072_v27 = vcombine.low %v32_v16, %v36_v17 }
   0x9   :  { %v1079_v28 = vcombine.high %v39_v22, %v43_v23  ;;  %v1081_v29 = vcombine.high %v40_v24, %v44_v25  ;;  %v47_v30 = vld [vmem:[%s1632_s1 + $0x100] sm:$0xff]  ;;  %v48_v32 = vld [vmem:[%s1632_s1 + $0x108] sm:$0xff]  ;;  %v1078_v34 = vcombine.low %v39_v22, %v43_v23  ;;  %v1080_v35 = vcombine.low %v40_v24, %v44_v25 }
   0xa   :  { %835 = vmatpush1.bf16.msra.mxu0 %v1062_v18  ;;  %876 = vmatpush1.bf16.msra.mxu1 %v1064_v19  ;;  %v51_v31 = vld [vmem:[%s1632_s1 + $0x120] sm:$0xff]  ;;  %v52_v33 = vld [vmem:[%s1632_s1 + $0x128] sm:$0xff] }
   0xb   :  { %836 = vmatprep.subr.bf16.mxu0 %v1071_v20  ;;  %877 = vmatprep.subr.bf16.mxu1 %v1073_v21  ;;  %v1087_v36 = vcombine.high %v47_v30, %v51_v31  ;;  %v1089_v37 = vcombine.high %v48_v32, %v52_v33  ;;  %v55_v38 = vld [vmem:[%s1632_s1 + $0x140] sm:$0xff]  ;;  %v56_v40 = vld [vmem:[%s1632_s1 + $0x148] sm:$0xff]  ;;  %v1086_v42 = vcombine.low %v47_v30, %v51_v31 }
   0xc   :  { %v59_v39 = vld [vmem:[%s1632_s1 + $0x160] sm:$0xff]  ;;  %v60_v41 = vld [vmem:[%s1632_s1 + $0x168] sm:$0xff]  ;;  %v1088_v43 = vcombine.low %v48_v32, %v52_v33 }
   0xd   :  { %v1095_v44 = vcombine.high %v55_v38, %v59_v39  ;;  %v1097_v45 = vcombine.high %v56_v40, %v60_v41  ;;  %v63_v46 = vld [vmem:[%s1632_s1 + $0x180] sm:$0xff]  ;;  %v64_v48 = vld [vmem:[%s1632_s1 + $0x188] sm:$0xff]  ;;  %v1094_v50 = vcombine.low %v55_v38, %v59_v39  ;;  %v1096_v51 = vcombine.low %v56_v40, %v60_v41 }
   0xe   :  { %837 = vmatpush1.bf16.msra.mxu0 %v1070_v26  ;;  %878 = vmatpush1.bf16.msra.mxu1 %v1072_v27  ;;  %v67_v47 = vld [vmem:[%s1632_s1 + $0x1a0] sm:$0xff]  ;;  %v68_v49 = vld [vmem:[%s1632_s1 + $0x1a8] sm:$0xff] }
   0xf   :  { %838 = vmatprep.subr.bf16.mxu0 %v1079_v28  ;;  %879 = vmatprep.subr.bf16.mxu1 %v1081_v29  ;;  %v1103_v52 = vcombine.high %v63_v46, %v67_v47  ;;  %v1299_v53 = vld [vmem:[%s1633_s0] sm:$0x77]  ;;  %v1105_v54 = vcombine.high %v64_v48, %v68_v49  ;;  %v72_v58 = vld [vmem:[%s1632_s1 + $0x1c8] sm:$0xff]  ;;  %v1102_v60 = vcombine.low %v63_v46, %v67_v47 }
  0x10   :  { %v71_v55 = vld [vmem:[%s1632_s1 + $0x1c0] sm:$0xff]  ;;  %v1309_v57 = vcombine.high %v1299_v53, %v1299_v53  ;;  %v76_v59 = vld [vmem:[%s1632_s1 + $0x1e8] sm:$0xff]  ;;  %v1104_v61 = vcombine.low %v64_v48, %v68_v49 }
  0x11   :  { %v75_v56 = vld [vmem:[%s1632_s1 + $0x1e0] sm:$0xff]  ;;  %v1113_v63 = vcombine.high %v72_v58, %v76_v59  ;;  %v80_v2 = vld [vmem:[%s1632_s1 + $0x208] sm:$0xff]  ;;  %v1112_v5 = vcombine.low %v72_v58, %v76_v59 }
  0x12   :  { %839 = vmatpush1.bf16.msra.mxu0 %v1078_v34  ;;  %880 = vmatpush1.bf16.msra.mxu1 %v1080_v35  ;;  %v1111_v62 = vcombine.high %v71_v55, %v75_v56  ;;  %v79_v0 = vld [vmem:[%s1632_s1 + $0x200] sm:$0xff]  ;;  %v84_v3 = vld [vmem:[%s1632_s1 + $0x228] sm:$0xff]  ;;  %v1110_v4 = vcombine.low %v71_v55, %v75_v56 }
  0x13   :  { %840 = vmatprep.subr.bf16.mxu0 %v1087_v36  ;;  %881 = vmatprep.subr.bf16.mxu1 %v1089_v37  ;;  %v83_v1 = vld [vmem:[%s1632_s1 + $0x220] sm:$0xff]  ;;  %v1121_v7 = vcombine.high %v80_v2, %v84_v3  ;;  %v88_v10 = vld [vmem:[%s1632_s1 + $0x248] sm:$0xff]  ;;  %v1120_v13 = vcombine.low %v80_v2, %v84_v3  ;;  %v17_v2 = vld [vmem:[%s1632_s1 + $0x10] sm:$0xff] }
  0x14   :  { %864 = vmatprep.mubr.bf16.mxu0 %v1309_v57  ;;  %905 = vmatprep.mubr.bf16.mxu1 %v1309_v57  ;;  %v1119_v6 = vcombine.high %v79_v0, %v83_v1  ;;  %v87_v8 = vld [vmem:[%s1632_s1 + $0x240] sm:$0xff]  ;;  %v92_v11 = vld [vmem:[%s1632_s1 + $0x268] sm:$0xff]  ;;  %v1118_v12 = vcombine.low %v79_v0, %v83_v1  ;;  %v21_v3 = vld [vmem:[%s1632_s1 + $0x30] sm:$0xff] }
  0x15   :  { %v91_v9 = vld [vmem:[%s1632_s1 + $0x260] sm:$0xff]  ;;  %v1129_v15 = vcombine.high %v88_v10, %v92_v11  ;;  %v96_v18 = vld [vmem:[%s1632_s1 + $0x288] sm:$0xff]  ;;  %v1128_v21 = vcombine.low %v88_v10, %v92_v11  ;;  %v25_v10 = vld [vmem:[%s1632_s1 + $0x50] sm:$0xff] }
  0x16   :  { %841 = vmatpush1.bf16.msra.mxu0 %v1086_v42  ;;  %882 = vmatpush1.bf16.msra.mxu1 %v1088_v43  ;;  %v1127_v14 = vcombine.high %v87_v8, %v91_v9  ;;  %v95_v16 = vld [vmem:[%s1632_s1 + $0x280] sm:$0xff]  ;;  %v100_v19 = vld [vmem:[%s1632_s1 + $0x2a8] sm:$0xff]  ;;  %v1126_v20 = vcombine.low %v87_v8, %v91_v9  ;;  %v1059_v8 = vcombine.high %v17_v2, %v21_v3  ;;  %v29_v11 = vld [vmem:[%s1632_s1 + $0x70] sm:$0xff] }
  0x17   :  { %842 = vmatprep.subr.bf16.mxu0 %v1095_v44  ;;  %883 = vmatprep.subr.bf16.mxu1 %v1097_v45  ;;  %v99_v17 = vld [vmem:[%s1632_s1 + $0x2a0] sm:$0xff]  ;;  %v1137_v23 = vcombine.high %v96_v18, %v100_v19  ;;  %v104_v26 = vld [vmem:[%s1632_s1 + $0x2c8] sm:$0xff]  ;;  %v1136_v29 = vcombine.low %v96_v18, %v100_v19  ;;  %v37_v19 = vld [vmem:[%s1632_s1 + $0xb0] sm:$0xff] }
  0x18   :  { %v1135_v22 = vcombine.high %v95_v16, %v99_v17  ;;  %v103_v24 = vld [vmem:[%s1632_s1 + $0x2c0] sm:$0xff]  ;;  %v108_v27 = vld [vmem:[%s1632_s1 + $0x2e8] sm:$0xff]  ;;  %v1134_v28 = vcombine.low %v95_v16, %v99_v17  ;;  %v1067_v17 = vcombine.high %v25_v10, %v29_v11 }
  0x19   :  { %v107_v25 = vld [vmem:[%s1632_s1 + $0x2e0] sm:$0xff]  ;;  %v1145_v31 = vcombine.high %v104_v26, %v108_v27  ;;  %v112_v34 = vld [vmem:[%s1632_s1 + $0x308] sm:$0xff]  ;;  %v1144_v37 = vcombine.low %v104_v26, %v108_v27  ;;  %v41_v26 = vld [vmem:[%s1632_s1 + $0xd0] sm:$0xff] }
  0x1a   :  { %843 = vmatpush1.bf16.msra.mxu0 %v1094_v50  ;;  %884 = vmatpush1.bf16.msra.mxu1 %v1096_v51  ;;  %v1143_v30 = vcombine.high %v103_v24, %v107_v25  ;;  %v111_v32 = vld [vmem:[%s1632_s1 + $0x300] sm:$0xff]  ;;  %v116_v35 = vld [vmem:[%s1632_s1 + $0x328] sm:$0xff]  ;;  %v1142_v36 = vcombine.low %v103_v24, %v107_v25  ;;  %v45_v27 = vld [vmem:[%s1632_s1 + $0xf0] sm:$0xff] }
  0x1b   :  { %844 = vmatprep.subr.bf16.mxu0 %v1103_v52  ;;  %885 = vmatprep.subr.bf16.mxu1 %v1105_v54  ;;  %v115_v33 = vld [vmem:[%s1632_s1 + $0x320] sm:$0xff]  ;;  %v1153_v39 = vcombine.high %v112_v34, %v116_v35  ;;  %v120_v42 = vld [vmem:[%s1632_s1 + $0x348] sm:$0xff]  ;;  %v1152_v45 = vcombine.low %v112_v34, %v116_v35  ;;  %v49_v34 = vld [vmem:[%s1632_s1 + $0x110] sm:$0xff] }
  0x1c   :  { %v1151_v38 = vcombine.high %v111_v32, %v115_v33  ;;  %v119_v40 = vld [vmem:[%s1632_s1 + $0x340] sm:$0xff]  ;;  %v124_v43 = vld [vmem:[%s1632_s1 + $0x368] sm:$0xff]  ;;  %v1150_v44 = vcombine.low %v111_v32, %v115_v33  ;;  %v1083_v32 = vcombine.high %v41_v26, %v45_v27  ;;  %v53_v35 = vld [vmem:[%s1632_s1 + $0x130] sm:$0xff] }
  0x1d   :  { %v123_v41 = vld [vmem:[%s1632_s1 + $0x360] sm:$0xff]  ;;  %v1161_v47 = vcombine.high %v120_v42, %v124_v43  ;;  %v128_v50 = vld [vmem:[%s1632_s1 + $0x388] sm:$0xff]  ;;  %v1160_v54 = vcombine.low %v120_v42, %v124_v43  ;;  %v61_v42 = vld [vmem:[%s1632_s1 + $0x170] sm:$0xff] }
  0x1e   :  { %845 = vmatpush1.bf16.msra.mxu0 %v1102_v60  ;;  %886 = vmatpush1.bf16.msra.mxu1 %v1104_v61  ;;  %v1159_v46 = vcombine.high %v119_v40, %v123_v41  ;;  %v127_v48 = vld [vmem:[%s1632_s1 + $0x380] sm:$0xff]  ;;  %v132_v51 = vld [vmem:[%s1632_s1 + $0x3a8] sm:$0xff]  ;;  %v1158_v52 = vcombine.low %v119_v40, %v123_v41  ;;  %v57_v41 = vld [vmem:[%s1632_s1 + $0x150] sm:$0xff] }
  0x1f   :  { %846 = vmatprep.subr.bf16.mxu0 %v1111_v62  ;;  %887 = vmatprep.subr.bf16.mxu1 %v1113_v63  ;;  %v131_v49 = vld [vmem:[%s1632_s1 + $0x3a0] sm:$0xff]  ;;  %v1169_v56 = vcombine.high %v128_v50, %v132_v51  ;;  %v136_v60 = vld [vmem:[%s1632_s1 + $0x3c8] sm:$0xff]  ;;  %v1168_v63 = vcombine.low %v128_v50, %v132_v51  ;;  %v58_v43 = vld [vmem:[%s1632_s1 + $0x158] sm:$0xff] }
  0x20   :  { %v1167_v55 = vcombine.high %v127_v48, %v131_v49  ;;  %v135_v58 = vld [vmem:[%s1632_s1 + $0x3c0] sm:$0xff]  ;;  %v140_v61 = vld [vmem:[%s1632_s1 + $0x3e8] sm:$0xff]  ;;  %v1166_v62 = vcombine.low %v127_v48, %v131_v49  ;;  %v65_v49 = vld [vmem:[%s1632_s1 + $0x190] sm:$0xff] }
  0x21   :  { %v139_v59 = vld [vmem:[%s1632_s1 + $0x3e0] sm:$0xff]  ;;  %v1177_v1 = vcombine.high %v136_v60, %v140_v61  ;;  %v69_v50 = vld [vmem:[%s1632_s1 + $0x1b0] sm:$0xff]  ;;  %v66_v51 = vld [vmem:[%s1632_s1 + $0x198] sm:$0xff] }
  0x22   :  { %847 = vmatpush1.bf16.msra.mxu0 %v1110_v4  ;;  %888 = vmatpush1.bf16.msra.mxu1 %v1112_v5  ;;  %v1175_v0 = vcombine.high %v135_v58, %v139_v59  ;;  %v18_v4 = vld [vmem:[%s1632_s1 + $0x18] sm:$0xff] }
  0x23   :  { %848 = vmatprep.subr.bf16.mxu0 %v1119_v6  ;;  %889 = vmatprep.subr.bf16.mxu1 %v1121_v7  ;;  %v22_v5 = vld [vmem:[%s1632_s1 + $0x38] sm:$0xff]  ;;  %v1174_v6 = vcombine.low %v135_v58, %v139_v59  ;;  %v1176_v7 = vcombine.low %v136_v60, %v140_v61  ;;  %v73_v59 = vld [vmem:[%s1632_s1 + $0x1d0] sm:$0xff] }
  0x24   :  { %v1061_v9 = vcombine.high %v18_v4, %v22_v5  ;;  %v1060_v16 = vcombine.low %v18_v4, %v22_v5  ;;  %v77_v60 = vld [vmem:[%s1632_s1 + $0x1f0] sm:$0xff]  ;;  %v74_v61 = vld [vmem:[%s1632_s1 + $0x1d8] sm:$0xff] }
  0x25   :  { %v85_v4 = vld [vmem:[%s1632_s1 + $0x230] sm:$0xff]  ;;  %v82_v5 = vld [vmem:[%s1632_s1 + $0x218] sm:$0xff] }
  0x26   :  { %849 = vmatpush1.bf16.msra.mxu0 %v1118_v12  ;;  %890 = vmatpush1.bf16.msra.mxu1 %v1120_v13  ;;  %v1435_v12 = vcombine.low %v1299_v53, %v1299_v53  ;;  %v26_v13 = vld [vmem:[%s1632_s1 + $0x58] sm:$0xff]  ;;  %v33_v53 = vld [vmem:[%s1632_s1 + $0x90] sm:$0xff] }
  0x27   :  { %850 = vmatprep.subr.bf16.mxu0 %v1127_v14  ;;  %891 = vmatprep.subr.bf16.mxu1 %v1129_v15  ;;  %v30_v14 = vld [vmem:[%s1632_s1 + $0x78] sm:$0xff]  ;;  %v1058_v15 = vcombine.low %v17_v2, %v21_v3  ;;  %v1075_v24 = vcombine.high %v33_v53, %v37_v19  ;;  %v81_v3 = vld [vmem:[%s1632_s1 + $0x210] sm:$0xff] }
  0x28   :  { %v1069_v18 = vcombine.high %v26_v13, %v30_v14 }
  0x2a   :  { %851 = vmatpush1.bf16.msra.mxu0 %v1126_v20  ;;  %892 = vmatpush1.bf16.msra.mxu1 %v1128_v21  ;;  %v34_v20 = vld [vmem:[%s1632_s1 + $0x98] sm:$0xff] }
  0x2b   :  { %852 = vmatprep.subr.bf16.mxu0 %v1135_v22  ;;  %893 = vmatprep.subr.bf16.mxu1 %v1137_v23  ;;  %v38_v21 = vld [vmem:[%s1632_s1 + $0xb8] sm:$0xff]  ;;  %v1066_v22 = vcombine.low %v25_v10, %v29_v11  ;;  %v1068_v23 = vcombine.low %v26_v13, %v30_v14  ;;  %v89_v11 = vld [vmem:[%s1632_s1 + $0x250] sm:$0xff] }
  0x2c   :  { %v1077_v25 = vcombine.high %v34_v20, %v38_v21  ;;  %v93_v13 = vld [vmem:[%s1632_s1 + $0x270] sm:$0xff]  ;;  %v90_v14 = vld [vmem:[%s1632_s1 + $0x258] sm:$0xff] }
  0x2e   :  { %853 = vmatpush1.bf16.msra.mxu0 %v1134_v28  ;;  %894 = vmatpush1.bf16.msra.mxu1 %v1136_v29  ;;  %v42_v28 = vld [vmem:[%s1632_s1 + $0xd8] sm:$0xff] }
  0x2f   :  { %854 = vmatprep.subr.bf16.mxu0 %v1143_v30  ;;  %895 = vmatprep.subr.bf16.mxu1 %v1145_v31  ;;  %v46_v29 = vld [vmem:[%s1632_s1 + $0xf8] sm:$0xff]  ;;  %v1074_v30 = vcombine.low %v33_v53, %v37_v19  ;;  %v1076_v31 = vcombine.low %v34_v20, %v38_v21  ;;  %v97_v19 = vld [vmem:[%s1632_s1 + $0x290] sm:$0xff] }
  0x30   :  { %v1085_v33 = vcombine.high %v42_v28, %v46_v29  ;;  %v101_v20 = vld [vmem:[%s1632_s1 + $0x2b0] sm:$0xff]  ;;  %v98_v21 = vld [vmem:[%s1632_s1 + $0x298] sm:$0xff] }
  0x32   :  { %855 = vmatpush1.bf16.msra.mxu0 %v1142_v36  ;;  %896 = vmatpush1.bf16.msra.mxu1 %v1144_v37  ;;  %v54_v36 = vld [vmem:[%s1632_s1 + $0x138] sm:$0xff]  ;;  %v1082_v37 = vcombine.low %v41_v26, %v45_v27  ;;  %v105_v27 = vld [vmem:[%s1632_s1 + $0x2d0] sm:$0xff] }
  0x33   :  { %856 = vmatprep.subr.bf16.mxu0 %v1151_v38  ;;  %897 = vmatprep.subr.bf16.mxu1 %v1153_v39  ;;  %v1084_v38 = vcombine.low %v42_v28, %v46_v29  ;;  %v1091_v39 = vcombine.high %v49_v34, %v53_v35  ;;  %v109_v28 = vld [vmem:[%s1632_s1 + $0x2f0] sm:$0xff]  ;;  %v106_v29 = vld [vmem:[%s1632_s1 + $0x2d8] sm:$0xff] }
  0x36   :  { %857 = vmatpush1.bf16.msra.mxu0 %v1150_v44  ;;  %898 = vmatpush1.bf16.msra.mxu1 %v1152_v45  ;;  %v62_v44 = vld [vmem:[%s1632_s1 + $0x178] sm:$0xff]  ;;  %v1090_v45 = vcombine.low %v49_v34, %v53_v35  ;;  %v113_v35 = vld [vmem:[%s1632_s1 + $0x310] sm:$0xff] }
  0x37   :  { %858 = vmatprep.subr.bf16.mxu0 %v1159_v46  ;;  %899 = vmatprep.subr.bf16.mxu1 %v1161_v47  ;;  %v1099_v47 = vcombine.high %v57_v41, %v61_v42  ;;  %v1101_v48 = vcombine.high %v58_v43, %v62_v44 }
  0x3a   :  { %859 = vmatpush1.bf16.msra.mxu0 %v1158_v52  ;;  %900 = vmatpush1.bf16.msra.mxu1 %v1160_v54  ;;  %v70_v52 = vld [vmem:[%s1632_s1 + $0x1b8] sm:$0xff]  ;;  %v1098_v54 = vcombine.low %v57_v41, %v61_v42  ;;  %v121_v42 = vld [vmem:[%s1632_s1 + $0x350] sm:$0xff] }
  0x3b   :  { %860 = vmatprep.subr.bf16.mxu0 %v1167_v55  ;;  %901 = vmatprep.subr.bf16.mxu1 %v1169_v56  ;;  %v1100_v55 = vcombine.low %v58_v43, %v62_v44  ;;  %v1107_v56 = vcombine.high %v65_v49, %v69_v50  ;;  %v1109_v58 = vcombine.high %v66_v51, %v70_v52  ;;  %v125_v43 = vld [vmem:[%s1632_s1 + $0x370] sm:$0xff]  ;;  %v122_v44 = vld [vmem:[%s1632_s1 + $0x358] sm:$0xff] }
  0x3e   :  { %861 = vmatpush1.bf16.msra.mxu0 %v1166_v62  ;;  %902 = vmatpush1.bf16.msra.mxu1 %v1168_v63  ;;  %v78_v62 = vld [vmem:[%s1632_s1 + $0x1f8] sm:$0xff]  ;;  %v1106_v63 = vcombine.low %v65_v49, %v69_v50  ;;  %v129_v50 = vld [vmem:[%s1632_s1 + $0x390] sm:$0xff] }
  0x3f   :  { %862 = vmatprep.subr.bf16.mxu0 %v1175_v0  ;;  %903 = vmatprep.subr.bf16.mxu1 %v1177_v1  ;;  %v1108_v0 = vcombine.low %v66_v51, %v70_v52  ;;  %v1115_v1 = vcombine.high %v73_v59, %v77_v60  ;;  %v1117_v2 = vcombine.high %v74_v61, %v78_v62  ;;  %v133_v51 = vld [vmem:[%s1632_s1 + $0x3b0] sm:$0xff]  ;;  %v130_v52 = vld [vmem:[%s1632_s1 + $0x398] sm:$0xff] }
  0x42   :  { %863 = vmatpush1.bf16.msra.mxu0 %v1174_v6  ;;  %904 = vmatpush1.bf16.msra.mxu1 %v1176_v7  ;;  %v86_v6 = vld [vmem:[%s1632_s1 + $0x238] sm:$0xff]  ;;  %v1114_v7 = vcombine.low %v73_v59, %v77_v60  ;;  %v137_v60 = vld [vmem:[%s1632_s1 + $0x3d0] sm:$0xff] }
  0x43   :  { %914 = vmatprep.subr.bf16.mxu0 %v1059_v8  ;;  %955 = vmatprep.subr.bf16.mxu1 %v1061_v9  ;;  %v1116_v8 = vcombine.low %v74_v61, %v78_v62  ;;  %v1123_v9 = vcombine.high %v81_v3, %v85_v4  ;;  %v1125_v10 = vcombine.high %v82_v5, %v86_v6  ;;  %v141_v61 = vld [vmem:[%s1632_s1 + $0x3f0] sm:$0xff]  ;;  %v138_v62 = vld [vmem:[%s1632_s1 + $0x3d8] sm:$0xff] }
  0x45   :  { %865 = vmatmul.mubr.bf16.vlgmr.msra.gmra.mrb[0].mxu0 %v1435_v12  ;;  %906 = vmatmul.mubr.bf16.vlgmr.msra.gmra.mrb[0].mxu1 %v1435_v12 }
  0x46   :  { %915 = vmatpush1.bf16.msra.mxu0 %v1058_v15  ;;  %956 = vmatpush1.bf16.msra.mxu1 %v1060_v16  ;;  %v94_v15 = vld [vmem:[%s1632_s1 + $0x278] sm:$0xff]  ;;  %v1122_v16 = vcombine.low %v81_v3, %v85_v4  ;;  %v1178_v4 = vcombine.low %v137_v60, %v141_v61 }
  0x47   :  { %916 = vmatprep.subr.bf16.mxu0 %v1067_v17  ;;  %957 = vmatprep.subr.bf16.mxu1 %v1069_v18  ;;  %v1124_v17 = vcombine.low %v82_v5, %v86_v6  ;;  %v1131_v18 = vcombine.high %v89_v11, %v93_v13  ;;  %v1133_v53 = vcombine.high %v90_v14, %v94_v15  ;;  %v145_v6 = vlaneseq }
  0x48   :  { %946 = vmatprep.mubr.bf16.mxu0 %v1309_v57  ;;  %987 = vmatprep.mubr.bf16.mxu1 %v1309_v57  ;;  %v50_v57 = vld [vmem:[%s1632_s1 + $0x118] sm:$0xff] }
  0x49   :  { %v1093_v40 = vcombine.high %v50_v57, %v54_v36  ;;  %v1092_v46 = vcombine.low %v50_v57, %v54_v36  ;;  %v117_v57 = vld [vmem:[%s1632_s1 + $0x330] sm:$0xff]  ;;  %v114_v36 = vld [vmem:[%s1632_s1 + $0x318] sm:$0xff] }
  0x4a   :  { %917 = vmatpush1.bf16.msra.mxu0 %v1066_v22  ;;  %958 = vmatpush1.bf16.msra.mxu1 %v1068_v23  ;;  %v102_v22 = vld [vmem:[%s1632_s1 + $0x2b8] sm:$0xff]  ;;  %v1130_v23 = vcombine.low %v89_v11, %v93_v13 }
  0x4b   :  { %918 = vmatprep.subr.bf16.mxu0 %v1075_v24  ;;  %959 = vmatprep.subr.bf16.mxu1 %v1077_v25  ;;  %v1132_v24 = vcombine.low %v90_v14, %v94_v15  ;;  %v1139_v25 = vcombine.high %v97_v19, %v101_v20  ;;  %v1141_v26 = vcombine.high %v98_v21, %v102_v22 }
  0x4e   :  { %919 = vmatpush1.bf16.msra.mxu0 %v1074_v30  ;;  %960 = vmatpush1.bf16.msra.mxu1 %v1076_v31  ;;  %v110_v30 = vld [vmem:[%s1632_s1 + $0x2f8] sm:$0xff]  ;;  %v1138_v31 = vcombine.low %v97_v19, %v101_v20 }
  0x4f   :  { %920 = vmatprep.subr.bf16.mxu0 %v1083_v32  ;;  %961 = vmatprep.subr.bf16.mxu1 %v1085_v33  ;;  %v1140_v32 = vcombine.low %v98_v21, %v102_v22  ;;  %v1147_v33 = vcombine.high %v105_v27, %v109_v28  ;;  %v1149_v34 = vcombine.high %v106_v29, %v110_v30 }
  0x52   :  { %921 = vmatpush1.bf16.msra.mxu0 %v1082_v37  ;;  %962 = vmatpush1.bf16.msra.mxu1 %v1084_v38  ;;  %v118_v37 = vld [vmem:[%s1632_s1 + $0x338] sm:$0xff]  ;;  %v1146_v38 = vcombine.low %v105_v27, %v109_v28 }
  0x53   :  { %922 = vmatprep.subr.bf16.mxu0 %v1091_v39  ;;  %963 = vmatprep.subr.bf16.mxu1 %v1093_v40  ;;  %v1148_v39 = vcombine.low %v106_v29, %v110_v30  ;;  %v1155_v40 = vcombine.high %v113_v35, %v117_v57  ;;  %v1157_v41 = vcombine.high %v114_v36, %v118_v37 }
  0x56   :  { %923 = vmatpush1.bf16.msra.mxu0 %v1090_v45  ;;  %964 = vmatpush1.bf16.msra.mxu1 %v1092_v46  ;;  %v126_v45 = vld [vmem:[%s1632_s1 + $0x378] sm:$0xff]  ;;  %v1154_v46 = vcombine.low %v113_v35, %v117_v57 }
  0x57   :  { %924 = vmatprep.subr.bf16.mxu0 %v1099_v47  ;;  %965 = vmatprep.subr.bf16.mxu1 %v1101_v48  ;;  %v1156_v47 = vcombine.low %v114_v36, %v118_v37  ;;  %v1163_v48 = vcombine.high %v121_v42, %v125_v43  ;;  %v1165_v49 = vcombine.high %v122_v44, %v126_v45 }
  0x5a   :  { %925 = vmatpush1.bf16.msra.mxu0 %v1098_v54  ;;  %966 = vmatpush1.bf16.msra.mxu1 %v1100_v55  ;;  %v134_v54 = vld [vmem:[%s1632_s1 + $0x3b8] sm:$0xff]  ;;  %v1162_v55 = vcombine.low %v121_v42, %v125_v43 }
  0x5b   :  { %926 = vmatprep.subr.bf16.mxu0 %v1107_v56  ;;  %967 = vmatprep.subr.bf16.mxu1 %v1109_v58  ;;  %v1164_v56 = vcombine.low %v122_v44, %v126_v45  ;;  %v1171_v58 = vcombine.high %v129_v50, %v133_v51  ;;  %v1173_v59 = vcombine.high %v130_v52, %v134_v54 }
  0x5e   :  { %927 = vmatpush1.bf16.msra.mxu0 %v1106_v63  ;;  %968 = vmatpush1.bf16.msra.mxu1 %v1108_v0  ;;  %v142_v63 = vld [vmem:[%s1632_s1 + $0x3f8] sm:$0xff]  ;;  %v1170_v0 = vcombine.low %v129_v50, %v133_v51 }
  0x5f   :  { %928 = vmatprep.subr.bf16.mxu0 %v1115_v1  ;;  %969 = vmatprep.subr.bf16.mxu1 %v1117_v2  ;;  %v1172_v1 = vcombine.low %v130_v52, %v134_v54  ;;  %v1179_v2 = vcombine.high %v137_v60, %v141_v61  ;;  %v1181_v3 = vcombine.high %v138_v62, %v142_v63 }
  0x60   :  { %v1180_v5 = vcombine.low %v138_v62, %v142_v63 }
  0x62   :  { %929 = vmatpush1.bf16.msra.mxu0 %v1114_v7  ;;  %970 = vmatpush1.bf16.msra.mxu1 %v1116_v8  ;;  %v146_v7 = vshrl.u32 %v145_v6, 7 }
  0x63   :  { %930 = vmatprep.subr.bf16.mxu0 %v1123_v9  ;;  %971 = vmatprep.subr.bf16.mxu1 %v1125_v10  ;;  %v143_v9 = vld [vmem:[%s1634_s2] sm:$0xff] }
  0x64   :  { %v147_v8 = vsub.s32 0, %v146_v7  ;;  %v155_v10 = vsub.s32 2, %v146_v7  ;;  %v151_v11 = vsub.s32 1, %v146_v7  ;;  %v159_v13 = vsub.s32 3, %v146_v7 }
  0x65   :  { %v163_v37 = vsub.s32 4, %v146_v7 }
  0x66   :  { %931 = vmatpush1.bf16.msra.mxu0 %v1122_v16  ;;  %972 = vmatpush1.bf16.msra.mxu1 %v1124_v17  ;;  %v148_v14 = vrot.slane %v143_v9, %v147_v8  ;;  %v156_v15 = vrot.slane %v143_v9, %v155_v10  ;;  %v152_v16 = vrot.slane %v143_v9, %v151_v11 }
  0x67   :  { %932 = vmatprep.subr.bf16.mxu0 %v1131_v18  ;;  %973 = vmatprep.subr.bf16.mxu1 %v1133_v53  ;;  %v160_v17 = vrot.slane %v143_v9, %v159_v13 }
  0x6a   :  { %933 = vmatpush1.bf16.msra.mxu0 %v1130_v23  ;;  %974 = vmatpush1.bf16.msra.mxu1 %v1132_v24 }
  0x6b   :  { %934 = vmatprep.subr.bf16.mxu0 %v1139_v25  ;;  %975 = vmatprep.subr.bf16.mxu1 %v1141_v26 }
  0x6e   :  { %935 = vmatpush1.bf16.msra.mxu0 %v1138_v31  ;;  %976 = vmatpush1.bf16.msra.mxu1 %v1140_v32 }
  0x6f   :  { %936 = vmatprep.subr.bf16.mxu0 %v1147_v33  ;;  %977 = vmatprep.subr.bf16.mxu1 %v1149_v34 }
  0x72   :  { %937 = vmatpush1.bf16.msra.mxu0 %v1146_v38  ;;  %978 = vmatpush1.bf16.msra.mxu1 %v1148_v39  ;;  %v171_v38 = vsub.s32 6, %v146_v7  ;;  %v167_v39 = vsub.s32 5, %v146_v7 }
  0x73   :  { %938 = vmatprep.subr.bf16.mxu0 %v1155_v40  ;;  %979 = vmatprep.subr.bf16.mxu1 %v1157_v41  ;;  %v175_v40 = vsub.s32 7, %v146_v7  ;;  %v164_v41 = vrot.slane %v143_v9, %v163_v37 }
  0x74   :  { %v172_v42 = vrot.slane %v143_v9, %v171_v38  ;;  %v168_v43 = vrot.slane %v143_v9, %v167_v39 }
  0x75   :  { %v176_v44 = vrot.slane %v143_v9, %v175_v40 }
  0x76   :  { %939 = vmatpush1.bf16.msra.mxu0 %v1154_v46  ;;  %980 = vmatpush1.bf16.msra.mxu1 %v1156_v47 }
  0x77   :  { %940 = vmatprep.subr.bf16.mxu0 %v1163_v48  ;;  %981 = vmatprep.subr.bf16.mxu1 %v1165_v49 }
  0x7a   :  { %941 = vmatpush1.bf16.msra.mxu0 %v1162_v55  ;;  %982 = vmatpush1.bf16.msra.mxu1 %v1164_v56 }
  0x7b   :  { %942 = vmatprep.subr.bf16.mxu0 %v1171_v58  ;;  %983 = vmatprep.subr.bf16.mxu1 %v1173_v59 }
  0x7e   :  { %943 = vmatpush1.bf16.msra.mxu0 %v1170_v0  ;;  %984 = vmatpush1.bf16.msra.mxu1 %v1172_v1 }
  0x7f   :  { %944 = vmatprep.subr.bf16.mxu0 %v1179_v2  ;;  %985 = vmatprep.subr.bf16.mxu1 %v1181_v3 }
  0x82   :  { %945 = vmatpush1.bf16.msra.mxu0 %v1178_v4  ;;  %986 = vmatpush1.bf16.msra.mxu1 %v1180_v5 }
  0x85   :  { %947 = vmatmul.mubr.bf16.vlgmr.msra.gmra.mrb[4].mxu0 %v1435_v12  ;;  %988 = vmatmul.mubr.bf16.vlgmr.msra.gmra.mrb[4].mxu1 %v1435_v12 }
 0x118   :  { %v866_v18 = vpop.f32.mrb[0].mxu0  ;;  %v907_v19 = vpop.f32.mrb[0].mxu1 }
 0x119   :  { %v867_v53 = vadd.f32 %v866_v18, %v148_v14  ;;  %v868_v20 = vpop.f32.mrb[1].mxu0  ;;  %v908_v21 = vadd.f32 %v907_v19, %v156_v15  ;;  %v909_v22 = vpop.f32.mrb[1].mxu1 }
 0x11a   :  { %v869_v12 = vadd.f32 %v868_v20, %v152_v16  ;;  %v870_v23 = vpop.f32.mrb[2].mxu0  ;;  %v910_v25 = vadd.f32 %v909_v22, %v160_v17  ;;  %v911_v26 = vpop.f32.mrb[2].mxu1 }
 0x11b   :  { %v996_v24 = vmax.f32 %v867_v53, 0.0  ;;  %v871_v27 = vpop.f32.mrb[3].mxu0  ;;  %v998_v28 = vmax.f32 %v908_v21, 0.0  ;;  %v912_v30 = vpop.f32.mrb[3].mxu1 }
 0x11c   :  { %v997_v29 = vmax.f32 %v869_v12, 0.0  ;;  %v999_v32 = vmax.f32 %v910_v25, 0.0 }
 0x11d   :  { %v1004_v31 = vmin.f32 %v996_v24, 6.0  ;;  %v1006_v33 = vmin.f32 %v998_v28, 6.0 }
 0x11e   :  { %v1005_v34 = vmin.f32 %v997_v29, 6.0  ;;  %v1007_v35 = vmin.f32 %v999_v32, 6.0 }
 0x120   :  { %v1186_v57 = vpack.c.bf16 %v1005_v34, %v1004_v31  ;;  %v1187_v36 = vpack.c.bf16 %v1007_v35, %v1006_v33 }
 0x122   :  { %1044 = vst [vmem:[%s1635_s3] sm:$0x77] %v1186_v57  ;;  %1045 = vst [vmem:[%s1635_s3 + $0x8] sm:$0x77] %v1187_v36 }
 0x158   :  { %v948_v45 = vpop.f32.mrb[4].mxu0  ;;  %v989_v47 = vpop.f32.mrb[4].mxu1 }
 0x159   :  { %v949_v46 = vadd.f32 %v948_v45, %v164_v41  ;;  %v950_v48 = vpop.f32.mrb[5].mxu0  ;;  %v990_v49 = vadd.f32 %v989_v47, %v172_v42  ;;  %v991_v51 = vpop.f32.mrb[5].mxu1 }
 0x15a   :  { %v951_v50 = vadd.f32 %v950_v48, %v168_v43  ;;  %v952_v52 = vpop.f32.mrb[6].mxu0  ;;  %v992_v55 = vadd.f32 %v991_v51, %v176_v44  ;;  %v993_v56 = vpop.f32.mrb[6].mxu1 }
 0x15b   :  { %v1000_v54 = vmax.f32 %v949_v46, 0.0  ;;  %v953_v58 = vpop.f32.mrb[7].mxu0  ;;  %v1002_v59 = vmax.f32 %v990_v49, 0.0  ;;  %v994_v61 = vpop.f32.mrb[7].mxu1 }
 0x15c   :  { %v1001_v60 = vmax.f32 %v951_v50, 0.0  ;;  %v1003_v63 = vmax.f32 %v992_v55, 0.0 }
 0x15d   :  { %v1008_v62 = vmin.f32 %v1000_v54, 6.0  ;;  %v1010_v0 = vmin.f32 %v1002_v59, 6.0 }
 0x15e   :  { %v1009_v1 = vmin.f32 %v1001_v60, 6.0  ;;  %v1011_v2 = vmin.f32 %v1003_v63, 6.0 }
 0x160   :  { %v1188_v3 = vpack.c.bf16 %v1009_v1, %v1008_v62  ;;  %v1189_v4 = vpack.c.bf16 %v1011_v2, %v1010_v0 }
 0x162   :  { %1046 = vst [vmem:[%s1635_s3 + $0x10] sm:$0x77] %v1188_v3  ;;  %1047 = vst [vmem:[%s1635_s3 + $0x18] sm:$0x77] %v1189_v4 }

// kernel: forward.63
= control target key start
LH: loop header
LB: loop body
LE: loop exit
PB: predicated region body
PF: predicated region fallthrough
CT: control target
= control target key end

     0   :  { %v34_v37 = vlaneseq  ;;  %s1870_s3 = inlined_call_operand.vmem [shape: bf16[1024,256], index: 3, kind: input, shape index: {}]   ;;  %s1871_s0 = inlined_call_operand.vmem [shape: bf16[6,1024], index: 0, kind: input, shape index: {}]   ;;  %s1872_s1 = inlined_call_operand.vmem [shape: f32[1,1024], index: 1, kind: input, shape index: {}]   ;;  %s1873_s4 = inlined_call_operand.vmem [shape: f32[1,256], index: 4, kind: input, shape index: {}]   ;;  %s1874_s2 = inlined_call_operand.vmem [shape: bf16[6,256], index: 2, kind: input, shape index: {}]   ;;  %s1875_s5 = inlined_call_operand.vmem [shape: bf16[6,256], index: 5, kind: output, shape index: {}]  }
   0x1   :  { %v1198_v0 = vld [vmem:[%s1870_s3 + $0x4] ss:$8 sps:$4 sm:$0xff]   ;;  %v1202_v2 = vld [vmem:[%s1870_s3] ss:$8 sps:$4 sm:$0xff]   ;;  %v1204_v4 = vld [vmem:[%s1870_s3 + $0x14] ss:$8 sps:$4 sm:$0xff]  }
   0x2   :  { %v1200_v1 = vld [vmem:[%s1870_s3 + $0x104] ss:$8 sps:$4 sm:$0xff]   ;;  %886 = vmatprep.subr.bf16.mxu0 %v1198_v0  ;;  %v1203_v3 = vld [vmem:[%s1870_s3 + $0x100] ss:$8 sps:$4 sm:$0xff]   ;;  %v1206_v5 = vld [vmem:[%s1870_s3 + $0x114] ss:$8 sps:$4 sm:$0xff]  }
   0x3   :  { %927 = vmatprep.subr.bf16.mxu1 %v1200_v1  ;;  %887 = vmatpush1.bf16.msra.mxu0 %v1202_v2  ;;  %v1208_v6 = vld [vmem:[%s1870_s3 + $0x10] ss:$8 sps:$4 sm:$0xff]   ;;  %v1210_v8 = vld [vmem:[%s1870_s3 + $0x24] ss:$8 sps:$4 sm:$0xff]   ;;  %v1214_v10 = vld [vmem:[%s1870_s3 + $0x20] ss:$8 sps:$4 sm:$0xff]  }
   0x4   :  { %928 = vmatpush1.bf16.msra.mxu1 %v1203_v3  ;;  %888 = vmatprep.subr.bf16.mxu0 %v1204_v4  ;;  %v1209_v7 = vld [vmem:[%s1870_s3 + $0x110] ss:$8 sps:$4 sm:$0xff]   ;;  %v1212_v9 = vld [vmem:[%s1870_s3 + $0x124] ss:$8 sps:$4 sm:$0xff]   ;;  %v1215_v11 = vld [vmem:[%s1870_s3 + $0x120] ss:$8 sps:$4 sm:$0xff]  }
   0x5   :  { %929 = vmatprep.subr.bf16.mxu1 %v1206_v5  ;;  %v1216_v12 = vld [vmem:[%s1870_s3 + $0x34] ss:$8 sps:$4 sm:$0xff]   ;;  %v1220_v14 = vld [vmem:[%s1870_s3 + $0x30] ss:$8 sps:$4 sm:$0xff]   ;;  %v1222_v16 = vld [vmem:[%s1870_s3 + $0x44] ss:$8 sps:$4 sm:$0xff]  }
   0x6   :  { %v1218_v13 = vld [vmem:[%s1870_s3 + $0x134] ss:$8 sps:$4 sm:$0xff]   ;;  %v1221_v15 = vld [vmem:[%s1870_s3 + $0x130] ss:$8 sps:$4 sm:$0xff]   ;;  %v1224_v17 = vld [vmem:[%s1870_s3 + $0x144] ss:$8 sps:$4 sm:$0xff]  }
   0x7   :  { %889 = vmatpush1.bf16.msra.mxu0 %v1208_v6  ;;  %v1226_v18 = vld [vmem:[%s1870_s3 + $0x40] ss:$8 sps:$4 sm:$0xff]   ;;  %v1228_v20 = vld [vmem:[%s1870_s3 + $0x54] ss:$8 sps:$4 sm:$0xff]   ;;  %v1232_v22 = vld [vmem:[%s1870_s3 + $0x50] ss:$8 sps:$4 sm:$0xff]  }
   0x8   :  { %930 = vmatpush1.bf16.msra.mxu1 %v1209_v7  ;;  %890 = vmatprep.subr.bf16.mxu0 %v1210_v8  ;;  %v1227_v19 = vld [vmem:[%s1870_s3 + $0x140] ss:$8 sps:$4 sm:$0xff]   ;;  %v1230_v21 = vld [vmem:[%s1870_s3 + $0x154] ss:$8 sps:$4 sm:$0xff]   ;;  %v1233_v23 = vld [vmem:[%s1870_s3 + $0x150] ss:$8 sps:$4 sm:$0xff]  }
   0x9   :  { %931 = vmatprep.subr.bf16.mxu1 %v1212_v9  ;;  %v1234_v24 = vld [vmem:[%s1870_s3 + $0x64] ss:$8 sps:$4 sm:$0xff]   ;;  %v1238_v26 = vld [vmem:[%s1870_s3 + $0x60] ss:$8 sps:$4 sm:$0xff]   ;;  %v1240_v28 = vld [vmem:[%s1870_s3 + $0x74] ss:$8 sps:$4 sm:$0xff]  }
   0xa   :  { %v1236_v25 = vld [vmem:[%s1870_s3 + $0x164] ss:$8 sps:$4 sm:$0xff]   ;;  %v1239_v27 = vld [vmem:[%s1870_s3 + $0x160] ss:$8 sps:$4 sm:$0xff]   ;;  %v1242_v29 = vld [vmem:[%s1870_s3 + $0x174] ss:$8 sps:$4 sm:$0xff]  }
   0xb   :  { %891 = vmatpush1.bf16.msra.mxu0 %v1214_v10  ;;  %v1244_v30 = vld [vmem:[%s1870_s3 + $0x70] ss:$8 sps:$4 sm:$0xff]   ;;  %v1246_v32 = vld [vmem:[%s1870_s3 + $0x84] ss:$8 sps:$4 sm:$0xff]   ;;  %v1250_v34 = vld [vmem:[%s1870_s3 + $0x80] ss:$8 sps:$4 sm:$0xff]  }
   0xc   :  { %932 = vmatpush1.bf16.msra.mxu1 %v1215_v11  ;;  %892 = vmatprep.subr.bf16.mxu0 %v1216_v12  ;;  %v1245_v31 = vld [vmem:[%s1870_s3 + $0x170] ss:$8 sps:$4 sm:$0xff]   ;;  %v1248_v33 = vld [vmem:[%s1870_s3 + $0x184] ss:$8 sps:$4 sm:$0xff]   ;;  %v1251_v35 = vld [vmem:[%s1870_s3 + $0x180] ss:$8 sps:$4 sm:$0xff]  }
   0xd   :  { %933 = vmatprep.subr.bf16.mxu1 %v1218_v13  ;;  %v1252_v36 = vld [vmem:[%s1870_s3 + $0x94] ss:$8 sps:$4 sm:$0xff]   ;;  %v1256_v39 = vld [vmem:[%s1870_s3 + $0x90] ss:$8 sps:$4 sm:$0xff]   ;;  %v1258_v41 = vld [vmem:[%s1870_s3 + $0xa4] ss:$8 sps:$4 sm:$0xff]  }
   0xe   :  { %v1254_v38 = vld [vmem:[%s1870_s3 + $0x194] ss:$8 sps:$4 sm:$0xff]   ;;  %v1257_v40 = vld [vmem:[%s1870_s3 + $0x190] ss:$8 sps:$4 sm:$0xff]   ;;  %v1543_v42 = vshrl.u32 %v34_v37, 7  ;;  %v1573_v55 = vld [vmem:[%s1872_s1] sm:$0xff] }
   0xf   :  { %893 = vmatpush1.bf16.msra.mxu0 %v1220_v14  ;;  %v1260_v43 = vld [vmem:[%s1870_s3 + $0x1a4] ss:$8 sps:$4 sm:$0xff]   ;;  %v1262_v44 = vld [vmem:[%s1870_s3 + $0xa0] ss:$8 sps:$4 sm:$0xff]   ;;  %v1264_v46 = vld [vmem:[%s1870_s3 + $0xb4] ss:$8 sps:$4 sm:$0xff]  }
  0x10   :  { %934 = vmatpush1.bf16.msra.mxu1 %v1221_v15  ;;  %894 = vmatprep.subr.bf16.mxu0 %v1222_v16  ;;  %v1263_v45 = vld [vmem:[%s1870_s3 + $0x1a0] ss:$8 sps:$4 sm:$0xff]   ;;  %v40_v47 = vsub.s32 1, %v1543_v42  ;;  %v48_v48 = vsub.s32 3, %v1543_v42  ;;  %v1266_v49 = vld [vmem:[%s1870_s3 + $0x1b4] ss:$8 sps:$4 sm:$0xff]  }
  0x11   :  { %935 = vmatprep.subr.bf16.mxu1 %v1224_v17  ;;  %v1268_v50 = vld [vmem:[%s1870_s3 + $0xb0] ss:$8 sps:$4 sm:$0xff]   ;;  %v20_v51 = vld [vmem:[%s1871_s0] sm:$0x77]  ;;  %v36_v52 = vsub.s32 0, %v1543_v42  ;;  %v52_v53 = vsub.s32 4, %v1543_v42 }
  0x12   :  { %v25_v54 = vunpack.c.h.bf16 %v20_v51  ;;  %v21_v56 = vld [vmem:[%s1871_s0 + $0x8] sm:$0x77]  ;;  %v44_v57 = vsub.s32 2, %v1543_v42  ;;  %v60_v58 = vsub.s32 6, %v1543_v42  ;;  %v1269_v59 = vld [vmem:[%s1870_s3 + $0x1b0] ss:$8 sps:$4 sm:$0xff]   ;;  %v41_v61 = vrot.slane %v1573_v55, %v40_v47 }
  0x13   :  { %895 = vmatpush1.bf16.msra.mxu0 %v1226_v18  ;;  %v1270_v60 = vld [vmem:[%s1870_s3 + $0xc4] ss:$8 sps:$4 sm:$0xff]   ;;  %v27_v62 = vunpack.c.h.bf16 %v21_v56  ;;  %v49_v63 = vrot.slane %v1573_v55, %v48_v48  ;;  %v24_v1 = vunpack.c.l.bf16 %v20_v51  ;;  %v1594_v4 = vrot.slane %v1573_v55, %v52_v53  ;;  %v1274_v5 = vld [vmem:[%s1870_s3 + $0xc0] ss:$8 sps:$4 sm:$0xff]   ;;  %v1276_v11 = vld [vmem:[%s1870_s3 + $0xd4] ss:$8 sps:$4 sm:$0xff]  }
  0x14   :  { %936 = vmatpush1.bf16.msra.mxu1 %v1227_v19  ;;  %896 = vmatprep.subr.bf16.mxu0 %v1228_v20  ;;  %v1272_v0 = vld [vmem:[%s1870_s3 + $0x1c4] ss:$8 sps:$4 sm:$0xff]   ;;  %v75_v2 = vadd.f32 %v41_v61, %v25_v54  ;;  %v1275_v6 = vld [vmem:[%s1870_s3 + $0x1c0] ss:$8 sps:$4 sm:$0xff]   ;;  %v26_v7 = vunpack.c.l.bf16 %v21_v56  ;;  %v37_v8 = vrot.slane %v1573_v55, %v36_v52  ;;  %v45_v9 = vrot.slane %v1573_v55, %v44_v57  ;;  %v1278_v14 = vld [vmem:[%s1870_s3 + $0x1d4] ss:$8 sps:$4 sm:$0xff]  }
  0x15   :  { %937 = vmatprep.subr.bf16.mxu1 %v1230_v21  ;;  %v77_v3 = vadd.f32 %v49_v63, %v27_v62  ;;  %v1607_v10 = vrot.slane %v1573_v55, %v60_v58  ;;  %v1280_v17 = vld [vmem:[%s1870_s3 + $0xd0] ss:$8 sps:$4 sm:$0xff]   ;;  %v1282_v21 = vld [vmem:[%s1870_s3 + $0xe4] ss:$8 sps:$4 sm:$0xff]   ;;  %v1314_v51 = vld [vmem:[%s1870_s3 + $0x234] ss:$8 sps:$4 sm:$0xff]  }
  0x16   :  { %v83_v12 = vmax.f32 %v75_v2, 0.0  ;;  %v74_v18 = vadd.f32 %v37_v8, %v24_v1  ;;  %v76_v19 = vadd.f32 %v45_v9, %v26_v7  ;;  %v1281_v20 = vld [vmem:[%s1870_s3 + $0x1d0] ss:$8 sps:$4 sm:$0xff]   ;;  %v1311_v48 = vld [vmem:[%s1870_s3 + $0x324] ss:$8 sps:$4 sm:$0xff]   ;;  %v56_v63 = vsub.s32 5, %v1543_v42 }
  0x17   :  { %897 = vmatpush1.bf16.msra.mxu0 %v1232_v22  ;;  %v85_v13 = vmax.f32 %v77_v3, 0.0  ;;  %v1317_v53 = vld [vmem:[%s1870_s3 + $0x334] ss:$8 sps:$4 sm:$0xff]   ;;  %v1312_v54 = vld [vmem:[%s1870_s3 + $0x230] ss:$8 sps:$4 sm:$0xff]  }
  0x18   :  { %938 = vmatpush1.bf16.msra.mxu1 %v1233_v23  ;;  %898 = vmatprep.subr.bf16.mxu0 %v1234_v24  ;;  %v91_v15 = vmin.f32 %v83_v12, 6.0  ;;  %v1284_v24 = vld [vmem:[%s1870_s3 + $0x1e4] ss:$8 sps:$4 sm:$0xff]   ;;  %v1315_v56 = vld [vmem:[%s1870_s3 + $0x330] ss:$8 sps:$4 sm:$0xff]  }
  0x19   :  { %939 = vmatprep.subr.bf16.mxu1 %v1236_v25  ;;  %v93_v16 = vmin.f32 %v85_v13, 6.0  ;;  %v1286_v25 = vld [vmem:[%s1870_s3 + $0xe0] ss:$8 sps:$4 sm:$0xff]   ;;  %v1320_v57 = vld [vmem:[%s1870_s3 + $0x244] ss:$8 sps:$4 sm:$0xff]  }
  0x1a   :  { %v99_v22 = vpack.c.bf16 %v91_v15, %v91_v15  ;;  %v1323_v58 = vld [vmem:[%s1870_s3 + $0x344] ss:$8 sps:$4 sm:$0xff]   ;;  %v1326_v61 = vld [vmem:[%s1870_s3 + $0x254] ss:$8 sps:$4 sm:$0xff]   ;;  %v1324_v1 = vld [vmem:[%s1870_s3 + $0x250] ss:$8 sps:$4 sm:$0xff]  }
  0x1b   :  { %899 = vmatpush1.bf16.msra.mxu0 %v1238_v26  ;;  %v101_v23 = vpack.c.bf16 %v93_v16, %v93_v16  ;;  %v1287_v26 = vld [vmem:[%s1870_s3 + $0x1e0] ss:$8 sps:$4 sm:$0xff]   ;;  %v1329_v62 = vld [vmem:[%s1870_s3 + $0x354] ss:$8 sps:$4 sm:$0xff]   ;;  %v1327_v2 = vld [vmem:[%s1870_s3 + $0x350] ss:$8 sps:$4 sm:$0xff]  }
  0x1c   :  { %940 = vmatpush1.bf16.msra.mxu1 %v1239_v27  ;;  %900 = vmatprep.subr.bf16.mxu0 %v1240_v28  ;;  %v82_v27 = vmax.f32 %v74_v18, 0.0  ;;  %v84_v28 = vmax.f32 %v76_v19, 0.0  ;;  %v1332_v3 = vld [vmem:[%s1870_s3 + $0x264] ss:$8 sps:$4 sm:$0xff]   ;;  %v1729_v7 = vld [vmem:[%s1871_s0 + $0x10] sm:$0x77] }
  0x1d   :  { %941 = vmatprep.subr.bf16.mxu1 %v1242_v29  ;;  %918 = vmatprep.mubr.bf16.mxu0 %v99_v22  ;;  %v1288_v29 = vld [vmem:[%s1870_s3 + $0xf4] ss:$8 sps:$4 sm:$0xff]   ;;  %v29_v9 = vunpack.c.h.bf16 %v1729_v7  ;;  %v1330_v12 = vld [vmem:[%s1870_s3 + $0x260] ss:$8 sps:$4 sm:$0xff]   ;;  %v1336_v19 = vld [vmem:[%s1870_s3 + $0x270] ss:$8 sps:$4 sm:$0xff]  }
  0x1e   :  { %959 = vmatprep.mubr.bf16.mxu1 %v101_v23  ;;  %v1333_v13 = vld [vmem:[%s1870_s3 + $0x360] ss:$8 sps:$4 sm:$0xff]   ;;  %v1341_v15 = vld [vmem:[%s1870_s3 + $0x374] ss:$8 sps:$4 sm:$0xff]   ;;  %v1344_v22 = vld [vmem:[%s1870_s3 + $0x284] ss:$8 sps:$4 sm:$0xff]  }
  0x1f   :  { %901 = vmatpush1.bf16.msra.mxu0 %v1244_v30  ;;  %v1290_v30 = vld [vmem:[%s1870_s3 + $0x1f4] ss:$8 sps:$4 sm:$0xff]   ;;  %v1347_v23 = vld [vmem:[%s1870_s3 + $0x384] ss:$8 sps:$4 sm:$0xff]  }
  0x20   :  { %942 = vmatpush1.bf16.msra.mxu1 %v1245_v31  ;;  %902 = vmatprep.subr.bf16.mxu0 %v1246_v32  ;;  %v1292_v31 = vld [vmem:[%s1870_s3 + $0xf0] ss:$8 sps:$4 sm:$0xff]  }
  0x21   :  { %943 = vmatprep.subr.bf16.mxu1 %v1248_v33  ;;  %v1293_v32 = vld [vmem:[%s1870_s3 + $0x1f0] ss:$8 sps:$4 sm:$0xff]   ;;  %v90_v33 = vmin.f32 %v82_v27, 6.0  ;;  %v1342_v27 = vld [vmem:[%s1870_s3 + $0x280] ss:$8 sps:$4 sm:$0xff]  }
  0x23   :  { %903 = vmatpush1.bf16.msra.mxu0 %v1250_v34  ;;  %v92_v34 = vmin.f32 %v84_v28, 6.0  ;;  %v98_v37 = vpack.c.bf16 %v90_v33, %v90_v33  ;;  %v1345_v28 = vld [vmem:[%s1870_s3 + $0x380] ss:$8 sps:$4 sm:$0xff]   ;;  %v1351_v33 = vld [vmem:[%s1870_s3 + $0x390] ss:$8 sps:$4 sm:$0xff]  }
  0x24   :  { %944 = vmatpush1.bf16.msra.mxu1 %v1251_v35  ;;  %904 = vmatprep.subr.bf16.mxu0 %v1252_v36  ;;  %v1296_v35 = vld [vmem:[%s1870_s3 + $0x204] ss:$8 sps:$4 sm:$0xff]  }
  0x25   :  { %945 = vmatprep.subr.bf16.mxu1 %v1254_v38  ;;  %v1299_v36 = vld [vmem:[%s1870_s3 + $0x304] ss:$8 sps:$4 sm:$0xff]   ;;  %v100_v38 = vpack.c.bf16 %v92_v34, %v92_v34 }
  0x26   :  { %v1356_v34 = vld [vmem:[%s1870_s3 + $0x2a4] ss:$8 sps:$4 sm:$0xff]  }
  0x27   :  { %905 = vmatpush1.bf16.msra.mxu0 %v1256_v39  ;;  %v1294_v39 = vld [vmem:[%s1870_s3 + $0x200] ss:$8 sps:$4 sm:$0xff]  }
  0x28   :  { %946 = vmatpush1.bf16.msra.mxu1 %v1257_v40  ;;  %906 = vmatprep.subr.bf16.mxu0 %v1258_v41  ;;  %v1297_v40 = vld [vmem:[%s1870_s3 + $0x300] ss:$8 sps:$4 sm:$0xff]   ;;  %v1302_v41 = vld [vmem:[%s1870_s3 + $0x214] ss:$8 sps:$4 sm:$0xff]  }
  0x29   :  { %947 = vmatprep.subr.bf16.mxu1 %v1260_v43  ;;  %v1305_v43 = vld [vmem:[%s1870_s3 + $0x314] ss:$8 sps:$4 sm:$0xff]  }
  0x2b   :  { %907 = vmatpush1.bf16.msra.mxu0 %v1262_v44  ;;  %v1300_v44 = vld [vmem:[%s1870_s3 + $0x210] ss:$8 sps:$4 sm:$0xff]  }
  0x2c   :  { %948 = vmatpush1.bf16.msra.mxu1 %v1263_v45  ;;  %908 = vmatprep.subr.bf16.mxu0 %v1264_v46  ;;  %v1303_v45 = vld [vmem:[%s1870_s3 + $0x310] ss:$8 sps:$4 sm:$0xff]   ;;  %v1308_v46 = vld [vmem:[%s1870_s3 + $0x224] ss:$8 sps:$4 sm:$0xff]  }
  0x2d   :  { %949 = vmatprep.subr.bf16.mxu1 %v1266_v49  ;;  %v1306_v49 = vld [vmem:[%s1870_s3 + $0x220] ss:$8 sps:$4 sm:$0xff]  }
  0x2f   :  { %909 = vmatpush1.bf16.msra.mxu0 %v1268_v50  ;;  %v1309_v50 = vld [vmem:[%s1870_s3 + $0x320] ss:$8 sps:$4 sm:$0xff]  }
  0x30   :  { %950 = vmatpush1.bf16.msra.mxu1 %v1269_v59  ;;  %910 = vmatprep.subr.bf16.mxu0 %v1270_v60  ;;  %v1318_v59 = vld [vmem:[%s1870_s3 + $0x240] ss:$8 sps:$4 sm:$0xff]  }
  0x31   :  { %951 = vmatprep.subr.bf16.mxu1 %v1272_v0  ;;  %v1321_v60 = vld [vmem:[%s1870_s3 + $0x340] ss:$8 sps:$4 sm:$0xff]   ;;  %v64_v0 = vsub.s32 7, %v1543_v42 }
  0x33   :  { %911 = vmatpush1.bf16.msra.mxu0 %v1274_v5  ;;  %v1335_v5 = vld [vmem:[%s1870_s3 + $0x364] ss:$8 sps:$4 sm:$0xff]   ;;  %v65_v8 = vrot.slane %v1573_v55, %v64_v0 }
  0x34   :  { %952 = vmatpush1.bf16.msra.mxu1 %v1275_v6  ;;  %912 = vmatprep.subr.bf16.mxu0 %v1276_v11  ;;  %v57_v6 = vrot.slane %v1573_v55, %v56_v63  ;;  %v1736_v11 = vld [vmem:[%s1871_s0 + $0x18] sm:$0x77] }
  0x35   :  { %953 = vmatprep.subr.bf16.mxu1 %v1278_v14  ;;  %v31_v14 = vunpack.c.h.bf16 %v1736_v11  ;;  %v1338_v55 = vld [vmem:[%s1870_s3 + $0x274] ss:$8 sps:$4 sm:$0xff]  }
  0x36   :  { %v79_v16 = vadd.f32 %v57_v6, %v29_v9  ;;  %v1389_v63 = vld [vmem:[%s1870_s3 + $0x3f4] ss:$8 sps:$4 sm:$0xff]  }
  0x37   :  { %913 = vmatpush1.bf16.msra.mxu0 %v1280_v17  ;;  %v81_v17 = vadd.f32 %v65_v8, %v31_v14 }
  0x38   :  { %954 = vmatpush1.bf16.msra.mxu1 %v1281_v20  ;;  %914 = vmatprep.subr.bf16.mxu0 %v1282_v21  ;;  %v87_v18 = vmax.f32 %v79_v16, 0.0  ;;  %v1339_v20 = vld [vmem:[%s1870_s3 + $0x370] ss:$8 sps:$4 sm:$0xff]  }
  0x39   :  { %955 = vmatprep.subr.bf16.mxu1 %v1284_v24  ;;  %v89_v21 = vmax.f32 %v81_v17, 0.0 }
  0x3a   :  { %v95_v24 = vmin.f32 %v87_v18, 6.0 }
  0x3b   :  { %915 = vmatpush1.bf16.msra.mxu0 %v1286_v25  ;;  %v97_v25 = vmin.f32 %v89_v21, 6.0 }
  0x3c   :  { %956 = vmatpush1.bf16.msra.mxu1 %v1287_v26  ;;  %916 = vmatprep.subr.bf16.mxu0 %v1288_v29  ;;  %v103_v26 = vpack.c.bf16 %v95_v24, %v95_v24 }
  0x3d   :  { %957 = vmatprep.subr.bf16.mxu1 %v1290_v30  ;;  %v105_v29 = vpack.c.bf16 %v97_v25, %v97_v25  ;;  %v1350_v30 = vld [vmem:[%s1870_s3 + $0x294] ss:$8 sps:$4 sm:$0xff]  }
  0x3f   :  { %917 = vmatpush1.bf16.msra.mxu0 %v1292_v31  ;;  %v1353_v31 = vld [vmem:[%s1870_s3 + $0x394] ss:$8 sps:$4 sm:$0xff]  }
  0x40   :  { %958 = vmatpush1.bf16.msra.mxu1 %v1293_v32  ;;  %968 = vmatprep.subr.bf16.mxu0 %v1296_v35  ;;  %v1348_v32 = vld [vmem:[%s1870_s3 + $0x290] ss:$8 sps:$4 sm:$0xff]   ;;  %v1359_v35 = vld [vmem:[%s1870_s3 + $0x3a4] ss:$8 sps:$4 sm:$0xff]  }
  0x41   :  { %1009 = vmatprep.subr.bf16.mxu1 %v1299_v36  ;;  %v1354_v36 = vld [vmem:[%s1870_s3 + $0x2a0] ss:$8 sps:$4 sm:$0xff]  }
  0x42   :  { %919 = vmatmul.mubr.bf16.vlgmr.msra.gmra.mrb[0].mxu0 %v98_v37  ;;  %v1357_v37 = vld [vmem:[%s1870_s3 + $0x3a0] ss:$8 sps:$4 sm:$0xff]  }
  0x43   :  { %960 = vmatmul.mubr.bf16.vlgmr.msra.gmra.mrb[0].mxu1 %v100_v38  ;;  %969 = vmatpush1.bf16.msra.mxu0 %v1294_v39  ;;  %v1362_v38 = vld [vmem:[%s1870_s3 + $0x2b4] ss:$8 sps:$4 sm:$0xff]  }
  0x44   :  { %1010 = vmatpush1.bf16.msra.mxu1 %v1297_v40  ;;  %970 = vmatprep.subr.bf16.mxu0 %v1302_v41  ;;  %v1365_v39 = vld [vmem:[%s1870_s3 + $0x3b4] ss:$8 sps:$4 sm:$0xff]   ;;  %v1360_v40 = vld [vmem:[%s1870_s3 + $0x2b0] ss:$8 sps:$4 sm:$0xff]  }
  0x45   :  { %1011 = vmatprep.subr.bf16.mxu1 %v1305_v43  ;;  %1000 = vmatprep.mubr.bf16.mxu0 %v103_v26  ;;  %v1363_v41 = vld [vmem:[%s1870_s3 + $0x3b0] ss:$8 sps:$4 sm:$0xff]   ;;  %v1368_v43 = vld [vmem:[%s1870_s3 + $0x2c4] ss:$8 sps:$4 sm:$0xff]  }
  0x46   :  { %1041 = vmatprep.mubr.bf16.mxu1 %v105_v29 }
  0x47   :  { %971 = vmatpush1.bf16.msra.mxu0 %v1300_v44  ;;  %v1371_v44 = vld [vmem:[%s1870_s3 + $0x3c4] ss:$8 sps:$4 sm:$0xff]  }
  0x48   :  { %1012 = vmatpush1.bf16.msra.mxu1 %v1303_v45  ;;  %972 = vmatprep.subr.bf16.mxu0 %v1308_v46  ;;  %v28_v45 = vunpack.c.l.bf16 %v1729_v7  ;;  %v30_v46 = vunpack.c.l.bf16 %v1736_v11  ;;  %v234_v7 = vld [vmem:[%s1873_s4] sm:$0x3] }
  0x49   :  { %1013 = vmatprep.subr.bf16.mxu1 %v1311_v48  ;;  %v1366_v48 = vld [vmem:[%s1870_s3 + $0x2c0] ss:$8 sps:$4 sm:$0xff]   ;;  %v239_v8 = vrot.slane %v234_v7, %v36_v52  ;;  %v243_v9 = vrot.slane %v234_v7, %v40_v47 }
  0x4b   :  { %973 = vmatpush1.bf16.msra.mxu0 %v1306_v49  ;;  %v1369_v49 = vld [vmem:[%s1870_s3 + $0x3c0] ss:$8 sps:$4 sm:$0xff]  }
  0x4c   :  { %1014 = vmatpush1.bf16.msra.mxu1 %v1309_v50  ;;  %974 = vmatprep.subr.bf16.mxu0 %v1314_v51  ;;  %v1374_v50 = vld [vmem:[%s1870_s3 + $0x2d4] ss:$8 sps:$4 sm:$0xff]  }
  0x4d   :  { %1015 = vmatprep.subr.bf16.mxu1 %v1317_v53  ;;  %v1377_v51 = vld [vmem:[%s1870_s3 + $0x3d4] ss:$8 sps:$4 sm:$0xff]   ;;  %v78_v53 = vadd.f32 %v1594_v4, %v28_v45  ;;  %v1383_v4 = vld [vmem:[%s1870_s3 + $0x3e4] ss:$8 sps:$4 sm:$0xff]  }
  0x4f   :  { %975 = vmatpush1.bf16.msra.mxu0 %v1312_v54  ;;  %v80_v54 = vadd.f32 %v1607_v10, %v30_v46  ;;  %v86_v10 = vmax.f32 %v78_v53, 0.0 }
  0x50   :  { %1016 = vmatpush1.bf16.msra.mxu1 %v1315_v56  ;;  %976 = vmatprep.subr.bf16.mxu0 %v1320_v57  ;;  %v1372_v56 = vld [vmem:[%s1870_s3 + $0x2d0] ss:$8 sps:$4 sm:$0xff]  }
  0x51   :  { %1017 = vmatprep.subr.bf16.mxu1 %v1323_v58  ;;  %v1375_v57 = vld [vmem:[%s1870_s3 + $0x3d0] ss:$8 sps:$4 sm:$0xff]   ;;  %v1380_v58 = vld [vmem:[%s1870_s3 + $0x2e4] ss:$8 sps:$4 sm:$0xff]   ;;  %v94_v0 = vmin.f32 %v86_v10, 6.0 }
  0x53   :  { %977 = vmatpush1.bf16.msra.mxu0 %v1318_v59  ;;  %v88_v59 = vmax.f32 %v80_v54, 0.0 }
  0x54   :  { %1018 = vmatpush1.bf16.msra.mxu1 %v1321_v60  ;;  %978 = vmatprep.subr.bf16.mxu0 %v1326_v61  ;;  %v1378_v60 = vld [vmem:[%s1870_s3 + $0x2e0] ss:$8 sps:$4 sm:$0xff]  }
  0x55   :  { %1019 = vmatprep.subr.bf16.mxu1 %v1329_v62  ;;  %v1381_v61 = vld [vmem:[%s1870_s3 + $0x3e0] ss:$8 sps:$4 sm:$0xff]   ;;  %v1386_v62 = vld [vmem:[%s1870_s3 + $0x2f4] ss:$8 sps:$4 sm:$0xff]  }
  0x57   :  { %979 = vmatpush1.bf16.msra.mxu0 %v1324_v1  ;;  %v96_v1 = vmin.f32 %v88_v59, 6.0 }
  0x58   :  { %1020 = vmatpush1.bf16.msra.mxu1 %v1327_v2  ;;  %980 = vmatprep.subr.bf16.mxu0 %v1332_v3  ;;  %v1384_v2 = vld [vmem:[%s1870_s3 + $0x2f0] ss:$8 sps:$4 sm:$0xff]  }
  0x59   :  { %1021 = vmatprep.subr.bf16.mxu1 %v1335_v5  ;;  %v1387_v3 = vld [vmem:[%s1870_s3 + $0x3f0] ss:$8 sps:$4 sm:$0xff]   ;;  %v102_v5 = vpack.c.bf16 %v94_v0, %v94_v0  ;;  %v104_v6 = vpack.c.bf16 %v96_v1, %v96_v1 }
  0x5b   :  { %981 = vmatpush1.bf16.msra.mxu0 %v1330_v12 }
  0x5c   :  { %1022 = vmatpush1.bf16.msra.mxu1 %v1333_v13  ;;  %982 = vmatprep.subr.bf16.mxu0 %v1338_v55 }
  0x5d   :  { %1023 = vmatprep.subr.bf16.mxu1 %v1341_v15 }
  0x5f   :  { %983 = vmatpush1.bf16.msra.mxu0 %v1336_v19 }
  0x60   :  { %1024 = vmatpush1.bf16.msra.mxu1 %v1339_v20  ;;  %984 = vmatprep.subr.bf16.mxu0 %v1344_v22  ;;  %v1050_v22 = vld [vmem:[%s1874_s2] sm:$0x77] }
  0x61   :  { %1025 = vmatprep.subr.bf16.mxu1 %v1347_v23  ;;  %v1051_v47 = vunpack.c.l.bf16 %v1050_v22 }
  0x63   :  { %985 = vmatpush1.bf16.msra.mxu0 %v1342_v27  ;;  %v1052_v27 = vunpack.c.h.bf16 %v1050_v22 }
  0x64   :  { %1026 = vmatpush1.bf16.msra.mxu1 %v1345_v28  ;;  %986 = vmatprep.subr.bf16.mxu0 %v1350_v30 }
  0x65   :  { %1027 = vmatprep.subr.bf16.mxu1 %v1353_v31 }
  0x67   :  { %987 = vmatpush1.bf16.msra.mxu0 %v1348_v32 }
  0x68   :  { %1028 = vmatpush1.bf16.msra.mxu1 %v1351_v33  ;;  %988 = vmatprep.subr.bf16.mxu0 %v1356_v34 }
  0x69   :  { %1029 = vmatprep.subr.bf16.mxu1 %v1359_v35 }
  0x6b   :  { %989 = vmatpush1.bf16.msra.mxu0 %v1354_v36 }
  0x6c   :  { %1030 = vmatpush1.bf16.msra.mxu1 %v1357_v37  ;;  %990 = vmatprep.subr.bf16.mxu0 %v1362_v38 }
  0x6d   :  { %1031 = vmatprep.subr.bf16.mxu1 %v1365_v39 }
  0x6f   :  { %991 = vmatpush1.bf16.msra.mxu0 %v1360_v40 }
  0x70   :  { %1032 = vmatpush1.bf16.msra.mxu1 %v1363_v41  ;;  %992 = vmatprep.subr.bf16.mxu0 %v1368_v43 }
  0x71   :  { %1033 = vmatprep.subr.bf16.mxu1 %v1371_v44 }
  0x73   :  { %993 = vmatpush1.bf16.msra.mxu0 %v1366_v48 }
  0x74   :  { %1034 = vmatpush1.bf16.msra.mxu1 %v1369_v49  ;;  %994 = vmatprep.subr.bf16.mxu0 %v1374_v50 }
  0x75   :  { %1035 = vmatprep.subr.bf16.mxu1 %v1377_v51 }
  0x77   :  { %995 = vmatpush1.bf16.msra.mxu0 %v1372_v56 }
  0x78   :  { %1036 = vmatpush1.bf16.msra.mxu1 %v1375_v57  ;;  %996 = vmatprep.subr.bf16.mxu0 %v1380_v58 }
  0x79   :  { %1037 = vmatprep.subr.bf16.mxu1 %v1383_v4 }
  0x7b   :  { %997 = vmatpush1.bf16.msra.mxu0 %v1378_v60 }
  0x7c   :  { %1038 = vmatpush1.bf16.msra.mxu1 %v1381_v61  ;;  %998 = vmatprep.subr.bf16.mxu0 %v1386_v62 }
  0x7d   :  { %1039 = vmatprep.subr.bf16.mxu1 %v1389_v63 }
  0x7f   :  { %999 = vmatpush1.bf16.msra.mxu0 %v1384_v2 }
  0x80   :  { %1040 = vmatpush1.bf16.msra.mxu1 %v1387_v3 }
  0x82   :  { %1001 = vmatmul.mubr.bf16.vlgmr.msra.gmra.mrb[4].mxu0 %v102_v5 }
  0x83   :  { %1042 = vmatmul.mubr.bf16.vlgmr.msra.gmra.mrb[4].mxu1 %v104_v6 }
 0x115   :  { %v920_v11 = vpop.f32.mrb[0].mxu0 }
 0x116   :  { %v961_v12 = vpop.f32.mrb[0].mxu1  ;;  %v921_v13 = vadd.f32 %v920_v11, %v239_v8  ;;  %v922_v14 = vpop.f32.mrb[1].mxu0 }
 0x117   :  { %v963_v55 = vpop.f32.mrb[1].mxu1  ;;  %v923_v15 = vadd.f32 %v922_v14, %v243_v9  ;;  %v924_v16 = vpop.f32.mrb[2].mxu0 }
 0x118   :  { %v965_v17 = vpop.f32.mrb[2].mxu1  ;;  %v962_v18 = vadd.f32 %v961_v12, %v921_v13  ;;  %v925_v19 = vpop.f32.mrb[3].mxu0 }
 0x119   :  { %v966_v20 = vpop.f32.mrb[3].mxu1  ;;  %v964_v21 = vadd.f32 %v963_v55, %v923_v15 }
 0x155   :  { %v1002_v52 = vpop.f32.mrb[4].mxu0 }
 0x156   :  { %v1043_v23 = vpop.f32.mrb[4].mxu1  ;;  %v1003_v42 = vadd.f32 %v1002_v52, %v962_v18  ;;  %v1004_v24 = vpop.f32.mrb[5].mxu0 }
 0x157   :  { %v1045_v25 = vpop.f32.mrb[5].mxu1  ;;  %v1005_v26 = vadd.f32 %v1004_v24, %v964_v21  ;;  %v1006_v28 = vpop.f32.mrb[6].mxu0 }
 0x158   :  { %v1047_v29 = vpop.f32.mrb[6].mxu1  ;;  %v1044_v30 = vadd.f32 %v1043_v23, %v1003_v42  ;;  %v1007_v31 = vpop.f32.mrb[7].mxu0 }
 0x159   :  { %v1048_v32 = vpop.f32.mrb[7].mxu1  ;;  %v1046_v33 = vadd.f32 %v1045_v25, %v1005_v26 }
 0x15a   :  { %v1053_v34 = vadd.f32 %v1051_v47, %v1044_v30 }
 0x15b   :  { %v1054_v35 = vadd.f32 %v1052_v27, %v1046_v33 }
 0x15d   :  { %v1197_v36 = vpack.c.bf16 %v1054_v35, %v1053_v34 }
 0x15f   :  { %1063 = vst [vmem:[%s1875_s5] sm:$0x77] %v1197_v36 }

// kernel: forward.67
= control target key start
LH: loop header
LB: loop body
LE: loop exit
PB: predicated region body
PF: predicated region fallthrough
CT: control target
= control target key end

     0   :  { %v32_v37 = vlaneseq  ;;  %s2986_s2 = inlined_call_operand.vmem [shape: bf16[1024,384], index: 2, kind: input, shape index: {}]   ;;  %s2987_s0 = inlined_call_operand.vmem [shape: bf16[6,1024], index: 0, kind: input, shape index: {}]   ;;  %s2988_s1 = inlined_call_operand.vmem [shape: f32[1,1024], index: 1, kind: input, shape index: {}]   ;;  %s2989_s3 = inlined_call_operand.vmem [shape: f32[1,384], index: 3, kind: input, shape index: {}]   ;;  %s2990_s4 = inlined_call_operand.vmem [shape: bf16[6,384], index: 4, kind: output, shape index: {}]  }
   0x1   :  { %v2040_v0 = vld [vmem:[%s2986_s2 + $0x4] ss:$12 sps:$4 sm:$0xff]   ;;  %v2044_v2 = vld [vmem:[%s2986_s2] ss:$12 sps:$4 sm:$0xff]   ;;  %v2046_v4 = vld [vmem:[%s2986_s2 + $0x1c] ss:$12 sps:$4 sm:$0xff]  }
   0x2   :  { %v2042_v1 = vld [vmem:[%s2986_s2 + $0x184] ss:$12 sps:$4 sm:$0xff]   ;;  %1401 = vmatprep.subr.bf16.mxu1 %v2040_v0  ;;  %v2045_v3 = vld [vmem:[%s2986_s2 + $0x180] ss:$12 sps:$4 sm:$0xff]   ;;  %v2048_v5 = vld [vmem:[%s2986_s2 + $0x19c] ss:$12 sps:$4 sm:$0xff]  }
   0x3   :  { %1442 = vmatprep.subr.bf16.mxu0 %v2042_v1  ;;  %1402 = vmatpush1.bf16.msra.mxu1 %v2044_v2  ;;  %v2050_v6 = vld [vmem:[%s2986_s2 + $0x18] ss:$12 sps:$4 sm:$0xff]   ;;  %v2052_v8 = vld [vmem:[%s2986_s2 + $0x34] ss:$12 sps:$4 sm:$0xff]   ;;  %v2056_v10 = vld [vmem:[%s2986_s2 + $0x30] ss:$12 sps:$4 sm:$0xff]  }
   0x4   :  { %1443 = vmatpush1.bf16.msra.mxu0 %v2045_v3  ;;  %1403 = vmatprep.subr.bf16.mxu1 %v2046_v4  ;;  %v2051_v7 = vld [vmem:[%s2986_s2 + $0x198] ss:$12 sps:$4 sm:$0xff]   ;;  %v2054_v9 = vld [vmem:[%s2986_s2 + $0x1b4] ss:$12 sps:$4 sm:$0xff]   ;;  %v2057_v11 = vld [vmem:[%s2986_s2 + $0x1b0] ss:$12 sps:$4 sm:$0xff]  }
   0x5   :  { %1444 = vmatprep.subr.bf16.mxu0 %v2048_v5  ;;  %v2058_v12 = vld [vmem:[%s2986_s2 + $0x4c] ss:$12 sps:$4 sm:$0xff]   ;;  %v2062_v14 = vld [vmem:[%s2986_s2 + $0x48] ss:$12 sps:$4 sm:$0xff]   ;;  %v2064_v16 = vld [vmem:[%s2986_s2 + $0x64] ss:$12 sps:$4 sm:$0xff]  }
   0x6   :  { %v2060_v13 = vld [vmem:[%s2986_s2 + $0x1cc] ss:$12 sps:$4 sm:$0xff]   ;;  %v2063_v15 = vld [vmem:[%s2986_s2 + $0x1c8] ss:$12 sps:$4 sm:$0xff]   ;;  %v2066_v17 = vld [vmem:[%s2986_s2 + $0x1e4] ss:$12 sps:$4 sm:$0xff]  }
   0x7   :  { %1404 = vmatpush1.bf16.msra.mxu1 %v2050_v6  ;;  %v2068_v18 = vld [vmem:[%s2986_s2 + $0x60] ss:$12 sps:$4 sm:$0xff]   ;;  %v2070_v20 = vld [vmem:[%s2986_s2 + $0x7c] ss:$12 sps:$4 sm:$0xff]   ;;  %v2074_v22 = vld [vmem:[%s2986_s2 + $0x78] ss:$12 sps:$4 sm:$0xff]  }
   0x8   :  { %1445 = vmatpush1.bf16.msra.mxu0 %v2051_v7  ;;  %1405 = vmatprep.subr.bf16.mxu1 %v2052_v8  ;;  %v2069_v19 = vld [vmem:[%s2986_s2 + $0x1e0] ss:$12 sps:$4 sm:$0xff]   ;;  %v2072_v21 = vld [vmem:[%s2986_s2 + $0x1fc] ss:$12 sps:$4 sm:$0xff]   ;;  %v2075_v23 = vld [vmem:[%s2986_s2 + $0x1f8] ss:$12 sps:$4 sm:$0xff]  }
   0x9   :  { %1446 = vmatprep.subr.bf16.mxu0 %v2054_v9  ;;  %v2076_v24 = vld [vmem:[%s2986_s2 + $0x94] ss:$12 sps:$4 sm:$0xff]   ;;  %v2080_v26 = vld [vmem:[%s2986_s2 + $0x90] ss:$12 sps:$4 sm:$0xff]   ;;  %v2082_v28 = vld [vmem:[%s2986_s2 + $0xac] ss:$12 sps:$4 sm:$0xff]  }
   0xa   :  { %v2078_v25 = vld [vmem:[%s2986_s2 + $0x214] ss:$12 sps:$4 sm:$0xff]   ;;  %v2081_v27 = vld [vmem:[%s2986_s2 + $0x210] ss:$12 sps:$4 sm:$0xff]   ;;  %v2084_v29 = vld [vmem:[%s2986_s2 + $0x22c] ss:$12 sps:$4 sm:$0xff]  }
   0xb   :  { %1406 = vmatpush1.bf16.msra.mxu1 %v2056_v10  ;;  %v2086_v30 = vld [vmem:[%s2986_s2 + $0xa8] ss:$12 sps:$4 sm:$0xff]   ;;  %v2088_v32 = vld [vmem:[%s2986_s2 + $0xc4] ss:$12 sps:$4 sm:$0xff]   ;;  %v2092_v34 = vld [vmem:[%s2986_s2 + $0xc0] ss:$12 sps:$4 sm:$0xff]  }
   0xc   :  { %1447 = vmatpush1.bf16.msra.mxu0 %v2057_v11  ;;  %1407 = vmatprep.subr.bf16.mxu1 %v2058_v12  ;;  %v2087_v31 = vld [vmem:[%s2986_s2 + $0x228] ss:$12 sps:$4 sm:$0xff]   ;;  %v2090_v33 = vld [vmem:[%s2986_s2 + $0x244] ss:$12 sps:$4 sm:$0xff]   ;;  %v2093_v35 = vld [vmem:[%s2986_s2 + $0x240] ss:$12 sps:$4 sm:$0xff]  }
   0xd   :  { %1448 = vmatprep.subr.bf16.mxu0 %v2060_v13  ;;  %v2094_v36 = vld [vmem:[%s2986_s2 + $0xdc] ss:$12 sps:$4 sm:$0xff]   ;;  %v2098_v39 = vld [vmem:[%s2986_s2 + $0xd8] ss:$12 sps:$4 sm:$0xff]   ;;  %v2100_v41 = vld [vmem:[%s2986_s2 + $0xf4] ss:$12 sps:$4 sm:$0xff]  }
   0xe   :  { %v2096_v38 = vld [vmem:[%s2986_s2 + $0x25c] ss:$12 sps:$4 sm:$0xff]   ;;  %v2099_v40 = vld [vmem:[%s2986_s2 + $0x258] ss:$12 sps:$4 sm:$0xff]   ;;  %v2444_v42 = vshrl.u32 %v32_v37, 7 }
   0xf   :  { %1408 = vmatpush1.bf16.msra.mxu1 %v2062_v14  ;;  %v2102_v43 = vld [vmem:[%s2986_s2 + $0x274] ss:$12 sps:$4 sm:$0xff]   ;;  %v2104_v44 = vld [vmem:[%s2986_s2 + $0xf0] ss:$12 sps:$4 sm:$0xff]   ;;  %v2106_v46 = vld [vmem:[%s2986_s2 + $0x10c] ss:$12 sps:$4 sm:$0xff]  }
  0x10   :  { %1449 = vmatpush1.bf16.msra.mxu0 %v2063_v15  ;;  %1409 = vmatprep.subr.bf16.mxu1 %v2064_v16  ;;  %v2105_v45 = vld [vmem:[%s2986_s2 + $0x270] ss:$12 sps:$4 sm:$0xff]   ;;  %v38_v47 = vsub.s32 1, %v2444_v42  ;;  %v2108_v48 = vld [vmem:[%s2986_s2 + $0x28c] ss:$12 sps:$4 sm:$0xff]   ;;  %v46_v49 = vsub.s32 3, %v2444_v42 }
  0x11   :  { %1450 = vmatprep.subr.bf16.mxu0 %v2066_v17  ;;  %v2110_v50 = vld [vmem:[%s2986_s2 + $0x108] ss:$12 sps:$4 sm:$0xff]   ;;  %v18_v51 = vld [vmem:[%s2987_s0] sm:$0x77]  ;;  %v50_v52 = vsub.s32 4, %v2444_v42  ;;  %v34_v55 = vsub.s32 0, %v2444_v42 }
  0x12   :  { %v23_v53 = vunpack.c.h.bf16 %v18_v51  ;;  %v2473_v54 = vld [vmem:[%s2988_s1] sm:$0xff]  ;;  %v19_v56 = vld [vmem:[%s2987_s0 + $0x8] sm:$0x77]  ;;  %v42_v57 = vsub.s32 2, %v2444_v42  ;;  %v22_v1 = vunpack.c.l.bf16 %v18_v51  ;;  %v2146_v51 = vld [vmem:[%s2986_s2 + $0x330] ss:$12 sps:$4 sm:$0xff]  }
  0x13   :  { %1410 = vmatpush1.bf16.msra.mxu1 %v2068_v18  ;;  %v2111_v58 = vld [vmem:[%s2986_s2 + $0x288] ss:$12 sps:$4 sm:$0xff]   ;;  %v2112_v59 = vld [vmem:[%s2986_s2 + $0x124] ss:$12 sps:$4 sm:$0xff]   ;;  %v39_v60 = vrot.slane %v2473_v54, %v38_v47  ;;  %v25_v61 = vunpack.c.h.bf16 %v19_v56  ;;  %v47_v63 = vrot.slane %v2473_v54, %v46_v49  ;;  %v2116_v0 = vld [vmem:[%s2986_s2 + $0x120] ss:$12 sps:$4 sm:$0xff]   ;;  %v2497_v3 = vrot.slane %v2473_v54, %v50_v52 }
  0x14   :  { %1451 = vmatpush1.bf16.msra.mxu0 %v2069_v19  ;;  %1411 = vmatprep.subr.bf16.mxu1 %v2070_v20  ;;  %v2114_v62 = vld [vmem:[%s2986_s2 + $0x2a4] ss:$12 sps:$4 sm:$0xff]   ;;  %v2117_v4 = vld [vmem:[%s2986_s2 + $0x2a0] ss:$12 sps:$4 sm:$0xff]   ;;  %v35_v5 = vrot.slane %v2473_v54, %v34_v55  ;;  %v24_v6 = vunpack.c.l.bf16 %v19_v56  ;;  %v43_v8 = vrot.slane %v2473_v54, %v42_v57  ;;  %v2118_v9 = vld [vmem:[%s2986_s2 + $0x13c] ss:$12 sps:$4 sm:$0xff]  }
  0x15   :  { %1452 = vmatprep.subr.bf16.mxu0 %v2072_v21  ;;  %v73_v2 = vadd.f32 %v39_v60, %v23_v53  ;;  %v75_v7 = vadd.f32 %v47_v63, %v25_v61  ;;  %v2120_v11 = vld [vmem:[%s2986_s2 + $0x2bc] ss:$12 sps:$4 sm:$0xff]   ;;  %v2122_v14 = vld [vmem:[%s2986_s2 + $0x138] ss:$12 sps:$4 sm:$0xff]   ;;  %v2124_v19 = vld [vmem:[%s2986_s2 + $0x154] ss:$12 sps:$4 sm:$0xff]  }
  0x16   :  { %v72_v15 = vadd.f32 %v35_v5, %v22_v1  ;;  %v74_v17 = vadd.f32 %v43_v8, %v24_v6  ;;  %v2123_v18 = vld [vmem:[%s2986_s2 + $0x2b8] ss:$12 sps:$4 sm:$0xff]   ;;  %v2126_v21 = vld [vmem:[%s2986_s2 + $0x2d4] ss:$12 sps:$4 sm:$0xff]   ;;  %v2154_v56 = vld [vmem:[%s2986_s2 + $0x110] ss:$12 sps:$4 sm:$0xff]  }
  0x17   :  { %1412 = vmatpush1.bf16.msra.mxu1 %v2074_v22  ;;  %v81_v10 = vmax.f32 %v73_v2, 0.0  ;;  %v83_v12 = vmax.f32 %v75_v7, 0.0  ;;  %v2138_v37 = vld [vmem:[%s2986_s2 + $0x304] ss:$12 sps:$4 sm:$0xff]   ;;  %v2148_v49 = vld [vmem:[%s2986_s2 + $0x334] ss:$12 sps:$4 sm:$0xff]  }
  0x18   :  { %1453 = vmatpush1.bf16.msra.mxu0 %v2075_v23  ;;  %1413 = vmatprep.subr.bf16.mxu1 %v2076_v24  ;;  %v2128_v23 = vld [vmem:[%s2986_s2 + $0x150] ss:$12 sps:$4 sm:$0xff]   ;;  %v62_v24 = vsub.s32 7, %v2444_v42  ;;  %v2150_v52 = vld [vmem:[%s2986_s2 + $0x38] ss:$12 sps:$4 sm:$0xff]  }
  0x19   :  { %1454 = vmatprep.subr.bf16.mxu0 %v2078_v25  ;;  %v89_v13 = vmin.f32 %v81_v10, 6.0  ;;  %v91_v16 = vmin.f32 %v83_v12, 6.0  ;;  %v2129_v25 = vld [vmem:[%s2986_s2 + $0x2d0] ss:$12 sps:$4 sm:$0xff]   ;;  %v2153_v53 = vld [vmem:[%s2986_s2 + $0x34c] ss:$12 sps:$4 sm:$0xff]  }
  0x1a   :  { %v2158_v60 = vld [vmem:[%s2986_s2 + $0x364] ss:$12 sps:$4 sm:$0xff]   ;;  %v2159_v61 = vld [vmem:[%s2986_s2 + $0x128] ss:$12 sps:$4 sm:$0xff]   ;;  %v2164_v1 = vld [vmem:[%s2986_s2 + $0x140] ss:$12 sps:$4 sm:$0xff]  }
  0x1b   :  { %1414 = vmatpush1.bf16.msra.mxu1 %v2080_v26  ;;  %v97_v20 = vpack.c.bf16 %v89_v13, %v89_v13  ;;  %v2526_v22 = vpack.c.bf16 %v91_v16, %v91_v16  ;;  %v80_v26 = vmax.f32 %v72_v15, 0.0  ;;  %v2160_v63 = vld [vmem:[%s2986_s2 + $0x68] ss:$12 sps:$4 sm:$0xff]   ;;  %v2161_v2 = vld [vmem:[%s2986_s2 + $0x378] ss:$12 sps:$4 sm:$0xff]   ;;  %v54_v12 = vsub.s32 5, %v2444_v42 }
  0x1c   :  { %1455 = vmatpush1.bf16.msra.mxu0 %v2081_v27  ;;  %1415 = vmatprep.subr.bf16.mxu1 %v2082_v28  ;;  %v82_v27 = vmax.f32 %v74_v17, 0.0  ;;  %v58_v28 = vsub.s32 6, %v2444_v42  ;;  %v2168_v5 = vld [vmem:[%s2986_s2 + $0x394] ss:$12 sps:$4 sm:$0xff]   ;;  %v2169_v6 = vld [vmem:[%s2986_s2 + $0x158] ss:$12 sps:$4 sm:$0xff]  }
  0x1d   :  { %1456 = vmatprep.subr.bf16.mxu0 %v2084_v29  ;;  %1433 = vmatprep.mubr.bf16.mxu1 %v97_v20  ;;  %v2130_v29 = vld [vmem:[%s2986_s2 + $0x16c] ss:$12 sps:$4 sm:$0xff]   ;;  %v2166_v7 = vld [vmem:[%s2986_s2 + $0x390] ss:$12 sps:$4 sm:$0xff]   ;;  %v2179_v15 = vld [vmem:[%s2986_s2 + $0x248] ss:$12 sps:$4 sm:$0xff]  }
  0x1e   :  { %1474 = vmatprep.mubr.bf16.mxu0 %v2526_v22  ;;  %v2170_v8 = vld [vmem:[%s2986_s2 + $0x98] ss:$12 sps:$4 sm:$0xff]   ;;  %v2174_v10 = vld [vmem:[%s2986_s2 + $0x170] ss:$12 sps:$4 sm:$0xff]   ;;  %v2176_v16 = vld [vmem:[%s2986_s2 + $0x3c0] ss:$12 sps:$4 sm:$0xff]  }
  0x1f   :  { %1416 = vmatpush1.bf16.msra.mxu1 %v2086_v30  ;;  %v2541_v30 = vrot.slane %v2473_v54, %v62_v24  ;;  %v2175_v13 = vld [vmem:[%s2986_s2 + $0xb0] ss:$12 sps:$4 sm:$0xff]   ;;  %v2180_v17 = vld [vmem:[%s2986_s2 + $0x188] ss:$12 sps:$4 sm:$0xff]   ;;  %v2185_v24 = vld [vmem:[%s2986_s2 + $0x1a0] ss:$12 sps:$4 sm:$0xff]  }
  0x20   :  { %1457 = vmatpush1.bf16.msra.mxu0 %v2087_v31  ;;  %1417 = vmatprep.subr.bf16.mxu1 %v2088_v32  ;;  %v2132_v31 = vld [vmem:[%s2986_s2 + $0x2ec] ss:$12 sps:$4 sm:$0xff]   ;;  %v2547_v32 = vrot.slane %v2473_v54, %v58_v28  ;;  %v2186_v28 = vld [vmem:[%s2986_s2 + $0x3f0] ss:$12 sps:$4 sm:$0xff]  }
  0x21   :  { %1458 = vmatprep.subr.bf16.mxu0 %v2090_v33  ;;  %v2134_v33 = vld [vmem:[%s2986_s2 + $0x168] ss:$12 sps:$4 sm:$0xff]  }
  0x23   :  { %1418 = vmatpush1.bf16.msra.mxu1 %v2092_v34  ;;  %v2135_v34 = vld [vmem:[%s2986_s2 + $0x2e8] ss:$12 sps:$4 sm:$0xff]  }
  0x24   :  { %1459 = vmatpush1.bf16.msra.mxu0 %v2093_v35  ;;  %1419 = vmatprep.subr.bf16.mxu1 %v2094_v36  ;;  %v88_v35 = vmin.f32 %v80_v26, 6.0  ;;  %v90_v36 = vmin.f32 %v82_v27, 6.0  ;;  %v2189_v26 = vld [vmem:[%s2986_s2 + $0x278] ss:$12 sps:$4 sm:$0xff]  }
  0x25   :  { %1460 = vmatprep.subr.bf16.mxu0 %v2096_v38  ;;  %v2139_v38 = vld [vmem:[%s2986_s2 + $0xc8] ss:$12 sps:$4 sm:$0xff]  }
  0x27   :  { %1420 = vmatpush1.bf16.msra.mxu1 %v2098_v39  ;;  %v2561_v39 = vpack.c.bf16 %v88_v35, %v88_v35 }
  0x28   :  { %1461 = vmatpush1.bf16.msra.mxu0 %v2099_v40  ;;  %1421 = vmatprep.subr.bf16.mxu1 %v2100_v41  ;;  %v2136_v40 = vld [vmem:[%s2986_s2 + $0x300] ss:$12 sps:$4 sm:$0xff]   ;;  %v2566_v41 = vpack.c.bf16 %v90_v36, %v90_v36  ;;  %v2191_v36 = vld [vmem:[%s2986_s2 + $0x408] ss:$12 sps:$4 sm:$0xff]  }
  0x29   :  { %1462 = vmatprep.subr.bf16.mxu0 %v2102_v43  ;;  %v2140_v43 = vld [vmem:[%s2986_s2 + $0x8] ss:$12 sps:$4 sm:$0xff]  }
  0x2b   :  { %1422 = vmatpush1.bf16.msra.mxu1 %v2104_v44  ;;  %v2143_v44 = vld [vmem:[%s2986_s2 + $0x31c] ss:$12 sps:$4 sm:$0xff]  }
  0x2c   :  { %1463 = vmatpush1.bf16.msra.mxu0 %v2105_v45  ;;  %1423 = vmatprep.subr.bf16.mxu1 %v2106_v46  ;;  %v2144_v45 = vld [vmem:[%s2986_s2 + $0xe0] ss:$12 sps:$4 sm:$0xff]   ;;  %v2141_v46 = vld [vmem:[%s2986_s2 + $0x318] ss:$12 sps:$4 sm:$0xff]  }
  0x2d   :  { %1464 = vmatprep.subr.bf16.mxu0 %v2108_v48  ;;  %v2145_v48 = vld [vmem:[%s2986_s2 + $0x20] ss:$12 sps:$4 sm:$0xff]  }
  0x2f   :  { %1424 = vmatpush1.bf16.msra.mxu1 %v2110_v50  ;;  %v2149_v50 = vld [vmem:[%s2986_s2 + $0xf8] ss:$12 sps:$4 sm:$0xff]  }
  0x30   :  { %1465 = vmatpush1.bf16.msra.mxu0 %v2111_v58  ;;  %1425 = vmatprep.subr.bf16.mxu1 %v2112_v59  ;;  %v2151_v58 = vld [vmem:[%s2986_s2 + $0x348] ss:$12 sps:$4 sm:$0xff]   ;;  %v2155_v59 = vld [vmem:[%s2986_s2 + $0x50] ss:$12 sps:$4 sm:$0xff]  }
  0x31   :  { %1466 = vmatprep.subr.bf16.mxu0 %v2114_v62  ;;  %v2156_v62 = vld [vmem:[%s2986_s2 + $0x360] ss:$12 sps:$4 sm:$0xff]  }
  0x33   :  { %1426 = vmatpush1.bf16.msra.mxu1 %v2116_v0  ;;  %v2163_v0 = vld [vmem:[%s2986_s2 + $0x37c] ss:$12 sps:$4 sm:$0xff]  }
  0x34   :  { %1467 = vmatpush1.bf16.msra.mxu0 %v2117_v4  ;;  %1427 = vmatprep.subr.bf16.mxu1 %v2118_v9  ;;  %v2165_v4 = vld [vmem:[%s2986_s2 + $0x80] ss:$12 sps:$4 sm:$0xff]  }
  0x35   :  { %1468 = vmatprep.subr.bf16.mxu0 %v2120_v11  ;;  %v2173_v9 = vld [vmem:[%s2986_s2 + $0x3ac] ss:$12 sps:$4 sm:$0xff]   ;;  %v2171_v11 = vld [vmem:[%s2986_s2 + $0x3a8] ss:$12 sps:$4 sm:$0xff]  }
  0x37   :  { %1428 = vmatpush1.bf16.msra.mxu1 %v2122_v14  ;;  %v2178_v14 = vld [vmem:[%s2986_s2 + $0x3c4] ss:$12 sps:$4 sm:$0xff]  }
  0x38   :  { %1469 = vmatpush1.bf16.msra.mxu0 %v2123_v18  ;;  %1429 = vmatprep.subr.bf16.mxu1 %v2124_v19  ;;  %v2183_v18 = vld [vmem:[%s2986_s2 + $0x3dc] ss:$12 sps:$4 sm:$0xff]   ;;  %v2184_v19 = vld [vmem:[%s2986_s2 + $0x260] ss:$12 sps:$4 sm:$0xff]  }
  0x39   :  { %1470 = vmatprep.subr.bf16.mxu0 %v2126_v21  ;;  %v20_v21 = vld [vmem:[%s2987_s0 + $0x10] sm:$0x77] }
  0x3b   :  { %1430 = vmatpush1.bf16.msra.mxu1 %v2128_v23  ;;  %v2181_v23 = vld [vmem:[%s2986_s2 + $0x3d8] ss:$12 sps:$4 sm:$0xff]  }
  0x3c   :  { %1471 = vmatpush1.bf16.msra.mxu0 %v2129_v25  ;;  %1431 = vmatprep.subr.bf16.mxu1 %v2130_v29  ;;  %v27_v25 = vunpack.c.h.bf16 %v20_v21  ;;  %v2190_v29 = vld [vmem:[%s2986_s2 + $0x1b8] ss:$12 sps:$4 sm:$0xff]  }
  0x3d   :  { %1472 = vmatprep.subr.bf16.mxu0 %v2132_v31 }
  0x3f   :  { %1432 = vmatpush1.bf16.msra.mxu1 %v2134_v33  ;;  %v2193_v33 = vld [vmem:[%s2986_s2 + $0x40c] ss:$12 sps:$4 sm:$0xff]  }
  0x40   :  { %1473 = vmatpush1.bf16.msra.mxu0 %v2135_v34  ;;  %1940 = vmatprep.subr.bf16.mxu1 %v2139_v38  ;;  %v2194_v34 = vld [vmem:[%s2986_s2 + $0x290] ss:$12 sps:$4 sm:$0xff]  }
  0x41   :  { %1483 = vmatprep.subr.bf16.mxu0 %v2138_v37  ;;  %v2198_v38 = vld [vmem:[%s2986_s2 + $0x424] ss:$12 sps:$4 sm:$0xff]  }
  0x42   :  { %1434 = vmatmul.mubr.bf16.vlgmr.msra.gmra.mrb[0].mxu1 %v2561_v39 }
  0x43   :  { %1475 = vmatmul.mubr.bf16.vlgmr.msra.gmra.mrb[0].mxu0 %v2566_v41  ;;  %1941 = vmatpush3.bf16.msra.mxu1 %v2140_v43  ;;  %v2200_v43 = vld [vmem:[%s2986_s2 + $0x1e8] ss:$12 sps:$4 sm:$0xff]  }
  0x44   :  { %1484 = vmatpush1.bf16.msra.mxu0 %v2136_v40  ;;  %1942 = vmatprep.subr.bf16.mxu1 %v2144_v45  ;;  %v2196_v40 = vld [vmem:[%s2986_s2 + $0x420] ss:$12 sps:$4 sm:$0xff]   ;;  %v2203_v45 = vld [vmem:[%s2986_s2 + $0x43c] ss:$12 sps:$4 sm:$0xff]  }
  0x45   :  { %1485 = vmatprep.subr.bf16.mxu0 %v2143_v44  ;;  %1597 = vmatprep.mubr.bf16.mxu1 %v97_v20  ;;  %v55_v20 = vrot.slane %v2473_v54, %v54_v12  ;;  %v2188_v54 = vld [vmem:[%s2986_s2 + $0x3f4] ss:$12 sps:$4 sm:$0xff]   ;;  %v26_v44 = vunpack.c.l.bf16 %v20_v21  ;;  %v2233_v12 = vld [vmem:[%s2986_s2 + $0x4cc] ss:$12 sps:$4 sm:$0xff]  }
  0x46   :  { %v2244_v21 = vld [vmem:[%s2986_s2 + $0x440] ss:$12 sps:$4 sm:$0xff]  }
  0x47   :  { %1943 = vmatpush3.bf16.msra.mxu1 %v2145_v48  ;;  %v77_v27 = vadd.f32 %v55_v20, %v27_v25  ;;  %v2201_v48 = vld [vmem:[%s2986_s2 + $0x438] ss:$12 sps:$4 sm:$0xff]   ;;  %v2243_v20 = vld [vmem:[%s2986_s2 + $0x4fc] ss:$12 sps:$4 sm:$0xff]   ;;  %v2248_v25 = vld [vmem:[%s2986_s2 + $0x514] ss:$12 sps:$4 sm:$0xff]  }
  0x48   :  { %1486 = vmatpush1.bf16.msra.mxu0 %v2141_v46  ;;  %1944 = vmatprep.subr.bf16.mxu1 %v2149_v50  ;;  %v2204_v46 = vld [vmem:[%s2986_s2 + $0x2c0] ss:$12 sps:$4 sm:$0xff]  }
  0x49   :  { %1487 = vmatprep.subr.bf16.mxu0 %v2148_v49  ;;  %v85_v31 = vmax.f32 %v77_v27, 0.0  ;;  %v76_v49 = vadd.f32 %v2497_v3, %v26_v44  ;;  %v2205_v50 = vld [vmem:[%s2986_s2 + $0x200] ss:$12 sps:$4 sm:$0xff]   ;;  %v2206_v3 = vld [vmem:[%s2986_s2 + $0x450] ss:$12 sps:$4 sm:$0xff]  }
  0x4a   :  { %v2250_v27 = vld [vmem:[%s2986_s2 + $0x398] ss:$12 sps:$4 sm:$0xff]   ;;  %v2264_v44 = vld [vmem:[%s2986_s2 + $0x560] ss:$12 sps:$4 sm:$0xff]  }
  0x4b   :  { %1945 = vmatpush3.bf16.msra.mxu1 %v2150_v52  ;;  %v93_v35 = vmin.f32 %v85_v31, 6.0  ;;  %v2209_v52 = vld [vmem:[%s2986_s2 + $0x2d8] ss:$12 sps:$4 sm:$0xff]   ;;  %v2254_v31 = vld [vmem:[%s2986_s2 + $0x470] ss:$12 sps:$4 sm:$0xff]  }
  0x4c   :  { %1488 = vmatpush1.bf16.msra.mxu0 %v2146_v51  ;;  %1946 = vmatprep.subr.bf16.mxu1 %v2154_v56  ;;  %v2208_v51 = vld [vmem:[%s2986_s2 + $0x454] ss:$12 sps:$4 sm:$0xff]   ;;  %v84_v56 = vmax.f32 %v76_v49, 0.0 }
  0x4d   :  { %1489 = vmatprep.subr.bf16.mxu0 %v2153_v53  ;;  %v2709_v37 = vpack.c.bf16 %v93_v35, %v93_v35  ;;  %v2210_v53 = vld [vmem:[%s2986_s2 + $0x218] ss:$12 sps:$4 sm:$0xff]   ;;  %v2251_v35 = vld [vmem:[%s2986_s2 + $0x528] ss:$12 sps:$4 sm:$0xff]  }
  0x4e   :  { %v2268_v49 = vld [vmem:[%s2986_s2 + $0x574] ss:$12 sps:$4 sm:$0xff]  }
  0x4f   :  { %1947 = vmatpush3.bf16.msra.mxu1 %v2155_v59  ;;  %1515 = vmatprep.mubr.bf16.mxu0 %v2709_v37  ;;  %v2214_v59 = vld [vmem:[%s2986_s2 + $0x2f0] ss:$12 sps:$4 sm:$0xff]  }
  0x50   :  { %1490 = vmatpush1.bf16.msra.mxu0 %v2151_v58  ;;  %1948 = vmatprep.subr.bf16.mxu1 %v2159_v61  ;;  %v2213_v58 = vld [vmem:[%s2986_s2 + $0x46c] ss:$12 sps:$4 sm:$0xff]   ;;  %v2215_v61 = vld [vmem:[%s2986_s2 + $0x230] ss:$12 sps:$4 sm:$0xff]  }
  0x51   :  { %1491 = vmatprep.subr.bf16.mxu0 %v2158_v60  ;;  %v2211_v60 = vld [vmem:[%s2986_s2 + $0x468] ss:$12 sps:$4 sm:$0xff]  }
  0x53   :  { %1949 = vmatpush3.bf16.msra.mxu1 %v2160_v63  ;;  %v2218_v63 = vld [vmem:[%s2986_s2 + $0x484] ss:$12 sps:$4 sm:$0xff]  }
  0x54   :  { %1492 = vmatpush1.bf16.msra.mxu0 %v2156_v62  ;;  %1950 = vmatprep.subr.bf16.mxu1 %v2164_v1  ;;  %v92_v62 = vmin.f32 %v84_v56, 6.0  ;;  %v2216_v1 = vld [vmem:[%s2986_s2 + $0x480] ss:$12 sps:$4 sm:$0xff]   ;;  %v2271_v56 = vld [vmem:[%s2986_s2 + $0x588] ss:$12 sps:$4 sm:$0xff]  }
  0x55   :  { %1493 = vmatprep.subr.bf16.mxu0 %v2163_v0  ;;  %v2219_v0 = vld [vmem:[%s2986_s2 + $0x3c8] ss:$12 sps:$4 sm:$0xff]  }
  0x57   :  { %1951 = vmatpush3.bf16.msra.mxu1 %v2165_v4  ;;  %v2220_v4 = vld [vmem:[%s2986_s2 + $0x308] ss:$12 sps:$4 sm:$0xff]  }
  0x58   :  { %1494 = vmatpush1.bf16.msra.mxu0 %v2161_v2  ;;  %1952 = vmatprep.subr.bf16.mxu1 %v2169_v6  ;;  %v2773_v2 = vpack.c.bf16 %v92_v62, %v92_v62  ;;  %v2224_v6 = vld [vmem:[%s2986_s2 + $0x3e0] ss:$12 sps:$4 sm:$0xff]  }
  0x59   :  { %1495 = vmatprep.subr.bf16.mxu0 %v2168_v5  ;;  %v2223_v5 = vld [vmem:[%s2986_s2 + $0x49c] ss:$12 sps:$4 sm:$0xff]   ;;  %v2276_v62 = vld [vmem:[%s2986_s2 + $0x5a0] ss:$12 sps:$4 sm:$0xff]  }
  0x5b   :  { %1953 = vmatpush3.bf16.msra.mxu1 %v2170_v8  ;;  %v2225_v8 = vld [vmem:[%s2986_s2 + $0x320] ss:$12 sps:$4 sm:$0xff]  }
  0x5c   :  { %1496 = vmatpush1.bf16.msra.mxu0 %v2166_v7  ;;  %1954 = vmatprep.subr.bf16.mxu1 %v2174_v10  ;;  %v2221_v7 = vld [vmem:[%s2986_s2 + $0x498] ss:$12 sps:$4 sm:$0xff]  }
  0x5d   :  { %1497 = vmatprep.subr.bf16.mxu0 %v2173_v9  ;;  %v2228_v9 = vld [vmem:[%s2986_s2 + $0x4b4] ss:$12 sps:$4 sm:$0xff]   ;;  %v2229_v10 = vld [vmem:[%s2986_s2 + $0x3f8] ss:$12 sps:$4 sm:$0xff]  }
  0x5f   :  { %1955 = vmatpush3.bf16.msra.mxu1 %v2175_v13  ;;  %v2234_v13 = vld [vmem:[%s2986_s2 + $0x410] ss:$12 sps:$4 sm:$0xff]  }
  0x60   :  { %1498 = vmatpush1.bf16.msra.mxu0 %v2171_v11  ;;  %1962 = vmatprep.subr.bf16.mxu1 %v2179_v15  ;;  %v2230_v11 = vld [vmem:[%s2986_s2 + $0x338] ss:$12 sps:$4 sm:$0xff]   ;;  %v2235_v15 = vld [vmem:[%s2986_s2 + $0x350] ss:$12 sps:$4 sm:$0xff]  }
  0x61   :  { %1499 = vmatprep.subr.bf16.mxu0 %v2178_v14  ;;  %v2231_v14 = vld [vmem:[%s2986_s2 + $0x4c8] ss:$12 sps:$4 sm:$0xff]  }
  0x62   :  { %1598 = vmatmul.mubr.bf16.vlgmr.msra.gmra.mrb[4].mxu1 %v2561_v39  ;;  %v2199_v39 = vld [vmem:[%s2986_s2 + $0x2a8] ss:$12 sps:$4 sm:$0xff]  }
  0x63   :  { %1963 = vmatpush3.bf16.msra.mxu1 %v2180_v17  ;;  %1637 = vmatprep.mubr.bf16.mxu1 %v2526_v22  ;;  %v2195_v22 = vld [vmem:[%s2986_s2 + $0x1d0] ss:$12 sps:$4 sm:$0xff]   ;;  %v2239_v17 = vld [vmem:[%s2986_s2 + $0x428] ss:$12 sps:$4 sm:$0xff]  }
  0x64   :  { %1500 = vmatpush1.bf16.msra.mxu0 %v2176_v16  ;;  %1964 = vmatprep.subr.bf16.mxu1 %v2184_v19  ;;  %v2238_v16 = vld [vmem:[%s2986_s2 + $0x4e4] ss:$12 sps:$4 sm:$0xff]   ;;  %v2240_v19 = vld [vmem:[%s2986_s2 + $0x368] ss:$12 sps:$4 sm:$0xff]  }
  0x65   :  { %1501 = vmatprep.subr.bf16.mxu0 %v2183_v18  ;;  %v2236_v18 = vld [vmem:[%s2986_s2 + $0x4e0] ss:$12 sps:$4 sm:$0xff]  }
  0x67   :  { %1965 = vmatpush3.bf16.msra.mxu1 %v2185_v24  ;;  %v2245_v24 = vld [vmem:[%s2986_s2 + $0x380] ss:$12 sps:$4 sm:$0xff]  }
  0x68   :  { %1502 = vmatpush1.bf16.msra.mxu0 %v2181_v23  ;;  %1966 = vmatprep.subr.bf16.mxu1 %v2189_v26  ;;  %v2241_v23 = vld [vmem:[%s2986_s2 + $0x4f8] ss:$12 sps:$4 sm:$0xff]   ;;  %v2246_v26 = vld [vmem:[%s2986_s2 + $0x510] ss:$12 sps:$4 sm:$0xff]  }
  0x69   :  { %1503 = vmatprep.subr.bf16.mxu0 %v2188_v54  ;;  %v2249_v54 = vld [vmem:[%s2986_s2 + $0x458] ss:$12 sps:$4 sm:$0xff]  }
  0x6b   :  { %1967 = vmatpush3.bf16.msra.mxu1 %v2190_v29  ;;  %v2253_v29 = vld [vmem:[%s2986_s2 + $0x52c] ss:$12 sps:$4 sm:$0xff]  }
  0x6c   :  { %1504 = vmatpush1.bf16.msra.mxu0 %v2186_v28  ;;  %1968 = vmatprep.subr.bf16.mxu1 %v2194_v34  ;;  %v2856_v28 = vld [vmem:[%s2987_s0 + $0x18] sm:$0x77] }
  0x6d   :  { %1505 = vmatprep.subr.bf16.mxu0 %v2193_v33  ;;  %v29_v33 = vunpack.c.h.bf16 %v2856_v28 }
  0x6f   :  { %1969 = vmatpush3.bf16.msra.mxu1 %v2195_v22  ;;  %v79_v34 = vadd.f32 %v2541_v30, %v29_v33  ;;  %v2259_v30 = vld [vmem:[%s2986_s2 + $0x548] ss:$12 sps:$4 sm:$0xff]  }
  0x70   :  { %1506 = vmatpush1.bf16.msra.mxu0 %v2191_v36  ;;  %1970 = vmatprep.subr.bf16.mxu1 %v2199_v39  ;;  %v2255_v36 = vld [vmem:[%s2986_s2 + $0x3b0] ss:$12 sps:$4 sm:$0xff]   ;;  %v2256_v39 = vld [vmem:[%s2986_s2 + $0x540] ss:$12 sps:$4 sm:$0xff]  }
  0x71   :  { %1507 = vmatprep.subr.bf16.mxu0 %v2198_v38  ;;  %v87_v22 = vmax.f32 %v79_v34, 0.0 }
  0x73   :  { %1971 = vmatpush3.bf16.msra.mxu1 %v2200_v43  ;;  %v95_v38 = vmin.f32 %v87_v22, 6.0  ;;  %v2263_v43 = vld [vmem:[%s2986_s2 + $0x55c] ss:$12 sps:$4 sm:$0xff]  }
  0x74   :  { %1508 = vmatpush1.bf16.msra.mxu0 %v2196_v40  ;;  %1972 = vmatprep.subr.bf16.mxu1 %v2204_v46  ;;  %v2260_v40 = vld [vmem:[%s2986_s2 + $0x488] ss:$12 sps:$4 sm:$0xff]   ;;  %v2261_v46 = vld [vmem:[%s2986_s2 + $0x558] ss:$12 sps:$4 sm:$0xff]  }
  0x75   :  { %1509 = vmatprep.subr.bf16.mxu0 %v2203_v45  ;;  %v103_v45 = vpack.c.bf16 %v95_v38, %v95_v38 }
  0x77   :  { %1973 = vmatpush3.bf16.msra.mxu1 %v2205_v50  ;;  %v2269_v50 = vld [vmem:[%s2986_s2 + $0x578] ss:$12 sps:$4 sm:$0xff]  }
  0x78   :  { %1510 = vmatpush1.bf16.msra.mxu0 %v2201_v48  ;;  %1974 = vmatprep.subr.bf16.mxu1 %v2209_v52  ;;  %v2265_v48 = vld [vmem:[%s2986_s2 + $0x4a0] ss:$12 sps:$4 sm:$0xff]   ;;  %v2270_v52 = vld [vmem:[%s2986_s2 + $0x4b8] ss:$12 sps:$4 sm:$0xff]  }
  0x79   :  { %1511 = vmatprep.subr.bf16.mxu0 %v2208_v51  ;;  %v2266_v51 = vld [vmem:[%s2986_s2 + $0x570] ss:$12 sps:$4 sm:$0xff]  }
  0x7b   :  { %1975 = vmatpush3.bf16.msra.mxu1 %v2210_v53  ;;  %v2274_v53 = vld [vmem:[%s2986_s2 + $0x590] ss:$12 sps:$4 sm:$0xff]  }
  0x7c   :  { %1512 = vmatpush1.bf16.msra.mxu0 %v2206_v3  ;;  %1976 = vmatprep.subr.bf16.mxu1 %v2214_v59  ;;  %v2273_v3 = vld [vmem:[%s2986_s2 + $0x58c] ss:$12 sps:$4 sm:$0xff]   ;;  %v2278_v59 = vld [vmem:[%s2986_s2 + $0x5a4] ss:$12 sps:$4 sm:$0xff]  }
  0x7d   :  { %1513 = vmatprep.subr.bf16.mxu0 %v2213_v58  ;;  %v2275_v58 = vld [vmem:[%s2986_s2 + $0x4d0] ss:$12 sps:$4 sm:$0xff]  }
  0x7f   :  { %1977 = vmatpush3.bf16.msra.mxu1 %v2215_v61  ;;  %v28_v61 = vunpack.c.l.bf16 %v2856_v28 }
  0x80   :  { %1514 = vmatpush1.bf16.msra.mxu0 %v2211_v60  ;;  %1984 = vmatprep.subr.bf16.mxu1 %v2219_v0  ;;  %v2279_v60 = vld [vmem:[%s2986_s2 + $0x5a8] ss:$12 sps:$4 sm:$0xff]  }
  0x81   :  { %1524 = vmatprep.subr.bf16.mxu0 %v2218_v63  ;;  %v2280_v63 = vld [vmem:[%s2986_s2 + $0x4e8] ss:$12 sps:$4 sm:$0xff]  }
  0x82   :  { %1638 = vmatmul.mubr.bf16.vlgmr.msra.gmra.mrb[8].mxu1 %v2566_v41  ;;  %v2226_v41 = vld [vmem:[%s2986_s2 + $0x4b0] ss:$12 sps:$4 sm:$0xff]  }
  0x83   :  { %1516 = vmatmul.mubr.bf16.vlgmr.msra.gmra.mrb[0].mxu0 %v2773_v2  ;;  %1985 = vmatpush3.bf16.msra.mxu1 %v2220_v4  ;;  %v2283_v0 = vld [vmem:[%s2986_s2 + $0x5bc] ss:$12 sps:$4 sm:$0xff]   ;;  %v2281_v4 = vld [vmem:[%s2986_s2 + $0x5b8] ss:$12 sps:$4 sm:$0xff]  }
  0x84   :  { %1525 = vmatpush1.bf16.msra.mxu0 %v2216_v1  ;;  %1986 = vmatprep.subr.bf16.mxu1 %v2224_v6  ;;  %v2284_v1 = vld [vmem:[%s2986_s2 + $0x5c0] ss:$12 sps:$4 sm:$0xff]  }
  0x85   :  { %1526 = vmatprep.subr.bf16.mxu0 %v2223_v5  ;;  %1677 = vmatprep.mubr.bf16.mxu1 %v2709_v37  ;;  %v2258_v37 = vld [vmem:[%s2986_s2 + $0x544] ss:$12 sps:$4 sm:$0xff]   ;;  %v2285_v5 = vld [vmem:[%s2986_s2 + $0x500] ss:$12 sps:$4 sm:$0xff]  }
  0x86   :  { %1556 = vmatprep.mubr.bf16.mxu0 %v103_v45  ;;  %v2288_v6 = vld [vmem:[%s2986_s2 + $0x5d4] ss:$12 sps:$4 sm:$0xff]  }
  0x87   :  { %1987 = vmatpush3.bf16.msra.mxu1 %v2225_v8  ;;  %v2286_v8 = vld [vmem:[%s2986_s2 + $0x5d0] ss:$12 sps:$4 sm:$0xff]  }
  0x88   :  { %1527 = vmatpush1.bf16.msra.mxu0 %v2221_v7  ;;  %1988 = vmatprep.subr.bf16.mxu1 %v2229_v10  ;;  %v2293_v10 = vld [vmem:[%s2986_s2 + $0x5ec] ss:$12 sps:$4 sm:$0xff]  }
  0x89   :  { %1528 = vmatprep.subr.bf16.mxu0 %v2228_v9  ;;  %v2290_v9 = vld [vmem:[%s2986_s2 + $0x518] ss:$12 sps:$4 sm:$0xff]  }
  0x8b   :  { %1989 = vmatpush3.bf16.msra.mxu1 %v2230_v11 }
  0x8c   :  { %1529 = vmatpush1.bf16.msra.mxu0 %v2226_v41  ;;  %1990 = vmatprep.subr.bf16.mxu1 %v2234_v13  ;;  %v2294_v41 = vld [vmem:[%s2986_s2 + $0x5f0] ss:$12 sps:$4 sm:$0xff]  }
  0x8d   :  { %1530 = vmatprep.subr.bf16.mxu0 %v2233_v12  ;;  %v2291_v12 = vld [vmem:[%s2986_s2 + $0x5e8] ss:$12 sps:$4 sm:$0xff]   ;;  %v2295_v13 = vld [vmem:[%s2986_s2 + $0x530] ss:$12 sps:$4 sm:$0xff]  }
  0x8f   :  { %1991 = vmatpush3.bf16.msra.mxu1 %v2235_v15 }
  0x90   :  { %1531 = vmatpush1.bf16.msra.mxu0 %v2231_v14  ;;  %1992 = vmatprep.subr.bf16.mxu1 %v2239_v17 }
  0x91   :  { %1532 = vmatprep.subr.bf16.mxu0 %v2238_v16 }
  0x93   :  { %1993 = vmatpush3.bf16.msra.mxu1 %v2240_v19 }
  0x94   :  { %1533 = vmatpush1.bf16.msra.mxu0 %v2236_v18  ;;  %1994 = vmatprep.subr.bf16.mxu1 %v2244_v21 }
  0x95   :  { %1534 = vmatprep.subr.bf16.mxu0 %v2243_v20 }
  0x97   :  { %1995 = vmatpush3.bf16.msra.mxu1 %v2245_v24 }
  0x98   :  { %1535 = vmatpush1.bf16.msra.mxu0 %v2241_v23  ;;  %1996 = vmatprep.subr.bf16.mxu1 %v2249_v54 }
  0x99   :  { %1536 = vmatprep.subr.bf16.mxu0 %v2248_v25  ;;  %v360_v25 = vld [vmem:[%s2989_s3] sm:$0x7] }
  0x9a   :  { %v373_v54 = vrot.slane %v360_v25, %v42_v57 }
  0x9b   :  { %1997 = vmatpush3.bf16.msra.mxu1 %v2250_v27 }
  0x9c   :  { %1537 = vmatpush1.bf16.msra.mxu0 %v2246_v26  ;;  %1998 = vmatprep.subr.bf16.mxu1 %v2254_v31 }
  0x9d   :  { %1538 = vmatprep.subr.bf16.mxu0 %v2253_v29 }
  0x9f   :  { %1999 = vmatpush3.bf16.msra.mxu1 %v2255_v36 }
  0xa0   :  { %1539 = vmatpush1.bf16.msra.mxu0 %v2251_v35  ;;  %2006 = vmatprep.subr.bf16.mxu1 %v2259_v30 }
  0xa1   :  { %1540 = vmatprep.subr.bf16.mxu0 %v2258_v37 }
  0xa2   :  { %1678 = vmatmul.mubr.bf16.vlgmr.msra.gmra.mrb[12].mxu1 %v2773_v2  ;;  %v78_v2 = vadd.f32 %v2547_v32, %v28_v61  ;;  %v2289_v32 = vld [vmem:[%s2986_s2 + $0x5d8] ss:$12 sps:$4 sm:$0xff]  }
  0xa3   :  { %2007 = vmatpush3.bf16.msra.mxu1 %v2260_v40  ;;  %1717 = vmatprep.mubr.bf16.mxu1 %v103_v45  ;;  %v369_v40 = vrot.slane %v360_v25, %v38_v47 }
  0xa4   :  { %1541 = vmatpush1.bf16.msra.mxu0 %v2256_v39  ;;  %2008 = vmatprep.subr.bf16.mxu1 %v2264_v44  ;;  %v86_v7 = vmax.f32 %v78_v2, 0.0  ;;  %v365_v39 = vrot.slane %v360_v25, %v34_v55 }
  0xa5   :  { %1542 = vmatprep.subr.bf16.mxu0 %v2263_v43 }
  0xa6   :  { %v94_v11 = vmin.f32 %v86_v7, 6.0 }
  0xa7   :  { %2009 = vmatpush3.bf16.msra.mxu1 %v2265_v48 }
  0xa8   :  { %1543 = vmatpush1.bf16.msra.mxu0 %v2261_v46  ;;  %2010 = vmatprep.subr.bf16.mxu1 %v2269_v50  ;;  %v102_v14 = vpack.c.bf16 %v94_v11, %v94_v11 }
  0xa9   :  { %1544 = vmatprep.subr.bf16.mxu0 %v2268_v49 }
  0xab   :  { %2011 = vmatpush3.bf16.msra.mxu1 %v2270_v52 }
  0xac   :  { %1545 = vmatpush1.bf16.msra.mxu0 %v2266_v51  ;;  %2012 = vmatprep.subr.bf16.mxu1 %v2274_v53 }
  0xad   :  { %1546 = vmatprep.subr.bf16.mxu0 %v2273_v3 }
  0xaf   :  { %2013 = vmatpush3.bf16.msra.mxu1 %v2275_v58 }
  0xb0   :  { %1547 = vmatpush1.bf16.msra.mxu0 %v2271_v56  ;;  %2014 = vmatprep.subr.bf16.mxu1 %v2279_v60 }
  0xb1   :  { %1548 = vmatprep.subr.bf16.mxu0 %v2278_v59 }
  0xb3   :  { %2015 = vmatpush3.bf16.msra.mxu1 %v2280_v63 }
  0xb4   :  { %1549 = vmatpush1.bf16.msra.mxu0 %v2276_v62  ;;  %2016 = vmatprep.subr.bf16.mxu1 %v2284_v1 }
  0xb5   :  { %1550 = vmatprep.subr.bf16.mxu0 %v2283_v0 }
  0xb7   :  { %2017 = vmatpush3.bf16.msra.mxu1 %v2285_v5 }
  0xb8   :  { %1551 = vmatpush1.bf16.msra.mxu0 %v2281_v4  ;;  %2018 = vmatprep.subr.bf16.mxu1 %v2289_v32 }
  0xb9   :  { %1552 = vmatprep.subr.bf16.mxu0 %v2288_v6 }
  0xbb   :  { %2019 = vmatpush3.bf16.msra.mxu1 %v2290_v9 }
  0xbc   :  { %1553 = vmatpush1.bf16.msra.mxu0 %v2286_v8  ;;  %2020 = vmatprep.subr.bf16.mxu1 %v2294_v41 }
  0xbd   :  { %1554 = vmatprep.subr.bf16.mxu0 %v2293_v10 }
  0xbf   :  { %2021 = vmatpush3.bf16.msra.mxu1 %v2295_v13 }
  0xc0   :  { %1555 = vmatpush1.bf16.msra.mxu0 %v2291_v12 }
  0xc2   :  { %1718 = vmatmul.mubr.bf16.vlgmr.msra.gmra.mrb[16].mxu1 %v102_v14 }
  0xc3   :  { %1557 = vmatmul.mubr.bf16.vlgmr.msra.gmra.mrb[0].mxu0 %v102_v14 }
 0x115   :  { %v1435_v15 = vpop.f32.mrb[0].mxu1 }
 0x116   :  { %v1437_v16 = vpop.f32.mrb[1].mxu1  ;;  %v1436_v57 = vadd.f32 %v1435_v15, %v365_v39 }
 0x117   :  { %v1439_v17 = vpop.f32.mrb[2].mxu1  ;;  %v1438_v43 = vadd.f32 %v1437_v16, %v369_v40 }
 0x118   :  { %v1440_v18 = vpop.f32.mrb[3].mxu1 }
 0x135   :  { %v1956_v19 = vpop.f32.mrb[4].mxu1 }
 0x136   :  { %v1957_v20 = vpop.f32.mrb[5].mxu1 }
 0x137   :  { %v1958_v21 = vadd.f32 %v1957_v20, %v1956_v19  ;;  %v1959_v23 = vpop.f32.mrb[6].mxu1 }
 0x138   :  { %v1960_v24 = vpop.f32.mrb[7].mxu1 }
 0x139   :  { %v1600_v28 = vadd.f32 %v1958_v21, %v373_v54 }
 0x155   :  { %v1978_v26 = vpop.f32.mrb[8].mxu1 }
 0x156   :  { %v1979_v27 = vpop.f32.mrb[9].mxu1 }
 0x157   :  { %v1980_v29 = vadd.f32 %v1979_v27, %v1978_v26  ;;  %v1981_v31 = vpop.f32.mrb[10].mxu1 }
 0x158   :  { %v1982_v33 = vpop.f32.mrb[11].mxu1 }
 0x159   :  { %v1640_v34 = vadd.f32 %v1980_v29, %v1600_v28 }
 0x175   :  { %v2000_v35 = vpop.f32.mrb[12].mxu1 }
 0x176   :  { %v2001_v36 = vpop.f32.mrb[13].mxu1 }
 0x177   :  { %v2002_v37 = vadd.f32 %v2001_v36, %v2000_v35  ;;  %v2003_v30 = vpop.f32.mrb[14].mxu1 }
 0x178   :  { %v2004_v22 = vpop.f32.mrb[15].mxu1 }
 0x179   :  { %v1680_v38 = vadd.f32 %v2002_v37, %v1640_v34 }
 0x195   :  { %v2022_v45 = vpop.f32.mrb[16].mxu1 }
 0x196   :  { %v1558_v44 = vpop.f32.mrb[0].mxu0  ;;  %v2023_v49 = vpop.f32.mrb[17].mxu1 }
 0x197   :  { %v2029_v46 = vadd.f32 %v1558_v44, %v1436_v57  ;;  %v1560_v48 = vpop.f32.mrb[1].mxu0  ;;  %v2024_v51 = vadd.f32 %v2023_v49, %v2022_v45  ;;  %v2025_v3 = vpop.f32.mrb[18].mxu1 }
 0x198   :  { %v2031_v50 = vadd.f32 %v1560_v48, %v1438_v43  ;;  %v1562_v52 = vpop.f32.mrb[2].mxu0  ;;  %v2026_v56 = vpop.f32.mrb[19].mxu1 }
 0x199   :  { %v1563_v53 = vpop.f32.mrb[3].mxu0  ;;  %v1720_v59 = vadd.f32 %v2024_v51, %v1680_v38 }
 0x19a   :  { %v1938_v58 = vpack.c.bf16 %v2031_v50, %v2029_v46 }
 0x19b   :  { %v1939_v42 = vpack.c.bf16 %v1720_v59, %v1720_v59 }
 0x19c   :  { %1738 = vst [vmem:[%s2990_s4] sm:$0x77] %v1938_v58 }
 0x19d   :  { %1739 = vst [vmem:[%s2990_s4 + $0x8] sm:$0x7] %v1939_v42 }

// kernel: forward.68
= control target key start
LH: loop header
LB: loop body
LE: loop exit
PB: predicated region body
PF: predicated region fallthrough
CT: control target
= control target key end

     0   :  { %v2808_v1 = vmov 0   ;;  %v265_v19 = vlaneseq  ;;  %v2809_v20 = vmov 1966171168   ;;  %vm478_vm0 = vcmask 1041409   ;;  %s3713_s1 = inlined_call_operand.vmem [shape: bf16[384,1280], index: 1, kind: input, shape index: {}]   ;;  %s3714_s0 = inlined_call_operand.vmem [shape: bf16[6,1,384], index: 0, kind: input, shape index: {}]   ;;  %s3715_s2 = inlined_call_operand.vmem [shape: f32[1,1280], index: 2, kind: input, shape index: {}]   ;;  %s3716_s3 = inlined_call_operand.vmem [shape: f32[6,1280], index: 3, kind: output, shape index: {}]  }
   0x1   :  { %v2448_v0 = vld [vmem:[%s3713_s1 + $0x4] ss:$40 sps:$4 sm:$0xff]   ;;  %1791 = vmatprep.mubr.bf16.mxu0 %v2808_v1  ;;  %v2452_v3 = vld [vmem:[%s3713_s1] ss:$40 sps:$4 sm:$0xff]   ;;  %v2454_v5 = vld [vmem:[%s3713_s1 + $0x54] ss:$40 sps:$4 sm:$0xff]   ;;  %v330_v21 = vunpack.c.l.s4 %v2809_v20 }
   0x2   :  { %v2450_v2 = vld [vmem:[%s3713_s1 + $0x504] ss:$40 sps:$4 sm:$0xff]   ;;  %1718 = vmatprep.subr.bf16.mxu1 %v2448_v0  ;;  %v2453_v4 = vld [vmem:[%s3713_s1 + $0x500] ss:$40 sps:$4 sm:$0xff]   ;;  %v2456_v6 = vld [vmem:[%s3713_s1 + $0x554] ss:$40 sps:$4 sm:$0xff]  }
   0x3   :  { %1759 = vmatprep.subr.bf16.mxu0 %v2450_v2  ;;  %1719 = vmatpush1.bf16.msra.mxu1 %v2452_v3  ;;  %v2458_v7 = vld [vmem:[%s3713_s1 + $0x50] ss:$40 sps:$4 sm:$0xff]   ;;  %v2460_v9 = vld [vmem:[%s3713_s1 + $0xa4] ss:$40 sps:$4 sm:$0xff]   ;;  %v2464_v11 = vld [vmem:[%s3713_s1 + $0xa0] ss:$40 sps:$4 sm:$0xff]   ;;  %v331_v27 = vunpack.c.0.s8 %v330_v21 }
   0x4   :  { %1760 = vmatpush1.bf16.msra.mxu0 %v2453_v4  ;;  %1720 = vmatprep.subr.bf16.mxu1 %v2454_v5  ;;  %v2459_v8 = vld [vmem:[%s3713_s1 + $0x550] ss:$40 sps:$4 sm:$0xff]   ;;  %v2462_v10 = vld [vmem:[%s3713_s1 + $0x5a4] ss:$40 sps:$4 sm:$0xff]   ;;  %v2465_v12 = vld [vmem:[%s3713_s1 + $0x5a0] ss:$40 sps:$4 sm:$0xff]  }
   0x5   :  { %1761 = vmatprep.subr.bf16.mxu0 %v2456_v6  ;;  %v2466_v13 = vld [vmem:[%s3713_s1 + $0xf4] ss:$40 sps:$4 sm:$0xff]   ;;  %v2470_v15 = vld [vmem:[%s3713_s1 + $0xf0] ss:$40 sps:$4 sm:$0xff]   ;;  %v2472_v17 = vld [vmem:[%s3713_s1 + $0x144] ss:$40 sps:$4 sm:$0xff]  }
   0x6   :  { %v2468_v14 = vld [vmem:[%s3713_s1 + $0x5f4] ss:$40 sps:$4 sm:$0xff]   ;;  %v2471_v16 = vld [vmem:[%s3713_s1 + $0x5f0] ss:$40 sps:$4 sm:$0xff]   ;;  %v2474_v18 = vld [vmem:[%s3713_s1 + $0x644] ss:$40 sps:$4 sm:$0xff]  }
   0x7   :  { %1721 = vmatpush1.bf16.msra.mxu1 %v2458_v7  ;;  %v2476_v22 = vld [vmem:[%s3713_s1 + $0x140] ss:$40 sps:$4 sm:$0xff]   ;;  %v2478_v24 = vld [vmem:[%s3713_s1 + $0x194] ss:$40 sps:$4 sm:$0xff]   ;;  %v2897_v26 = vshrl.u32 %v265_v19, 7  ;;  %vm481_vm1 = vcmask 1042434  }
   0x8   :  { %1762 = vmatpush1.bf16.msra.mxu0 %v2459_v8  ;;  %1722 = vmatprep.subr.bf16.mxu1 %v2460_v9  ;;  %v2477_v23 = vld [vmem:[%s3713_s1 + $0x640] ss:$40 sps:$4 sm:$0xff]   ;;  %v2480_v25 = vld [vmem:[%s3713_s1 + $0x694] ss:$40 sps:$4 sm:$0xff]   ;;  %v2482_v28 = vld [vmem:[%s3713_s1 + $0x190] ss:$40 sps:$4 sm:$0xff]  }
   0x9   :  { %1763 = vmatprep.subr.bf16.mxu0 %v2462_v10  ;;  %v2483_v29 = vld [vmem:[%s3713_s1 + $0x690] ss:$40 sps:$4 sm:$0xff]   ;;  %v2484_v30 = vld [vmem:[%s3713_s1 + $0x1e4] ss:$40 sps:$4 sm:$0xff]   ;;  %v2912_v32 = vsub.s32 %v331_v27, %v2897_v26  ;;  %v2488_v33 = vld [vmem:[%s3713_s1 + $0x1e0] ss:$40 sps:$4 sm:$0xff]  }
   0xa   :  { %v2486_v31 = vld [vmem:[%s3713_s1 + $0x6e4] ss:$40 sps:$4 sm:$0xff]   ;;  %v2489_v34 = vld [vmem:[%s3713_s1 + $0x6e0] ss:$40 sps:$4 sm:$0xff]   ;;  %v2490_v35 = vld [vmem:[%s3713_s1 + $0x234] ss:$40 sps:$4 sm:$0xff]  }
   0xb   :  { %1723 = vmatpush1.bf16.msra.mxu1 %v2464_v11  ;;  %v2172_v36 = vld.sshfl [vmem:[%s3714_s0] sm:$0x13 pattern:$0x75316420]  ;;  %v2492_v37 = vld [vmem:[%s3713_s1 + $0x734] ss:$40 sps:$4 sm:$0xff]  }
   0xc   :  { %1764 = vmatpush1.bf16.msra.mxu0 %v2465_v12  ;;  %1724 = vmatprep.subr.bf16.mxu1 %v2466_v13  ;;  %v2173_v38 = vld.sshfl [vmem:[%s3714_s0 + $0x3] sm:$0x13 pattern:$0x75316420]  ;;  %v2933_v39 = vrot.slane %v2172_v36, %v2912_v32  ;;  %vm484_vm2 = vcmask 1043459   ;;  %v328_v40 = vcombine.high %v2172_v36, %v2172_v36  ;;  %vm487_vm3 = vcmask 1044484  }
   0xd   :  { %1765 = vmatprep.subr.bf16.mxu0 %v2468_v14  ;;  %v2494_v41 = vld [vmem:[%s3713_s1 + $0x230] ss:$40 sps:$4 sm:$0xff]   ;;  %v2174_v42 = vld.sshfl [vmem:[%s3714_s0 + $0x6] sm:$0x13 pattern:$0x75316420]  ;;  %v2942_v43 = vrot.slane %v2173_v38, %v2912_v32  ;;  %v351_v44 = vcombine.high %v2173_v38, %v2173_v38 }
   0xe   :  { %v2495_v45 = vld [vmem:[%s3713_s1 + $0x730] ss:$40 sps:$4 sm:$0xff]   ;;  %v2175_v46 = vld.sshfl [vmem:[%s3714_s0 + $0x9] sm:$0x13 pattern:$0x75316420]  ;;  %v343_v47 = vcombine.high %v2933_v39, %v2933_v39  ;;  %v2953_v48 = vrot.slane %v2174_v42, %v2912_v32  ;;  %v2956_v49 = vrot.slane %v328_v40, %v2912_v32  ;;  %v374_v50 = vcombine.high %v2174_v42, %v2174_v42 }
   0xf   :  { %1725 = vmatpush1.bf16.msra.mxu1 %v2470_v15  ;;  %vm490_vm4 = vcmask 1045509   ;;  %v2496_v51 = vld [vmem:[%s3713_s1 + $0x284] ss:$40 sps:$4 sm:$0xff]   ;;  %v366_v53 = vcombine.high %v2942_v43, %v2942_v43  ;;  %v2967_v54 = vrot.slane %v2175_v46, %v2912_v32  ;;  %v365_v55 = vrot.slane %v351_v44, %v2912_v32  ;;  %v2500_v56 = vld [vmem:[%s3713_s1 + $0x14] ss:$40 sps:$4 sm:$0xff]  }
  0x10   :  { %1766 = vmatpush1.bf16.msra.mxu0 %v2471_v16  ;;  %1726 = vmatprep.subr.bf16.mxu1 %v2472_v17  ;;  %v2176_v52 = vld.sshfl [vmem:[%s3714_s0 + $0xc] sm:$0x13 pattern:$0x75316420]  ;;  %v389_v58 = vcombine.high %v2953_v48, %v2953_v48  ;;  %v461_v60 = vunpack.c.l.b16 %v343_v47  ;;  %v388_v61 = vrot.slane %v374_v50, %v2912_v32  ;;  %v397_v2 = vcombine.high %v2175_v46, %v2175_v46  ;;  %v2501_v7 = vld [vmem:[%s3713_s1 + $0x280] ss:$40 sps:$4 sm:$0xff]  }
  0x11   :  { %1767 = vmatprep.subr.bf16.mxu0 %v2474_v18  ;;  %v2177_v57 = vld.sshfl [vmem:[%s3714_s0 + $0xf] sm:$0x13 pattern:$0x75316420]  ;;  %v2979_v59 = vrot.slane %v2176_v52, %v2912_v32  ;;  %v412_v62 = vcombine.high %v2967_v54, %v2967_v54  ;;  %v464_v0 = vunpack.c.l.b16 %v366_v53  ;;  %v420_v5 = vcombine.high %v2176_v52, %v2176_v52  ;;  %v2502_v14 = vld [vmem:[%s3713_s1 + $0x2d4] ss:$40 sps:$4 sm:$0xff]  }
  0x12   :  { %v2985_v63 = vrot.slane %v2177_v57, %v2912_v32  ;;  %v467_v4 = vunpack.c.l.b16 %v389_v58  ;;  %v443_v6 = vcombine.high %v2177_v57, %v2177_v57  ;;  %v411_v11 = vrot.slane %v397_v2, %v2912_v32  ;;  %v2506_v40 = vld [vmem:[%s3713_s1 + $0x64] ss:$40 sps:$4 sm:$0xff]   ;;  %v2513_v44 = vld [vmem:[%s3713_s1 + $0x320] ss:$40 sps:$4 sm:$0xff]  }
  0x13   :  { %1727 = vmatpush1.bf16.msra.mxu1 %v2476_v22  ;;  %v435_v3 = vcombine.high %v2979_v59, %v2979_v59  ;;  %v470_v9 = vunpack.c.l.b16 %v412_v62  ;;  %v502_v10 = vrot.slane %v464_v0, 7  ;;  %v434_v15 = vrot.slane %v420_v5, %v2912_v32 }
  0x14   :  { %1768 = vmatpush1.bf16.msra.mxu0 %v2477_v23  ;;  %1728 = vmatprep.subr.bf16.mxu1 %v2478_v24  ;;  %v458_v8 = vcombine.high %v2985_v63, %v2985_v63  ;;  %v504_v13 = vrot.slane %v467_v4, 6  ;;  %v457_v16 = vrot.slane %v443_v6, %v2912_v32  ;;  %v460_v20 = vunpack.c.l.b16 %v2956_v49  ;;  %v2508_v32 = vld [vmem:[%s3713_s1 + $0x324] ss:$40 sps:$4 sm:$0xff]   ;;  %v2514_v49 = vld [vmem:[%s3713_s1 + $0x374] ss:$40 sps:$4 sm:$0xff]  }
  0x15   :  { %1769 = vmatprep.subr.bf16.mxu0 %v2480_v25  ;;  %v473_v12 = vunpack.c.l.b16 %v435_v3  ;;  %v503_v18 = vsel %vm478_vm0, %v502_v10, %v461_v60  ;;  %v506_v19 = vrot.slane %v470_v9, 5  ;;  %v463_v23 = vunpack.c.l.b16 %v365_v55  ;;  %v2525_v3 = vld [vmem:[%s3713_s1 + $0x3c0] ss:$40 sps:$4 sm:$0xff]   ;;  %v2531_v10 = vld [vmem:[%s3713_s1 + $0x410] ss:$40 sps:$4 sm:$0xff]  }
  0x16   :  { %v476_v17 = vunpack.c.l.b16 %v458_v8  ;;  %v505_v21 = vsel %vm481_vm1, %v504_v13, %v503_v18  ;;  %v466_v24 = vunpack.c.l.b16 %v388_v61  ;;  %v462_v47 = vunpack.c.l.b16 %v2942_v43  ;;  %v2512_v43 = vld [vmem:[%s3713_s1 + $0xb4] ss:$40 sps:$4 sm:$0xff]   ;;  %v2520_v61 = vld [vmem:[%s3713_s1 + $0x3c4] ss:$40 sps:$4 sm:$0xff]   ;;  %v2516_v6 = vld [vmem:[%s3713_s1 + $0x100] ss:$40 sps:$4 sm:$0xff]  }
  0x17   :  { %1729 = vmatpush1.bf16.msra.mxu1 %v2482_v28  ;;  %v508_v22 = vrot.slane %v473_v12, 4  ;;  %v507_v25 = vsel %vm484_vm2, %v506_v19, %v505_v21  ;;  %v2507_v28 = vld [vmem:[%s3713_s1 + $0x2d0] ss:$40 sps:$4 sm:$0xff]   ;;  %v492_v36 = vrot.slane %v463_v23, 7  ;;  %v465_v55 = vunpack.c.l.b16 %v2953_v48  ;;  %v2524_v8 = vld [vmem:[%s3713_s1 + $0x154] ss:$40 sps:$4 sm:$0xff]  }
  0x18   :  { %1770 = vmatpush1.bf16.msra.mxu0 %v2483_v29  ;;  %1730 = vmatprep.subr.bf16.mxu1 %v2484_v30  ;;  %v510_v27 = vrot.slane %v476_v17, 3  ;;  %v469_v29 = vunpack.c.l.b16 %v411_v11  ;;  %v472_v30 = vunpack.c.l.b16 %v434_v15  ;;  %v459_v58 = vunpack.c.l.b16 %v2933_v39  ;;  %v2510_v48 = vld [vmem:[%s3713_s1 + $0xb0] ss:$40 sps:$4 sm:$0xff]   ;;  %v2518_v39 = vld [vmem:[%s3713_s1 + $0x104] ss:$40 sps:$4 sm:$0xff]  }
  0x19   :  { %1771 = vmatprep.subr.bf16.mxu0 %v2486_v31  ;;  %v509_v31 = vsel %vm487_vm3, %v508_v22, %v507_v25  ;;  %v477_v60 = vrot.slane %v462_v47, 7  ;;  %v468_v0 = vunpack.c.l.b16 %v2967_v54  ;;  %v480_v2 = vrot.slane %v465_v55, 6  ;;  %v2526_v54 = vld [vmem:[%s3713_s1 + $0x414] ss:$40 sps:$4 sm:$0xff]   ;;  %v2532_v11 = vld [vmem:[%s3713_s1 + $0x464] ss:$40 sps:$4 sm:$0xff]  }
  0x1a   :  { %v498_v42 = vrot.slane %v472_v30, 4  ;;  %v471_v5 = vunpack.c.l.b16 %v2979_v59  ;;  %v474_v59 = vunpack.c.l.b16 %v2985_v63  ;;  %v2522_v13 = vld [vmem:[%s3713_s1 + $0x150] ss:$40 sps:$4 sm:$0xff]   ;;  %v2530_v15 = vld [vmem:[%s3713_s1 + $0x1a4] ss:$40 sps:$4 sm:$0xff]  }
  0x1b   :  { %1731 = vmatpush1.bf16.msra.mxu1 %v2488_v33  ;;  %v475_v33 = vunpack.c.l.b16 %v457_v16  ;;  %v479_v4 = vsel %vm478_vm0, %v477_v60, %v459_v58  ;;  %v2537_v63 = vld [vmem:[%s3713_s1 + $0x460] ss:$40 sps:$4 sm:$0xff]   ;;  %v2538_v17 = vld [vmem:[%s3713_s1 + $0x4b4] ss:$40 sps:$4 sm:$0xff]   ;;  %v2543_v21 = vld [vmem:[%s3713_s1 + $0x4b0] ss:$40 sps:$4 sm:$0xff]  }
  0x1c   :  { %1772 = vmatpush1.bf16.msra.mxu0 %v2489_v34  ;;  %1732 = vmatprep.subr.bf16.mxu1 %v2490_v35  ;;  %v2498_v34 = vld [vmem:[%s3713_s1 + $0x10] ss:$40 sps:$4 sm:$0xff]   ;;  %v511_v35 = vsel %vm490_vm4, %v510_v27, %v509_v31  ;;  %v482_v9 = vsel %vm481_vm1, %v480_v2, %v479_v4  ;;  %v486_v12 = vrot.slane %v471_v5, 4  ;;  %v489_v16 = vrot.slane %v474_v59, 3  ;;  %v2528_v19 = vld [vmem:[%s3713_s1 + $0x1a0] ss:$40 sps:$4 sm:$0xff]  }
  0x1d   :  { %1773 = vmatprep.subr.bf16.mxu0 %v2492_v37  ;;  %v494_v37 = vrot.slane %v466_v24, 6  ;;  %v3015_v38 = vpack.c.b16 %v511_v35, %v511_v35  ;;  %v500_v46 = vrot.slane %v475_v33, 3  ;;  %v2546_v23 = vld [vmem:[%s3713_s1 + $0xc] ss:$40 sps:$4 sm:$0xff]   ;;  %v2534_v24 = vld [vmem:[%s3713_s1 + $0x1f0] ss:$40 sps:$4 sm:$0xff]  }
  0x1e   :  { %v2542_v25 = vld [vmem:[%s3713_s1 + $0x244] ss:$40 sps:$4 sm:$0xff]   ;;  %v2540_v30 = vld [vmem:[%s3713_s1 + $0x240] ss:$40 sps:$4 sm:$0xff]   ;;  %v2549_v31 = vld [vmem:[%s3713_s1 + $0x294] ss:$40 sps:$4 sm:$0xff]  }
  0x1f   :  { %1733 = vmatpush1.bf16.msra.mxu1 %v2494_v41  ;;  %v496_v41 = vrot.slane %v469_v29, 5  ;;  %v2552_v29 = vld [vmem:[%s3713_s1 + $0x5c] ss:$40 sps:$4 sm:$0xff]   ;;  %v2558_v33 = vld [vmem:[%s3713_s1 + $0xac] ss:$40 sps:$4 sm:$0xff]  }
  0x20   :  { %1774 = vmatpush1.bf16.msra.mxu0 %v2495_v45  ;;  %1734 = vmatprep.subr.bf16.mxu1 %v2496_v51  ;;  %v493_v45 = vsel %vm478_vm0, %v492_v36, %v460_v20  ;;  %v2504_v51 = vld [vmem:[%s3713_s1 + $0x60] ss:$40 sps:$4 sm:$0xff]   ;;  %v2536_v20 = vld [vmem:[%s3713_s1 + $0x1f4] ss:$40 sps:$4 sm:$0xff]   ;;  %v2555_v35 = vld [vmem:[%s3713_s1 + $0x2e4] ss:$40 sps:$4 sm:$0xff]  }
  0x21   :  { %1882 = vmatprep.subr.bf16.mxu0 %v2500_v56  ;;  %v495_v50 = vsel %vm481_vm1, %v494_v37, %v493_v45  ;;  %v2519_v56 = vld [vmem:[%s3713_s1 + $0x370] ss:$40 sps:$4 sm:$0xff]   ;;  %v2564_v37 = vld [vmem:[%s3713_s1 + $0xfc] ss:$40 sps:$4 sm:$0xff]   ;;  %v2577_v58 = vld [vmem:[%s3713_s1 + $0x420] ss:$40 sps:$4 sm:$0xff]  }
  0x22   :  { %v497_v52 = vsel %vm484_vm2, %v496_v41, %v495_v50  ;;  %v2556_v36 = vld [vmem:[%s3713_s1 + $0xa8] ss:$40 sps:$4 sm:$0xff]   ;;  %v2561_v41 = vld [vmem:[%s3713_s1 + $0x334] ss:$40 sps:$4 sm:$0xff]   ;;  %v2579_v55 = vld [vmem:[%s3713_s1 + $0x424] ss:$40 sps:$4 sm:$0xff]  }
  0x23   :  { %1735 = vmatpush1.bf16.msra.mxu1 %v2501_v7  ;;  %1792 = vmatmul.mubr.bf16.vlgmr.msra.gmra.mrb[0].mxu0 %v3015_v38  ;;  %v499_v53 = vsel %vm487_vm3, %v498_v42, %v497_v52  ;;  %v483_v7 = vrot.slane %v468_v0, 5  ;;  %v2562_v42 = vld [vmem:[%s3713_s1 + $0xf8] ss:$40 sps:$4 sm:$0xff]   ;;  %v2568_v47 = vld [vmem:[%s3713_s1 + $0x148] ss:$40 sps:$4 sm:$0xff]  }
  0x24   :  { %1736 = vmatprep.subr.bf16.mxu1 %v2502_v14  ;;  %1883 = vmatpush1.bf16.msra.mxu0 %v2498_v34  ;;  %v501_v57 = vsel %vm490_vm4, %v500_v46, %v499_v53  ;;  %v2547_v34 = vld [vmem:[%s3713_s1 + $0x290] ss:$40 sps:$4 sm:$0xff]   ;;  %v2567_v46 = vld [vmem:[%s3713_s1 + $0x384] ss:$40 sps:$4 sm:$0xff]   ;;  %v2565_v50 = vld [vmem:[%s3713_s1 + $0x380] ss:$40 sps:$4 sm:$0xff]  }
  0x25   :  { %1884 = vmatprep.subr.bf16.mxu0 %v2506_v40  ;;  %v3047_v62 = vpack.c.b16 %v501_v57, %v501_v57  ;;  %v485_v14 = vsel %vm484_vm2, %v483_v7, %v482_v9  ;;  %v2553_v40 = vld [vmem:[%s3713_s1 + $0x2e0] ss:$40 sps:$4 sm:$0xff]   ;;  %v2559_v45 = vld [vmem:[%s3713_s1 + $0x330] ss:$40 sps:$4 sm:$0xff]   ;;  %v2588_v57 = vld [vmem:[%s3713_s1 + $0x23c] ss:$40 sps:$4 sm:$0xff]  }
  0x26   :  { %v488_v18 = vsel %vm487_vm3, %v486_v12, %v485_v14  ;;  %v2574_v52 = vld [vmem:[%s3713_s1 + $0x198] ss:$40 sps:$4 sm:$0xff]   ;;  %v2585_v60 = vld [vmem:[%s3713_s1 + $0x474] ss:$40 sps:$4 sm:$0xff]   ;;  %v2592_v2 = vld [vmem:[%s3713_s1 + $0x288] ss:$40 sps:$4 sm:$0xff]  }
  0x27   :  { %1737 = vmatpush1.bf16.msra.mxu1 %v2507_v28  ;;  %1750 = vmatprep.mubr.bf16.mxu1 %v3047_v62  ;;  %v491_v22 = vsel %vm490_vm4, %v489_v16, %v488_v18  ;;  %v2544_v28 = vld [vmem:[%s3713_s1 + $0x8] ss:$40 sps:$4 sm:$0xff]   ;;  %v2598_v5 = vld [vmem:[%s3713_s1 + $0x2d8] ss:$40 sps:$4 sm:$0xff]   ;;  %v2624_v16 = vld [vmem:[%s3713_s1 + $0x41c] ss:$40 sps:$4 sm:$0xff]  }
  0x28   :  { %1738 = vmatprep.subr.bf16.mxu1 %v2508_v32  ;;  %1885 = vmatpush1.bf16.msra.mxu0 %v2504_v51  ;;  %v3113_v27 = vpack.c.b16 %v491_v22, %v491_v22  ;;  %v2550_v32 = vld [vmem:[%s3713_s1 + $0x58] ss:$40 sps:$4 sm:$0xff]   ;;  %v2573_v51 = vld [vmem:[%s3713_s1 + $0x3d4] ss:$40 sps:$4 sm:$0xff]   ;;  %v2604_v9 = vld [vmem:[%s3713_s1 + $0x328] ss:$40 sps:$4 sm:$0xff]  }
  0x29   :  { %1886 = vmatprep.subr.bf16.mxu0 %v2512_v43  ;;  %1914 = vmatprep.mubr.bf16.mxu0 %v3047_v62  ;;  %v2582_v43 = vld [vmem:[%s3713_s1 + $0x1ec] ss:$40 sps:$4 sm:$0xff]   ;;  %v2571_v53 = vld [vmem:[%s3713_s1 + $0x3d0] ss:$40 sps:$4 sm:$0xff]   ;;  %v2589_v4 = vld [vmem:[%s3713_s1 + $0x4c0] ss:$40 sps:$4 sm:$0xff]  }
  0x2a   :  { %v2583_v0 = vld [vmem:[%s3713_s1 + $0x470] ss:$40 sps:$4 sm:$0xff]   ;;  %v2601_v59 = vld [vmem:[%s3713_s1 + $0x560] ss:$40 sps:$4 sm:$0xff]   ;;  %v2621_v18 = vld [vmem:[%s3713_s1 + $0x654] ss:$40 sps:$4 sm:$0xff]  }
  0x2b   :  { %1739 = vmatpush1.bf16.msra.mxu1 %v2513_v44  ;;  %v2570_v44 = vld [vmem:[%s3713_s1 + $0x14c] ss:$40 sps:$4 sm:$0xff]   ;;  %v2595_v7 = vld [vmem:[%s3713_s1 + $0x510] ss:$40 sps:$4 sm:$0xff]  }
  0x2c   :  { %1740 = vmatprep.subr.bf16.mxu1 %v2514_v49  ;;  %1887 = vmatpush1.bf16.msra.mxu0 %v2510_v48  ;;  %v2576_v49 = vld [vmem:[%s3713_s1 + $0x19c] ss:$40 sps:$4 sm:$0xff]   ;;  %v2594_v48 = vld [vmem:[%s3713_s1 + $0x28c] ss:$40 sps:$4 sm:$0xff]   ;;  %v2610_v12 = vld [vmem:[%s3713_s1 + $0x378] ss:$40 sps:$4 sm:$0xff]  }
  0x2d   :  { %1888 = vmatprep.subr.bf16.mxu0 %v2518_v39  ;;  %v2591_v39 = vld [vmem:[%s3713_s1 + $0x4c4] ss:$40 sps:$4 sm:$0xff]   ;;  %v2607_v14 = vld [vmem:[%s3713_s1 + $0x5b0] ss:$40 sps:$4 sm:$0xff]  }
  0x2e   :  { %v2627_v22 = vld [vmem:[%s3713_s1 + $0x6a4] ss:$40 sps:$4 sm:$0xff]  }
  0x2f   :  { %1741 = vmatpush1.bf16.msra.mxu1 %v2519_v56  ;;  %v2580_v56 = vld [vmem:[%s3713_s1 + $0x1e8] ss:$40 sps:$4 sm:$0xff]  }
  0x30   :  { %1742 = vmatprep.subr.bf16.mxu1 %v2520_v61  ;;  %1889 = vmatpush1.bf16.msra.mxu0 %v2516_v6  ;;  %v2586_v61 = vld [vmem:[%s3713_s1 + $0x238] ss:$40 sps:$4 sm:$0xff]   ;;  %v2606_v6 = vld [vmem:[%s3713_s1 + $0x32c] ss:$40 sps:$4 sm:$0xff]  }
  0x31   :  { %1890 = vmatprep.subr.bf16.mxu0 %v2524_v8  ;;  %v2603_v8 = vld [vmem:[%s3713_s1 + $0x564] ss:$40 sps:$4 sm:$0xff]  }
  0x33   :  { %1743 = vmatpush1.bf16.msra.mxu1 %v2525_v3  ;;  %v2600_v3 = vld [vmem:[%s3713_s1 + $0x2dc] ss:$40 sps:$4 sm:$0xff]  }
  0x34   :  { %1744 = vmatprep.subr.bf16.mxu1 %v2526_v54  ;;  %1891 = vmatpush1.bf16.msra.mxu0 %v2522_v13  ;;  %v2597_v54 = vld [vmem:[%s3713_s1 + $0x514] ss:$40 sps:$4 sm:$0xff]  }
  0x35   :  { %1892 = vmatprep.subr.bf16.mxu0 %v2530_v15  ;;  %v2618_v13 = vld [vmem:[%s3713_s1 + $0x3cc] ss:$40 sps:$4 sm:$0xff]  }
  0x36   :  { %v2615_v15 = vld [vmem:[%s3713_s1 + $0x604] ss:$40 sps:$4 sm:$0xff]  }
  0x37   :  { %1745 = vmatpush1.bf16.msra.mxu1 %v2531_v10  ;;  %v2612_v10 = vld [vmem:[%s3713_s1 + $0x37c] ss:$40 sps:$4 sm:$0xff]  }
  0x38   :  { %1746 = vmatprep.subr.bf16.mxu1 %v2532_v11  ;;  %1893 = vmatpush1.bf16.msra.mxu0 %v2528_v19  ;;  %v2609_v11 = vld [vmem:[%s3713_s1 + $0x5b4] ss:$40 sps:$4 sm:$0xff]   ;;  %v2622_v19 = vld [vmem:[%s3713_s1 + $0x418] ss:$40 sps:$4 sm:$0xff]  }
  0x39   :  { %1894 = vmatprep.subr.bf16.mxu0 %v2536_v20  ;;  %v2630_v20 = vld [vmem:[%s3713_s1 + $0x46c] ss:$40 sps:$4 sm:$0xff]  }
  0x3b   :  { %1747 = vmatpush1.bf16.msra.mxu1 %v2537_v63  ;;  %v2616_v63 = vld [vmem:[%s3713_s1 + $0x3c8] ss:$40 sps:$4 sm:$0xff]  }
  0x3c   :  { %1748 = vmatprep.subr.bf16.mxu1 %v2538_v17  ;;  %1895 = vmatpush1.bf16.msra.mxu0 %v2534_v24  ;;  %v2613_v17 = vld [vmem:[%s3713_s1 + $0x600] ss:$40 sps:$4 sm:$0xff]   ;;  %v2636_v24 = vld [vmem:[%s3713_s1 + $0x4bc] ss:$40 sps:$4 sm:$0xff]  }
  0x3d   :  { %1896 = vmatprep.subr.bf16.mxu0 %v2542_v25  ;;  %v2625_v25 = vld [vmem:[%s3713_s1 + $0x6a0] ss:$40 sps:$4 sm:$0xff]  }
  0x3f   :  { %1749 = vmatpush1.bf16.msra.mxu1 %v2543_v21  ;;  %v2619_v21 = vld [vmem:[%s3713_s1 + $0x650] ss:$40 sps:$4 sm:$0xff]  }
  0x40   :  { %1800 = vmatprep.subr.bf16.mxu1 %v2546_v23  ;;  %1897 = vmatpush1.bf16.msra.mxu0 %v2540_v30  ;;  %v2628_v23 = vld [vmem:[%s3713_s1 + $0x468] ss:$40 sps:$4 sm:$0xff]   ;;  %v2642_v30 = vld [vmem:[%s3713_s1 + $0x50c] ss:$40 sps:$4 sm:$0xff]  }
  0x41   :  { %1898 = vmatprep.subr.bf16.mxu0 %v2549_v31  ;;  %v2631_v31 = vld [vmem:[%s3713_s1 + $0x6f0] ss:$40 sps:$4 sm:$0xff]  }
  0x42   :  { %1751 = vmatmul.mubr.bf16.vlgmr.msra.gmra.mrb[0].mxu1 %v3113_v27 }
  0x43   :  { %1801 = vmatpush1.bf16.msra.mxu1 %v2544_v28  ;;  %1832 = vmatprep.mubr.bf16.mxu1 %v3047_v62  ;;  %v2633_v28 = vld [vmem:[%s3713_s1 + $0x6f4] ss:$40 sps:$4 sm:$0xff]  }
  0x44   :  { %1802 = vmatprep.subr.bf16.mxu1 %v2552_v29  ;;  %1899 = vmatpush1.bf16.msra.mxu0 %v2547_v34  ;;  %v2634_v29 = vld [vmem:[%s3713_s1 + $0x4b8] ss:$40 sps:$4 sm:$0xff]   ;;  %v2648_v34 = vld [vmem:[%s3713_s1 + $0x55c] ss:$40 sps:$4 sm:$0xff]  }
  0x45   :  { %1900 = vmatprep.subr.bf16.mxu0 %v2555_v35  ;;  %v2637_v35 = vld [vmem:[%s3713_s1 + $0x740] ss:$40 sps:$4 sm:$0xff]  }
  0x47   :  { %1803 = vmatpush1.bf16.msra.mxu1 %v2550_v32  ;;  %v2639_v32 = vld [vmem:[%s3713_s1 + $0x744] ss:$40 sps:$4 sm:$0xff]  }
  0x48   :  { %1804 = vmatprep.subr.bf16.mxu1 %v2558_v33  ;;  %1901 = vmatpush1.bf16.msra.mxu0 %v2553_v40  ;;  %v2640_v33 = vld [vmem:[%s3713_s1 + $0x508] ss:$40 sps:$4 sm:$0xff]   ;;  %v2654_v40 = vld [vmem:[%s3713_s1 + $0x5ac] ss:$40 sps:$4 sm:$0xff]  }
  0x49   :  { %1902 = vmatprep.subr.bf16.mxu0 %v2561_v41  ;;  %v2643_v41 = vld [vmem:[%s3713_s1 + $0x20] ss:$40 sps:$4 sm:$0xff]  }
  0x4b   :  { %1805 = vmatpush1.bf16.msra.mxu1 %v2556_v36  ;;  %v2645_v36 = vld [vmem:[%s3713_s1 + $0x24] ss:$40 sps:$4 sm:$0xff]  }
  0x4c   :  { %1806 = vmatprep.subr.bf16.mxu1 %v2564_v37  ;;  %1903 = vmatpush1.bf16.msra.mxu0 %v2559_v45  ;;  %v2646_v37 = vld [vmem:[%s3713_s1 + $0x558] ss:$40 sps:$4 sm:$0xff]   ;;  %v2660_v45 = vld [vmem:[%s3713_s1 + $0x5fc] ss:$40 sps:$4 sm:$0xff]  }
  0x4d   :  { %1904 = vmatprep.subr.bf16.mxu0 %v2567_v46  ;;  %v2649_v46 = vld [vmem:[%s3713_s1 + $0x70] ss:$40 sps:$4 sm:$0xff]  }
  0x4f   :  { %1807 = vmatpush1.bf16.msra.mxu1 %v2562_v42  ;;  %v2651_v42 = vld [vmem:[%s3713_s1 + $0x74] ss:$40 sps:$4 sm:$0xff]  }
  0x50   :  { %1808 = vmatprep.subr.bf16.mxu1 %v2570_v44  ;;  %1905 = vmatpush1.bf16.msra.mxu0 %v2565_v50  ;;  %v2652_v44 = vld [vmem:[%s3713_s1 + $0x5a8] ss:$40 sps:$4 sm:$0xff]   ;;  %v2666_v50 = vld [vmem:[%s3713_s1 + $0x64c] ss:$40 sps:$4 sm:$0xff]  }
  0x51   :  { %1906 = vmatprep.subr.bf16.mxu0 %v2573_v51  ;;  %v2655_v51 = vld [vmem:[%s3713_s1 + $0xc0] ss:$40 sps:$4 sm:$0xff]  }
  0x53   :  { %1809 = vmatpush1.bf16.msra.mxu1 %v2568_v47  ;;  %v2657_v47 = vld [vmem:[%s3713_s1 + $0xc4] ss:$40 sps:$4 sm:$0xff]  }
  0x54   :  { %1810 = vmatprep.subr.bf16.mxu1 %v2576_v49  ;;  %1907 = vmatpush1.bf16.msra.mxu0 %v2571_v53  ;;  %v2658_v49 = vld [vmem:[%s3713_s1 + $0x5f8] ss:$40 sps:$4 sm:$0xff]   ;;  %v2672_v53 = vld [vmem:[%s3713_s1 + $0x69c] ss:$40 sps:$4 sm:$0xff]  }
  0x55   :  { %1908 = vmatprep.subr.bf16.mxu0 %v2579_v55  ;;  %v2661_v55 = vld [vmem:[%s3713_s1 + $0x110] ss:$40 sps:$4 sm:$0xff]  }
  0x57   :  { %1811 = vmatpush1.bf16.msra.mxu1 %v2574_v52  ;;  %v2663_v52 = vld [vmem:[%s3713_s1 + $0x114] ss:$40 sps:$4 sm:$0xff]  }
  0x58   :  { %1812 = vmatprep.subr.bf16.mxu1 %v2582_v43  ;;  %1909 = vmatpush1.bf16.msra.mxu0 %v2577_v58  ;;  %v2664_v43 = vld [vmem:[%s3713_s1 + $0x648] ss:$40 sps:$4 sm:$0xff]   ;;  %v2678_v58 = vld [vmem:[%s3713_s1 + $0x6ec] ss:$40 sps:$4 sm:$0xff]  }
  0x59   :  { %1910 = vmatprep.subr.bf16.mxu0 %v2585_v60  ;;  %v2667_v60 = vld [vmem:[%s3713_s1 + $0x160] ss:$40 sps:$4 sm:$0xff]  }
  0x5b   :  { %1813 = vmatpush1.bf16.msra.mxu1 %v2580_v56  ;;  %v2669_v56 = vld [vmem:[%s3713_s1 + $0x164] ss:$40 sps:$4 sm:$0xff]  }
  0x5c   :  { %1814 = vmatprep.subr.bf16.mxu1 %v2588_v57  ;;  %1911 = vmatpush1.bf16.msra.mxu0 %v2583_v0  ;;  %v2670_v57 = vld [vmem:[%s3713_s1 + $0x698] ss:$40 sps:$4 sm:$0xff]   ;;  %v2684_v0 = vld [vmem:[%s3713_s1 + $0x73c] ss:$40 sps:$4 sm:$0xff]  }
  0x5d   :  { %1912 = vmatprep.subr.bf16.mxu0 %v2591_v39  ;;  %v2673_v39 = vld [vmem:[%s3713_s1 + $0x1b0] ss:$40 sps:$4 sm:$0xff]  }
  0x5f   :  { %1815 = vmatpush1.bf16.msra.mxu1 %v2586_v61  ;;  %v2675_v61 = vld [vmem:[%s3713_s1 + $0x1b4] ss:$40 sps:$4 sm:$0xff]  }
  0x60   :  { %1816 = vmatprep.subr.bf16.mxu1 %v2594_v48  ;;  %1913 = vmatpush1.bf16.msra.mxu0 %v2589_v4  ;;  %v2676_v48 = vld [vmem:[%s3713_s1 + $0x6e8] ss:$40 sps:$4 sm:$0xff]   ;;  %v2690_v4 = vld [vmem:[%s3713_s1 + $0x1c] ss:$40 sps:$4 sm:$0xff]  }
  0x61   :  { %1923 = vmatprep.subr.bf16.mxu0 %v2597_v54  ;;  %v2679_v54 = vld [vmem:[%s3713_s1 + $0x200] ss:$40 sps:$4 sm:$0xff]  }
  0x63   :  { %1817 = vmatpush1.bf16.msra.mxu1 %v2592_v2  ;;  %1915 = vmatmul.mubr.bf16.vlgmr.msra.gmra.mrb[4].mxu0 %v3113_v27  ;;  %v2681_v2 = vld [vmem:[%s3713_s1 + $0x204] ss:$40 sps:$4 sm:$0xff]  }
  0x64   :  { %1818 = vmatprep.subr.bf16.mxu1 %v2600_v3  ;;  %1924 = vmatpush1.bf16.msra.mxu0 %v2595_v7  ;;  %v2682_v3 = vld [vmem:[%s3713_s1 + $0x738] ss:$40 sps:$4 sm:$0xff]   ;;  %v2696_v7 = vld [vmem:[%s3713_s1 + $0x6c] ss:$40 sps:$4 sm:$0xff]  }
  0x65   :  { %1955 = vmatprep.mubr.bf16.mxu0 %v2808_v1  ;;  %1925 = vmatprep.subr.bf16.mxu0 %v2603_v8  ;;  %v2685_v8 = vld [vmem:[%s3713_s1 + $0x250] ss:$40 sps:$4 sm:$0xff]  }
  0x67   :  { %1819 = vmatpush1.bf16.msra.mxu1 %v2598_v5  ;;  %v2687_v5 = vld [vmem:[%s3713_s1 + $0x254] ss:$40 sps:$4 sm:$0xff]  }
  0x68   :  { %1820 = vmatprep.subr.bf16.mxu1 %v2606_v6  ;;  %1926 = vmatpush1.bf16.msra.mxu0 %v2601_v59  ;;  %v2688_v6 = vld [vmem:[%s3713_s1 + $0x18] ss:$40 sps:$4 sm:$0xff]   ;;  %v2702_v59 = vld [vmem:[%s3713_s1 + $0xbc] ss:$40 sps:$4 sm:$0xff]  }
  0x69   :  { %1927 = vmatprep.subr.bf16.mxu0 %v2609_v11  ;;  %v2691_v11 = vld [vmem:[%s3713_s1 + $0x2a0] ss:$40 sps:$4 sm:$0xff]  }
  0x6b   :  { %1821 = vmatpush1.bf16.msra.mxu1 %v2604_v9  ;;  %v2693_v9 = vld [vmem:[%s3713_s1 + $0x2a4] ss:$40 sps:$4 sm:$0xff]  }
  0x6c   :  { %1822 = vmatprep.subr.bf16.mxu1 %v2612_v10  ;;  %1928 = vmatpush1.bf16.msra.mxu0 %v2607_v14  ;;  %v2694_v10 = vld [vmem:[%s3713_s1 + $0x68] ss:$40 sps:$4 sm:$0xff]  }
  0x6d   :  { %1929 = vmatprep.subr.bf16.mxu0 %v2615_v15  ;;  %v2697_v14 = vld [vmem:[%s3713_s1 + $0x2f0] ss:$40 sps:$4 sm:$0xff]   ;;  %v2705_v15 = vld [vmem:[%s3713_s1 + $0x344] ss:$40 sps:$4 sm:$0xff]  }
  0x6f   :  { %1823 = vmatpush1.bf16.msra.mxu1 %v2610_v12  ;;  %v2699_v12 = vld [vmem:[%s3713_s1 + $0x2f4] ss:$40 sps:$4 sm:$0xff]  }
  0x70   :  { %1824 = vmatprep.subr.bf16.mxu1 %v2618_v13  ;;  %1930 = vmatpush1.bf16.msra.mxu0 %v2613_v17  ;;  %v2708_v13 = vld [vmem:[%s3713_s1 + $0x10c] ss:$40 sps:$4 sm:$0xff]   ;;  %v2703_v17 = vld [vmem:[%s3713_s1 + $0x340] ss:$40 sps:$4 sm:$0xff]  }
  0x71   :  { %1931 = vmatprep.subr.bf16.mxu0 %v2621_v18  ;;  %v2711_v18 = vld [vmem:[%s3713_s1 + $0x394] ss:$40 sps:$4 sm:$0xff]  }
  0x73   :  { %1825 = vmatpush1.bf16.msra.mxu1 %v2616_v63  ;;  %v2706_v63 = vld [vmem:[%s3713_s1 + $0x108] ss:$40 sps:$4 sm:$0xff]  }
  0x74   :  { %1826 = vmatprep.subr.bf16.mxu1 %v2624_v16  ;;  %1932 = vmatpush1.bf16.msra.mxu0 %v2619_v21  ;;  %v2714_v16 = vld [vmem:[%s3713_s1 + $0x15c] ss:$40 sps:$4 sm:$0xff]   ;;  %v2709_v21 = vld [vmem:[%s3713_s1 + $0x390] ss:$40 sps:$4 sm:$0xff]  }
  0x75   :  { %1933 = vmatprep.subr.bf16.mxu0 %v2627_v22  ;;  %v2717_v22 = vld [vmem:[%s3713_s1 + $0x3e4] ss:$40 sps:$4 sm:$0xff]  }
  0x77   :  { %1827 = vmatpush1.bf16.msra.mxu1 %v2622_v19  ;;  %v2712_v19 = vld [vmem:[%s3713_s1 + $0x158] ss:$40 sps:$4 sm:$0xff]  }
  0x78   :  { %1828 = vmatprep.subr.bf16.mxu1 %v2630_v20  ;;  %1934 = vmatpush1.bf16.msra.mxu0 %v2625_v25  ;;  %v2720_v20 = vld [vmem:[%s3713_s1 + $0x1ac] ss:$40 sps:$4 sm:$0xff]   ;;  %v2715_v25 = vld [vmem:[%s3713_s1 + $0x3e0] ss:$40 sps:$4 sm:$0xff]  }
  0x79   :  { %1935 = vmatprep.subr.bf16.mxu0 %v2633_v28  ;;  %v2723_v28 = vld [vmem:[%s3713_s1 + $0x434] ss:$40 sps:$4 sm:$0xff]  }
  0x7b   :  { %1829 = vmatpush1.bf16.msra.mxu1 %v2628_v23  ;;  %v2718_v23 = vld [vmem:[%s3713_s1 + $0x1a8] ss:$40 sps:$4 sm:$0xff]  }
  0x7c   :  { %1830 = vmatprep.subr.bf16.mxu1 %v2636_v24  ;;  %1936 = vmatpush1.bf16.msra.mxu0 %v2631_v31  ;;  %v2726_v24 = vld [vmem:[%s3713_s1 + $0x1fc] ss:$40 sps:$4 sm:$0xff]   ;;  %v2721_v31 = vld [vmem:[%s3713_s1 + $0x430] ss:$40 sps:$4 sm:$0xff]  }
  0x7d   :  { %1937 = vmatprep.subr.bf16.mxu0 %v2639_v32  ;;  %v2729_v32 = vld [vmem:[%s3713_s1 + $0x484] ss:$40 sps:$4 sm:$0xff]  }
  0x7f   :  { %1831 = vmatpush1.bf16.msra.mxu1 %v2634_v29  ;;  %v2724_v29 = vld [vmem:[%s3713_s1 + $0x1f8] ss:$40 sps:$4 sm:$0xff]  }
  0x80   :  { %1841 = vmatprep.subr.bf16.mxu1 %v2642_v30  ;;  %1938 = vmatpush1.bf16.msra.mxu0 %v2637_v35  ;;  %v2732_v30 = vld [vmem:[%s3713_s1 + $0x24c] ss:$40 sps:$4 sm:$0xff]   ;;  %v2727_v35 = vld [vmem:[%s3713_s1 + $0x480] ss:$40 sps:$4 sm:$0xff]  }
  0x81   :  { %2046 = vmatprep.subr.bf16.mxu0 %v2645_v36  ;;  %v2735_v36 = vld [vmem:[%s3713_s1 + $0x4d4] ss:$40 sps:$4 sm:$0xff]  }
  0x82   :  { %1833 = vmatmul.mubr.bf16.vlgmr.msra.gmra.mrb[4].mxu1 %v3113_v27 }
  0x83   :  { %1842 = vmatpush1.bf16.msra.mxu1 %v2640_v33  ;;  %1873 = vmatprep.mubr.bf16.mxu1 %v2808_v1  ;;  %v2730_v33 = vld [vmem:[%s3713_s1 + $0x248] ss:$40 sps:$4 sm:$0xff]  }
  0x84   :  { %1843 = vmatprep.subr.bf16.mxu1 %v2648_v34  ;;  %1956 = vmatmul.mubr.bf16.vlgmr.msra.gmra.mrb[4].mxu0 %v3015_v38  ;;  %v2738_v34 = vld [vmem:[%s3713_s1 + $0x29c] ss:$40 sps:$4 sm:$0xff]  }
  0x85   :  { %2047 = vmatpush1.bf16.msra.mxu0 %v2643_v41  ;;  %2078 = vmatprep.mubr.bf16.mxu0 %v3047_v62  ;;  %v2733_v41 = vld [vmem:[%s3713_s1 + $0x4d0] ss:$40 sps:$4 sm:$0xff]  }
  0x86   :  { %2048 = vmatprep.subr.bf16.mxu0 %v2651_v42  ;;  %v2741_v42 = vld [vmem:[%s3713_s1 + $0x524] ss:$40 sps:$4 sm:$0xff]  }
  0x87   :  { %1844 = vmatpush1.bf16.msra.mxu1 %v2646_v37  ;;  %v2736_v37 = vld [vmem:[%s3713_s1 + $0x298] ss:$40 sps:$4 sm:$0xff]  }
  0x88   :  { %1845 = vmatprep.subr.bf16.mxu1 %v2654_v40  ;;  %v2744_v40 = vld [vmem:[%s3713_s1 + $0x2ec] ss:$40 sps:$4 sm:$0xff]  }
  0x89   :  { %2049 = vmatpush1.bf16.msra.mxu0 %v2649_v46  ;;  %v2739_v46 = vld [vmem:[%s3713_s1 + $0x520] ss:$40 sps:$4 sm:$0xff]  }
  0x8a   :  { %2050 = vmatprep.subr.bf16.mxu0 %v2657_v47  ;;  %v2747_v47 = vld [vmem:[%s3713_s1 + $0x574] ss:$40 sps:$4 sm:$0xff]  }
  0x8b   :  { %1846 = vmatpush1.bf16.msra.mxu1 %v2652_v44  ;;  %v2742_v44 = vld [vmem:[%s3713_s1 + $0x2e8] ss:$40 sps:$4 sm:$0xff]  }
  0x8c   :  { %1847 = vmatprep.subr.bf16.mxu1 %v2660_v45  ;;  %v2750_v45 = vld [vmem:[%s3713_s1 + $0x33c] ss:$40 sps:$4 sm:$0xff]  }
  0x8d   :  { %2051 = vmatpush1.bf16.msra.mxu0 %v2655_v51  ;;  %v2745_v51 = vld [vmem:[%s3713_s1 + $0x570] ss:$40 sps:$4 sm:$0xff]  }
  0x8e   :  { %2052 = vmatprep.subr.bf16.mxu0 %v2663_v52  ;;  %v2753_v52 = vld [vmem:[%s3713_s1 + $0x5c4] ss:$40 sps:$4 sm:$0xff]  }
  0x8f   :  { %1848 = vmatpush1.bf16.msra.mxu1 %v2658_v49  ;;  %v2748_v49 = vld [vmem:[%s3713_s1 + $0x338] ss:$40 sps:$4 sm:$0xff]  }
  0x90   :  { %1849 = vmatprep.subr.bf16.mxu1 %v2666_v50  ;;  %v2756_v50 = vld [vmem:[%s3713_s1 + $0x38c] ss:$40 sps:$4 sm:$0xff]  }
  0x91   :  { %2053 = vmatpush1.bf16.msra.mxu0 %v2661_v55  ;;  %v2751_v55 = vld [vmem:[%s3713_s1 + $0x5c0] ss:$40 sps:$4 sm:$0xff]  }
  0x92   :  { %2054 = vmatprep.subr.bf16.mxu0 %v2669_v56  ;;  %v2759_v56 = vld [vmem:[%s3713_s1 + $0x614] ss:$40 sps:$4 sm:$0xff]  }
  0x93   :  { %1850 = vmatpush1.bf16.msra.mxu1 %v2664_v43  ;;  %v2754_v43 = vld [vmem:[%s3713_s1 + $0x388] ss:$40 sps:$4 sm:$0xff]  }
  0x94   :  { %1851 = vmatprep.subr.bf16.mxu1 %v2672_v53  ;;  %v2762_v53 = vld [vmem:[%s3713_s1 + $0x3dc] ss:$40 sps:$4 sm:$0xff]  }
  0x95   :  { %2055 = vmatpush1.bf16.msra.mxu0 %v2667_v60  ;;  %v2757_v60 = vld [vmem:[%s3713_s1 + $0x610] ss:$40 sps:$4 sm:$0xff]  }
  0x96   :  { %2056 = vmatprep.subr.bf16.mxu0 %v2675_v61  ;;  %v2765_v61 = vld [vmem:[%s3713_s1 + $0x664] ss:$40 sps:$4 sm:$0xff]  }
  0x97   :  { %1852 = vmatpush1.bf16.msra.mxu1 %v2670_v57  ;;  %v2760_v57 = vld [vmem:[%s3713_s1 + $0x3d8] ss:$40 sps:$4 sm:$0xff]  }
  0x98   :  { %1853 = vmatprep.subr.bf16.mxu1 %v2678_v58  ;;  %v2768_v58 = vld [vmem:[%s3713_s1 + $0x42c] ss:$40 sps:$4 sm:$0xff]  }
  0x99   :  { %2057 = vmatpush1.bf16.msra.mxu0 %v2673_v39  ;;  %v2763_v39 = vld [vmem:[%s3713_s1 + $0x660] ss:$40 sps:$4 sm:$0xff]  }
  0x9a   :  { %2058 = vmatprep.subr.bf16.mxu0 %v2681_v2  ;;  %v2771_v2 = vld [vmem:[%s3713_s1 + $0x6b4] ss:$40 sps:$4 sm:$0xff]  }
  0x9b   :  { %1854 = vmatpush1.bf16.msra.mxu1 %v2676_v48  ;;  %v2766_v48 = vld [vmem:[%s3713_s1 + $0x428] ss:$40 sps:$4 sm:$0xff]  }
  0x9c   :  { %1855 = vmatprep.subr.bf16.mxu1 %v2684_v0  ;;  %v2774_v0 = vld [vmem:[%s3713_s1 + $0x47c] ss:$40 sps:$4 sm:$0xff]  }
  0x9d   :  { %2059 = vmatpush1.bf16.msra.mxu0 %v2679_v54  ;;  %v2769_v54 = vld [vmem:[%s3713_s1 + $0x6b0] ss:$40 sps:$4 sm:$0xff]  }
  0x9e   :  { %2060 = vmatprep.subr.bf16.mxu0 %v2687_v5  ;;  %v2777_v5 = vld [vmem:[%s3713_s1 + $0x704] ss:$40 sps:$4 sm:$0xff]  }
  0x9f   :  { %1856 = vmatpush1.bf16.msra.mxu1 %v2682_v3  ;;  %v2772_v3 = vld [vmem:[%s3713_s1 + $0x478] ss:$40 sps:$4 sm:$0xff]  }
  0xa0   :  { %1964 = vmatprep.subr.bf16.mxu1 %v2690_v4  ;;  %v2780_v4 = vld [vmem:[%s3713_s1 + $0x4cc] ss:$40 sps:$4 sm:$0xff]  }
  0xa1   :  { %2061 = vmatpush1.bf16.msra.mxu0 %v2685_v8  ;;  %v2775_v8 = vld [vmem:[%s3713_s1 + $0x700] ss:$40 sps:$4 sm:$0xff]  }
  0xa2   :  { %1874 = vmatmul.mubr.bf16.vlgmr.msra.gmra.mrb[4].mxu1 %v3015_v38  ;;  %2062 = vmatprep.subr.bf16.mxu0 %v2693_v9  ;;  %v2783_v9 = vld [vmem:[%s3713_s1 + $0x754] ss:$40 sps:$4 sm:$0xff]  }
  0xa3   :  { %1965 = vmatpush1.bf16.msra.mxu1 %v2688_v6  ;;  %1996 = vmatprep.mubr.bf16.mxu1 %v3047_v62  ;;  %v2700_v62 = vld [vmem:[%s3713_s1 + $0xb8] ss:$40 sps:$4 sm:$0xff]   ;;  %v2778_v6 = vld [vmem:[%s3713_s1 + $0x4c8] ss:$40 sps:$4 sm:$0xff]  }
  0xa4   :  { %1966 = vmatprep.subr.bf16.mxu1 %v2696_v7  ;;  %v2786_v7 = vld [vmem:[%s3713_s1 + $0x51c] ss:$40 sps:$4 sm:$0xff]  }
  0xa5   :  { %2063 = vmatpush1.bf16.msra.mxu0 %v2691_v11  ;;  %v2781_v11 = vld [vmem:[%s3713_s1 + $0x750] ss:$40 sps:$4 sm:$0xff]  }
  0xa6   :  { %2064 = vmatprep.subr.bf16.mxu0 %v2699_v12  ;;  %v2787_v12 = vld [vmem:[%s3713_s1 + $0x568] ss:$40 sps:$4 sm:$0xff]  }
  0xa7   :  { %1967 = vmatpush1.bf16.msra.mxu1 %v2694_v10  ;;  %v2784_v10 = vld [vmem:[%s3713_s1 + $0x518] ss:$40 sps:$4 sm:$0xff]  }
  0xa8   :  { %1968 = vmatprep.subr.bf16.mxu1 %v2702_v59  ;;  %v2789_v59 = vld [vmem:[%s3713_s1 + $0x56c] ss:$40 sps:$4 sm:$0xff]  }
  0xa9   :  { %2065 = vmatpush1.bf16.msra.mxu0 %v2697_v14  ;;  %v2798_v14 = vld [vmem:[%s3713_s1 + $0x65c] ss:$40 sps:$4 sm:$0xff]  }
  0xaa   :  { %2066 = vmatprep.subr.bf16.mxu0 %v2705_v15  ;;  %v2796_v15 = vld [vmem:[%s3713_s1 + $0x658] ss:$40 sps:$4 sm:$0xff]  }
  0xab   :  { %1969 = vmatpush1.bf16.msra.mxu1 %v2700_v62  ;;  %v2792_v62 = vld [vmem:[%s3713_s1 + $0x5bc] ss:$40 sps:$4 sm:$0xff]  }
  0xac   :  { %1970 = vmatprep.subr.bf16.mxu1 %v2708_v13  ;;  %v2790_v13 = vld [vmem:[%s3713_s1 + $0x5b8] ss:$40 sps:$4 sm:$0xff]  }
  0xad   :  { %2067 = vmatpush1.bf16.msra.mxu0 %v2703_v17  ;;  %v2804_v17 = vld [vmem:[%s3713_s1 + $0x6fc] ss:$40 sps:$4 sm:$0xff]  }
  0xae   :  { %2068 = vmatprep.subr.bf16.mxu0 %v2711_v18  ;;  %v2802_v18 = vld [vmem:[%s3713_s1 + $0x6f8] ss:$40 sps:$4 sm:$0xff]  }
  0xaf   :  { %1971 = vmatpush1.bf16.msra.mxu1 %v2706_v63  ;;  %v2801_v63 = vld [vmem:[%s3713_s1 + $0x6ac] ss:$40 sps:$4 sm:$0xff]  }
  0xb0   :  { %1972 = vmatprep.subr.bf16.mxu1 %v2714_v16  ;;  %v2799_v16 = vld [vmem:[%s3713_s1 + $0x6a8] ss:$40 sps:$4 sm:$0xff]  }
  0xb1   :  { %2069 = vmatpush1.bf16.msra.mxu0 %v2709_v21 }
  0xb2   :  { %2070 = vmatprep.subr.bf16.mxu0 %v2717_v22 }
  0xb3   :  { %1973 = vmatpush1.bf16.msra.mxu1 %v2712_v19  ;;  %v2807_v19 = vld [vmem:[%s3713_s1 + $0x74c] ss:$40 sps:$4 sm:$0xff]  }
  0xb4   :  { %1974 = vmatprep.subr.bf16.mxu1 %v2720_v20  ;;  %v2805_v20 = vld [vmem:[%s3713_s1 + $0x748] ss:$40 sps:$4 sm:$0xff]  }
  0xb5   :  { %2071 = vmatpush1.bf16.msra.mxu0 %v2715_v25  ;;  %v267_v25 = vsub.s32 0, %v2897_v26 }
  0xb6   :  { %2072 = vmatprep.subr.bf16.mxu0 %v2723_v28  ;;  %v3663_v28 = vld [vmem:[%s3715_s2] sm:$0xff] }
  0xb7   :  { %1975 = vmatpush1.bf16.msra.mxu1 %v2718_v23 }
  0xb8   :  { %1976 = vmatprep.subr.bf16.mxu1 %v2726_v24 }
  0xb9   :  { %2073 = vmatpush1.bf16.msra.mxu0 %v2721_v31 }
  0xba   :  { %2074 = vmatprep.subr.bf16.mxu0 %v2729_v32 }
  0xbb   :  { %1977 = vmatpush1.bf16.msra.mxu1 %v2724_v29  ;;  %v271_v29 = vsub.s32 1, %v2897_v26 }
  0xbc   :  { %1978 = vmatprep.subr.bf16.mxu1 %v2732_v30  ;;  %v268_v30 = vrot.slane %v3663_v28, %v267_v25 }
  0xbd   :  { %2075 = vmatpush1.bf16.msra.mxu0 %v2727_v35  ;;  %v272_v31 = vrot.slane %v3663_v28, %v271_v29 }
  0xbe   :  { %2076 = vmatprep.subr.bf16.mxu0 %v2735_v36 }
  0xbf   :  { %1979 = vmatpush1.bf16.msra.mxu1 %v2730_v33 }
  0xc0   :  { %1980 = vmatprep.subr.bf16.mxu1 %v2738_v34 }
  0xc1   :  { %2077 = vmatpush1.bf16.msra.mxu0 %v2733_v41 }
  0xc2   :  { %2087 = vmatprep.subr.bf16.mxu0 %v2741_v42 }
  0xc3   :  { %1981 = vmatpush1.bf16.msra.mxu1 %v2736_v37 }
  0xc4   :  { %1982 = vmatprep.subr.bf16.mxu1 %v2744_v40  ;;  %2079 = vmatmul.mubr.bf16.vlgmr.msra.gmra.mrb[8].mxu0 %v3113_v27 }
  0xc5   :  { %2088 = vmatpush1.bf16.msra.mxu0 %v2739_v46  ;;  %2119 = vmatprep.mubr.bf16.mxu0 %v2808_v1  ;;  %v283_v46 = vsub.s32 4, %v2897_v26 }
  0xc6   :  { %2089 = vmatprep.subr.bf16.mxu0 %v2747_v47  ;;  %v287_v47 = vsub.s32 5, %v2897_v26 }
  0xc7   :  { %1983 = vmatpush1.bf16.msra.mxu1 %v2742_v44 }
  0xc8   :  { %1984 = vmatprep.subr.bf16.mxu1 %v2750_v45 }
  0xc9   :  { %2090 = vmatpush1.bf16.msra.mxu0 %v2745_v51 }
  0xca   :  { %2091 = vmatprep.subr.bf16.mxu0 %v2753_v52 }
  0xcb   :  { %1985 = vmatpush1.bf16.msra.mxu1 %v2748_v49  ;;  %v284_v49 = vrot.slane %v3663_v28, %v283_v46 }
  0xcc   :  { %1986 = vmatprep.subr.bf16.mxu1 %v2756_v50  ;;  %v288_v50 = vrot.slane %v3663_v28, %v287_v47 }
  0xcd   :  { %2092 = vmatpush1.bf16.msra.mxu0 %v2751_v55 }
  0xce   :  { %2093 = vmatprep.subr.bf16.mxu0 %v2759_v56 }
  0xcf   :  { %1987 = vmatpush1.bf16.msra.mxu1 %v2754_v43 }
  0xd0   :  { %1988 = vmatprep.subr.bf16.mxu1 %v2762_v53 }
  0xd1   :  { %2094 = vmatpush1.bf16.msra.mxu0 %v2757_v60 }
  0xd2   :  { %2095 = vmatprep.subr.bf16.mxu0 %v2765_v61 }
  0xd3   :  { %1989 = vmatpush1.bf16.msra.mxu1 %v2760_v57 }
  0xd4   :  { %1990 = vmatprep.subr.bf16.mxu1 %v2768_v58 }
  0xd5   :  { %2096 = vmatpush1.bf16.msra.mxu0 %v2763_v39 }
  0xd6   :  { %2097 = vmatprep.subr.bf16.mxu0 %v2771_v2 }
  0xd7   :  { %1991 = vmatpush1.bf16.msra.mxu1 %v2766_v48  ;;  %v275_v48 = vsub.s32 2, %v2897_v26 }
  0xd8   :  { %1992 = vmatprep.subr.bf16.mxu1 %v2774_v0  ;;  %v279_v0 = vsub.s32 3, %v2897_v26 }
  0xd9   :  { %2098 = vmatpush1.bf16.msra.mxu0 %v2769_v54  ;;  %v276_v39 = vrot.slane %v3663_v28, %v275_v48 }
  0xda   :  { %2099 = vmatprep.subr.bf16.mxu0 %v2777_v5  ;;  %v280_v2 = vrot.slane %v3663_v28, %v279_v0 }
  0xdb   :  { %1993 = vmatpush1.bf16.msra.mxu1 %v2772_v3 }
  0xdc   :  { %1994 = vmatprep.subr.bf16.mxu1 %v2780_v4 }
  0xdd   :  { %2100 = vmatpush1.bf16.msra.mxu0 %v2775_v8 }
  0xde   :  { %2101 = vmatprep.subr.bf16.mxu0 %v2783_v9 }
  0xdf   :  { %1995 = vmatpush1.bf16.msra.mxu1 %v2778_v6 }
  0xe0   :  { %2005 = vmatprep.subr.bf16.mxu1 %v2786_v7 }
  0xe1   :  { %2102 = vmatpush1.bf16.msra.mxu0 %v2781_v11  ;;  %v262_v11 = vld [vmem:[%s3715_s2 + $0x8] sm:$0x3] }
  0xe2   :  { %1997 = vmatmul.mubr.bf16.vlgmr.msra.gmra.mrb[8].mxu1 %v3113_v27  ;;  %v2795_v27 = vld [vmem:[%s3713_s1 + $0x60c] ss:$40 sps:$4 sm:$0xff]  }
  0xe3   :  { %2006 = vmatpush1.bf16.msra.mxu1 %v2784_v10  ;;  %2037 = vmatprep.mubr.bf16.mxu1 %v2808_v1  ;;  %v2793_v1 = vld [vmem:[%s3713_s1 + $0x608] ss:$40 sps:$4 sm:$0xff]  }
  0xe4   :  { %2007 = vmatprep.subr.bf16.mxu1 %v2789_v59  ;;  %2120 = vmatmul.mubr.bf16.vlgmr.msra.gmra.mrb[8].mxu0 %v3015_v38 }
  0xe7   :  { %2008 = vmatpush1.bf16.msra.mxu1 %v2787_v12  ;;  %v300_v12 = vrot.slane %v262_v11, %v267_v25 }
  0xe8   :  { %2009 = vmatprep.subr.bf16.mxu1 %v2792_v62  ;;  %v304_v62 = vrot.slane %v262_v11, %v271_v29 }
  0xeb   :  { %2010 = vmatpush1.bf16.msra.mxu1 %v2790_v13 }
  0xec   :  { %2011 = vmatprep.subr.bf16.mxu1 %v2795_v27 }
  0xef   :  { %2012 = vmatpush1.bf16.msra.mxu1 %v2793_v1 }
  0xf0   :  { %2013 = vmatprep.subr.bf16.mxu1 %v2798_v14 }
  0xf3   :  { %2014 = vmatpush1.bf16.msra.mxu1 %v2796_v15 }
  0xf4   :  { %2015 = vmatprep.subr.bf16.mxu1 %v2801_v63 }
  0xf6   :  { %v1793_v21 = vpop.f32.mrb[0].mxu0 }
  0xf7   :  { %2016 = vmatpush1.bf16.msra.mxu1 %v2799_v16  ;;  %v1795_v22 = vpop.f32.mrb[1].mxu0 }
  0xf8   :  { %2017 = vmatprep.subr.bf16.mxu1 %v2804_v17  ;;  %v1797_v23 = vpop.f32.mrb[2].mxu0 }
  0xf9   :  { %v1798_v24 = vpop.f32.mrb[3].mxu0 }
  0xfb   :  { %2018 = vmatpush1.bf16.msra.mxu1 %v2802_v18 }
  0xfc   :  { %2019 = vmatprep.subr.bf16.mxu1 %v2807_v19 }
  0xff   :  { %2020 = vmatpush1.bf16.msra.mxu1 %v2805_v20  ;;  %v291_v20 = vsub.s32 6, %v2897_v26 }
 0x102   :  { %2038 = vmatmul.mubr.bf16.vlgmr.msra.gmra.mrb[8].mxu1 %v3015_v38 }
 0x115   :  { %v1752_v32 = vpop.f32.mrb[0].mxu1 }
 0x116   :  { %v1753_v33 = vadd.f32 %v1752_v32, %v268_v30  ;;  %v1754_v34 = vpop.f32.mrb[1].mxu1 }
 0x117   :  { %v1755_v35 = vadd.f32 %v1754_v34, %v272_v31  ;;  %v1756_v36 = vpop.f32.mrb[2].mxu1 }
 0x118   :  { %v1794_v37 = vadd.f32 %v1793_v21, %v1753_v33  ;;  %v1757_v38 = vpop.f32.mrb[3].mxu1  ;;  %v295_v21 = vsub.s32 7, %v2897_v26 }
 0x119   :  { %v1796_v40 = vadd.f32 %v1795_v22, %v1755_v35  ;;  %v292_v22 = vrot.slane %v3663_v28, %v291_v20 }
 0x11a   :  { %v2128_v41 = vmax.f32 %v1794_v37, 0.0  ;;  %v296_v23 = vrot.slane %v3663_v28, %v295_v21 }
 0x11b   :  { %v2129_v42 = vmax.f32 %v1796_v40, 0.0 }
 0x11c   :  { %v2138_v44 = vmin.f32 %v2128_v41, 6.0 }
 0x11d   :  { %v2139_v45 = vmin.f32 %v2129_v42, 6.0 }
 0x11e   :  { %2158 = vst [vmem:[%s3716_s3] sm:$0x3f] %v2138_v44 }
 0x11f   :  { %2159 = vst [vmem:[%s3716_s3 + $0x8] sm:$0x3f] %v2139_v45 }
 0x157   :  { %v1957_v51 = vpop.f32.mrb[4].mxu0 }
 0x158   :  { %v2424_v52 = vadd.f32 %v1957_v51, %v284_v49  ;;  %v1959_v43 = vpop.f32.mrb[5].mxu0 }
 0x159   :  { %v2425_v53 = vadd.f32 %v1959_v43, %v288_v50  ;;  %v1961_v55 = vpop.f32.mrb[6].mxu0 }
 0x15a   :  { %v2132_v56 = vmax.f32 %v2424_v52, 0.0  ;;  %v1962_v57 = vpop.f32.mrb[7].mxu0 }
 0x15b   :  { %v2133_v58 = vmax.f32 %v2425_v53, 0.0 }
 0x15c   :  { %v2142_v60 = vmin.f32 %v2132_v56, 6.0 }
 0x15d   :  { %v2143_v61 = vmin.f32 %v2133_v58, 6.0 }
 0x15e   :  { %2162 = vst [vmem:[%s3716_s3 + $0x20] sm:$0x3f] %v2142_v60 }
 0x15f   :  { %2163 = vst [vmem:[%s3716_s3 + $0x28] sm:$0x3f] %v2143_v61 }
 0x175   :  { %v1875_v3 = vpop.f32.mrb[4].mxu1 }
 0x176   :  { %v2422_v4 = vadd.f32 %v1875_v3, %v276_v39  ;;  %v1877_v54 = vpop.f32.mrb[5].mxu1 }
 0x177   :  { %v2423_v5 = vadd.f32 %v1877_v54, %v280_v2  ;;  %v1879_v6 = vpop.f32.mrb[6].mxu1 }
 0x178   :  { %v2130_v7 = vmax.f32 %v2422_v4, 0.0  ;;  %v1880_v8 = vpop.f32.mrb[7].mxu1 }
 0x179   :  { %v2131_v9 = vmax.f32 %v2423_v5, 0.0 }
 0x17a   :  { %v2140_v10 = vmin.f32 %v2130_v7, 6.0 }
 0x17b   :  { %v2141_v59 = vmin.f32 %v2131_v9, 6.0 }
 0x17c   :  { %2160 = vst [vmem:[%s3716_s3 + $0x10] sm:$0x3f] %v2140_v10 }
 0x17d   :  { %2161 = vst [vmem:[%s3716_s3 + $0x18] sm:$0x3f] %v2141_v59 }
 0x1b7   :  { %v2121_v13 = vpop.f32.mrb[8].mxu0 }
 0x1b8   :  { %v2428_v27 = vadd.f32 %v2121_v13, %v300_v12  ;;  %v2123_v1 = vpop.f32.mrb[9].mxu0 }
 0x1b9   :  { %v2429_v14 = vadd.f32 %v2123_v1, %v304_v62  ;;  %v2125_v15 = vpop.f32.mrb[10].mxu0 }
 0x1ba   :  { %v2136_v63 = vmax.f32 %v2428_v27, 0.0  ;;  %v2126_v16 = vpop.f32.mrb[11].mxu0 }
 0x1bb   :  { %v2137_v17 = vmax.f32 %v2429_v14, 0.0 }
 0x1bc   :  { %v2146_v18 = vmin.f32 %v2136_v63, 6.0 }
 0x1bd   :  { %v2147_v19 = vmin.f32 %v2137_v17, 6.0 }
 0x1be   :  { %2166 = vst [vmem:[%s3716_s3 + $0x40] sm:$0x3f] %v2146_v18 }
 0x1bf   :  { %2167 = vst [vmem:[%s3716_s3 + $0x48] sm:$0x3f] %v2147_v19 }
 0x1d5   :  { %v2039_v24 = vpop.f32.mrb[8].mxu1 }
 0x1d6   :  { %v2426_v25 = vadd.f32 %v2039_v24, %v292_v22  ;;  %v2041_v29 = vpop.f32.mrb[9].mxu1 }
 0x1d7   :  { %v2427_v30 = vadd.f32 %v2041_v29, %v296_v23  ;;  %v2043_v31 = vpop.f32.mrb[10].mxu1 }
 0x1d8   :  { %v2134_v32 = vmax.f32 %v2426_v25, 0.0  ;;  %v2044_v33 = vpop.f32.mrb[11].mxu1 }
 0x1d9   :  { %v2135_v34 = vmax.f32 %v2427_v30, 0.0 }
 0x1da   :  { %v2144_v35 = vmin.f32 %v2134_v32, 6.0 }
 0x1db   :  { %v2145_v36 = vmin.f32 %v2135_v34, 6.0 }
 0x1dc   :  { %2164 = vst [vmem:[%s3716_s3 + $0x30] sm:$0x3f] %v2144_v35 }
 0x1dd   :  { %2165 = vst [vmem:[%s3716_s3 + $0x38] sm:$0x3f] %v2145_v36 }

// kernel: forward.69
= control target key start
LH: loop header
LB: loop body
LE: loop exit
PB: predicated region body
PF: predicated region fallthrough
CT: control target
= control target key end

     0   :  { %v1506_v47 = vmov 1983009808   ;;  %v223_v49 = vlaneseq  ;;  %vm1508_vm0 = vmmov 0   ;;  %vm633_vm1 = vcmask 261120   ;;  %s2236_s2 = inlined_call_operand.vmem [shape: f32[1280,128], index: 2, kind: input, shape index: {}]   ;;  %s2237_s0 = inlined_call_operand.vmem [shape: f32[2,1280], index: 0, kind: input, shape index: {}]   ;;  %s2238_s4 = inlined_call_operand.vmem [shape: f32[32,64], index: 4, kind: input, shape index: {}]   ;;  %s2239_s1 = inlined_call_operand.vmem [shape: f32[2,32], index: 1, kind: input, shape index: {}]   ;;  %s2240_s6 = inlined_call_operand.vmem [shape: f32[64,32], index: 6, kind: input, shape index: {}]   ;;  %s2241_s8 = inlined_call_operand.vmem [shape: f32[128,64], index: 8, kind: input, shape index: {}]   ;;  %s2242_s3 = inlined_call_operand.vmem [shape: f32[1,128], index: 3, kind: input, shape index: {}]   ;;  %s2243_s5 = inlined_call_operand.vmem [shape: f32[1,64], index: 5, kind: input, shape index: {}]   ;;  %s2244_s9 = inlined_call_operand.vmem [shape: f32[32,64], index: 9, kind: input, shape index: {}]   ;;  %s2245_s7 = inlined_call_operand.vmem [shape: f32[1,32], index: 7, kind: input, shape index: {}]   ;;  %s2246_s12 = inlined_call_operand.<no memory space> [shape: f32[1,1], index: 12, kind: input, shape index: {}]   ;;  %s2247_s10 = inlined_call_operand.vmem [shape: f32[1,64], index: 10, kind: input, shape index: {}]   ;;  %s2248_s11 = inlined_call_operand.vmem [shape: f32[1,64], index: 11, kind: input, shape index: {}]   ;;  %s2249_s13 = inlined_call_operand.vmem [shape: f32[2,1], index: 13, kind: output, shape index: {}]  }
   0x1   :  { %v65_v0 = vld [vmem:[%s2236_s2 + $0x80] sm:$0xff]  ;;  %v66_v1 = vld [vmem:[%s2236_s2 + $0x88] sm:$0xff]  ;;  %v67_v11 = vld [vmem:[%s2236_s2 + $0x90] sm:$0xff]  ;;  %v221_v48 = vunpack.c.l.s4 %v1506_v47  ;;  %vm723_vm2 = vcmask 523264   ;;  %vm977_vm3 = vcmask 517120   ;;  %vm989_vm4 = vcmask 1024  }
   0x2   :  { %v97_v2 = vld [vmem:[%s2236_s2 + $0x180] sm:$0xff]  ;;  %v1292_v3 = vpack.c.bf16 %v66_v1, %v65_v0  ;;  %v98_v4 = vld [vmem:[%s2236_s2 + $0x188] sm:$0xff]  ;;  %v68_v13 = vld [vmem:[%s2236_s2 + $0x98] sm:$0xff]  ;;  %v224_v0 = vshrl.u32 %v223_v49, 7 }
   0x3   :  { %v49_v5 = vld [vmem:[%s2236_s2] sm:$0xff]  ;;  %v50_v6 = vld [vmem:[%s2236_s2 + $0x8] sm:$0xff]  ;;  %v1324_v7 = vpack.c.bf16 %v98_v4, %v97_v2  ;;  %v99_v14 = vld [vmem:[%s2236_s2 + $0x190] sm:$0xff]  ;;  %v1296_v16 = vpack.c.bf16 %v68_v13, %v67_v11  ;;  %v222_v63 = vunpack.c.0.s8 %v221_v48 }
   0x4   :  { %v1294_v8 = vpack.c.bf16 %v50_v6, %v49_v5  ;;  %v81_v9 = vld [vmem:[%s2236_s2 + $0x100] sm:$0xff]  ;;  %v82_v10 = vld [vmem:[%s2236_s2 + $0x108] sm:$0xff]  ;;  %1293 = vmatprep.subr.bf16.mxu0 %v1292_v3  ;;  %v100_v15 = vld [vmem:[%s2236_s2 + $0x198] sm:$0xff] }
   0x5   :  { %v1326_v12 = vpack.c.bf16 %v82_v10, %v81_v9  ;;  %1325 = vmatprep.subr.bf16.mxu1 %v1324_v7  ;;  %v1328_v17 = vpack.c.bf16 %v100_v15, %v99_v14  ;;  %v51_v18 = vld [vmem:[%s2236_s2 + $0x10] sm:$0xff]  ;;  %v52_v19 = vld [vmem:[%s2236_s2 + $0x18] sm:$0xff]  ;;  %v69_v23 = vld [vmem:[%s2236_s2 + $0xa0] sm:$0xff]  ;;  %v1730_v13 = vsub.s32 %v222_v63, %v224_v0 }
   0x6   :  { %1295 = vmatpush3.bf16.msra.mxu0 %v1294_v8  ;;  %v83_v20 = vld [vmem:[%s2236_s2 + $0x110] sm:$0xff]  ;;  %v1298_v21 = vpack.c.bf16 %v52_v19, %v51_v18  ;;  %v84_v22 = vld [vmem:[%s2236_s2 + $0x118] sm:$0xff]  ;;  %v70_v24 = vld [vmem:[%s2236_s2 + $0xa8] sm:$0xff] }
   0x7   :  { %1327 = vmatpush3.bf16.msra.mxu1 %v1326_v12  ;;  %1297 = vmatprep.subr.bf16.mxu0 %v1296_v16  ;;  %v1330_v25 = vpack.c.bf16 %v84_v22, %v83_v20  ;;  %v1300_v26 = vpack.c.bf16 %v70_v24, %v69_v23  ;;  %v101_v27 = vld [vmem:[%s2236_s2 + $0x1a0] sm:$0xff]  ;;  %v102_v28 = vld [vmem:[%s2236_s2 + $0x1a8] sm:$0xff]  ;;  %v71_v35 = vld [vmem:[%s2236_s2 + $0xb0] sm:$0xff] }
   0x8   :  { %1329 = vmatprep.subr.bf16.mxu1 %v1328_v17  ;;  %v53_v29 = vld [vmem:[%s2236_s2 + $0x20] sm:$0xff]  ;;  %v1332_v30 = vpack.c.bf16 %v102_v28, %v101_v27  ;;  %v54_v31 = vld [vmem:[%s2236_s2 + $0x28] sm:$0xff]  ;;  %v72_v36 = vld [vmem:[%s2236_s2 + $0xb8] sm:$0xff] }
   0x9   :  { %v85_v32 = vld [vmem:[%s2236_s2 + $0x120] sm:$0xff]  ;;  %v86_v33 = vld [vmem:[%s2236_s2 + $0x128] sm:$0xff]  ;;  %v1302_v34 = vpack.c.bf16 %v54_v31, %v53_v29  ;;  %v103_v37 = vld [vmem:[%s2236_s2 + $0x1b0] sm:$0xff]  ;;  %v1304_v39 = vpack.c.bf16 %v72_v36, %v71_v35 }
   0xa   :  { %1299 = vmatpush3.bf16.msra.mxu0 %v1298_v21  ;;  %v1334_v38 = vpack.c.bf16 %v86_v33, %v85_v32  ;;  %v104_v40 = vld [vmem:[%s2236_s2 + $0x1b8] sm:$0xff]  ;;  %v55_v41 = vld [vmem:[%s2236_s2 + $0x30] sm:$0xff]  ;;  %v73_v46 = vld [vmem:[%s2236_s2 + $0xc0] sm:$0xff] }
   0xb   :  { %1331 = vmatpush3.bf16.msra.mxu1 %v1330_v25  ;;  %1301 = vmatprep.subr.bf16.mxu0 %v1300_v26  ;;  %v56_v42 = vld [vmem:[%s2236_s2 + $0x38] sm:$0xff]  ;;  %v1336_v43 = vpack.c.bf16 %v104_v40, %v103_v37  ;;  %v87_v44 = vld [vmem:[%s2236_s2 + $0x130] sm:$0xff]  ;;  %v74_v50 = vld [vmem:[%s2236_s2 + $0xc8] sm:$0xff] }
   0xc   :  { %1333 = vmatprep.subr.bf16.mxu1 %v1332_v30  ;;  %v88_v45 = vld [vmem:[%s2236_s2 + $0x138] sm:$0xff]  ;;  %v105_v51 = vld [vmem:[%s2236_s2 + $0x1c0] sm:$0xff]  ;;  %v106_v52 = vld [vmem:[%s2236_s2 + $0x1c8] sm:$0xff]  ;;  %v1306_v53 = vpack.c.bf16 %v56_v42, %v55_v41  ;;  %v1308_v55 = vpack.c.bf16 %v74_v50, %v73_v46 }
   0xd   :  { %v1338_v54 = vpack.c.bf16 %v88_v45, %v87_v44  ;;  %v57_v56 = vld [vmem:[%s2236_s2 + $0x40] sm:$0xff]  ;;  %v58_v57 = vld [vmem:[%s2236_s2 + $0x48] sm:$0xff]  ;;  %v1340_v59 = vpack.c.bf16 %v106_v52, %v105_v51  ;;  %v75_v61 = vld [vmem:[%s2236_s2 + $0xd0] sm:$0xff] }
   0xe   :  { %1303 = vmatpush3.bf16.msra.mxu0 %v1302_v34  ;;  %v89_v58 = vld [vmem:[%s2236_s2 + $0x140] sm:$0xff]  ;;  %v90_v60 = vld [vmem:[%s2236_s2 + $0x148] sm:$0xff]  ;;  %v76_v62 = vld [vmem:[%s2236_s2 + $0xd8] sm:$0xff]  ;;  %v1310_v3 = vpack.c.bf16 %v58_v57, %v57_v56 }
   0xf   :  { %1335 = vmatpush3.bf16.msra.mxu1 %v1334_v38  ;;  %1305 = vmatprep.subr.bf16.mxu0 %v1304_v39  ;;  %v107_v1 = vld [vmem:[%s2236_s2 + $0x1d0] sm:$0xff]  ;;  %v108_v2 = vld [vmem:[%s2236_s2 + $0x1d8] sm:$0xff]  ;;  %v1342_v4 = vpack.c.bf16 %v90_v60, %v89_v58  ;;  %v1312_v5 = vpack.c.bf16 %v76_v62, %v75_v61  ;;  %v77_v11 = vld [vmem:[%s2236_s2 + $0xe0] sm:$0xff] }
  0x10   :  { %1337 = vmatprep.subr.bf16.mxu1 %v1336_v43  ;;  %v59_v6 = vld [vmem:[%s2236_s2 + $0x50] sm:$0xff]  ;;  %v60_v7 = vld [vmem:[%s2236_s2 + $0x58] sm:$0xff]  ;;  %v1344_v9 = vpack.c.bf16 %v108_v2, %v107_v1  ;;  %v78_v12 = vld [vmem:[%s2236_s2 + $0xe8] sm:$0xff] }
  0x11   :  { %v91_v8 = vld [vmem:[%s2236_s2 + $0x150] sm:$0xff]  ;;  %v92_v10 = vld [vmem:[%s2236_s2 + $0x158] sm:$0xff]  ;;  %v109_v14 = vld [vmem:[%s2236_s2 + $0x1e0] sm:$0xff]  ;;  %v1314_v16 = vpack.c.bf16 %v60_v7, %v59_v6  ;;  %v1316_v19 = vpack.c.bf16 %v78_v12, %v77_v11 }
  0x12   :  { %1307 = vmatpush3.bf16.msra.mxu0 %v1306_v53  ;;  %v110_v15 = vld [vmem:[%s2236_s2 + $0x1e8] sm:$0xff]  ;;  %v61_v17 = vld [vmem:[%s2236_s2 + $0x60] sm:$0xff]  ;;  %v1346_v18 = vpack.c.bf16 %v92_v10, %v91_v8  ;;  %v79_v25 = vld [vmem:[%s2236_s2 + $0xf0] sm:$0xff] }
  0x13   :  { %1339 = vmatpush3.bf16.msra.mxu1 %v1338_v54  ;;  %1309 = vmatprep.subr.bf16.mxu0 %v1308_v55  ;;  %v62_v20 = vld [vmem:[%s2236_s2 + $0x68] sm:$0xff]  ;;  %v93_v21 = vld [vmem:[%s2236_s2 + $0x160] sm:$0xff]  ;;  %v1348_v23 = vpack.c.bf16 %v110_v15, %v109_v14  ;;  %v80_v26 = vld [vmem:[%s2236_s2 + $0xf8] sm:$0xff] }
  0x14   :  { %1341 = vmatprep.subr.bf16.mxu1 %v1340_v59  ;;  %v46_v22 = vld [vmem:[%s2237_s0] sm:$0xff]  ;;  %v94_v24 = vld [vmem:[%s2236_s2 + $0x168] sm:$0xff]  ;;  %v111_v29 = vld [vmem:[%s2236_s2 + $0x1f0] sm:$0xff]  ;;  %v1318_v31 = vpack.c.bf16 %v62_v20, %v61_v17  ;;  %v1320_v35 = vpack.c.bf16 %v80_v26, %v79_v25 }
  0x15   :  { %v226_v27 = vrot.slane %v46_v22, %v1730_v13  ;;  %v219_v28 = vcombine.high %v46_v22, %v46_v22  ;;  %v112_v30 = vld [vmem:[%s2236_s2 + $0x1f8] sm:$0xff]  ;;  %v1350_v34 = vpack.c.bf16 %v94_v24, %v93_v21  ;;  %v63_v36 = vld [vmem:[%s2236_s2 + $0x70] sm:$0xff]  ;;  %v129_v42 = vld [vmem:[%s2236_s2 + $0x280] sm:$0xff] }
  0x16   :  { %1311 = vmatpush3.bf16.msra.mxu0 %v1310_v3  ;;  %v64_v37 = vld [vmem:[%s2236_s2 + $0x78] sm:$0xff]  ;;  %v95_v38 = vld [vmem:[%s2236_s2 + $0x170] sm:$0xff]  ;;  %v1352_v39 = vpack.c.bf16 %v112_v30, %v111_v29  ;;  %v130_v43 = vld [vmem:[%s2236_s2 + $0x288] sm:$0xff] }
  0x17   :  { %1343 = vmatpush3.bf16.msra.mxu1 %v1342_v4  ;;  %1313 = vmatprep.subr.bf16.mxu0 %v1312_v5  ;;  %v234_v32 = vcombine.high %v226_v27, %v226_v27  ;;  %v233_v33 = vrot.slane %v219_v28, %v1730_v13  ;;  %v96_v40 = vld [vmem:[%s2236_s2 + $0x178] sm:$0xff]  ;;  %v161_v44 = vld [vmem:[%s2236_s2 + $0x380] sm:$0xff]  ;;  %v162_v45 = vld [vmem:[%s2236_s2 + $0x388] sm:$0xff]  ;;  %v1322_v46 = vpack.c.bf16 %v64_v37, %v63_v36 }
  0x18   :  { %1345 = vmatprep.subr.bf16.mxu1 %v1344_v9  ;;  %v1354_v47 = vpack.c.bf16 %v96_v40, %v95_v38  ;;  %v1356_v48 = vpack.c.bf16 %v130_v43, %v129_v42  ;;  %v113_v49 = vld [vmem:[%s2236_s2 + $0x200] sm:$0xff]  ;;  %v114_v50 = vld [vmem:[%s2236_s2 + $0x208] sm:$0xff]  ;;  %v1388_v52 = vpack.c.bf16 %v162_v45, %v161_v44  ;;  %v131_v54 = vld [vmem:[%s2236_s2 + $0x290] sm:$0xff] }
  0x19   :  { %335 = vmatprep.mubr.f32.mxu0 %v234_v32  ;;  %v235_v41 = vcombine.high %v233_v33, %v233_v33  ;;  %v145_v51 = vld [vmem:[%s2236_s2 + $0x300] sm:$0xff]  ;;  %v146_v53 = vld [vmem:[%s2236_s2 + $0x308] sm:$0xff]  ;;  %v132_v55 = vld [vmem:[%s2236_s2 + $0x298] sm:$0xff]  ;;  %v1358_v58 = vpack.c.bf16 %v114_v50, %v113_v49 }
  0x1a   :  { %1315 = vmatpush3.bf16.msra.mxu0 %v1314_v16  ;;  %v163_v56 = vld [vmem:[%s2236_s2 + $0x390] sm:$0xff]  ;;  %v164_v57 = vld [vmem:[%s2236_s2 + $0x398] sm:$0xff]  ;;  %v1390_v59 = vpack.c.bf16 %v146_v53, %v145_v51  ;;  %v1360_v60 = vpack.c.bf16 %v132_v55, %v131_v54  ;;  %v133_v2 = vld [vmem:[%s2236_s2 + $0x2a0] sm:$0xff] }
  0x1b   :  { %1347 = vmatpush3.bf16.msra.mxu1 %v1346_v18  ;;  %1317 = vmatprep.subr.bf16.mxu0 %v1316_v19  ;;  %v115_v61 = vld [vmem:[%s2236_s2 + $0x210] sm:$0xff]  ;;  %v116_v62 = vld [vmem:[%s2236_s2 + $0x218] sm:$0xff]  ;;  %v1392_v0 = vpack.c.bf16 %v164_v57, %v163_v56  ;;  %v134_v3 = vld [vmem:[%s2236_s2 + $0x2a8] sm:$0xff] }
  0x1c   :  { %1349 = vmatprep.subr.bf16.mxu1 %v1348_v23  ;;  %405 = vmatprep.mubr.f32.mxu1 %v235_v41  ;;  %v147_v63 = vld [vmem:[%s2236_s2 + $0x310] sm:$0xff]  ;;  %v148_v1 = vld [vmem:[%s2236_s2 + $0x318] sm:$0xff]  ;;  %v165_v4 = vld [vmem:[%s2236_s2 + $0x3a0] sm:$0xff]  ;;  %v1362_v6 = vpack.c.bf16 %v116_v62, %v115_v61  ;;  %v1364_v8 = vpack.c.bf16 %v134_v3, %v133_v2 }
  0x1d   :  { %v166_v5 = vld [vmem:[%s2236_s2 + $0x3a8] sm:$0xff]  ;;  %v1394_v7 = vpack.c.bf16 %v148_v1, %v147_v63  ;;  %v117_v9 = vld [vmem:[%s2236_s2 + $0x220] sm:$0xff]  ;;  %v135_v15 = vld [vmem:[%s2236_s2 + $0x2b0] sm:$0xff] }
  0x1e   :  { %1319 = vmatpush3.bf16.msra.mxu0 %v1318_v31  ;;  %v118_v10 = vld [vmem:[%s2236_s2 + $0x228] sm:$0xff]  ;;  %v149_v11 = vld [vmem:[%s2236_s2 + $0x320] sm:$0xff]  ;;  %v1396_v12 = vpack.c.bf16 %v166_v5, %v165_v4  ;;  %v136_v16 = vld [vmem:[%s2236_s2 + $0x2b8] sm:$0xff] }
  0x1f   :  { %1351 = vmatpush3.bf16.msra.mxu1 %v1350_v34  ;;  %1321 = vmatprep.subr.bf16.mxu0 %v1320_v35  ;;  %v150_v14 = vld [vmem:[%s2236_s2 + $0x328] sm:$0xff]  ;;  %v167_v17 = vld [vmem:[%s2236_s2 + $0x3b0] sm:$0xff]  ;;  %v168_v18 = vld [vmem:[%s2236_s2 + $0x3b8] sm:$0xff]  ;;  %v1366_v19 = vpack.c.bf16 %v118_v10, %v117_v9  ;;  %v1368_v21 = vpack.c.bf16 %v136_v16, %v135_v15 }
  0x20   :  { %1353 = vmatprep.subr.bf16.mxu1 %v1352_v39  ;;  %v1398_v20 = vpack.c.bf16 %v150_v14, %v149_v11  ;;  %v119_v22 = vld [vmem:[%s2236_s2 + $0x230] sm:$0xff]  ;;  %v120_v23 = vld [vmem:[%s2236_s2 + $0x238] sm:$0xff]  ;;  %v1400_v25 = vpack.c.bf16 %v168_v18, %v167_v17  ;;  %v138_v28 = vld [vmem:[%s2236_s2 + $0x2c8] sm:$0xff] }
  0x21   :  { %v151_v24 = vld [vmem:[%s2236_s2 + $0x330] sm:$0xff]  ;;  %v152_v26 = vld [vmem:[%s2236_s2 + $0x338] sm:$0xff]  ;;  %v169_v29 = vld [vmem:[%s2236_s2 + $0x3c0] sm:$0xff]  ;;  %v1370_v32 = vpack.c.bf16 %v120_v23, %v119_v22 }
  0x22   :  { %1323 = vmatpush3.bf16.msra.mxu0 %v1322_v46  ;;  %v170_v30 = vld [vmem:[%s2236_s2 + $0x3c8] sm:$0xff]  ;;  %v1402_v35 = vpack.c.bf16 %v152_v26, %v151_v24  ;;  %v121_v37 = vld [vmem:[%s2236_s2 + $0x240] sm:$0xff]  ;;  %v139_v42 = vld [vmem:[%s2236_s2 + $0x2d0] sm:$0xff] }
  0x23   :  { %1355 = vmatpush3.bf16.msra.mxu1 %v1354_v47  ;;  %1357 = vmatprep.subr.bf16.mxu0 %v1356_v48  ;;  %v47_v31 = vld [vmem:[%s2237_s0 + $0x8] sm:$0xff]  ;;  %v153_v39 = vld [vmem:[%s2236_s2 + $0x340] sm:$0xff]  ;;  %v1404_v40 = vpack.c.bf16 %v170_v30, %v169_v29  ;;  %v140_v43 = vld [vmem:[%s2236_s2 + $0x2d8] sm:$0xff] }
  0x24   :  { %1389 = vmatprep.subr.bf16.mxu1 %v1388_v52  ;;  %v236_v34 = vcombine.high %v47_v31, %v47_v31  ;;  %v122_v38 = vld [vmem:[%s2236_s2 + $0x248] sm:$0xff]  ;;  %v171_v46 = vld [vmem:[%s2236_s2 + $0x3d0] sm:$0xff]  ;;  %v172_v47 = vld [vmem:[%s2236_s2 + $0x3d8] sm:$0xff]  ;;  %v1376_v51 = vpack.c.bf16 %v140_v43, %v139_v42 }
  0x25   :  { %336 = vmatmul.mubr.f32.vlgmr.msra.gmra.mrb[0].mxu0 %v226_v27  ;;  %v137_v27 = vld [vmem:[%s2236_s2 + $0x2c0] sm:$0xff]  ;;  %v154_v41 = vld [vmem:[%s2236_s2 + $0x348] sm:$0xff]  ;;  %v1374_v48 = vpack.c.bf16 %v122_v38, %v121_v37  ;;  %v124_v52 = vld [vmem:[%s2236_s2 + $0x258] sm:$0xff]  ;;  %v1408_v54 = vpack.c.bf16 %v172_v47, %v171_v46 }
  0x26   :  { %406 = vmatmul.mubr.f32.vlgmr.msra.gmra.mrb[0].mxu1 %v233_v33  ;;  %1359 = vmatpush3.bf16.msra.mxu0 %v1358_v58  ;;  %v1891_v33 = vrot.slane %v47_v31, %v1730_v13  ;;  %v1372_v36 = vpack.c.bf16 %v138_v28, %v137_v27  ;;  %v1914_v45 = vrot.slane %v236_v34, %v1730_v13  ;;  %v123_v13 = vld [vmem:[%s2236_s2 + $0x250] sm:$0xff]  ;;  %v156_v55 = vld [vmem:[%s2236_s2 + $0x358] sm:$0xff]  ;;  %v141_v56 = vld [vmem:[%s2236_s2 + $0x2e0] sm:$0xff] }
  0x27   :  { %1391 = vmatpush3.bf16.msra.mxu1 %v1390_v59  ;;  %1361 = vmatprep.subr.bf16.mxu0 %v1360_v60  ;;  %v1406_v50 = vpack.c.bf16 %v154_v41, %v153_v39  ;;  %v155_v53 = vld [vmem:[%s2236_s2 + $0x350] sm:$0xff]  ;;  %v142_v57 = vld [vmem:[%s2236_s2 + $0x2e8] sm:$0xff]  ;;  %v173_v58 = vld [vmem:[%s2236_s2 + $0x3e0] sm:$0xff]  ;;  %v1378_v60 = vpack.c.bf16 %v124_v52, %v123_v13 }
  0x28   :  { %1393 = vmatprep.subr.bf16.mxu1 %v1392_v0  ;;  %v251_v44 = vcombine.high %v1891_v33, %v1891_v33  ;;  %v252_v49 = vcombine.high %v1914_v45, %v1914_v45  ;;  %v174_v59 = vld [vmem:[%s2236_s2 + $0x3e8] sm:$0xff]  ;;  %v1410_v61 = vpack.c.bf16 %v156_v55, %v155_v53  ;;  %v1380_v62 = vpack.c.bf16 %v142_v57, %v141_v56  ;;  %v125_v63 = vld [vmem:[%s2236_s2 + $0x260] sm:$0xff]  ;;  %v143_v4 = vld [vmem:[%s2236_s2 + $0x2f0] sm:$0xff] }
  0x29   :  { %v126_v0 = vld [vmem:[%s2236_s2 + $0x268] sm:$0xff]  ;;  %v157_v1 = vld [vmem:[%s2236_s2 + $0x360] sm:$0xff]  ;;  %v1412_v2 = vpack.c.bf16 %v174_v59, %v173_v58  ;;  %v144_v5 = vld [vmem:[%s2236_s2 + $0x2f8] sm:$0xff] }
  0x2a   :  { %1363 = vmatpush3.bf16.msra.mxu0 %v1362_v6  ;;  %475 = vmatprep.mubr.f32.mxu0 %v251_v44  ;;  %v158_v3 = vld [vmem:[%s2236_s2 + $0x368] sm:$0xff]  ;;  %v175_v6 = vld [vmem:[%s2236_s2 + $0x3f0] sm:$0xff]  ;;  %v1384_v10 = vpack.c.bf16 %v144_v5, %v143_v4  ;;  %v160_v16 = vld [vmem:[%s2236_s2 + $0x378] sm:$0xff] }
  0x2b   :  { %1395 = vmatpush3.bf16.msra.mxu1 %v1394_v7  ;;  %1365 = vmatprep.subr.bf16.mxu0 %v1364_v8  ;;  %v176_v7 = vld [vmem:[%s2236_s2 + $0x3f8] sm:$0xff]  ;;  %v1382_v8 = vpack.c.bf16 %v126_v0, %v125_v63  ;;  %v1414_v9 = vpack.c.bf16 %v158_v3, %v157_v1  ;;  %v127_v11 = vld [vmem:[%s2236_s2 + $0x270] sm:$0xff]  ;;  %v193_v17 = vld [vmem:[%s2236_s2 + $0x480] sm:$0xff] }
  0x2c   :  { %1397 = vmatprep.subr.bf16.mxu1 %v1396_v12  ;;  %545 = vmatprep.mubr.f32.mxu1 %v252_v49  ;;  %v128_v12 = vld [vmem:[%s2236_s2 + $0x278] sm:$0xff]  ;;  %v159_v14 = vld [vmem:[%s2236_s2 + $0x370] sm:$0xff]  ;;  %v1416_v15 = vpack.c.bf16 %v176_v7, %v175_v6  ;;  %v194_v18 = vld [vmem:[%s2236_s2 + $0x488] sm:$0xff] }
  0x2d   :  { %v177_v22 = vld [vmem:[%s2236_s2 + $0x400] sm:$0xff]  ;;  %v178_v23 = vld [vmem:[%s2236_s2 + $0x408] sm:$0xff]  ;;  %v195_v26 = vld [vmem:[%s2236_s2 + $0x490] sm:$0xff] }
  0x2e   :  { %1367 = vmatpush3.bf16.msra.mxu0 %v1366_v19  ;;  %v1386_v19 = vpack.c.bf16 %v128_v12, %v127_v11  ;;  %v622_v24 = vld [vmem:[%s2238_s4] sm:$0xff]  ;;  %v196_v27 = vld [vmem:[%s2236_s2 + $0x498] sm:$0xff]  ;;  %v1422_v28 = vpack.c.bf16 %v178_v23, %v177_v22  ;;  %v2011_v29 = vld.sshfl [vmem:[%s2237_s0 + $0x10] sm:$0x33 pattern:$0x76325410] }
  0x2f   :  { %1399 = vmatpush3.bf16.msra.mxu1 %v1398_v20  ;;  %1369 = vmatprep.subr.bf16.mxu0 %v1368_v21  ;;  %v1418_v20 = vpack.c.bf16 %v160_v16, %v159_v14  ;;  %v1420_v21 = vpack.c.bf16 %v194_v18, %v193_v17  ;;  %v1424_v31 = vpack.c.bf16 %v196_v27, %v195_v26  ;;  %v180_v34 = vld [vmem:[%s2236_s2 + $0x418] sm:$0xff]  ;;  %v197_v38 = vld [vmem:[%s2236_s2 + $0x4a0] sm:$0xff]  ;;  %v198_v39 = vld [vmem:[%s2236_s2 + $0x4a8] sm:$0xff] }
  0x30   :  { %1401 = vmatprep.subr.bf16.mxu1 %v1400_v25  ;;  %v623_v25 = vld [vmem:[%s2238_s4 + $0x8] sm:$0xff]  ;;  %v625_v37 = vld [vmem:[%s2238_s4 + $0x18] sm:$0xff]  ;;  %v1428_v43 = vpack.c.bf16 %v198_v39, %v197_v38  ;;  %v181_v44 = vld [vmem:[%s2236_s2 + $0x420] sm:$0xff] }
  0x31   :  { %v1453_v30 = vpack.c.bf16 %v623_v25, %v622_v24  ;;  %v182_v46 = vld [vmem:[%s2236_s2 + $0x428] sm:$0xff]  ;;  %v200_v47 = vld [vmem:[%s2236_s2 + $0x4b8] sm:$0xff]  ;;  %v621_v49 = vld [vmem:[%s2239_s1] sm:$0x3] }
  0x32   :  { %1371 = vmatpush3.bf16.msra.mxu0 %v1370_v32  ;;  %v179_v32 = vld [vmem:[%s2236_s2 + $0x410] sm:$0xff]  ;;  %v184_v13 = vld [vmem:[%s2236_s2 + $0x438] sm:$0xff]  ;;  %v201_v52 = vld [vmem:[%s2236_s2 + $0x4c0] sm:$0xff] }
  0x33   :  { %1403 = vmatpush3.bf16.msra.mxu1 %v1402_v35  ;;  %1373 = vmatprep.subr.bf16.mxu0 %v1372_v36  ;;  %v624_v35 = vld [vmem:[%s2238_s4 + $0x10] sm:$0xff]  ;;  %v1507_v36 = vmov 0.0|0.0   ;;  %v1426_v41 = vpack.c.bf16 %v180_v34, %v179_v32  ;;  %v202_v53 = vld [vmem:[%s2236_s2 + $0x4c8] sm:$0xff]  ;;  %v185_v56 = vld [vmem:[%s2236_s2 + $0x440] sm:$0xff] }
  0x34   :  { %1405 = vmatprep.subr.bf16.mxu1 %v1404_v40  ;;  %v260_v40 = vcombine.high %v2011_v29, %v2011_v29  ;;  %v1456_v42 = vpack.c.bf16 %v625_v37, %v624_v35  ;;  %v1436_v55 = vpack.c.bf16 %v202_v53, %v201_v52  ;;  %v186_v57 = vld [vmem:[%s2236_s2 + $0x448] sm:$0xff]  ;;  %v203_v58 = vld [vmem:[%s2236_s2 + $0x4d0] sm:$0xff]  ;;  %v204_v59 = vld [vmem:[%s2236_s2 + $0x4d8] sm:$0xff] }
  0x35   :  { %v188_v63 = vld [vmem:[%s2236_s2 + $0x458] sm:$0xff]  ;;  %v205_v0 = vld [vmem:[%s2236_s2 + $0x4e0] sm:$0xff]  ;;  %v206_v1 = vld [vmem:[%s2236_s2 + $0x4e8] sm:$0xff] }
  0x36   :  { %1375 = vmatpush3.bf16.msra.mxu0 %v1374_v48  ;;  %v1430_v48 = vpack.c.bf16 %v182_v46, %v181_v44  ;;  %v1444_v3 = vpack.c.bf16 %v206_v1, %v205_v0  ;;  %v189_v4 = vld [vmem:[%s2236_s2 + $0x460] sm:$0xff]  ;;  %v190_v5 = vld [vmem:[%s2236_s2 + $0x468] sm:$0xff]  ;;  %v207_v6 = vld [vmem:[%s2236_s2 + $0x4f0] sm:$0xff] }
  0x37   :  { %1407 = vmatpush3.bf16.msra.mxu1 %v1406_v50  ;;  %1377 = vmatprep.subr.bf16.mxu0 %v1376_v51  ;;  %v183_v51 = vld [vmem:[%s2236_s2 + $0x430] sm:$0xff]  ;;  %v208_v7 = vld [vmem:[%s2236_s2 + $0x4f8] sm:$0xff]  ;;  %v708_v14 = vld [vmem:[%s2240_s6] sm:$0xff] }
  0x38   :  { %1409 = vmatprep.subr.bf16.mxu1 %v1408_v54  ;;  %v1434_v54 = vpack.c.bf16 %v184_v13, %v183_v51  ;;  %v192_v11 = vld [vmem:[%s2236_s2 + $0x478] sm:$0xff]  ;;  %v710_v17 = vld [vmem:[%s2240_s6 + $0x10] sm:$0xff]  ;;  %v797_v23 = vld [vmem:[%s2241_s8] sm:$0xff] }
  0x39   :  { %v711_v18 = vld [vmem:[%s2240_s6 + $0x18] sm:$0xff]  ;;  %v798_v24 = vld [vmem:[%s2241_s8 + $0x8] sm:$0xff]  ;;  %v714_v26 = vld [vmem:[%s2240_s6 + $0x30] sm:$0xff] }
  0x3a   :  { %1379 = vmatpush3.bf16.msra.mxu0 %v1378_v60  ;;  %v1438_v60 = vpack.c.bf16 %v186_v57, %v185_v56  ;;  %v1477_v25 = vpack.c.bf16 %v798_v24, %v797_v23  ;;  %v715_v27 = vld [vmem:[%s2240_s6 + $0x38] sm:$0xff]  ;;  %v801_v32 = vld [vmem:[%s2241_s8 + $0x20] sm:$0xff]  ;;  %v802_v34 = vld [vmem:[%s2241_s8 + $0x28] sm:$0xff]  ;;  %v18_v24 = vstv %s2246_s12 }
  0x3b   :  { %1411 = vmatpush3.bf16.msra.mxu1 %v1410_v61  ;;  %1381 = vmatprep.subr.bf16.mxu0 %v1380_v62  ;;  %v1440_v61 = vpack.c.bf16 %v204_v59, %v203_v58  ;;  %v187_v62 = vld [vmem:[%s2236_s2 + $0x450] sm:$0xff]  ;;  %v1483_v35 = vpack.c.bf16 %v802_v34, %v801_v32  ;;  %v804_v38 = vld [vmem:[%s2241_s8 + $0x38] sm:$0xff]  ;;  %v995_v53 = vld [vmem:[%s2242_s3] ss:$0 sm:$0xff]  ;;  %19 = vst [vmem:[#allocation2] sm:$0x1] %v18_v24 }
  0x3c   :  { %1413 = vmatprep.subr.bf16.mxu1 %v1412_v2  ;;  %v1442_v2 = vpack.c.bf16 %v188_v63, %v187_v62  ;;  %v803_v37 = vld [vmem:[%s2241_s8 + $0x30] sm:$0xff]  ;;  %v808_v44 = vld [vmem:[%s2241_s8 + $0x58] sm:$0xff] }
  0x3d   :  { %v1486_v39 = vpack.c.bf16 %v804_v38, %v803_v37 }
  0x3e   :  { %1383 = vmatpush3.bf16.msra.mxu0 %v1382_v8  ;;  %v1446_v8 = vpack.c.bf16 %v190_v5, %v189_v4  ;;  %v997_v4 = vld [vmem:[%s2243_s5] ss:$0 sm:$0xff] }
  0x3f   :  { %1415 = vmatpush3.bf16.msra.mxu1 %v1414_v9  ;;  %1385 = vmatprep.subr.bf16.mxu0 %v1384_v10  ;;  %v1448_v9 = vpack.c.bf16 %v208_v7, %v207_v6  ;;  %v191_v10 = vld [vmem:[%s2236_s2 + $0x470] sm:$0xff]  ;;  %v813_v5 = vld [vmem:[%s2244_s9] sm:$0xff]  ;;  %v814_v6 = vld [vmem:[%s2244_s9 + $0x8] sm:$0xff] }
  0x40   :  { %1417 = vmatprep.subr.bf16.mxu1 %v1416_v15  ;;  %v1450_v12 = vpack.c.bf16 %v192_v11, %v191_v10  ;;  %v709_v15 = vld [vmem:[%s2240_s6 + $0x8] sm:$0xff]  ;;  %v1471_v10 = vpack.c.bf16 %v814_v6, %v813_v5 }
  0x41   :  { %v1459_v16 = vpack.c.bf16 %v709_v15, %v708_v14 }
  0x42   :  { %1387 = vmatpush3.bf16.msra.mxu0 %v1386_v19  ;;  %v1462_v19 = vpack.c.bf16 %v711_v18, %v710_v17  ;;  %v815_v17 = vld [vmem:[%s2244_s9 + $0x10] sm:$0xff]  ;;  %v816_v18 = vld [vmem:[%s2244_s9 + $0x18] sm:$0xff] }
  0x43   :  { %1419 = vmatpush3.bf16.msra.mxu1 %v1418_v20  ;;  %1421 = vmatprep.subr.bf16.mxu0 %v1420_v21  ;;  %v712_v20 = vld [vmem:[%s2240_s6 + $0x20] sm:$0xff]  ;;  %v713_v21 = vld [vmem:[%s2240_s6 + $0x28] sm:$0xff] }
  0x44   :  { %1452 = vmatprep.subr.bf16.mxu1 %v1507_v36  ;;  %v1465_v22 = vpack.c.bf16 %v713_v21, %v712_v20 }
  0x45   :  { %476 = vmatmul.mubr.f32.vlgmr.msra.gmra.mrb[2].mxu0 %v1891_v33  ;;  %v1509_v33 = vmov 0.0  }
  0x46   :  { %546 = vmatmul.mubr.f32.vlgmr.msra.gmra.mrb[2].mxu1 %v1914_v45  ;;  %1423 = vmatpush3.bf16.msra.mxu0 %v1422_v28  ;;  %v199_v45 = vld [vmem:[%s2236_s2 + $0x4b0] sm:$0xff]  ;;  %v1468_v28 = vpack.c.bf16 %v715_v27, %v714_v26  ;;  %v1002_v26 = vld [vmem:[%s2247_s10] ss:$0 sm:$0xff] }
  0x47   :  { %1454 = vmatpush3.bf16.msra.mxu1 %v1453_v30  ;;  %1425 = vmatprep.subr.bf16.mxu0 %v1424_v31  ;;  %v1432_v50 = vpack.c.bf16 %v200_v47, %v199_v45  ;;  %v800_v30 = vld [vmem:[%s2241_s8 + $0x18] sm:$0xff]  ;;  %v809_v45 = vld [vmem:[%s2241_s8 + $0x60] sm:$0xff]  ;;  %v810_v47 = vld [vmem:[%s2241_s8 + $0x68] sm:$0xff] }
  0x48   :  { %1455 = vmatprep.subr.bf16.mxu1 %v1507_v36  ;;  %1224 = vmatprep.mubr.msk.f32.mxu1 %vm1508_vm0, %v1509_v33 }
  0x49   :  { %615 = vmatprep.mubr.f32.mxu0 %v260_v40  ;;  %v805_v40 = vld [vmem:[%s2241_s8 + $0x40] sm:$0xff] }
  0x4a   :  { %1427 = vmatpush3.bf16.msra.mxu0 %v1426_v41  ;;  %v806_v41 = vld [vmem:[%s2241_s8 + $0x48] sm:$0xff] }
  0x4b   :  { %1457 = vmatpush3.bf16.msra.mxu1 %v1456_v42  ;;  %1429 = vmatprep.subr.bf16.mxu0 %v1428_v43  ;;  %v1489_v42 = vpack.c.bf16 %v806_v41, %v805_v40  ;;  %v807_v43 = vld [vmem:[%s2241_s8 + $0x50] sm:$0xff] }
  0x4c   :  { %1458 = vmatprep.subr.bf16.mxu1 %v1507_v36  ;;  %v1492_v46 = vpack.c.bf16 %v808_v44, %v807_v43 }
  0x4e   :  { %1225 = vmatmul.mubr.msk.f32.vlgmr.msra.gmra.mrb[4].mxu1 %vm633_vm1, %v621_v49  ;;  %1431 = vmatpush3.bf16.msra.mxu0 %v1430_v48  ;;  %v1495_v48 = vpack.c.bf16 %v810_v47, %v809_v45  ;;  %v811_v49 = vld [vmem:[%s2241_s8 + $0x70] sm:$0xff] }
  0x4f   :  { %1433 = vmatprep.subr.bf16.mxu0 %v1432_v50  ;;  %1243 = vmatprep.mubr.msk.f32.mxu1 %vm1508_vm0, %v1509_v33  ;;  %v812_v50 = vld [vmem:[%s2241_s8 + $0x78] sm:$0xff] }
  0x50   :  { %1460 = vmatpush3.bf16.msra.mxu1 %v1459_v16  ;;  %v1498_v51 = vpack.c.bf16 %v812_v50, %v811_v49 }
  0x51   :  { %1461 = vmatprep.subr.bf16.mxu1 %v1507_v36 }
  0x52   :  { %1435 = vmatpush3.bf16.msra.mxu0 %v1434_v54 }
  0x53   :  { %1437 = vmatprep.subr.bf16.mxu0 %v1436_v55 }
  0x54   :  { %1463 = vmatpush3.bf16.msra.mxu1 %v1462_v19  ;;  %v1474_v19 = vpack.c.bf16 %v816_v18, %v815_v17 }
  0x55   :  { %1464 = vmatprep.subr.bf16.mxu1 %v1507_v36 }
  0x56   :  { %1439 = vmatpush3.bf16.msra.mxu0 %v1438_v60 }
  0x57   :  { %1441 = vmatprep.subr.bf16.mxu0 %v1440_v61 }
  0x58   :  { %1466 = vmatpush3.bf16.msra.mxu1 %v1465_v22 }
  0x59   :  { %1467 = vmatprep.subr.bf16.mxu1 %v1507_v36 }
  0x5a   :  { %1443 = vmatpush3.bf16.msra.mxu0 %v1442_v2 }
  0x5b   :  { %1445 = vmatprep.subr.bf16.mxu0 %v1444_v3 }
  0x5c   :  { %1469 = vmatpush3.bf16.msra.mxu1 %v1468_v28 }
  0x5d   :  { %1470 = vmatprep.subr.bf16.mxu1 %v1507_v36 }
  0x5e   :  { %1447 = vmatpush3.bf16.msra.mxu0 %v1446_v8 }
  0x5f   :  { %1449 = vmatprep.subr.bf16.mxu0 %v1448_v9 }
  0x62   :  { %1451 = vmatpush3.bf16.msra.mxu0 %v1450_v12 }
  0x63   :  { %1476 = vmatprep.subr.bf16.mxu0 %v1507_v36 }
  0x65   :  { %616 = vmatmul.mubr.f32.vlgmr.msra.gmra.mrb[4].mxu0 %v2011_v29  ;;  %v799_v29 = vld [vmem:[%s2241_s8 + $0x10] sm:$0xff] }
  0x66   :  { %1289 = vmatprep.mubr.msk.f32.mxu0 %vm1508_vm0, %v1509_v33  ;;  %1478 = vmatpush3.bf16.msra.mxu0 %v1477_v25  ;;  %v1480_v31 = vpack.c.bf16 %v800_v30, %v799_v29  ;;  %v1003_v30 = vld [vmem:[%s2248_s11] ss:$0 sm:$0xff] }
  0x67   :  { %1479 = vmatprep.subr.bf16.mxu0 %v1507_v36 }
  0x6a   :  { %1481 = vmatpush3.bf16.msra.mxu0 %v1480_v31 }
  0x6b   :  { %1482 = vmatprep.subr.bf16.mxu0 %v1507_v36 }
  0x6e   :  { %1484 = vmatpush3.bf16.msra.mxu0 %v1483_v35  ;;  %v1004_v35 = vld [vmem:[#allocation2] ss:$0 sm:$0xff] }
  0x6f   :  { %1485 = vmatprep.subr.bf16.mxu0 %v1507_v36 }
  0x72   :  { %1487 = vmatpush3.bf16.msra.mxu0 %v1486_v39 }
  0x73   :  { %1488 = vmatprep.subr.bf16.mxu0 %v1507_v36 }
  0x76   :  { %1490 = vmatpush3.bf16.msra.mxu0 %v1489_v42 }
  0x77   :  { %1491 = vmatprep.subr.bf16.mxu0 %v1507_v36 }
  0x7a   :  { %1493 = vmatpush3.bf16.msra.mxu0 %v1492_v46 }
  0x7b   :  { %1494 = vmatprep.subr.bf16.mxu0 %v1507_v36 }
  0x7e   :  { %1496 = vmatpush3.bf16.msra.mxu0 %v1495_v48 }
  0x7f   :  { %1497 = vmatprep.subr.bf16.mxu0 %v1507_v36 }
  0x82   :  { %1499 = vmatpush3.bf16.msra.mxu0 %v1498_v51 }
  0xf8   :  { %v1037_v13 = vpop.f32.mrb[0].mxu0 }
  0xf9   :  { %v1072_v52 = vpop.f32.mrb[0].mxu1  ;;  %v1038_v54 = vpop.f32.mrb[1].mxu0 }
  0xfa   :  { %v1039_v55 = vadd.f32 %v1038_v54, %v1037_v13  ;;  %v1073_v56 = vpop.f32.mrb[1].mxu1 }
  0xfb   :  { %v1074_v57 = vadd.f32 %v1073_v56, %v1072_v52 }
  0xfc   :  { %v338_v58 = vadd.f32 %v1039_v55, %v995_v53 }
  0xfe   :  { %v408_v59 = vadd.f32 %v1074_v57, %v338_v58 }
 0x118   :  { %v1107_v60 = vpop.f32.mrb[2].mxu0 }
 0x119   :  { %v1142_v61 = vpop.f32.mrb[2].mxu1  ;;  %v1108_v62 = vpop.f32.mrb[3].mxu0 }
 0x11a   :  { %v1109_v63 = vadd.f32 %v1108_v62, %v1107_v60  ;;  %v1143_v0 = vpop.f32.mrb[3].mxu1 }
 0x11b   :  { %v1144_v1 = vadd.f32 %v1143_v0, %v1142_v61 }
 0x11c   :  { %v478_v2 = vadd.f32 %v1109_v63, %v408_v59 }
 0x11e   :  { %v548_v3 = vadd.f32 %v1144_v1, %v478_v2 }
 0x121   :  { %v703_v7 = vpop.f32.mrb[4].mxu1 }
 0x122   :  { %v704_v8 = vadd.f32 %v997_v4, %v703_v7  ;;  %v1226_v9 = vpop.f32.mrb[5].mxu1 }
 0x124   :  { %v707_v11 = vmax.f32 %v704_v8, 0.0 }
 0x126   :  { %1244 = vmatmul.mubr.msk.f32.vlgmr.msra.gmra.mrb[6].mxu1 %vm723_vm2, %v707_v11 }
 0x127   :  { %1472 = vmatpush3.bf16.msra.mxu1 %v1471_v10  ;;  %1254 = vmatprep.mubr.msk.f32.mxu1 %vm1508_vm0, %v1509_v33  ;;  %v999_v33 = vld [vmem:[%s2245_s7] ss:$0 sm:$0xff] }
 0x128   :  { %1473 = vmatprep.subr.bf16.mxu1 %v1507_v36 }
 0x12b   :  { %1475 = vmatpush3.bf16.msra.mxu1 %v1474_v19 }
 0x138   :  { %v1177_v12 = vpop.f32.mrb[4].mxu0 }
 0x139   :  { %v1178_v14 = vpop.f32.mrb[5].mxu0 }
 0x13a   :  { %v1179_v15 = vadd.f32 %v1178_v14, %v1177_v12 }
 0x13c   :  { %v618_v16 = vadd.f32 %v1179_v15, %v548_v3 }
 0x13e   :  { %1290 = vmatmul.mubr.f32.vlgmr.msra.gmra.mrb[6].mxu0 %v618_v16 }
 0x1f9   :  { %v793_v36 = vpop.f32.mrb[6].mxu1 }
 0x1fa   :  { %v794_v20 = vadd.f32 %v999_v33, %v793_v36  ;;  %v1245_v21 = vpop.f32.mrb[7].mxu1 }
 0x1fc   :  { %1255 = vmatmul.mubr.msk.f32.vlgmr.msra.gmra.mrb[8].mxu1 %vm633_vm1, %v794_v20 }
 0x211   :  { %v956_v22 = vpop.f32.mrb[6].mxu0 }
 0x212   :  { %v1291_v23 = vpop.f32.mrb[7].mxu0 }
 0x2cf   :  { %v886_v25 = vpop.f32.mrb[8].mxu1 }
 0x2d0   :  { %v957_v27 = vadd.f32 %v956_v22, %v886_v25  ;;  %v1256_v28 = vpop.f32.mrb[9].mxu1 }
 0x2d2   :  { %v967_v29 = vadd.f32 %v1002_v26, %v957_v27 }
 0x2d4   :  { %v968_v31 = vmax.f32 %v967_v29, 0.0 }
 0x2d6   :  { %v976_v32 = vmul.f32 %v1003_v30, %v968_v31 }
 0x2d8   :  { %v978_v34 = vsel %vm977_vm3, %v976_v32, 0.0 }
 0x2d9   :  { %979 = vadd.xlane.f32.xlu0 %v978_v34 }
 0x366   :  { %v980_v37 = vpop.xlane.xlu0 %979 }
 0x367   :  { %v988_v38 = vadd.f32 %v1004_v35, %v980_v37 }
 0x369   :  { %990 = vst.msk [vmem:[%s2249_s13] sm:$0x3] %vm989_vm4, %v988_v38 }

</bundles_post_ra>
